<compile_context>
chip_gen: v7x
topology: tpu7x:2x2x1
jax: 0.10.0
libtpu: 0.0.40
codegen_flags: <defaults>
</compile_context>

<pallas_src>
import functools

import jax
import jax.numpy as jnp
from jax.experimental import pallas as pl
from jax.experimental.pallas import tpu as pltpu

LANE = 128


# ---------------------------------------------------------------------------
# small helpers
# ---------------------------------------------------------------------------
def _round_up(n, m):
    return ((n + m - 1) // m) * m


def _vmem_limit_bytes():
    """~75% of physical VMEM (=> ~96 MiB on v5e/v6e, ~48 MiB on v7x)."""
    cap = 64 * 1024 * 1024  # conservative (v7x-sized) fallback
    try:
        info = pltpu.get_tpu_info()
        cap = int(getattr(info, "vmem_capacity_bytes", cap))
    except Exception:
        pass
    return min((cap * 3) // 4, 100 * 1024 * 1024)


def _pick_row_tile(h, w, target_m=512, max_m=2048):
    """Largest divisor of h whose slab (row_tile*w) stays <= max_m, stopping as
    soon as the MXU-friendly target M is reached."""
    best = 1
    for d in range(1, h + 1):
        if h % d != 0 or d * w > max_m:
            continue
        best = d
        if d * w >= target_m:
            break
    return best


# ---------------------------------------------------------------------------
# Pallas kernels
# ---------------------------------------------------------------------------
def _pool_bias_kernel(x_ref, w1_ref, s1_ref, w2_ref, o_ref, acc_ref, *, inv_area):
    """Tiled GAP + pooling 1x1 conv (BN folded) + ReLU, then multiplied by the
    pooling rows of the scale-folded projection weight.  The bilinear upsample
    of a 1x1 map is spatially constant, so the whole pooling branch collapses
    to a per-image additive bias of the projection."""
    s = pl.program_id(0)

    @pl.when(s == 0)
    def _init():
        acc_ref[...] = jnp.zeros_like(acc_ref)

    acc_ref[...] += jnp.sum(x_ref[...].astype(jnp.float32), axis=(1, 2))

    @pl.when(s == pl.num_programs(0) - 1)
    def _finalize():
        pooled = (acc_ref[...] * inv_area).astype(jnp.bfloat16)        # (N, Cin)
        y = jnp.dot(pooled, w1_ref[...], preferred_element_type=jnp.float32)
        y = jnp.maximum(y + s1_ref[...], 0.0).astype(jnp.bfloat16)     # (N, Cbr)
        o_ref[...] = jnp.dot(y, w2_ref[...], preferred_element_type=jnp.float32)


def _fused_aspp_kernel(*refs, rates, pad_r, row_tile, w_out, c_in, c_br, c_fin):
    """Fused ASPP: 1x1 branch + dilated 3x3 branches + concat/1x1 projection
    (+BN+ReLU each), on one (row_tile, W) slab per grid step.

    grid = (N, n_slabs).  The padded-H input stays in HBM (pl.ANY) and the
    needed row window is DMA'd manually with double buffering; all weights are
    VMEM-resident via constant-index BlockSpecs; branch activations stay in
    VMEM and are folded straight into the projection accumulator."""
    n_r = len(rates)
    pb_ref = refs[0]                      # (1, 1, c_fin)        f32  pool bias
    x_hbm = refs[1]                       # (N, H+2p, W, c_in)   bf16 HBM (ANY)
    w1_ref = refs[2]                      # (c_in, c_br)         bf16
    s1_ref = refs[3]                      # (1, c_br)            f32
    wa_refs = refs[4:4 + n_r]             # each (9, c_in, c_br) bf16
    sa_refs = refs[4 + n_r:4 + 2 * n_r]   # each (1, c_br)       f32
    wp_ref = refs[4 + 2 * n_r]            # (1+n_r, c_br, c_fin) bf16
    ps_ref = refs[5 + 2 * n_r]            # (1, c_fin)           f32
    o_ref = refs[6 + 2 * n_r]             # (1, row_tile, W, c_fin) bf16
    xwin = refs[7 + 2 * n_r]              # VMEM (2, row_win, W, c_in) bf16
    sem = refs[8 + 2 * n_r]               # DMA semaphores (2,)

    ni = pl.program_id(0)
    hi = pl.program_id(1)
    slot = hi % 2
    row_win = row_tile + 2 * pad_r
    m = row_tile * w_out

    def slab_copy(slab_idx, slot_idx):
        row0 = pl.multiple_of(slab_idx * row_tile, row_tile)
        return pltpu.make_async_copy(x_hbm.at[ni, pl.ds(row0, row_win)],
                                     xwin.at[slot_idx], sem.at[slot_idx])

    # Manual double buffering: slab hi was prefetched by step hi-1 (or is
    # primed here for the first slab of each image); prefetch slab hi+1 while
    # computing on slab hi.
    @pl.when(hi == 0)
    def _prime():
        slab_copy(hi, slot).start()

    slab_copy(hi, slot).wait()

    @pl.when(hi + 1 < pl.num_programs(1))
    def _prefetch():
        slab_copy(hi + 1, 1 - slot).start()

    window = xwin[slot]                                       # (row_win, W, c_in)

    # W halo synthesized locally (the HBM input is only H-padded).
    if pad_r > 0:
        zcols = jnp.zeros((row_win, pad_r, c_in), window.dtype)
        padded = jnp.concatenate([zcols, window, zcols], axis=1)
    else:
        padded = window                                       # (row_win, W+2p, c_in)

    # ---- 1x1 branch, folded straight into the projection accumulator --------
    lhs = window[pad_r:pad_r + row_tile].reshape(m, c_in)
    y = jnp.dot(lhs, w1_ref[...], preferred_element_type=jnp.float32)
    y = jnp.maximum(y + s1_ref[...], 0.0).astype(jnp.bfloat16)
    out_acc = jnp.dot(y, wp_ref[0], preferred_element_type=jnp.float32)

    # ---- dilated 3x3 branches (9 accumulated MXU taps each) ------------------
    for bi, rate in enumerate(rates):
        wa = wa_refs[bi]
        acc = None
        tap = 0
        for dr in (-rate, 0, rate):
            r0 = pad_r + dr
            for dc in (-rate, 0, rate):
                c0 = pad_r + dc
                lhs = padded[r0:r0 + row_tile, c0:c0 + w_out].reshape(m, c_in)
                d = jnp.dot(lhs, wa[tap], preferred_element_type=jnp.float32)
                acc = d if acc is None else acc + d
                tap += 1
        y = jnp.maximum(acc + sa_refs[bi][...], 0.0).astype(jnp.bfloat16)
        out_acc = out_acc + jnp.dot(y, wp_ref[bi + 1],
                                    preferred_element_type=jnp.float32)

    # ---- projection shift + pooling-branch bias + ReLU, bf16 NHWC store -----
    out_acc = out_acc + pb_ref[...].reshape(1, c_fin) + ps_ref[...]
    res = jnp.maximum(out_acc, 0.0)
    o_ref[...] = res.reshape(1, row_tile, w_out, c_fin).astype(o_ref.dtype)


# ---------------------------------------------------------------------------
# pallas_call wrappers
# ---------------------------------------------------------------------------
def pooling_branch_bias(x_nhwc, w1, s1, w2):
    n, h, w, c_in = x_nhwc.shape
    c_br = w1.shape[-1]
    c_fin = w2.shape[-1]
    row_tile = _pick_row_tile(h, w, target_m=1024, max_m=4096)
    kern = functools.partial(_pool_bias_kernel, inv_area=1.0 / float(h * w))
    return pl.pallas_call(
        kern,
        out_shape=jax.ShapeDtypeStruct((n, c_fin), jnp.float32),
        grid_spec=pltpu.PrefetchScalarGridSpec(
            num_scalar_prefetch=0,
            grid=(h // row_tile,),
            in_specs=[
                pl.BlockSpec((n, row_tile, w, c_in), lambda s: (0, s, 0, 0)),
                pl.BlockSpec((c_in, c_br), lambda s: (0, 0)),
                pl.BlockSpec((1, c_br), lambda s: (0, 0)),
                pl.BlockSpec((c_br, c_fin), lambda s: (0, 0)),
            ],
            out_specs=pl.BlockSpec((n, c_fin), lambda s: (0, 0)),
            scratch_shapes=[pltpu.VMEM((n, c_in), jnp.float32)],
        ),
        compiler_params=pltpu.CompilerParams(
            dimension_semantics=("arbitrary",),
            vmem_limit_bytes=_vmem_limit_bytes()),
    )(x_nhwc, w1, s1, w2)


def fused_aspp(x_hpad, pool_bias, kp, rates, *, h, w, row_tile):
    n = x_hpad.shape[0]
    c_in = x_hpad.shape[-1]
    c_br = kp["w1"].shape[-1]
    c_fin = kp["proj_s"].shape[-1]
    pad_r = max(rates) if rates else 0
    n_r = len(rates)
    n_slabs = h // row_tile
    row_win = row_tile + 2 * pad_r

    kern = functools.partial(_fused_aspp_kernel, rates=tuple(rates), pad_r=pad_r,
                             row_tile=row_tile, w_out=w, c_in=c_in, c_br=c_br,
                             c_fin=c_fin)

    const2 = lambda ni, hi: (0, 0)
    const3 = lambda ni, hi: (0, 0, 0)
    in_specs = (
        [pl.BlockSpec((1, 1, c_fin), lambda ni, hi: (ni, 0, 0)),   # pool bias
         pl.BlockSpec(memory_space=pl.ANY),                        # x (HBM, manual DMA)
         pl.BlockSpec((c_in, c_br), const2),                       # 1x1 weight
         pl.BlockSpec((1, c_br), const2)]                          # 1x1 BN shift
        + [pl.BlockSpec((9, c_in, c_br), const3) for _ in rates]   # 3x3 weights
        + [pl.BlockSpec((1, c_br), const2) for _ in rates]         # 3x3 BN shifts
        + [pl.BlockSpec((1 + n_r, c_br, c_fin), const3),           # proj blocks
           pl.BlockSpec((1, c_fin), const2)]                       # proj BN shift
    )

    return pl.pallas_call(
        kern,
        out_shape=jax.ShapeDtypeStruct((n, h, w, c_fin), jnp.bfloat16),
        grid_spec=pltpu.PrefetchScalarGridSpec(
            num_scalar_prefetch=0,
            grid=(n, n_slabs),
            in_specs=in_specs,
            out_specs=pl.BlockSpec((1, row_tile, w, c_fin),
                                   lambda ni, hi: (ni, hi, 0, 0)),
            scratch_shapes=[
                pltpu.VMEM((2, row_win, w, c_in), jnp.bfloat16),
                pltpu.SemaphoreType.DMA((2,)),
            ],
        ),
        compiler_params=pltpu.CompilerParams(
            dimension_semantics=("parallel", "arbitrary"),
            vmem_limit_bytes=_vmem_limit_bytes()),
    )(pool_bias, x_hpad, kp["w1"], kp["s1"], *kp["wa"], *kp["sa"],
      kp["wproj"], kp["proj_s"])


# ---------------------------------------------------------------------------
# parameters (eval-mode BN folding, bf16 casting, lane padding)
# ---------------------------------------------------------------------------
def fold_bn(gamma, beta, mean, var, eps=1e-5):
    scale = gamma / jnp.sqrt(var + eps)
    shift = beta - mean * scale
    return scale, shift


def init_aspp_params(key, in_ch, rates, out_ch):
    """Random eval-mode parameters mirroring the PyTorch ASPP module."""
    keys = iter(jax.random.split(key, 64))

    def conv_w(shape):
        return jax.random.normal(next(keys), shape, jnp.float32) * 0.05

    def bn(c):
        gamma = 1.0 + 0.1 * jax.random.normal(next(keys), (c,), jnp.float32)
        beta = 0.1 * jax.random.normal(next(keys), (c,), jnp.float32)
        mean = 0.1 * jax.random.normal(next(keys), (c,), jnp.float32)
        var = jax.random.uniform(next(keys), (c,), jnp.float32, 0.5, 1.5)
        return gamma, beta, mean, var

    p = {"b0_w": conv_w((1, 1, in_ch, out_ch)), "b0_bn": bn(out_ch)}
    for i, _ in enumerate(rates):
        p[f"a{i}_w"] = conv_w((3, 3, in_ch, out_ch))
        p[f"a{i}_bn"] = bn(out_ch)
    p["pool_w"] = conv_w((1, 1, in_ch, out_ch))
    p["pool_bn"] = bn(out_ch)
    n_br = len(rates) + 2
    p["proj_w"] = conv_w((1, 1, n_br * out_ch, out_ch))
    p["proj_bn"] = bn(out_ch)
    return p


def pack_params(p, in_ch, rates, out_ch):
    """Fold eval-mode BN scale into conv-weight columns, cast MXU operands to
    bf16, zero-pad input/branch/output channels to lane (128) multiples."""
    c_in = _round_up(in_ch, LANE)
    c_br = _round_up(out_ch, LANE)
    c_fin = _round_up(out_ch, LANE)

    def fold(w_hwio, bn_stats):
        scale, shift = fold_bn(*bn_stats)
        w = w_hwio * scale                                   # scale -> columns
        kh, kw, ci, co = w.shape
        w = w.reshape(kh * kw, ci, co)
        w = jnp.pad(w, ((0, 0), (0, c_in - ci), (0, c_br - co))).astype(jnp.bfloat16)
        s = jnp.pad(shift, (0, c_br - co)).reshape(1, c_br).astype(jnp.float32)
        return w, s

    kp = {}
    w0, s0 = fold(p["b0_w"], p["b0_bn"])
    kp["w1"], kp["s1"] = w0.reshape(c_in, c_br), s0
    kp["wa"], kp["sa"] = [], []
    for i, _ in enumerate(rates):
        wa, sa = fold(p[f"a{i}_w"], p[f"a{i}_bn"])
        kp["wa"].append(wa)
        kp["sa"].append(sa)

    wpool, spool = fold(p["pool_w"], p["pool_bn"])
    kp["pool_w1"], kp["pool_s1"] = wpool.reshape(c_in, c_br), spool

    pscale, pshift = fold_bn(*p["proj_bn"])
    n_br = len(rates) + 2
    wproj = p["proj_w"].reshape(n_br * out_ch, out_ch) * pscale
    blocks = []
    for b in range(n_br):
        blk = wproj[b * out_ch:(b + 1) * out_ch]
        blk = jnp.pad(blk, ((0, c_br - out_ch), (0, c_fin - out_ch)))
        blocks.append(blk.astype(jnp.bfloat16))
    kp["wproj"] = jnp.stack(blocks[:-1], axis=0)   # conv branches (torch cat order)
    kp["pool_w2"] = blocks[-1]                     # pooling rows of the proj weight
    kp["proj_s"] = jnp.pad(pshift, (0, c_fin - out_ch)).reshape(1, c_fin).astype(
        jnp.float32)
    return kp


# ---------------------------------------------------------------------------
# forward
# ---------------------------------------------------------------------------
def aspp_forward(x_nchw, kp, rates, out_ch):
    n, c_in0, h, w = x_nchw.shape
    pad_r = max(rates) if rates else 0
    c_in = kp["w1"].shape[0]
    c_fin = kp["proj_s"].shape[-1]

    # NCHW -> NHWC bf16; zero-pad the input-channel axis to the lane-padded
    # width the packed weights expect (zero channels contribute nothing).
    x_nhwc = jnp.transpose(x_nchw, (0, 2, 3, 1)).astype(jnp.bfloat16)
    if c_in > c_in0:
        x_nhwc = jnp.pad(x_nhwc, ((0, 0), (0, 0), (0, 0), (0, c_in - c_in0)))

    # Pooling branch on the UNPADDED input -> per-image projection bias.
    pool_bias = pooling_branch_bias(x_nhwc, kp["pool_w1"], kp["pool_s1"],
                                    kp["pool_w2"]).reshape(n, 1, c_fin)

    # Minimal H-only zero halo for the dilated row taps; the W halo is built
    # in VMEM inside the fused kernel.
    x_hpad = jnp.pad(x_nhwc, ((0, 0), (pad_r, pad_r), (0, 0), (0, 0)))

    # Fused 1x1 + dilated 3x3 branches + concat/projection + BN + ReLU.
    # TODO(synk): Dropout(0.5) is identity in eval mode; training-mode dropout
    # is not implemented.
    row_tile = _pick_row_tile(h, w)
    out = fused_aspp(x_hpad, pool_bias, kp, rates, h=h, w=w, row_tile=row_tile)

    # Single post-pass: drop lane padding, back to the module's NCHW / f32.
    return jnp.transpose(out[..., :out_ch], (0, 3, 1, 2)).astype(jnp.float32)


# ---------------------------------------------------------------------------
if __name__ == "__main__":
    key = jax.random.PRNGKey(0)
    kx, kparams = jax.random.split(key)

    N, C_IN, H, W = 2, 8, 16, 16
    RATES = (1, 2, 3)
    OUT_CH = 32

    x = jax.random.normal(kx, (N, C_IN, H, W), jnp.float32)
    raw_params = init_aspp_params(kparams, C_IN, RATES, OUT_CH)
    packed = pack_params(raw_params, C_IN, RATES, OUT_CH)

    fwd = jax.jit(aspp_forward, static_argnums=(2, 3))
    y = fwd(x, packed, RATES, OUT_CH)
    jax.block_until_ready(y)

    assert y.shape == (N, OUT_CH, H, W), y.shape
    assert bool(jnp.all(jnp.isfinite(y)))
    print("KERNEL_OK")
</pallas_src>

<mosaic_0001>
module attributes {stable_mosaic.version = 11 : i64} {
  func.func @_pool_bias_kernel(%arg0: i32, %arg1: memref<2x16x16x128xbf16, #tpu.memory_space<vmem>>, %arg2: memref<128x128xbf16, #tpu.memory_space<vmem>>, %arg3: memref<1x128xf32, #tpu.memory_space<vmem>>, %arg4: memref<128x128xbf16, #tpu.memory_space<vmem>>, %arg5: memref<2x128xf32, #tpu.memory_space<vmem>>, %arg6: memref<2x128xf32, #tpu.memory_space<vmem>>) attributes {dimension_semantics = [#tpu.dimension_semantics<arbitrary>], iteration_bounds = array<i64: 1>, scalar_prefetch = 0 : i64, scratch_operands = 1 : i64, tpu.core_type = #tpu.core_type<tc>, window_params = [{transform_indices = @transform_0, window_bounds = array<i64: 2, 16, 16, 128>}, {pipeline_mode = #tpu.pipeline_mode<synchronous>, transform_indices = @transform_1, window_bounds = array<i64: 128, 128>}, {pipeline_mode = #tpu.pipeline_mode<synchronous>, transform_indices = @transform_2, window_bounds = array<i64: 1, 128>}, {pipeline_mode = #tpu.pipeline_mode<synchronous>, transform_indices = @transform_3, window_bounds = array<i64: 128, 128>}, {pipeline_mode = #tpu.pipeline_mode<synchronous>, transform_indices = @transform_4, window_bounds = array<i64: 2, 128>}]} {
    %c0_i32 = arith.constant 0 : i32
    %0 = arith.cmpi eq, %arg0, %c0_i32 : i32
    %1 = arith.extui %0 : i1 to i32
    %c0_i32_0 = arith.constant 0 : i32
    %2 = arith.cmpi ne, %1, %c0_i32_0 : i32
    scf.if %2 {
      %cst_10 = arith.constant 0.000000e+00 : f32
      %12 = vector.broadcast %cst_10 : f32 to vector<2x128xf32>
      %c0_11 = arith.constant 0 : index
      %c0_12 = arith.constant 0 : index
      %13 = vector.load %arg6[%c0_11, %c0_12] : memref<2x128xf32, #tpu.memory_space<vmem>>, vector<2x128xf32>
      tpu.vector_store %arg6[%c0_11, %c0_12], %12 {strides = array<i32>} : memref<2x128xf32, #tpu.memory_space<vmem>>, vector<2x128xf32>,
    } else {
    }
    %c0 = arith.constant 0 : index
    %c0_1 = arith.constant 0 : index
    %3 = vector.load %arg6[%c0, %c0_1] : memref<2x128xf32, #tpu.memory_space<vmem>>, vector<2x128xf32>
    %c0_2 = arith.constant 0 : index
    %c0_3 = arith.constant 0 : index
    %c0_4 = arith.constant 0 : index
    %c0_5 = arith.constant 0 : index
    %4 = vector.load %arg1[%c0_2, %c0_3, %c0_4, %c0_5] : memref<2x16x16x128xbf16, #tpu.memory_space<vmem>>, vector<2x16x16x128xbf16>
    %5 = arith.extf %4 : vector<2x16x16x128xbf16> to vector<2x16x16x128xf32>
    %cst = arith.constant dense<0.000000e+00> : vector<2x128xf32>
    %6 = vector.multi_reduction <add>, %5, %cst [1, 2] : vector<2x16x16x128xf32> to vector<2x128xf32>
    %7 = arith.addf %3, %6 : vector<2x128xf32>
    %c0_6 = arith.constant 0 : index
    %c0_7 = arith.constant 0 : index
    %8 = vector.load %arg6[%c0_6, %c0_7] : memref<2x128xf32, #tpu.memory_space<vmem>>, vector<2x128xf32>
    tpu.vector_store %arg6[%c0_6, %c0_7], %7 {strides = array<i32>} : memref<2x128xf32, #tpu.memory_space<vmem>>, vector<2x128xf32>,
    %c0_i32_8 = arith.constant 0 : i32
    %9 = arith.cmpi eq, %arg0, %c0_i32_8 : i32
    %10 = arith.extui %9 : i1 to i32
    %c0_i32_9 = arith.constant 0 : i32
    %11 = arith.cmpi ne, %10, %c0_i32_9 : i32
    scf.if %11 {
      %c0_10 = arith.constant 0 : index
      %c0_11 = arith.constant 0 : index
      %12 = vector.load %arg6[%c0_10, %c0_11] : memref<2x128xf32, #tpu.memory_space<vmem>>, vector<2x128xf32>
      %cst_12 = arith.constant 3.906250e-03 : f32
      %13 = vector.broadcast %cst_12 : f32 to vector<2x128xf32>
      %14 = arith.mulf %12, %13 : vector<2x128xf32>
      %15 = arith.truncf %14 : vector<2x128xf32> to vector<2x128xbf16>
      %c0_13 = arith.constant 0 : index
      %c0_14 = arith.constant 0 : index
      %16 = vector.load %arg2[%c0_13, %c0_14] : memref<128x128xbf16, #tpu.memory_space<vmem>>, vector<128x128xbf16>
      %cst_15 = arith.constant dense<0.000000e+00> : vector<2x128xf32>
      %17 = tpu.matmul %15, %16, %cst_15 {dimension_numbers = #tpu.dot_dimension_numbers<[1], [0], [0], [1], [0, 0, 1, 1], [], []>} : vector<2x128xbf16>, vector<128x128xbf16>, vector<2x128xf32> -> vector<2x128xf32>
      %c0_16 = arith.constant 0 : index
      %c0_17 = arith.constant 0 : index
      %18 = vector.load %arg3[%c0_16, %c0_17] : memref<1x128xf32, #tpu.memory_space<vmem>>, vector<1x128xf32>
      %19 = vector.broadcast %18 : vector<1x128xf32> to vector<2x128xf32>
      %20 = arith.addf %17, %19 : vector<2x128xf32>
      %cst_18 = arith.constant 0.000000e+00 : f32
      %21 = vector.broadcast %cst_18 : f32 to vector<2x128xf32>
      %22 = arith.maximumf %20, %21 : vector<2x128xf32>
      %23 = arith.truncf %22 : vector<2x128xf32> to vector<2x128xbf16>
      %c0_19 = arith.constant 0 : index
      %c0_20 = arith.constant 0 : index
      %24 = vector.load %arg4[%c0_19, %c0_20] : memref<128x128xbf16, #tpu.memory_space<vmem>>, vector<128x128xbf16>
      %cst_21 = arith.constant dense<0.000000e+00> : vector<2x128xf32>
      %25 = tpu.matmul %23, %24, %cst_21 {dimension_numbers = #tpu.dot_dimension_numbers<[1], [0], [0], [1], [0, 0, 1, 1], [], []>} : vector<2x128xbf16>, vector<128x128xbf16>, vector<2x128xf32> -> vector<2x128xf32>
      %c0_22 = arith.constant 0 : index
      %c0_23 = arith.constant 0 : index
      %26 = vector.load %arg5[%c0_22, %c0_23] : memref<2x128xf32, #tpu.memory_space<vmem>>, vector<2x128xf32>
      tpu.vector_store %arg5[%c0_22, %c0_23], %25 {strides = array<i32>} : memref<2x128xf32, #tpu.memory_space<vmem>>, vector<2x128xf32>,
    } else {
    }
    return
  }
  func.func @transform_0(%arg0: i32) -> (i32, i32, i32, i32) {
    %c0_i32 = arith.constant 0 : i32
    %c0_i32_0 = arith.constant 0 : i32
    %c0_i32_1 = arith.constant 0 : i32
    %c0_i32_2 = arith.constant 0 : i32
    return %c0_i32, %arg0, %c0_i32_0, %c0_i32_1 : i32, i32, i32, i32
  }
  func.func @transform_1(%arg0: i32) -> (i32, i32) {
    %c0_i32 = arith.constant 0 : i32
    %c0_i32_0 = arith.constant 0 : i32
    %c0_i32_1 = arith.constant 0 : i32
    return %c0_i32, %c0_i32_0 : i32, i32
  }
  func.func @transform_2(%arg0: i32) -> (i32, i32) {
    %c0_i32 = arith.constant 0 : i32
    %c0_i32_0 = arith.constant 0 : i32
    %c0_i32_1 = arith.constant 0 : i32
    return %c0_i32, %c0_i32_0 : i32, i32
  }
  func.func @transform_3(%arg0: i32) -> (i32, i32) {
    %c0_i32 = arith.constant 0 : i32
    %c0_i32_0 = arith.constant 0 : i32
    %c0_i32_1 = arith.constant 0 : i32
    return %c0_i32, %c0_i32_0 : i32, i32
  }
  func.func @transform_4(%arg0: i32) -> (i32, i32) {
    %c0_i32 = arith.constant 0 : i32
    %c0_i32_0 = arith.constant 0 : i32
    %c0_i32_1 = arith.constant 0 : i32
    return %c0_i32, %c0_i32_0 : i32, i32
  }
}

module attributes {stable_mosaic.version = 11 : i64} {
  func.func @_fused_aspp_kernel(%arg0: i32, %arg1: i32, %arg2: memref<1x1x128xf32, #tpu.memory_space<vmem>>, %arg3: memref<2x22x16x128xbf16, #tpu.memory_space<any>>, %arg4: memref<128x128xbf16, #tpu.memory_space<vmem>>, %arg5: memref<1x128xf32, #tpu.memory_space<vmem>>, %arg6: memref<9x128x128xbf16, #tpu.memory_space<vmem>>, %arg7: memref<9x128x128xbf16, #tpu.memory_space<vmem>>, %arg8: memref<9x128x128xbf16, #tpu.memory_space<vmem>>, %arg9: memref<1x128xf32, #tpu.memory_space<vmem>>, %arg10: memref<1x128xf32, #tpu.memory_space<vmem>>, %arg11: memref<1x128xf32, #tpu.memory_space<vmem>>, %arg12: memref<4x128x128xbf16, #tpu.memory_space<vmem>>, %arg13: memref<1x128xf32, #tpu.memory_space<vmem>>, %arg14: memref<1x16x16x128xbf16, #tpu.memory_space<vmem>>, %arg15: memref<2x22x16x128xbf16, #tpu.memory_space<vmem>>, %arg16: memref<2x!tpu.dma_semaphore, #tpu.memory_space<semaphore_mem>>) attributes {dimension_semantics = [#tpu.dimension_semantics<parallel>, #tpu.dimension_semantics<arbitrary>], iteration_bounds = array<i64: 2, 1>, scalar_prefetch = 0 : i64, scratch_operands = 2 : i64, tpu.core_type = #tpu.core_type<tc>, window_params = [{transform_indices = @transform_0, window_bounds = array<i64: 1, 1, 128>}, {}, {pipeline_mode = #tpu.pipeline_mode<synchronous>, transform_indices = @transform_2, window_bounds = array<i64: 128, 128>}, {pipeline_mode = #tpu.pipeline_mode<synchronous>, transform_indices = @transform_3, window_bounds = array<i64: 1, 128>}, {pipeline_mode = #tpu.pipeline_mode<synchronous>, transform_indices = @transform_4, window_bounds = array<i64: 9, 128, 128>}, {pipeline_mode = #tpu.pipeline_mode<synchronous>, transform_indices = @transform_5, window_bounds = array<i64: 9, 128, 128>}, {pipeline_mode = #tpu.pipeline_mode<synchronous>, transform_indices = @transform_6, window_bounds = array<i64: 9, 128, 128>}, {pipeline_mode = #tpu.pipeline_mode<synchronous>, transform_indices = @transform_7, window_bounds = array<i64: 1, 128>}, {pipeline_mode = #tpu.pipeline_mode<synchronous>, transform_indices = @transform_8, window_bounds = array<i64: 1, 128>}, {pipeline_mode = #tpu.pipeline_mode<synchronous>, transform_indices = @transform_9, window_bounds = array<i64: 1, 128>}, {pipeline_mode = #tpu.pipeline_mode<synchronous>, transform_indices = @transform_10, window_bounds = array<i64: 4, 128, 128>}, {pipeline_mode = #tpu.pipeline_mode<synchronous>, transform_indices = @transform_11, window_bounds = array<i64: 1, 128>}, {transform_indices = @transform_12, window_bounds = array<i64: 1, 16, 16, 128>}]} {
    %c2_i32 = arith.constant 2 : i32
    %c0_i32 = arith.constant 0 : i32
    %0 = arith.cmpi eq, %c2_i32, %c0_i32 : i32
    %c1_i32 = arith.constant 1 : i32
    %1 = arith.select %0, %c1_i32, %c2_i32 : i32
    %2 = arith.remsi %arg1, %1 : i32
    %c0_i32_0 = arith.constant 0 : i32
    %3 = arith.cmpi ne, %2, %c0_i32_0 : i32
    %c0_i32_1 = arith.constant 0 : i32
    %4 = arith.cmpi slt, %2, %c0_i32_1 : i32
    %c0_i32_2 = arith.constant 0 : i32
    %5 = arith.cmpi slt, %1, %c0_i32_2 : i32
    %6 = arith.xori %4, %5 : i1
    %7 = arith.andi %6, %3 : i1
    %8 = arith.addi %2, %1 : i32
    %9 = arith.select %7, %8, %2 : i32
    %c0_i32_3 = arith.constant 0 : i32
    %10 = arith.cmpi eq, %arg1, %c0_i32_3 : i32
    %11 = arith.extui %10 : i1 to i32
    %c0_i32_4 = arith.constant 0 : i32
    %12 = arith.cmpi ne, %11, %c0_i32_4 : i32
    scf.if %12 {
      %c16_i32_156 = arith.constant 16 : i32
      %244 = arith.muli %arg1, %c16_i32_156 : i32
      %245 = tpu.assume_multiple %244, 16 : i32
      %c0_i32_157 = arith.constant 0 : i32
      %c0_i32_158 = arith.constant 0 : i32
      %246 = tpu.memref_slice %arg3[%arg0, %245, %c0_i32_157, %c0_i32_158] : memref<2x22x16x128xbf16, #tpu.memory_space<any>> -> memref<1x22x16x128xbf16, #tpu.memory_space<any>>
      %247 = tpu.memref_squeeze %246 : memref<1x22x16x128xbf16, #tpu.memory_space<any>> -> memref<22x16x128xbf16, #tpu.memory_space<any>>
      %c0_i32_159 = arith.constant 0 : i32
      %c0_i32_160 = arith.constant 0 : i32
      %c0_i32_161 = arith.constant 0 : i32
      %248 = tpu.memref_slice %arg15[%9, %c0_i32_159, %c0_i32_160, %c0_i32_161] : memref<2x22x16x128xbf16, #tpu.memory_space<vmem>> -> memref<1x22x16x128xbf16, #tpu.memory_space<vmem>>
      %249 = tpu.memref_squeeze %248 : memref<1x22x16x128xbf16, #tpu.memory_space<vmem>> -> memref<22x16x128xbf16, #tpu.memory_space<vmem>>
      %250 = tpu.memref_slice %arg16[%9] : memref<2x!tpu.dma_semaphore, #tpu.memory_space<semaphore_mem>> -> memref<1x!tpu.dma_semaphore, #tpu.memory_space<semaphore_mem>>
      %251 = tpu.memref_squeeze %250 : memref<1x!tpu.dma_semaphore, #tpu.memory_space<semaphore_mem>> -> memref<!tpu.dma_semaphore, #tpu.memory_space<semaphore_mem>>
      tpu.enqueue_dma source(%247 : memref<22x16x128xbf16, #tpu.memory_space<any>>) target(%249 : memref<22x16x128xbf16, #tpu.memory_space<vmem>>) target_semaphore(%251 : memref<!tpu.dma_semaphore, #tpu.memory_space<semaphore_mem>>)
    } else {
    }
    %c16_i32 = arith.constant 16 : i32
    %13 = arith.muli %arg1, %c16_i32 : i32
    %14 = tpu.assume_multiple %13, 16 : i32
    %c0_i32_5 = arith.constant 0 : i32
    %c0_i32_6 = arith.constant 0 : i32
    %15 = tpu.memref_slice %arg3[%arg0, %14, %c0_i32_5, %c0_i32_6] : memref<2x22x16x128xbf16, #tpu.memory_space<any>> -> memref<1x22x16x128xbf16, #tpu.memory_space<any>>
    %16 = tpu.memref_squeeze %15 : memref<1x22x16x128xbf16, #tpu.memory_space<any>> -> memref<22x16x128xbf16, #tpu.memory_space<any>>
    %c0_i32_7 = arith.constant 0 : i32
    %c0_i32_8 = arith.constant 0 : i32
    %c0_i32_9 = arith.constant 0 : i32
    %17 = tpu.memref_slice %arg15[%9, %c0_i32_7, %c0_i32_8, %c0_i32_9] : memref<2x22x16x128xbf16, #tpu.memory_space<vmem>> -> memref<1x22x16x128xbf16, #tpu.memory_space<vmem>>
    %18 = tpu.memref_squeeze %17 : memref<1x22x16x128xbf16, #tpu.memory_space<vmem>> -> memref<22x16x128xbf16, #tpu.memory_space<vmem>>
    %19 = tpu.memref_slice %arg16[%9] : memref<2x!tpu.dma_semaphore, #tpu.memory_space<semaphore_mem>> -> memref<1x!tpu.dma_semaphore, #tpu.memory_space<semaphore_mem>>
    %20 = tpu.memref_squeeze %19 : memref<1x!tpu.dma_semaphore, #tpu.memory_space<semaphore_mem>> -> memref<!tpu.dma_semaphore, #tpu.memory_space<semaphore_mem>>
    tpu.wait_dma2 semaphore(%20 : memref<!tpu.dma_semaphore, #tpu.memory_space<semaphore_mem>>) src(%16 : memref<22x16x128xbf16, #tpu.memory_space<any>>) dst(%18 : memref<22x16x128xbf16, #tpu.memory_space<vmem>>)
    %c1_i32_10 = arith.constant 1 : i32
    %21 = arith.addi %arg1, %c1_i32_10 : i32
    %c1_i32_11 = arith.constant 1 : i32
    %22 = arith.cmpi slt, %21, %c1_i32_11 : i32
    %23 = arith.extui %22 : i1 to i32
    %c0_i32_12 = arith.constant 0 : i32
    %24 = arith.cmpi ne, %23, %c0_i32_12 : i32
    scf.if %24 {
      %c1_i32_156 = arith.constant 1 : i32
      %244 = arith.addi %arg1, %c1_i32_156 : i32
      %c1_i32_157 = arith.constant 1 : i32
      %245 = arith.subi %c1_i32_157, %9 : i32
      %c16_i32_158 = arith.constant 16 : i32
      %246 = arith.muli %244, %c16_i32_158 : i32
      %247 = tpu.assume_multiple %246, 16 : i32
      %c0_i32_159 = arith.constant 0 : i32
      %c0_i32_160 = arith.constant 0 : i32
      %248 = tpu.memref_slice %arg3[%arg0, %247, %c0_i32_159, %c0_i32_160] : memref<2x22x16x128xbf16, #tpu.memory_space<any>> -> memref<1x22x16x128xbf16, #tpu.memory_space<any>>
      %249 = tpu.memref_squeeze %248 : memref<1x22x16x128xbf16, #tpu.memory_space<any>> -> memref<22x16x128xbf16, #tpu.memory_space<any>>
      %c0_i32_161 = arith.constant 0 : i32
      %c0_i32_162 = arith.constant 0 : i32
      %c0_i32_163 = arith.constant 0 : i32
      %250 = tpu.memref_slice %arg15[%245, %c0_i32_161, %c0_i32_162, %c0_i32_163] : memref<2x22x16x128xbf16, #tpu.memory_space<vmem>> -> memref<1x22x16x128xbf16, #tpu.memory_space<vmem>>
      %251 = tpu.memref_squeeze %250 : memref<1x22x16x128xbf16, #tpu.memory_space<vmem>> -> memref<22x16x128xbf16, #tpu.memory_space<vmem>>
      %252 = tpu.memref_slice %arg16[%245] : memref<2x!tpu.dma_semaphore, #tpu.memory_space<semaphore_mem>> -> memref<1x!tpu.dma_semaphore, #tpu.memory_space<semaphore_mem>>
      %253 = tpu.memref_squeeze %252 : memref<1x!tpu.dma_semaphore, #tpu.memory_space<semaphore_mem>> -> memref<!tpu.dma_semaphore, #tpu.memory_space<semaphore_mem>>
      tpu.enqueue_dma source(%249 : memref<22x16x128xbf16, #tpu.memory_space<any>>) target(%251 : memref<22x16x128xbf16, #tpu.memory_space<vmem>>) target_semaphore(%253 : memref<!tpu.dma_semaphore, #tpu.memory_space<semaphore_mem>>)
    } else {
    }
    %25 = arith.index_cast %9 : i32 to index
    %c0 = arith.constant 0 : index
    %c0_13 = arith.constant 0 : index
    %c0_14 = arith.constant 0 : index
    %26 = vector.load %arg15[%25, %c0, %c0_13, %c0_14] : memref<2x22x16x128xbf16, #tpu.memory_space<vmem>>, vector<1x22x16x128xbf16>
    %27 = vector.shape_cast %26 : vector<1x22x16x128xbf16> to vector<22x16x128xbf16>
    %cst = arith.constant 0.000000e+00 : bf16
    %28 = vector.broadcast %cst : bf16 to vector<22x3x128xbf16>
    %29 = tpu.concatenate %28, %27, %28 in 1 : vector<22x3x128xbf16>, vector<22x16x128xbf16>, vector<22x3x128xbf16> -> vector<22x22x128xbf16>
    %30 = vector.extract_strided_slice %27 {offsets = [3, 0, 0], sizes = [16, 16, 128], strides = [1, 1, 1]} : vector<22x16x128xbf16> to vector<16x16x128xbf16>
    %31 = vector.shape_cast %30 : vector<16x16x128xbf16> to vector<256x128xbf16>
    %c0_15 = arith.constant 0 : index
    %c0_16 = arith.constant 0 : index
    %32 = vector.load %arg4[%c0_15, %c0_16] : memref<128x128xbf16, #tpu.memory_space<vmem>>, vector<128x128xbf16>
    %cst_17 = arith.constant dense<0.000000e+00> : vector<256x128xf32>
    %33 = tpu.matmul %31, %32, %cst_17 {dimension_numbers = #tpu.dot_dimension_numbers<[1], [0], [0], [1], [0, 0, 1, 1], [], []>} : vector<256x128xbf16>, vector<128x128xbf16>, vector<256x128xf32> -> vector<256x128xf32>
    %c0_18 = arith.constant 0 : index
    %c0_19 = arith.constant 0 : index
    %34 = vector.load %arg5[%c0_18, %c0_19] : memref<1x128xf32, #tpu.memory_space<vmem>>, vector<1x128xf32>
    %35 = vector.broadcast %34 : vector<1x128xf32> to vector<256x128xf32>
    %36 = arith.addf %33, %35 : vector<256x128xf32>
    %cst_20 = arith.constant 0.000000e+00 : f32
    %37 = vector.broadcast %cst_20 : f32 to vector<256x128xf32>
    %38 = arith.maximumf %36, %37 : vector<256x128xf32>
    %39 = arith.truncf %38 : vector<256x128xf32> to vector<256x128xbf16>
    %c0_21 = arith.constant 0 : index
    %c0_22 = arith.constant 0 : index
    %c0_23 = arith.constant 0 : index
    %40 = vector.load %arg12[%c0_21, %c0_22, %c0_23] : memref<4x128x128xbf16, #tpu.memory_space<vmem>>, vector<1x128x128xbf16>
    %41 = vector.shape_cast %40 : vector<1x128x128xbf16> to vector<128x128xbf16>
    %cst_24 = arith.constant dense<0.000000e+00> : vector<256x128xf32>
    %42 = tpu.matmul %39, %41, %cst_24 {dimension_numbers = #tpu.dot_dimension_numbers<[1], [0], [0], [1], [0, 0, 1, 1], [], []>} : vector<256x128xbf16>, vector<128x128xbf16>, vector<256x128xf32> -> vector<256x128xf32>
    %43 = vector.extract_strided_slice %29 {offsets = [2, 2, 0], sizes = [16, 16, 128], strides = [1, 1, 1]} : vector<22x22x128xbf16> to vector<16x16x128xbf16>
    %44 = vector.shape_cast %43 : vector<16x16x128xbf16> to vector<256x128xbf16>
    %c0_25 = arith.constant 0 : index
    %c0_26 = arith.constant 0 : index
    %c0_27 = arith.constant 0 : index
    %45 = vector.load %arg6[%c0_25, %c0_26, %c0_27] : memref<9x128x128xbf16, #tpu.memory_space<vmem>>, vector<1x128x128xbf16>
    %46 = vector.shape_cast %45 : vector<1x128x128xbf16> to vector<128x128xbf16>
    %cst_28 = arith.constant dense<0.000000e+00> : vector<256x128xf32>
    %47 = tpu.matmul %44, %46, %cst_28 {dimension_numbers = #tpu.dot_dimension_numbers<[1], [0], [0], [1], [0, 0, 1, 1], [], []>} : vector<256x128xbf16>, vector<128x128xbf16>, vector<256x128xf32> -> vector<256x128xf32>
    %48 = vector.extract_strided_slice %29 {offsets = [2, 3, 0], sizes = [16, 16, 128], strides = [1, 1, 1]} : vector<22x22x128xbf16> to vector<16x16x128xbf16>
    %49 = vector.shape_cast %48 : vector<16x16x128xbf16> to vector<256x128xbf16>
    %c1 = arith.constant 1 : index
    %c0_29 = arith.constant 0 : index
    %c0_30 = arith.constant 0 : index
    %50 = vector.load %arg6[%c1, %c0_29, %c0_30] : memref<9x128x128xbf16, #tpu.memory_space<vmem>>, vector<1x128x128xbf16>
    %51 = vector.shape_cast %50 : vector<1x128x128xbf16> to vector<128x128xbf16>
    %cst_31 = arith.constant dense<0.000000e+00> : vector<256x128xf32>
    %52 = tpu.matmul %49, %51, %cst_31 {dimension_numbers = #tpu.dot_dimension_numbers<[1], [0], [0], [1], [0, 0, 1, 1], [], []>} : vector<256x128xbf16>, vector<128x128xbf16>, vector<256x128xf32> -> vector<256x128xf32>
    %53 = arith.addf %47, %52 : vector<256x128xf32>
    %54 = vector.extract_strided_slice %29 {offsets = [2, 4, 0], sizes = [16, 16, 128], strides = [1, 1, 1]} : vector<22x22x128xbf16> to vector<16x16x128xbf16>
    %55 = vector.shape_cast %54 : vector<16x16x128xbf16> to vector<256x128xbf16>
    %c2 = arith.constant 2 : index
    %c0_32 = arith.constant 0 : index
    %c0_33 = arith.constant 0 : index
    %56 = vector.load %arg6[%c2, %c0_32, %c0_33] : memref<9x128x128xbf16, #tpu.memory_space<vmem>>, vector<1x128x128xbf16>
    %57 = vector.shape_cast %56 : vector<1x128x128xbf16> to vector<128x128xbf16>
    %cst_34 = arith.constant dense<0.000000e+00> : vector<256x128xf32>
    %58 = tpu.matmul %55, %57, %cst_34 {dimension_numbers = #tpu.dot_dimension_numbers<[1], [0], [0], [1], [0, 0, 1, 1], [], []>} : vector<256x128xbf16>, vector<128x128xbf16>, vector<256x128xf32> -> vector<256x128xf32>
    %59 = arith.addf %53, %58 : vector<256x128xf32>
    %60 = vector.extract_strided_slice %29 {offsets = [3, 2, 0], sizes = [16, 16, 128], strides = [1, 1, 1]} : vector<22x22x128xbf16> to vector<16x16x128xbf16>
    %61 = vector.shape_cast %60 : vector<16x16x128xbf16> to vector<256x128xbf16>
    %c3 = arith.constant 3 : index
    %c0_35 = arith.constant 0 : index
    %c0_36 = arith.constant 0 : index
    %62 = vector.load %arg6[%c3, %c0_35, %c0_36] : memref<9x128x128xbf16, #tpu.memory_space<vmem>>, vector<1x128x128xbf16>
    %63 = vector.shape_cast %62 : vector<1x128x128xbf16> to vector<128x128xbf16>
    %cst_37 = arith.constant dense<0.000000e+00> : vector<256x128xf32>
    %64 = tpu.matmul %61, %63, %cst_37 {dimension_numbers = #tpu.dot_dimension_numbers<[1], [0], [0], [1], [0, 0, 1, 1], [], []>} : vector<256x128xbf16>, vector<128x128xbf16>, vector<256x128xf32> -> vector<256x128xf32>
    %65 = arith.addf %59, %64 : vector<256x128xf32>
    %66 = vector.extract_strided_slice %29 {offsets = [3, 3, 0], sizes = [16, 16, 128], strides = [1, 1, 1]} : vector<22x22x128xbf16> to vector<16x16x128xbf16>
    %67 = vector.shape_cast %66 : vector<16x16x128xbf16> to vector<256x128xbf16>
    %c4 = arith.constant 4 : index
    %c0_38 = arith.constant 0 : index
    %c0_39 = arith.constant 0 : index
    %68 = vector.load %arg6[%c4, %c0_38, %c0_39] : memref<9x128x128xbf16, #tpu.memory_space<vmem>>, vector<1x128x128xbf16>
    %69 = vector.shape_cast %68 : vector<1x128x128xbf16> to vector<128x128xbf16>
    %cst_40 = arith.constant dense<0.000000e+00> : vector<256x128xf32>
    %70 = tpu.matmul %67, %69, %cst_40 {dimension_numbers = #tpu.dot_dimension_numbers<[1], [0], [0], [1], [0, 0, 1, 1], [], []>} : vector<256x128xbf16>, vector<128x128xbf16>, vector<256x128xf32> -> vector<256x128xf32>
    %71 = arith.addf %65, %70 : vector<256x128xf32>
    %72 = vector.extract_strided_slice %29 {offsets = [3, 4, 0], sizes = [16, 16, 128], strides = [1, 1, 1]} : vector<22x22x128xbf16> to vector<16x16x128xbf16>
    %73 = vector.shape_cast %72 : vector<16x16x128xbf16> to vector<256x128xbf16>
    %c5 = arith.constant 5 : index
    %c0_41 = arith.constant 0 : index
    %c0_42 = arith.constant 0 : index
    %74 = vector.load %arg6[%c5, %c0_41, %c0_42] : memref<9x128x128xbf16, #tpu.memory_space<vmem>>, vector<1x128x128xbf16>
    %75 = vector.shape_cast %74 : vector<1x128x128xbf16> to vector<128x128xbf16>
    %cst_43 = arith.constant dense<0.000000e+00> : vector<256x128xf32>
    %76 = tpu.matmul %73, %75, %cst_43 {dimension_numbers = #tpu.dot_dimension_numbers<[1], [0], [0], [1], [0, 0, 1, 1], [], []>} : vector<256x128xbf16>, vector<128x128xbf16>, vector<256x128xf32> -> vector<256x128xf32>
    %77 = arith.addf %71, %76 : vector<256x128xf32>
    %78 = vector.extract_strided_slice %29 {offsets = [4, 2, 0], sizes = [16, 16, 128], strides = [1, 1, 1]} : vector<22x22x128xbf16> to vector<16x16x128xbf16>
    %79 = vector.shape_cast %78 : vector<16x16x128xbf16> to vector<256x128xbf16>
    %c6 = arith.constant 6 : index
    %c0_44 = arith.constant 0 : index
    %c0_45 = arith.constant 0 : index
    %80 = vector.load %arg6[%c6, %c0_44, %c0_45] : memref<9x128x128xbf16, #tpu.memory_space<vmem>>, vector<1x128x128xbf16>
    %81 = vector.shape_cast %80 : vector<1x128x128xbf16> to vector<128x128xbf16>
    %cst_46 = arith.constant dense<0.000000e+00> : vector<256x128xf32>
    %82 = tpu.matmul %79, %81, %cst_46 {dimension_numbers = #tpu.dot_dimension_numbers<[1], [0], [0], [1], [0, 0, 1, 1], [], []>} : vector<256x128xbf16>, vector<128x128xbf16>, vector<256x128xf32> -> vector<256x128xf32>
    %83 = arith.addf %77, %82 : vector<256x128xf32>
    %84 = vector.extract_strided_slice %29 {offsets = [4, 3, 0], sizes = [16, 16, 128], strides = [1, 1, 1]} : vector<22x22x128xbf16> to vector<16x16x128xbf16>
    %85 = vector.shape_cast %84 : vector<16x16x128xbf16> to vector<256x128xbf16>
    %c7 = arith.constant 7 : index
    %c0_47 = arith.constant 0 : index
    %c0_48 = arith.constant 0 : index
    %86 = vector.load %arg6[%c7, %c0_47, %c0_48] : memref<9x128x128xbf16, #tpu.memory_space<vmem>>, vector<1x128x128xbf16>
    %87 = vector.shape_cast %86 : vector<1x128x128xbf16> to vector<128x128xbf16>
    %cst_49 = arith.constant dense<0.000000e+00> : vector<256x128xf32>
    %88 = tpu.matmul %85, %87, %cst_49 {dimension_numbers = #tpu.dot_dimension_numbers<[1], [0], [0], [1], [0, 0, 1, 1], [], []>} : vector<256x128xbf16>, vector<128x128xbf16>, vector<256x128xf32> -> vector<256x128xf32>
    %89 = arith.addf %83, %88 : vector<256x128xf32>
    %90 = vector.extract_strided_slice %29 {offsets = [4, 4, 0], sizes = [16, 16, 128], strides = [1, 1, 1]} : vector<22x22x128xbf16> to vector<16x16x128xbf16>
    %91 = vector.shape_cast %90 : vector<16x16x128xbf16> to vector<256x128xbf16>
    %c8 = arith.constant 8 : index
    %c0_50 = arith.constant 0 : index
    %c0_51 = arith.constant 0 : index
    %92 = vector.load %arg6[%c8, %c0_50, %c0_51] : memref<9x128x128xbf16, #tpu.memory_space<vmem>>, vector<1x128x128xbf16>
    %93 = vector.shape_cast %92 : vector<1x128x128xbf16> to vector<128x128xbf16>
    %cst_52 = arith.constant dense<0.000000e+00> : vector<256x128xf32>
    %94 = tpu.matmul %91, %93, %cst_52 {dimension_numbers = #tpu.dot_dimension_numbers<[1], [0], [0], [1], [0, 0, 1, 1], [], []>} : vector<256x128xbf16>, vector<128x128xbf16>, vector<256x128xf32> -> vector<256x128xf32>
    %95 = arith.addf %89, %94 : vector<256x128xf32>
    %c0_53 = arith.constant 0 : index
    %c0_54 = arith.constant 0 : index
    %96 = vector.load %arg9[%c0_53, %c0_54] : memref<1x128xf32, #tpu.memory_space<vmem>>, vector<1x128xf32>
    %97 = vector.broadcast %96 : vector<1x128xf32> to vector<256x128xf32>
    %98 = arith.addf %95, %97 : vector<256x128xf32>
    %cst_55 = arith.constant 0.000000e+00 : f32
    %99 = vector.broadcast %cst_55 : f32 to vector<256x128xf32>
    %100 = arith.maximumf %98, %99 : vector<256x128xf32>
    %101 = arith.truncf %100 : vector<256x128xf32> to vector<256x128xbf16>
    %c1_56 = arith.constant 1 : index
    %c0_57 = arith.constant 0 : index
    %c0_58 = arith.constant 0 : index
    %102 = vector.load %arg12[%c1_56, %c0_57, %c0_58] : memref<4x128x128xbf16, #tpu.memory_space<vmem>>, vector<1x128x128xbf16>
    %103 = vector.shape_cast %102 : vector<1x128x128xbf16> to vector<128x128xbf16>
    %cst_59 = arith.constant dense<0.000000e+00> : vector<256x128xf32>
    %104 = tpu.matmul %101, %103, %cst_59 {dimension_numbers = #tpu.dot_dimension_numbers<[1], [0], [0], [1], [0, 0, 1, 1], [], []>} : vector<256x128xbf16>, vector<128x128xbf16>, vector<256x128xf32> -> vector<256x128xf32>
    %105 = arith.addf %42, %104 : vector<256x128xf32>
    %106 = vector.extract_strided_slice %29 {offsets = [1, 1, 0], sizes = [16, 16, 128], strides = [1, 1, 1]} : vector<22x22x128xbf16> to vector<16x16x128xbf16>
    %107 = vector.shape_cast %106 : vector<16x16x128xbf16> to vector<256x128xbf16>
    %c0_60 = arith.constant 0 : index
    %c0_61 = arith.constant 0 : index
    %c0_62 = arith.constant 0 : index
    %108 = vector.load %arg7[%c0_60, %c0_61, %c0_62] : memref<9x128x128xbf16, #tpu.memory_space<vmem>>, vector<1x128x128xbf16>
    %109 = vector.shape_cast %108 : vector<1x128x128xbf16> to vector<128x128xbf16>
    %cst_63 = arith.constant dense<0.000000e+00> : vector<256x128xf32>
    %110 = tpu.matmul %107, %109, %cst_63 {dimension_numbers = #tpu.dot_dimension_numbers<[1], [0], [0], [1], [0, 0, 1, 1], [], []>} : vector<256x128xbf16>, vector<128x128xbf16>, vector<256x128xf32> -> vector<256x128xf32>
    %111 = vector.extract_strided_slice %29 {offsets = [1, 3, 0], sizes = [16, 16, 128], strides = [1, 1, 1]} : vector<22x22x128xbf16> to vector<16x16x128xbf16>
    %112 = vector.shape_cast %111 : vector<16x16x128xbf16> to vector<256x128xbf16>
    %c1_64 = arith.constant 1 : index
    %c0_65 = arith.constant 0 : index
    %c0_66 = arith.constant 0 : index
    %113 = vector.load %arg7[%c1_64, %c0_65, %c0_66] : memref<9x128x128xbf16, #tpu.memory_space<vmem>>, vector<1x128x128xbf16>
    %114 = vector.shape_cast %113 : vector<1x128x128xbf16> to vector<128x128xbf16>
    %cst_67 = arith.constant dense<0.000000e+00> : vector<256x128xf32>
    %115 = tpu.matmul %112, %114, %cst_67 {dimension_numbers = #tpu.dot_dimension_numbers<[1], [0], [0], [1], [0, 0, 1, 1], [], []>} : vector<256x128xbf16>, vector<128x128xbf16>, vector<256x128xf32> -> vector<256x128xf32>
    %116 = arith.addf %110, %115 : vector<256x128xf32>
    %117 = vector.extract_strided_slice %29 {offsets = [1, 5, 0], sizes = [16, 16, 128], strides = [1, 1, 1]} : vector<22x22x128xbf16> to vector<16x16x128xbf16>
    %118 = vector.shape_cast %117 : vector<16x16x128xbf16> to vector<256x128xbf16>
    %c2_68 = arith.constant 2 : index
    %c0_69 = arith.constant 0 : index
    %c0_70 = arith.constant 0 : index
    %119 = vector.load %arg7[%c2_68, %c0_69, %c0_70] : memref<9x128x128xbf16, #tpu.memory_space<vmem>>, vector<1x128x128xbf16>
    %120 = vector.shape_cast %119 : vector<1x128x128xbf16> to vector<128x128xbf16>
    %cst_71 = arith.constant dense<0.000000e+00> : vector<256x128xf32>
    %121 = tpu.matmul %118, %120, %cst_71 {dimension_numbers = #tpu.dot_dimension_numbers<[1], [0], [0], [1], [0, 0, 1, 1], [], []>} : vector<256x128xbf16>, vector<128x128xbf16>, vector<256x128xf32> -> vector<256x128xf32>
    %122 = arith.addf %116, %121 : vector<256x128xf32>
    %123 = vector.extract_strided_slice %29 {offsets = [3, 1, 0], sizes = [16, 16, 128], strides = [1, 1, 1]} : vector<22x22x128xbf16> to vector<16x16x128xbf16>
    %124 = vector.shape_cast %123 : vector<16x16x128xbf16> to vector<256x128xbf16>
    %c3_72 = arith.constant 3 : index
    %c0_73 = arith.constant 0 : index
    %c0_74 = arith.constant 0 : index
    %125 = vector.load %arg7[%c3_72, %c0_73, %c0_74] : memref<9x128x128xbf16, #tpu.memory_space<vmem>>, vector<1x128x128xbf16>
    %126 = vector.shape_cast %125 : vector<1x128x128xbf16> to vector<128x128xbf16>
    %cst_75 = arith.constant dense<0.000000e+00> : vector<256x128xf32>
    %127 = tpu.matmul %124, %126, %cst_75 {dimension_numbers = #tpu.dot_dimension_numbers<[1], [0], [0], [1], [0, 0, 1, 1], [], []>} : vector<256x128xbf16>, vector<128x128xbf16>, vector<256x128xf32> -> vector<256x128xf32>
    %128 = arith.addf %122, %127 : vector<256x128xf32>
    %129 = vector.extract_strided_slice %29 {offsets = [3, 3, 0], sizes = [16, 16, 128], strides = [1, 1, 1]} : vector<22x22x128xbf16> to vector<16x16x128xbf16>
    %130 = vector.shape_cast %129 : vector<16x16x128xbf16> to vector<256x128xbf16>
    %c4_76 = arith.constant 4 : index
    %c0_77 = arith.constant 0 : index
    %c0_78 = arith.constant 0 : index
    %131 = vector.load %arg7[%c4_76, %c0_77, %c0_78] : memref<9x128x128xbf16, #tpu.memory_space<vmem>>, vector<1x128x128xbf16>
    %132 = vector.shape_cast %131 : vector<1x128x128xbf16> to vector<128x128xbf16>
    %cst_79 = arith.constant dense<0.000000e+00> : vector<256x128xf32>
    %133 = tpu.matmul %130, %132, %cst_79 {dimension_numbers = #tpu.dot_dimension_numbers<[1], [0], [0], [1], [0, 0, 1, 1], [], []>} : vector<256x128xbf16>, vector<128x128xbf16>, vector<256x128xf32> -> vector<256x128xf32>
    %134 = arith.addf %128, %133 : vector<256x128xf32>
    %135 = vector.extract_strided_slice %29 {offsets = [3, 5, 0], sizes = [16, 16, 128], strides = [1, 1, 1]} : vector<22x22x128xbf16> to vector<16x16x128xbf16>
    %136 = vector.shape_cast %135 : vector<16x16x128xbf16> to vector<256x128xbf16>
    %c5_80 = arith.constant 5 : index
    %c0_81 = arith.constant 0 : index
    %c0_82 = arith.constant 0 : index
    %137 = vector.load %arg7[%c5_80, %c0_81, %c0_82] : memref<9x128x128xbf16, #tpu.memory_space<vmem>>, vector<1x128x128xbf16>
    %138 = vector.shape_cast %137 : vector<1x128x128xbf16> to vector<128x128xbf16>
    %cst_83 = arith.constant dense<0.000000e+00> : vector<256x128xf32>
    %139 = tpu.matmul %136, %138, %cst_83 {dimension_numbers = #tpu.dot_dimension_numbers<[1], [0], [0], [1], [0, 0, 1, 1], [], []>} : vector<256x128xbf16>, vector<128x128xbf16>, vector<256x128xf32> -> vector<256x128xf32>
    %140 = arith.addf %134, %139 : vector<256x128xf32>
    %141 = vector.extract_strided_slice %29 {offsets = [5, 1, 0], sizes = [16, 16, 128], strides = [1, 1, 1]} : vector<22x22x128xbf16> to vector<16x16x128xbf16>
    %142 = vector.shape_cast %141 : vector<16x16x128xbf16> to vector<256x128xbf16>
    %c6_84 = arith.constant 6 : index
    %c0_85 = arith.constant 0 : index
    %c0_86 = arith.constant 0 : index
    %143 = vector.load %arg7[%c6_84, %c0_85, %c0_86] : memref<9x128x128xbf16, #tpu.memory_space<vmem>>, vector<1x128x128xbf16>
    %144 = vector.shape_cast %143 : vector<1x128x128xbf16> to vector<128x128xbf16>
    %cst_87 = arith.constant dense<0.000000e+00> : vector<256x128xf32>
    %145 = tpu.matmul %142, %144, %cst_87 {dimension_numbers = #tpu.dot_dimension_numbers<[1], [0], [0], [1], [0, 0, 1, 1], [], []>} : vector<256x128xbf16>, vector<128x128xbf16>, vector<256x128xf32> -> vector<256x128xf32>
    %146 = arith.addf %140, %145 : vector<256x128xf32>
    %147 = vector.extract_strided_slice %29 {offsets = [5, 3, 0], sizes = [16, 16, 128], strides = [1, 1, 1]} : vector<22x22x128xbf16> to vector<16x16x128xbf16>
    %148 = vector.shape_cast %147 : vector<16x16x128xbf16> to vector<256x128xbf16>
    %c7_88 = arith.constant 7 : index
    %c0_89 = arith.constant 0 : index
    %c0_90 = arith.constant 0 : index
    %149 = vector.load %arg7[%c7_88, %c0_89, %c0_90] : memref<9x128x128xbf16, #tpu.memory_space<vmem>>, vector<1x128x128xbf16>
    %150 = vector.shape_cast %149 : vector<1x128x128xbf16> to vector<128x128xbf16>
    %cst_91 = arith.constant dense<0.000000e+00> : vector<256x128xf32>
    %151 = tpu.matmul %148, %150, %cst_91 {dimension_numbers = #tpu.dot_dimension_numbers<[1], [0], [0], [1], [0, 0, 1, 1], [], []>} : vector<256x128xbf16>, vector<128x128xbf16>, vector<256x128xf32> -> vector<256x128xf32>
    %152 = arith.addf %146, %151 : vector<256x128xf32>
    %153 = vector.extract_strided_slice %29 {offsets = [5, 5, 0], sizes = [16, 16, 128], strides = [1, 1, 1]} : vector<22x22x128xbf16> to vector<16x16x128xbf16>
    %154 = vector.shape_cast %153 : vector<16x16x128xbf16> to vector<256x128xbf16>
    %c8_92 = arith.constant 8 : index
    %c0_93 = arith.constant 0 : index
    %c0_94 = arith.constant 0 : index
    %155 = vector.load %arg7[%c8_92, %c0_93, %c0_94] : memref<9x128x128xbf16, #tpu.memory_space<vmem>>, vector<1x128x128xbf16>
    %156 = vector.shape_cast %155 : vector<1x128x128xbf16> to vector<128x128xbf16>
    %cst_95 = arith.constant dense<0.000000e+00> : vector<256x128xf32>
    %157 = tpu.matmul %154, %156, %cst_95 {dimension_numbers = #tpu.dot_dimension_numbers<[1], [0], [0], [1], [0, 0, 1, 1], [], []>} : vector<256x128xbf16>, vector<128x128xbf16>, vector<256x128xf32> -> vector<256x128xf32>
    %158 = arith.addf %152, %157 : vector<256x128xf32>
    %c0_96 = arith.constant 0 : index
    %c0_97 = arith.constant 0 : index
    %159 = vector.load %arg10[%c0_96, %c0_97] : memref<1x128xf32, #tpu.memory_space<vmem>>, vector<1x128xf32>
    %160 = vector.broadcast %159 : vector<1x128xf32> to vector<256x128xf32>
    %161 = arith.addf %158, %160 : vector<256x128xf32>
    %cst_98 = arith.constant 0.000000e+00 : f32
    %162 = vector.broadcast %cst_98 : f32 to vector<256x128xf32>
    %163 = arith.maximumf %161, %162 : vector<256x128xf32>
    %164 = arith.truncf %163 : vector<256x128xf32> to vector<256x128xbf16>
    %c2_99 = arith.constant 2 : index
    %c0_100 = arith.constant 0 : index
    %c0_101 = arith.constant 0 : index
    %165 = vector.load %arg12[%c2_99, %c0_100, %c0_101] : memref<4x128x128xbf16, #tpu.memory_space<vmem>>, vector<1x128x128xbf16>
    %166 = vector.shape_cast %165 : vector<1x128x128xbf16> to vector<128x128xbf16>
    %cst_102 = arith.constant dense<0.000000e+00> : vector<256x128xf32>
    %167 = tpu.matmul %164, %166, %cst_102 {dimension_numbers = #tpu.dot_dimension_numbers<[1], [0], [0], [1], [0, 0, 1, 1], [], []>} : vector<256x128xbf16>, vector<128x128xbf16>, vector<256x128xf32> -> vector<256x128xf32>
    %168 = arith.addf %105, %167 : vector<256x128xf32>
    %169 = vector.extract_strided_slice %29 {offsets = [0, 0, 0], sizes = [16, 16, 128], strides = [1, 1, 1]} : vector<22x22x128xbf16> to vector<16x16x128xbf16>
    %170 = vector.shape_cast %169 : vector<16x16x128xbf16> to vector<256x128xbf16>
    %c0_103 = arith.constant 0 : index
    %c0_104 = arith.constant 0 : index
    %c0_105 = arith.constant 0 : index
    %171 = vector.load %arg8[%c0_103, %c0_104, %c0_105] : memref<9x128x128xbf16, #tpu.memory_space<vmem>>, vector<1x128x128xbf16>
    %172 = vector.shape_cast %171 : vector<1x128x128xbf16> to vector<128x128xbf16>
    %cst_106 = arith.constant dense<0.000000e+00> : vector<256x128xf32>
    %173 = tpu.matmul %170, %172, %cst_106 {dimension_numbers = #tpu.dot_dimension_numbers<[1], [0], [0], [1], [0, 0, 1, 1], [], []>} : vector<256x128xbf16>, vector<128x128xbf16>, vector<256x128xf32> -> vector<256x128xf32>
    %174 = vector.extract_strided_slice %29 {offsets = [0, 3, 0], sizes = [16, 16, 128], strides = [1, 1, 1]} : vector<22x22x128xbf16> to vector<16x16x128xbf16>
    %175 = vector.shape_cast %174 : vector<16x16x128xbf16> to vector<256x128xbf16>
    %c1_107 = arith.constant 1 : index
    %c0_108 = arith.constant 0 : index
    %c0_109 = arith.constant 0 : index
    %176 = vector.load %arg8[%c1_107, %c0_108, %c0_109] : memref<9x128x128xbf16, #tpu.memory_space<vmem>>, vector<1x128x128xbf16>
    %177 = vector.shape_cast %176 : vector<1x128x128xbf16> to vector<128x128xbf16>
    %cst_110 = arith.constant dense<0.000000e+00> : vector<256x128xf32>
    %178 = tpu.matmul %175, %177, %cst_110 {dimension_numbers = #tpu.dot_dimension_numbers<[1], [0], [0], [1], [0, 0, 1, 1], [], []>} : vector<256x128xbf16>, vector<128x128xbf16>, vector<256x128xf32> -> vector<256x128xf32>
    %179 = arith.addf %173, %178 : vector<256x128xf32>
    %180 = vector.extract_strided_slice %29 {offsets = [0, 6, 0], sizes = [16, 16, 128], strides = [1, 1, 1]} : vector<22x22x128xbf16> to vector<16x16x128xbf16>
    %181 = vector.shape_cast %180 : vector<16x16x128xbf16> to vector<256x128xbf16>
    %c2_111 = arith.constant 2 : index
    %c0_112 = arith.constant 0 : index
    %c0_113 = arith.constant 0 : index
    %182 = vector.load %arg8[%c2_111, %c0_112, %c0_113] : memref<9x128x128xbf16, #tpu.memory_space<vmem>>, vector<1x128x128xbf16>
    %183 = vector.shape_cast %182 : vector<1x128x128xbf16> to vector<128x128xbf16>
    %cst_114 = arith.constant dense<0.000000e+00> : vector<256x128xf32>
    %184 = tpu.matmul %181, %183, %cst_114 {dimension_numbers = #tpu.dot_dimension_numbers<[1], [0], [0], [1], [0, 0, 1, 1], [], []>} : vector<256x128xbf16>, vector<128x128xbf16>, vector<256x128xf32> -> vector<256x128xf32>
    %185 = arith.addf %179, %184 : vector<256x128xf32>
    %186 = vector.extract_strided_slice %29 {offsets = [3, 0, 0], sizes = [16, 16, 128], strides = [1, 1, 1]} : vector<22x22x128xbf16> to vector<16x16x128xbf16>
    %187 = vector.shape_cast %186 : vector<16x16x128xbf16> to vector<256x128xbf16>
    %c3_115 = arith.constant 3 : index
    %c0_116 = arith.constant 0 : index
    %c0_117 = arith.constant 0 : index
    %188 = vector.load %arg8[%c3_115, %c0_116, %c0_117] : memref<9x128x128xbf16, #tpu.memory_space<vmem>>, vector<1x128x128xbf16>
    %189 = vector.shape_cast %188 : vector<1x128x128xbf16> to vector<128x128xbf16>
    %cst_118 = arith.constant dense<0.000000e+00> : vector<256x128xf32>
    %190 = tpu.matmul %187, %189, %cst_118 {dimension_numbers = #tpu.dot_dimension_numbers<[1], [0], [0], [1], [0, 0, 1, 1], [], []>} : vector<256x128xbf16>, vector<128x128xbf16>, vector<256x128xf32> -> vector<256x128xf32>
    %191 = arith.addf %185, %190 : vector<256x128xf32>
    %192 = vector.extract_strided_slice %29 {offsets = [3, 3, 0], sizes = [16, 16, 128], strides = [1, 1, 1]} : vector<22x22x128xbf16> to vector<16x16x128xbf16>
    %193 = vector.shape_cast %192 : vector<16x16x128xbf16> to vector<256x128xbf16>
    %c4_119 = arith.constant 4 : index
    %c0_120 = arith.constant 0 : index
    %c0_121 = arith.constant 0 : index
    %194 = vector.load %arg8[%c4_119, %c0_120, %c0_121] : memref<9x128x128xbf16, #tpu.memory_space<vmem>>, vector<1x128x128xbf16>
    %195 = vector.shape_cast %194 : vector<1x128x128xbf16> to vector<128x128xbf16>
    %cst_122 = arith.constant dense<0.000000e+00> : vector<256x128xf32>
    %196 = tpu.matmul %193, %195, %cst_122 {dimension_numbers = #tpu.dot_dimension_numbers<[1], [0], [0], [1], [0, 0, 1, 1], [], []>} : vector<256x128xbf16>, vector<128x128xbf16>, vector<256x128xf32> -> vector<256x128xf32>
    %197 = arith.addf %191, %196 : vector<256x128xf32>
    %198 = vector.extract_strided_slice %29 {offsets = [3, 6, 0], sizes = [16, 16, 128], strides = [1, 1, 1]} : vector<22x22x128xbf16> to vector<16x16x128xbf16>
    %199 = vector.shape_cast %198 : vector<16x16x128xbf16> to vector<256x128xbf16>
    %c5_123 = arith.constant 5 : index
    %c0_124 = arith.constant 0 : index
    %c0_125 = arith.constant 0 : index
    %200 = vector.load %arg8[%c5_123, %c0_124, %c0_125] : memref<9x128x128xbf16, #tpu.memory_space<vmem>>, vector<1x128x128xbf16>
    %201 = vector.shape_cast %200 : vector<1x128x128xbf16> to vector<128x128xbf16>
    %cst_126 = arith.constant dense<0.000000e+00> : vector<256x128xf32>
    %202 = tpu.matmul %199, %201, %cst_126 {dimension_numbers = #tpu.dot_dimension_numbers<[1], [0], [0], [1], [0, 0, 1, 1], [], []>} : vector<256x128xbf16>, vector<128x128xbf16>, vector<256x128xf32> -> vector<256x128xf32>
    %203 = arith.addf %197, %202 : vector<256x128xf32>
    %204 = vector.extract_strided_slice %29 {offsets = [6, 0, 0], sizes = [16, 16, 128], strides = [1, 1, 1]} : vector<22x22x128xbf16> to vector<16x16x128xbf16>
    %205 = vector.shape_cast %204 : vector<16x16x128xbf16> to vector<256x128xbf16>
    %c6_127 = arith.constant 6 : index
    %c0_128 = arith.constant 0 : index
    %c0_129 = arith.constant 0 : index
    %206 = vector.load %arg8[%c6_127, %c0_128, %c0_129] : memref<9x128x128xbf16, #tpu.memory_space<vmem>>, vector<1x128x128xbf16>
    %207 = vector.shape_cast %206 : vector<1x128x128xbf16> to vector<128x128xbf16>
    %cst_130 = arith.constant dense<0.000000e+00> : vector<256x128xf32>
    %208 = tpu.matmul %205, %207, %cst_130 {dimension_numbers = #tpu.dot_dimension_numbers<[1], [0], [0], [1], [0, 0, 1, 1], [], []>} : vector<256x128xbf16>, vector<128x128xbf16>, vector<256x128xf32> -> vector<256x128xf32>
    %209 = arith.addf %203, %208 : vector<256x128xf32>
    %210 = vector.extract_strided_slice %29 {offsets = [6, 3, 0], sizes = [16, 16, 128], strides = [1, 1, 1]} : vector<22x22x128xbf16> to vector<16x16x128xbf16>
    %211 = vector.shape_cast %210 : vector<16x16x128xbf16> to vector<256x128xbf16>
    %c7_131 = arith.constant 7 : index
    %c0_132 = arith.constant 0 : index
    %c0_133 = arith.constant 0 : index
    %212 = vector.load %arg8[%c7_131, %c0_132, %c0_133] : memref<9x128x128xbf16, #tpu.memory_space<vmem>>, vector<1x128x128xbf16>
    %213 = vector.shape_cast %212 : vector<1x128x128xbf16> to vector<128x128xbf16>
    %cst_134 = arith.constant dense<0.000000e+00> : vector<256x128xf32>
    %214 = tpu.matmul %211, %213, %cst_134 {dimension_numbers = #tpu.dot_dimension_numbers<[1], [0], [0], [1], [0, 0, 1, 1], [], []>} : vector<256x128xbf16>, vector<128x128xbf16>, vector<256x128xf32> -> vector<256x128xf32>
    %215 = arith.addf %209, %214 : vector<256x128xf32>
    %216 = vector.extract_strided_slice %29 {offsets = [6, 6, 0], sizes = [16, 16, 128], strides = [1, 1, 1]} : vector<22x22x128xbf16> to vector<16x16x128xbf16>
    %217 = vector.shape_cast %216 : vector<16x16x128xbf16> to vector<256x128xbf16>
    %c8_135 = arith.constant 8 : index
    %c0_136 = arith.constant 0 : index
    %c0_137 = arith.constant 0 : index
    %218 = vector.load %arg8[%c8_135, %c0_136, %c0_137] : memref<9x128x128xbf16, #tpu.memory_space<vmem>>, vector<1x128x128xbf16>
    %219 = vector.shape_cast %218 : vector<1x128x128xbf16> to vector<128x128xbf16>
    %cst_138 = arith.constant dense<0.000000e+00> : vector<256x128xf32>
    %220 = tpu.matmul %217, %219, %cst_138 {dimension_numbers = #tpu.dot_dimension_numbers<[1], [0], [0], [1], [0, 0, 1, 1], [], []>} : vector<256x128xbf16>, vector<128x128xbf16>, vector<256x128xf32> -> vector<256x128xf32>
    %221 = arith.addf %215, %220 : vector<256x128xf32>
    %c0_139 = arith.constant 0 : index
    %c0_140 = arith.constant 0 : index
    %222 = vector.load %arg11[%c0_139, %c0_140] : memref<1x128xf32, #tpu.memory_space<vmem>>, vector<1x128xf32>
    %223 = vector.broadcast %222 : vector<1x128xf32> to vector<256x128xf32>
    %224 = arith.addf %221, %223 : vector<256x128xf32>
    %cst_141 = arith.constant 0.000000e+00 : f32
    %225 = vector.broadcast %cst_141 : f32 to vector<256x128xf32>
    %226 = arith.maximumf %224, %225 : vector<256x128xf32>
    %227 = arith.truncf %226 : vector<256x128xf32> to vector<256x128xbf16>
    %c3_142 = arith.constant 3 : index
    %c0_143 = arith.constant 0 : index
    %c0_144 = arith.constant 0 : index
    %228 = vector.load %arg12[%c3_142, %c0_143, %c0_144] : memref<4x128x128xbf16, #tpu.memory_space<vmem>>, vector<1x128x128xbf16>
    %229 = vector.shape_cast %228 : vector<1x128x128xbf16> to vector<128x128xbf16>
    %cst_145 = arith.constant dense<0.000000e+00> : vector<256x128xf32>
    %230 = tpu.matmul %227, %229, %cst_145 {dimension_numbers = #tpu.dot_dimension_numbers<[1], [0], [0], [1], [0, 0, 1, 1], [], []>} : vector<256x128xbf16>, vector<128x128xbf16>, vector<256x128xf32> -> vector<256x128xf32>
    %231 = arith.addf %168, %230 : vector<256x128xf32>
    %c0_146 = arith.constant 0 : index
    %c0_147 = arith.constant 0 : index
    %c0_148 = arith.constant 0 : index
    %232 = vector.load %arg2[%c0_146, %c0_147, %c0_148] : memref<1x1x128xf32, #tpu.memory_space<vmem>>, vector<1x1x128xf32>
    %233 = vector.shape_cast %232 : vector<1x1x128xf32> to vector<1x128xf32>
    %234 = vector.broadcast %233 : vector<1x128xf32> to vector<256x128xf32>
    %235 = arith.addf %231, %234 : vector<256x128xf32>
    %c0_149 = arith.constant 0 : index
    %c0_150 = arith.constant 0 : index
    %236 = vector.load %arg13[%c0_149, %c0_150] : memref<1x128xf32, #tpu.memory_space<vmem>>, vector<1x128xf32>
    %237 = vector.broadcast %236 : vector<1x128xf32> to vector<256x128xf32>
    %238 = arith.addf %235, %237 : vector<256x128xf32>
    %cst_151 = arith.constant 0.000000e+00 : f32
    %239 = vector.broadcast %cst_151 : f32 to vector<256x128xf32>
    %240 = arith.maximumf %238, %239 : vector<256x128xf32>
    %241 = vector.shape_cast %240 : vector<256x128xf32> to vector<1x16x16x128xf32>
    %242 = arith.truncf %241 : vector<1x16x16x128xf32> to vector<1x16x16x128xbf16>
    %c0_152 = arith.constant 0 : index
    %c0_153 = arith.constant 0 : index
    %c0_154 = arith.constant 0 : index
    %c0_155 = arith.constant 0 : index
    %243 = vector.load %arg14[%c0_152, %c0_153, %c0_154, %c0_155] : memref<1x16x16x128xbf16, #tpu.memory_space<vmem>>, vector<1x16x16x128xbf16>
    tpu.vector_store %arg14[%c0_152, %c0_153, %c0_154, %c0_155], %242 {strides = array<i32>} : memref<1x16x16x128xbf16, #tpu.memory_space<vmem>>, vector<1x16x16x128xbf16>,
    return
  }
  func.func @transform_0(%arg0: i32, %arg1: i32) -> (i32, i32, i32) {
    %c0_i32 = arith.constant 0 : i32
    %c0_i32_0 = arith.constant 0 : i32
    %c0_i32_1 = arith.constant 0 : i32
    return %arg0, %c0_i32, %c0_i32_0 : i32, i32, i32
  }
  func.func @transform_2(%arg0: i32, %arg1: i32) -> (i32, i32) {
    %c0_i32 = arith.constant 0 : i32
    %c0_i32_0 = arith.constant 0 : i32
    %c0_i32_1 = arith.constant 0 : i32
    return %c0_i32, %c0_i32_0 : i32, i32
  }
  func.func @transform_3(%arg0: i32, %arg1: i32) -> (i32, i32) {
    %c0_i32 = arith.constant 0 : i32
    %c0_i32_0 = arith.constant 0 : i32
    %c0_i32_1 = arith.constant 0 : i32
    return %c0_i32, %c0_i32_0 : i32, i32
  }
  func.func @transform_4(%arg0: i32, %arg1: i32) -> (i32, i32, i32) {
    %c0_i32 = arith.constant 0 : i32
    %c0_i32_0 = arith.constant 0 : i32
    %c0_i32_1 = arith.constant 0 : i32
    %c0_i32_2 = arith.constant 0 : i32
    return %c0_i32, %c0_i32_0, %c0_i32_1 : i32, i32, i32
  }
  func.func @transform_5(%arg0: i32, %arg1: i32) -> (i32, i32, i32) {
    %c0_i32 = arith.constant 0 : i32
    %c0_i32_0 = arith.constant 0 : i32
    %c0_i32_1 = arith.constant 0 : i32
    %c0_i32_2 = arith.constant 0 : i32
    return %c0_i32, %c0_i32_0, %c0_i32_1 : i32, i32, i32
  }
  func.func @transform_6(%arg0: i32, %arg1: i32) -> (i32, i32, i32) {
    %c0_i32 = arith.constant 0 : i32
    %c0_i32_0 = arith.constant 0 : i32
    %c0_i32_1 = arith.constant 0 : i32
    %c0_i32_2 = arith.constant 0 : i32
    return %c0_i32, %c0_i32_0, %c0_i32_1 : i32, i32, i32
  }
  func.func @transform_7(%arg0: i32, %arg1: i32) -> (i32, i32) {
    %c0_i32 = arith.constant 0 : i32
    %c0_i32_0 = arith.constant 0 : i32
    %c0_i32_1 = arith.constant 0 : i32
    return %c0_i32, %c0_i32_0 : i32, i32
  }
  func.func @transform_8(%arg0: i32, %arg1: i32) -> (i32, i32) {
    %c0_i32 = arith.constant 0 : i32
    %c0_i32_0 = arith.constant 0 : i32
    %c0_i32_1 = arith.constant 0 : i32
    return %c0_i32, %c0_i32_0 : i32, i32
  }
  func.func @transform_9(%arg0: i32, %arg1: i32) -> (i32, i32) {
    %c0_i32 = arith.constant 0 : i32
    %c0_i32_0 = arith.constant 0 : i32
    %c0_i32_1 = arith.constant 0 : i32
    return %c0_i32, %c0_i32_0 : i32, i32
  }
  func.func @transform_10(%arg0: i32, %arg1: i32) -> (i32, i32, i32) {
    %c0_i32 = arith.constant 0 : i32
    %c0_i32_0 = arith.constant 0 : i32
    %c0_i32_1 = arith.constant 0 : i32
    %c0_i32_2 = arith.constant 0 : i32
    return %c0_i32, %c0_i32_0, %c0_i32_1 : i32, i32, i32
  }
  func.func @transform_11(%arg0: i32, %arg1: i32) -> (i32, i32) {
    %c0_i32 = arith.constant 0 : i32
    %c0_i32_0 = arith.constant 0 : i32
    %c0_i32_1 = arith.constant 0 : i32
    return %c0_i32, %c0_i32_0 : i32, i32
  }
  func.func @transform_12(%arg0: i32, %arg1: i32) -> (i32, i32, i32, i32) {
    %c0_i32 = arith.constant 0 : i32
    %c0_i32_0 = arith.constant 0 : i32
    %c0_i32_1 = arith.constant 0 : i32
    return %arg0, %arg1, %c0_i32, %c0_i32_0 : i32, i32, i32, i32
  }
}

</mosaic_0001>

<bundles_post_ra>
// kernel: aspp_forward.2
= control target key start
LH: loop header
LB: loop body
LE: loop exit
PB: predicated region body
PF: predicated region fallthrough
CT: control target
= control target key end

     0   :  { %v713_v0 = vmov 0.0   ;;  %vm714_vm0 = vmmov 0   ;;  %vm228_vm1 = vcmask 1041409   ;;  %s909_s1 = inlined_call_operand.vmem [shape: bf16[128,128], index: 1, kind: input, shape index: {}]   ;;  %s910_s0 = inlined_call_operand.vmem [shape: bf16[2,16,16,128], index: 0, kind: input, shape index: {}]   ;;  %s911_s3 = inlined_call_operand.vmem [shape: bf16[128,128], index: 3, kind: input, shape index: {}]   ;;  %s912_s2 = inlined_call_operand.vmem [shape: f32[1,128], index: 2, kind: input, shape index: {}]   ;;  %s913_s4 = inlined_call_operand.vmem [shape: f32[2,128], index: 4, kind: output, shape index: {}]  }
   0x1   :  { %655 = vmatprep.subr.bf16.mxu0 %v713_v0  ;;  %22 = vst [vmem:[#allocation2] sm:$0x3] %v713_v0  ;;  %v697_v1 = vld [vmem:[%s909_s1] sm:$0xff]   ;;  %671 = vmatprep.mubr.msk.bf16.mxu0 %vm714_vm0, %v713_v0  ;;  %v698_v2 = vld [vmem:[%s909_s1 + $0x8] sm:$0xff]   ;;  %v699_v3 = vld [vmem:[%s909_s1 + $0x10] sm:$0xff]  }
   0x2   :  { %675 = vmatprep.subr.bf16.mxu1 %v713_v0  ;;  %691 = vmatprep.mubr.msk.bf16.mxu1 %vm714_vm0, %v713_v0  ;;  %v700_v4 = vld [vmem:[%s909_s1 + $0x18] sm:$0xff]   ;;  %v701_v5 = vld [vmem:[%s909_s1 + $0x20] sm:$0xff]   ;;  %v702_v6 = vld [vmem:[%s909_s1 + $0x28] sm:$0xff]  }
   0x3   :  { %656 = vmatpush3.bf16.msra.mxu0 %v697_v1  ;;  %v479_v7 = vld [vmem:[%s910_s0] sm:$0xff]   ;;  %v606_v8 = vld [vmem:[%s910_s0 + $0x8] sm:$0xff]   ;;  %v703_v17 = vld [vmem:[%s909_s1 + $0x30] sm:$0xff]  }
   0x4   :  { %657 = vmatprep.subr.bf16.mxu0 %v713_v0  ;;  %v621_v9 = vld [vmem:[%s910_s0 + $0x80] sm:$0xff]   ;;  %v622_v11 = vld [vmem:[%s910_s0 + $0x88] sm:$0xff]   ;;  %v480_v12 = vunpack.c.l.bf16 %v479_v7  ;;  %v481_v13 = vunpack.c.h.bf16 %v479_v7  ;;  %v484_v18 = vunpack.c.l.bf16 %v606_v8  ;;  %v607_v19 = vld [vmem:[%s910_s0 + $0x10] sm:$0xff]   ;;  %v485_v22 = vunpack.c.h.bf16 %v606_v8 }
   0x5   :  { %v705_v10 = vld [vmem:[%s911_s3] sm:$0xff]   ;;  %v544_v14 = vunpack.c.l.bf16 %v621_v9  ;;  %v545_v15 = vunpack.c.h.bf16 %v621_v9  ;;  %v706_v16 = vld [vmem:[%s911_s3 + $0x8] sm:$0xff]   ;;  %v548_v20 = vunpack.c.l.bf16 %v622_v11  ;;  %v623_v21 = vld [vmem:[%s910_s0 + $0x90] sm:$0xff]   ;;  %v549_v23 = vunpack.c.h.bf16 %v622_v11 }
   0x6   :  { %676 = vmatpush3.bf16.msra.mxu1 %v705_v10  ;;  %v152_v24 = vadd.f32 %v481_v13, %v480_v12  ;;  %v707_v26 = vld [vmem:[%s911_s3 + $0x10] sm:$0xff]   ;;  %v704_v27 = vld [vmem:[%s909_s1 + $0x38] sm:$0xff]   ;;  %v488_v28 = vunpack.c.l.bf16 %v607_v19  ;;  %v552_v29 = vunpack.c.l.bf16 %v623_v21  ;;  %v489_v34 = vunpack.c.h.bf16 %v607_v19  ;;  %v609_v43 = vld [vmem:[%s910_s0 + $0x20] sm:$0xff]  }
   0x7   :  { %658 = vmatpush3.bf16.msra.mxu0 %v698_v2  ;;  %677 = vmatprep.subr.bf16.mxu1 %v713_v0  ;;  %v189_v25 = vadd.f32 %v545_v15, %v544_v14  ;;  %v608_v32 = vld [vmem:[%s910_s0 + $0x18] sm:$0xff]   ;;  %v553_v35 = vunpack.c.h.bf16 %v623_v21  ;;  %v625_v44 = vld [vmem:[%s910_s0 + $0xa0] sm:$0xff]   ;;  %v496_v50 = vunpack.c.l.bf16 %v609_v43  ;;  %v610_v54 = vld [vmem:[%s910_s0 + $0x28] sm:$0xff]   ;;  %v497_v56 = vunpack.c.h.bf16 %v609_v43 }
   0x8   :  { %659 = vmatprep.subr.bf16.mxu0 %v713_v0  ;;  %v153_v30 = vadd.f32 %v484_v18, %v152_v24  ;;  %v624_v33 = vld [vmem:[%s910_s0 + $0x98] sm:$0xff]   ;;  %v492_v39 = vunpack.c.l.bf16 %v608_v32  ;;  %v493_v45 = vunpack.c.h.bf16 %v608_v32  ;;  %v709_v49 = vld [vmem:[%s911_s3 + $0x20] sm:$0xff]   ;;  %v560_v51 = vunpack.c.l.bf16 %v625_v44  ;;  %v626_v55 = vld [vmem:[%s910_s0 + $0xa8] sm:$0xff]  }
   0x9   :  { %v190_v31 = vadd.f32 %v548_v20, %v189_v25  ;;  %v708_v38 = vld [vmem:[%s911_s3 + $0x18] sm:$0xff]   ;;  %v556_v40 = vunpack.c.l.bf16 %v624_v33  ;;  %v557_v46 = vunpack.c.h.bf16 %v624_v33  ;;  %v561_v57 = vunpack.c.h.bf16 %v625_v44  ;;  %v710_v60 = vld [vmem:[%s911_s3 + $0x28] sm:$0xff]   ;;  %v611_v2 = vld [vmem:[%s910_s0 + $0x30] sm:$0xff]  }
   0xa   :  { %678 = vmatpush3.bf16.msra.mxu1 %v706_v16  ;;  %v154_v36 = vadd.f32 %v485_v22, %v153_v30  ;;  %v500_v61 = vunpack.c.l.bf16 %v610_v54  ;;  %v564_v62 = vunpack.c.l.bf16 %v626_v55  ;;  %v504_v8 = vunpack.c.l.bf16 %v611_v2  ;;  %v612_v12 = vld [vmem:[%s910_s0 + $0x38] sm:$0xff]   ;;  %v613_v22 = vld [vmem:[%s910_s0 + $0x40] sm:$0xff]   ;;  %v614_v32 = vld [vmem:[%s910_s0 + $0x48] sm:$0xff]  }
   0xb   :  { %660 = vmatpush3.bf16.msra.mxu0 %v699_v3  ;;  %679 = vmatprep.subr.bf16.mxu1 %v713_v0  ;;  %v191_v37 = vadd.f32 %v549_v23, %v190_v31  ;;  %v627_v3 = vld [vmem:[%s910_s0 + $0xb0] sm:$0xff]   ;;  %v628_v13 = vld [vmem:[%s910_s0 + $0xb8] sm:$0xff]   ;;  %v505_v14 = vunpack.c.h.bf16 %v611_v2  ;;  %v508_v18 = vunpack.c.l.bf16 %v612_v12  ;;  %v629_v23 = vld [vmem:[%s910_s0 + $0xc0] sm:$0xff]   ;;  %v509_v24 = vunpack.c.h.bf16 %v612_v12 }
   0xc   :  { %661 = vmatprep.subr.bf16.mxu0 %v713_v0  ;;  %v155_v41 = vadd.f32 %v488_v28, %v154_v36  ;;  %v568_v9 = vunpack.c.l.bf16 %v627_v3  ;;  %v569_v15 = vunpack.c.h.bf16 %v627_v3  ;;  %v572_v19 = vunpack.c.l.bf16 %v628_v13  ;;  %v630_v33 = vld [vmem:[%s910_s0 + $0xc8] sm:$0xff]   ;;  %v631_v43 = vld [vmem:[%s910_s0 + $0xd0] sm:$0xff]  }
   0xd   :  { %v192_v42 = vadd.f32 %v552_v29, %v191_v37  ;;  %v573_v25 = vunpack.c.h.bf16 %v628_v13  ;;  %v512_v28 = vunpack.c.l.bf16 %v613_v22  ;;  %v576_v29 = vunpack.c.l.bf16 %v629_v23 }
   0xe   :  { %680 = vmatpush3.bf16.msra.mxu1 %v707_v26  ;;  %v156_v47 = vadd.f32 %v489_v34, %v155_v41  ;;  %v513_v34 = vunpack.c.h.bf16 %v613_v22  ;;  %v517_v44 = vunpack.c.h.bf16 %v614_v32 }
   0xf   :  { %662 = vmatpush3.bf16.msra.mxu0 %v700_v4  ;;  %681 = vmatprep.subr.bf16.mxu1 %v713_v0  ;;  %v193_v48 = vadd.f32 %v553_v35, %v192_v42  ;;  %v501_v4 = vunpack.c.h.bf16 %v610_v54  ;;  %v577_v35 = vunpack.c.h.bf16 %v629_v23  ;;  %v615_v42 = vld [vmem:[%s910_s0 + $0x50] sm:$0xff]  }
  0x10   :  { %663 = vmatprep.subr.bf16.mxu0 %v713_v0  ;;  %v157_v52 = vadd.f32 %v492_v39, %v156_v47  ;;  %v580_v39 = vunpack.c.l.bf16 %v630_v33  ;;  %v521_v54 = vunpack.c.h.bf16 %v615_v42 }
  0x11   :  { %v194_v53 = vadd.f32 %v556_v40, %v193_v48  ;;  %v520_v48 = vunpack.c.l.bf16 %v615_v42 }
  0x12   :  { %682 = vmatpush3.bf16.msra.mxu1 %v708_v38  ;;  %v158_v58 = vadd.f32 %v493_v45, %v157_v52  ;;  %v516_v38 = vunpack.c.l.bf16 %v614_v32  ;;  %v581_v45 = vunpack.c.h.bf16 %v630_v33  ;;  %v616_v52 = vld [vmem:[%s910_s0 + $0x58] sm:$0xff]  }
  0x13   :  { %664 = vmatpush3.bf16.msra.mxu0 %v701_v5  ;;  %683 = vmatprep.subr.bf16.mxu1 %v713_v0  ;;  %v195_v59 = vadd.f32 %v557_v46, %v194_v53  ;;  %v565_v5 = vunpack.c.h.bf16 %v626_v55  ;;  %v632_v53 = vld [vmem:[%s910_s0 + $0xd8] sm:$0xff]   ;;  %v585_v55 = vunpack.c.h.bf16 %v631_v43 }
  0x14   :  { %665 = vmatprep.subr.bf16.mxu0 %v713_v0  ;;  %v159_v63 = vadd.f32 %v496_v50, %v158_v58  ;;  %v524_v58 = vunpack.c.l.bf16 %v616_v52  ;;  %v589_v2 = vunpack.c.h.bf16 %v632_v53 }
  0x15   :  { %v196_v1 = vadd.f32 %v560_v51, %v195_v59  ;;  %v588_v59 = vunpack.c.l.bf16 %v632_v53 }
  0x16   :  { %684 = vmatpush3.bf16.msra.mxu1 %v709_v49  ;;  %v584_v49 = vunpack.c.l.bf16 %v631_v43 }
  0x17   :  { %666 = vmatpush3.bf16.msra.mxu0 %v702_v6  ;;  %685 = vmatprep.subr.bf16.mxu1 %v713_v0  ;;  %v160_v6 = vadd.f32 %v497_v56, %v159_v63  ;;  %v197_v7 = vadd.f32 %v561_v57, %v196_v1  ;;  %v633_v63 = vld [vmem:[%s910_s0 + $0xe0] sm:$0xff]   ;;  %v525_v1 = vunpack.c.h.bf16 %v616_v52 }
  0x18   :  { %667 = vmatprep.subr.bf16.mxu0 %v713_v0  ;;  %v593_v12 = vunpack.c.h.bf16 %v633_v63 }
  0x19   :  { %v161_v10 = vadd.f32 %v500_v61, %v160_v6  ;;  %v198_v11 = vadd.f32 %v564_v62, %v197_v7  ;;  %v617_v62 = vld [vmem:[%s910_s0 + $0x60] sm:$0xff]   ;;  %v592_v6 = vunpack.c.l.bf16 %v633_v63 }
  0x1a   :  { %686 = vmatpush3.bf16.msra.mxu1 %v710_v60 }
  0x1b   :  { %668 = vmatpush3.bf16.msra.mxu0 %v703_v17  ;;  %687 = vmatprep.subr.bf16.mxu1 %v713_v0  ;;  %v162_v16 = vadd.f32 %v501_v4, %v161_v10  ;;  %v199_v17 = vadd.f32 %v565_v5, %v198_v11  ;;  %v528_v5 = vunpack.c.l.bf16 %v617_v62  ;;  %v634_v10 = vld [vmem:[%s910_s0 + $0xe8] sm:$0xff]   ;;  %v529_v11 = vunpack.c.h.bf16 %v617_v62 }
  0x1c   :  { %669 = vmatprep.subr.bf16.mxu0 %v713_v0  ;;  %v597_v22 = vunpack.c.h.bf16 %v634_v10 }
  0x1d   :  { %v163_v20 = vadd.f32 %v504_v8, %v162_v16  ;;  %v200_v21 = vadd.f32 %v568_v9, %v199_v17  ;;  %v618_v9 = vld [vmem:[%s910_s0 + $0x68] sm:$0xff]   ;;  %v596_v16 = vunpack.c.l.bf16 %v634_v10 }
  0x1f   :  { %670 = vmatpush3.bf16.msra.mxu0 %v704_v27  ;;  %v164_v26 = vadd.f32 %v505_v14, %v163_v20  ;;  %v201_v27 = vadd.f32 %v569_v15, %v200_v21  ;;  %v532_v15 = vunpack.c.l.bf16 %v618_v9  ;;  %v635_v20 = vld [vmem:[%s910_s0 + $0xf0] sm:$0xff]   ;;  %v533_v21 = vunpack.c.h.bf16 %v618_v9 }
  0x20   :  { %v601_v32 = vunpack.c.h.bf16 %v635_v20 }
  0x21   :  { %v165_v30 = vadd.f32 %v508_v18, %v164_v26  ;;  %v202_v31 = vadd.f32 %v572_v19, %v201_v27  ;;  %v619_v19 = vld [vmem:[%s910_s0 + $0x70] sm:$0xff]   ;;  %v600_v26 = vunpack.c.l.bf16 %v635_v20 }
  0x23   :  { %v166_v36 = vadd.f32 %v509_v24, %v165_v30  ;;  %v203_v37 = vadd.f32 %v573_v25, %v202_v31  ;;  %v536_v25 = vunpack.c.l.bf16 %v619_v19  ;;  %v636_v30 = vld [vmem:[%s910_s0 + $0xf8] sm:$0xff]   ;;  %v537_v31 = vunpack.c.h.bf16 %v619_v19 }
  0x25   :  { %v167_v40 = vadd.f32 %v512_v28, %v166_v36  ;;  %v204_v41 = vadd.f32 %v576_v29, %v203_v37  ;;  %v620_v29 = vld [vmem:[%s910_s0 + $0x78] sm:$0xff]   ;;  %v604_v36 = vunpack.c.l.bf16 %v636_v30 }
  0x27   :  { %v168_v46 = vadd.f32 %v513_v34, %v167_v40  ;;  %v205_v47 = vadd.f32 %v577_v35, %v204_v41  ;;  %v540_v35 = vunpack.c.l.bf16 %v620_v29  ;;  %v605_v40 = vunpack.c.h.bf16 %v636_v30 }
  0x29   :  { %v169_v50 = vadd.f32 %v516_v38, %v168_v46  ;;  %v206_v51 = vadd.f32 %v580_v39, %v205_v47  ;;  %v541_v39 = vunpack.c.h.bf16 %v620_v29 }
  0x2b   :  { %v170_v56 = vadd.f32 %v517_v44, %v169_v50  ;;  %v207_v57 = vadd.f32 %v581_v45, %v206_v51 }
  0x2d   :  { %v171_v60 = vadd.f32 %v520_v48, %v170_v56  ;;  %v208_v61 = vadd.f32 %v584_v49, %v207_v57  ;;  %v23_v57 = vld [vmem:[#allocation2] sm:$0x3] }
  0x2f   :  { %v172_v3 = vadd.f32 %v521_v54, %v171_v60  ;;  %v209_v4 = vadd.f32 %v585_v55, %v208_v61 }
  0x31   :  { %v173_v7 = vadd.f32 %v524_v58, %v172_v3  ;;  %v210_v8 = vadd.f32 %v588_v59, %v209_v4  ;;  %v712_v3 = vld [vmem:[%s911_s3 + $0x38] sm:$0xff]   ;;  %v461_v4 = vld [vmem:[%s912_s2] ss:$0 sm:$0xff] }
  0x33   :  { %v174_v13 = vadd.f32 %v525_v1, %v173_v7  ;;  %v211_v14 = vadd.f32 %v589_v2, %v210_v8  ;;  %v711_v2 = vld [vmem:[%s911_s3 + $0x30] sm:$0xff]  }
  0x34   :  { %688 = vmatpush3.bf16.msra.mxu1 %v711_v2 }
  0x35   :  { %v175_v17 = vadd.f32 %v528_v5, %v174_v13  ;;  %v212_v18 = vadd.f32 %v592_v6, %v211_v14  ;;  %689 = vmatprep.subr.bf16.mxu1 %v713_v0 }
  0x37   :  { %v176_v23 = vadd.f32 %v529_v11, %v175_v17  ;;  %v213_v24 = vadd.f32 %v593_v12, %v212_v18 }
  0x38   :  { %690 = vmatpush3.bf16.msra.mxu1 %v712_v3 }
  0x39   :  { %v177_v27 = vadd.f32 %v532_v15, %v176_v23  ;;  %v214_v28 = vadd.f32 %v596_v16, %v213_v24 }
  0x3b   :  { %v178_v33 = vadd.f32 %v533_v21, %v177_v27  ;;  %v215_v34 = vadd.f32 %v597_v22, %v214_v28 }
  0x3d   :  { %v179_v37 = vadd.f32 %v536_v25, %v178_v33  ;;  %v216_v38 = vadd.f32 %v600_v26, %v215_v34 }
  0x3f   :  { %v180_v41 = vadd.f32 %v537_v31, %v179_v37  ;;  %v217_v42 = vadd.f32 %v601_v32, %v216_v38 }
  0x41   :  { %v181_v43 = vadd.f32 %v540_v35, %v180_v41  ;;  %v218_v44 = vadd.f32 %v604_v36, %v217_v42 }
  0x43   :  { %v182_v45 = vadd.f32 %v541_v39, %v181_v43  ;;  %v219_v46 = vadd.f32 %v605_v40, %v218_v44 }
  0x45   :  { %v183_v47 = vrot.slane %v182_v45, 4  ;;  %v220_v48 = vrot.slane %v219_v46, 4 }
  0x47   :  { %v184_v49 = vadd.f32 %v183_v47, %v182_v45  ;;  %v221_v50 = vadd.f32 %v220_v48, %v219_v46 }
  0x49   :  { %v185_v51 = vrot.slane %v184_v49, 2  ;;  %v222_v52 = vrot.slane %v221_v50, 2 }
  0x4b   :  { %v186_v53 = vadd.f32 %v185_v51, %v184_v49  ;;  %v223_v54 = vadd.f32 %v222_v52, %v221_v50 }
  0x4d   :  { %v187_v55 = vrot.slane %v186_v53, 1  ;;  %v224_v56 = vrot.slane %v223_v54, 1 }
  0x4f   :  { %v188_v58 = vadd.f32 %v187_v55, %v186_v53  ;;  %v225_v59 = vadd.f32 %v224_v56, %v223_v54 }
  0x51   :  { %v229_v60 = vsel %vm228_vm1, %v225_v59, %v188_v58 }
  0x52   :  { %v231_v61 = vadd.f32 %v229_v60, %v23_v57 }
  0x54   :  { %232 = vst [vmem:[#allocation2] sm:$0x3] %v231_v61 }
  0x5b   :  { %v236_v62 = vld [vmem:[#allocation2] sm:$0x3] }
  0x5c   :  { %v237_v63 = vmul.f32 0.00390625, %v236_v62 }
  0x5e   :  { %v238_v1 = vpack.c.bf16 %v237_v63, %v237_v63 }
  0x60   :  { %672 = vmatmul.mubr.bf16.vlgmr.msra.gmra.mrb[0].mxu0 %v238_v1 }
 0x133   :  { %v344_v5 = vpop.f32.mrb[0].mxu0 }
 0x134   :  { %v345_v6 = vadd.f32 %v461_v4, %v344_v5  ;;  %v673_v7 = vpop.f32.mrb[1].mxu0 }
 0x135   :  { %v347_v8 = vpop.f32.mrb[2].mxu0 }
 0x136   :  { %v350_v9 = vmax.f32 %v345_v6, 0.0  ;;  %v674_v10 = vpop.f32.mrb[3].mxu0 }
 0x138   :  { %v351_v11 = vpack.c.bf16 %v350_v9, %v350_v9 }
 0x13a   :  { %692 = vmatmul.mubr.bf16.vlgmr.msra.gmra.mrb[0].mxu1 %v351_v11 }
 0x20d   :  { %v450_v12 = vpop.f32.mrb[0].mxu1 }
 0x20e   :  { %456 = vst [vmem:[%s913_s4] sm:$0x3] %v450_v12  ;;  %v693_v0 = vpop.f32.mrb[1].mxu1 }
 0x20f   :  { %v453_v13 = vpop.f32.mrb[2].mxu1 }
 0x210   :  { %v694_v14 = vpop.f32.mrb[3].mxu1 }

// kernel: aspp_forward.3
= control target key start
LH: loop header
LB: loop body
LE: loop exit
PB: predicated region body
PF: predicated region fallthrough
CT: control target
= control target key end

     0   :  { %s14968_s21 = smov 0   ;;  %s14970_s22 = smov 0   ;;  %s18049_s0 = inlined_call_operand.vmem [shape: f32[2,1,128], index: 0, kind: input, shape index: {}]   ;;  %s18050_s1 = inlined_call_operand.vmem [shape: bf16[2,22,16,128], index: 1, kind: input, shape index: {}]   ;;  %s18051_s2 = inlined_call_operand.vmem [shape: bf16[128,128], index: 2, kind: input, shape index: {}]   ;;  %s18052_s3 = inlined_call_operand.vmem [shape: f32[1,128], index: 3, kind: input, shape index: {}]   ;;  %s18053_s4 = inlined_call_operand.vmem [shape: bf16[9,128,128], index: 4, kind: input, shape index: {}]   ;;  %s18054_s5 = inlined_call_operand.vmem [shape: bf16[9,128,128], index: 5, kind: input, shape index: {}]   ;;  %s18055_s6 = inlined_call_operand.vmem [shape: bf16[9,128,128], index: 6, kind: input, shape index: {}]   ;;  %s18056_s7 = inlined_call_operand.vmem [shape: f32[1,128], index: 7, kind: input, shape index: {}]   ;;  %s18057_s8 = inlined_call_operand.vmem [shape: f32[1,128], index: 8, kind: input, shape index: {}]   ;;  %s18058_s9 = inlined_call_operand.vmem [shape: f32[1,128], index: 9, kind: input, shape index: {}]   ;;  %s18059_s10 = inlined_call_operand.vmem [shape: bf16[4,128,128], index: 10, kind: input, shape index: {}]   ;;  %s18060_s11 = inlined_call_operand.vmem [shape: f32[1,128], index: 11, kind: input, shape index: {}]   ;;  %s18061_s12 = inlined_call_operand.vmem [shape: bf16[2,16,16,128], index: 12, kind: output, shape index: {}]  }
   0x1   :  { %s14972_s23 = smov 0  }
   0x2 LB: > { %s34_s24 = sadd.s32 1, %s14897_s22  ;;  %p10519_p0 = scmp.ge.s32.totalorder %s14901_s23, 1  ;;  %s14901_s23 = sphi %s14972_s23, %s22_s23   ;;  %s14897_s22 = sphi %s14970_s22, %s18985_s22   ;;  %s14893_s21 = sphi %s14968_s21, %s18984_s21  }
   0x3   : > { %p36_p1 = scmp.ge.s32.totalorder %s34_s24, 2  ;;  %p350_p2 = scmp.lt.s32.totalorder %s14901_s23, 3 }
   0x5   : > { %s18987_s24 = smov (%p36_p1, %s34_s24), 0  ;;  %p351_p3 = pnand %p10519_p0, %p350_p2 }
   0x7   : > { %354 = sbr.rel (%p351_p3) target bundleno = 1877 (0x755), region = 64 }
   0xe   : > { %p393_p4 = scmp.lt.s32.totalorder %s14893_s21, 1  ;;  %s11301_s25 = smul.u32 176, %s14893_s21 }
  0x10   : > { %s18989_s21 = smov (!%p393_p4, %s14893_s21), 1  ;;  %s429_s28 = scalar_lea.vmem %s18050_s1, %s11301_s25 }
  0x11   : > { %s395_s13 = scalar_lea.vmem %s18049_s0, %s18989_s21  ;;  %s11300_s14 = sshll.u32 %s18989_s21, 7  ;;  %v14996_v0 = vld [vmem:[%s429_s28] sm:$0xff]  ;;  %v14998_v1 = vld [vmem:[%s429_s28 + $0x8] sm:$0xff]  ;;  %v470_v2 = vld [vmem:[%s429_s28 + $0x10] sm:$0xff] }
  0x12   : > { %18401 = vst [vmem:[#allocation7_spill] sm:$0xff] %v14996_v0  ;;  %18402 = vst [vmem:[#allocation8_spill] sm:$0xff] %v14998_v1  ;;  %s15003_s17 = scalar_lea.vmem %s18061_s12, %s11300_s14  ;;  %v472_v3 = vld [vmem:[%s429_s28 + $0x18] sm:$0xff]  ;;  %v15005_v4 = vld [vmem:[%s429_s28 + $0x20] sm:$0xff] }
  0x13   : > { %v15007_v5 = vld [vmem:[%s429_s28 + $0x28] sm:$0xff]  ;;  %v15009_v6 = vld [vmem:[%s429_s28 + $0x30] sm:$0xff]  ;;  %v15011_v7 = vld [vmem:[%s429_s28 + $0x38] sm:$0xff] }
  0x14   : > { %v15013_v8 = vld [vmem:[%s429_s28 + $0x40] sm:$0xff]  ;;  %v15015_v9 = vld [vmem:[%s429_s28 + $0x48] sm:$0xff]  ;;  %v15017_v10 = vld [vmem:[%s429_s28 + $0x50] sm:$0xff] }
  0x15   : > { %v15019_v11 = vld [vmem:[%s429_s28 + $0x58] sm:$0xff]  ;;  %v15021_v12 = vld [vmem:[%s429_s28 + $0x60] sm:$0xff]  ;;  %v15023_v13 = vld [vmem:[%s429_s28 + $0x68] sm:$0xff] }
  0x16   : > { %v15025_v14 = vld [vmem:[%s429_s28 + $0x70] sm:$0xff]  ;;  %v15027_v15 = vld [vmem:[%s429_s28 + $0x78] sm:$0xff]  ;;  %v15029_v16 = vld [vmem:[%s429_s28 + $0x80] sm:$0xff] }
  0x17   : > { %18403 = vst [vmem:[#allocation9_spill] sm:$0xff] %v15025_v14  ;;  %18404 = vst [vmem:[#allocation10_spill] sm:$0xff] %v15027_v15  ;;  %v15031_v17 = vld [vmem:[%s429_s28 + $0x88] sm:$0xff]  ;;  %v15033_v18 = vld [vmem:[%s429_s28 + $0x90] sm:$0xff] }
  0x18   : > { %18405 = vst [vmem:[#allocation11_spill] sm:$0xff] %v15029_v16  ;;  %18406 = vst [vmem:[#allocation12_spill] sm:$0xff] %v15031_v17  ;;  %v15035_v19 = vld [vmem:[%s429_s28 + $0x98] sm:$0xff]  ;;  %v15037_v20 = vld [vmem:[%s429_s28 + $0xa0] sm:$0xff] }
  0x19   : > { %18407 = vst [vmem:[#allocation13_spill] sm:$0xff] %v15033_v18  ;;  %18408 = vst [vmem:[#allocation14_spill] sm:$0xff] %v15035_v19  ;;  %v15039_v21 = vld [vmem:[%s429_s28 + $0xa8] sm:$0xff] }
  0x1a   : > { %18409 = vst [vmem:[#allocation15_spill] sm:$0xff] %v15037_v20  ;;  %18410 = vst [vmem:[#allocation16_spill] sm:$0xff] %v15039_v21 }
  0x1b   : > { %517 = vsyncadd [#allocation3], 2816 }
  0x1c   : > { %14889 = dma.done.wait [#allocation3], 2816 }
  0x1d   : > { %14890 = vsyncadd [#allocation3], 4294964480  ;;  %v667_v22 = vshrl.u32 %v470_v2, 16  ;;  %v670_v23 = vshll.u32 %v470_v2, 16  ;;  %vm848_vm0 = vcmask 1041408   ;;  %12213 = vmatprep.mubr.bf16.mxu0 %v472_v3  ;;  %v18411_v26 = vmov 0 }
  0x1e   : > { %vm849_vm1 = vsmask.f32 1280  ;;  %vm2028_vm3 = vcmask 1045504   ;;  %v14621_v30 = vld [vmem:[%s18053_s4 + $0x80] sm:$0xff]   ;;  %v14622_v32 = vld [vmem:[%s18053_s4 + $0x88] sm:$0xff]   ;;  %v14623_v35 = vld [vmem:[%s18053_s4 + $0x90] sm:$0xff]  }
  0x1f   : > { %v669_v24 = vrot.slane %v667_v22, 6  ;;  %v672_v25 = vrot.slane %v670_v23, 7  ;;  %vm15041_vm2 = vmand %vm848_vm0, %vm849_vm1  ;;  %12341 = vmatprep.subr.bf16.mxu1 %v14621_v30  ;;  %v14624_v36 = vld [vmem:[%s18053_s4 + $0x98] sm:$0xff]   ;;  %v675_v37 = vshrl.u32 %v472_v3, 16  ;;  %v678_v38 = vshll.u32 %v472_v3, 16  ;;  %v14625_v41 = vld [vmem:[%s18053_s4 + $0xa0] sm:$0xff]  }
  0x20   : > { %v18412_v26 = vsel %vm15041_vm2, 4294967295, %v18411_v26  ;;  %12342 = vmatpush3.bf16.msra.mxu1 %v14621_v30  ;;  %v683_v39 = vshrl.u32 %v15005_v4, 16  ;;  %v686_v40 = vshll.u32 %v15005_v4, 16  ;;  %v14626_v46 = vld [vmem:[%s18053_s4 + $0xa8] sm:$0xff]   ;;  %v691_v47 = vshrl.u32 %v15007_v5, 16  ;;  %v14627_v53 = vld [vmem:[%s18053_s4 + $0xb0] sm:$0xff]  }
  0x21   : > { %18413 = vst [vmem:[#allocation17_spill] sm:$0xff] %v18412_v26  ;;  %v673_v27 = vor.u32 %v672_v25, %v669_v24  ;;  %12343 = vmatprep.subr.bf16.mxu1 %v14622_v32  ;;  %v677_v42 = vrot.slane %v675_v37, 6  ;;  %v680_v43 = vrot.slane %v678_v38, 7  ;;  %v694_v48 = vshll.u32 %v15007_v5, 16  ;;  %v14628_v63 = vld [vmem:[%s18053_s4 + $0xb8] sm:$0xff]   ;;  %v14629_v25 = vld [vmem:[%s18053_s4 + $0xc0] sm:$0xff]  }
  0x22   : > { %v685_v44 = vrot.slane %v683_v39, 6  ;;  %v688_v45 = vrot.slane %v686_v40, 7  ;;  %v699_v50 = vshrl.u32 %v15009_v6, 16  ;;  %v702_v52 = vshll.u32 %v15009_v6, 16 }
  0x23   : > { %v15047_v28 = vsel %vm15041_vm2, 0, %v673_v27  ;;  %v15051_v29 = vsel %vm15041_vm2, %v673_v27, 0  ;;  %v681_v49 = vor.u32 %v680_v43, %v677_v42  ;;  %v693_v54 = vrot.slane %v691_v47, 6  ;;  %v14630_v42 = vld [vmem:[%s18053_s4 + $0xc8] sm:$0xff]  }
  0x24   : > { %18414 = vst [vmem:[#allocation18_spill] sm:$0xff] %v15047_v28  ;;  %18415 = vst [vmem:[#allocation19_spill] sm:$0xff] %v15051_v29  ;;  %v2029_v31 = vrot.slane %v15047_v28, 2  ;;  %v2030_v33 = vrot.slane %v15051_v29, 2  ;;  %12344 = vmatpush3.bf16.msra.mxu1 %v14622_v32  ;;  %v689_v51 = vor.u32 %v688_v45, %v685_v44  ;;  %v696_v55 = vrot.slane %v694_v48, 7 }
  0x25   : > { %12345 = vmatprep.subr.bf16.mxu1 %v14623_v35  ;;  %v707_v56 = vshrl.u32 %v15011_v7, 16  ;;  %v15086_v57 = vsel %vm15041_vm2, 0, %v681_v49  ;;  %v701_v58 = vrot.slane %v699_v50, 6  ;;  %v15090_v59 = vsel %vm15041_vm2, %v681_v49, 0 }
  0x26   : > { %v2031_v34 = vsel %vm2028_vm3, %v2029_v31, %v2030_v33  ;;  %18416 = vst [vmem:[#allocation20_spill] sm:$0xff] %v15086_v57  ;;  %18417 = vst [vmem:[#allocation21_spill] sm:$0xff] %v15090_v59  ;;  %v15094_v60 = vsel %vm15041_vm2, 0, %v689_v51  ;;  %v704_v61 = vrot.slane %v702_v52, 7  ;;  %v710_v62 = vshll.u32 %v15011_v7, 16 }
  0x27   : > { %12357 = vmatprep.mubr.bf16.mxu1 %v2031_v34  ;;  %18418 = vst [vmem:[#allocation22_spill] sm:$0xff] %v15094_v60  ;;  %v15102_v2 = vsel %vm15041_vm2, %v689_v51, 0  ;;  %v2032_v3 = vrot.slane %v15086_v57, 2  ;;  %v2033_v22 = vrot.slane %v15090_v59, 2  ;;  %v2035_v23 = vrot.slane %v15094_v60, 2 }
  0x28   : > { %12346 = vmatpush3.bf16.msra.mxu1 %v14623_v35  ;;  %18419 = vst [vmem:[#allocation23_spill] sm:$0xff] %v15102_v2  ;;  %v697_v24 = vor.u32 %v696_v55, %v693_v54  ;;  %v2036_v27 = vrot.slane %v15102_v2, 2  ;;  %v705_v30 = vor.u32 %v704_v61, %v701_v58  ;;  %v709_v31 = vrot.slane %v707_v56, 6 }
  0x29   : > { %12347 = vmatprep.subr.bf16.mxu1 %v14624_v36  ;;  %v712_v32 = vrot.slane %v710_v62, 7  ;;  %v715_v33 = vshrl.u32 %v15013_v8, 16  ;;  %v718_v34 = vshll.u32 %v15013_v8, 16  ;;  %v15114_v35 = vsel %vm2028_vm3, %v2032_v3, %v2033_v22 }
  0x2a   : > { %18420 = vst [vmem:[#allocation24_spill] sm:$0xff] %v15114_v35  ;;  %v15122_v37 = vsel %vm15041_vm2, %v697_v24, 0  ;;  %v15126_v38 = vsel %vm15041_vm2, 0, %v705_v30  ;;  %v15130_v39 = vsel %vm15041_vm2, %v705_v30, 0  ;;  %v15139_v45 = vshll.u32 %v15090_v59, 16 }
  0x2b   : > { %18422 = vst [vmem:[#allocation26_spill] sm:$0xff] %v15122_v37  ;;  %18423 = vst [vmem:[#allocation27_spill] sm:$0xff] %v15126_v38  ;;  %v713_v40 = vor.u32 %v712_v32, %v709_v31  ;;  %v717_v43 = vrot.slane %v715_v33, 6  ;;  %v720_v44 = vrot.slane %v718_v34, 7  ;;  %v723_v48 = vshrl.u32 %v15015_v9, 16  ;;  %v14632_v33 = vld [vmem:[%s18053_s4 + $0xd8] sm:$0xff]  }
  0x2c   : > { %12348 = vmatpush3.bf16.msra.mxu1 %v14624_v36  ;;  %v15118_v36 = vsel %vm15041_vm2, 0, %v697_v24  ;;  %18424 = vst [vmem:[#allocation28_spill] sm:$0xff] %v15130_v39  ;;  %18426 = vst [vmem:[#allocation30_spill] sm:$0xff] %v15139_v45  ;;  %v2039_v49 = vrot.slane %v15122_v37, 2  ;;  %v2041_v50 = vrot.slane %v15126_v38, 2  ;;  %v2042_v51 = vrot.slane %v15130_v39, 2 }
  0x2d   : > { %12349 = vmatprep.subr.bf16.mxu1 %v14625_v41  ;;  %18421 = vst [vmem:[#allocation25_spill] sm:$0xff] %v15118_v36  ;;  %v2038_v47 = vrot.slane %v15118_v36, 2  ;;  %v726_v52 = vshll.u32 %v15015_v9, 16  ;;  %v15156_v54 = vsel %vm15041_vm2, %v713_v40, 0  ;;  %v731_v55 = vshrl.u32 %v15017_v10, 16 }
  0x2e   : > { %18428 = vst [vmem:[#allocation32_spill] sm:$0xff] %v15156_v54  ;;  %v734_v56 = vshll.u32 %v15017_v10, 16  ;;  %v15161_v58 = vshll.u32 %v15102_v2, 16  ;;  %v18064_v61 = vshrl.u32 %v15122_v37, 16  ;;  %v15165_v62 = vshll.u32 %v15122_v37, 16 }
  0x2f   : > { %v721_v3 = vor.u32 %v720_v44, %v717_v43  ;;  %v18067_v22 = vshrl.u32 %v15130_v39, 16  ;;  %v18068_v24 = vshrl.u32 %v15156_v54, 16  ;;  %v2045_v31 = vrot.slane %v15156_v54, 2 }
  0x30   : > { %12350 = vmatpush3.bf16.msra.mxu1 %v14625_v41  ;;  %v15133_v41 = vsel %vm2028_vm3, %v2035_v23, %v2036_v27  ;;  %18429 = vst [vmem:[#allocation33_spill] sm:$0xff] %v15161_v58  ;;  %18430 = vst [vmem:[#allocation34_spill] sm:$0xff] %v15165_v62  ;;  %v15172_v23 = vshll.u32 %v15130_v39, 16  ;;  %v15176_v27 = vshll.u32 %v15156_v54, 16  ;;  %v728_v32 = vrot.slane %v726_v52, 7 }
  0x31   : > { %12351 = vmatprep.subr.bf16.mxu1 %v14626_v46  ;;  %18425 = vst [vmem:[#allocation29_spill] sm:$0xff] %v15133_v41  ;;  %v15184_v34 = vsel %vm2028_vm3, %v2038_v47, %v2039_v49  ;;  %v733_v43 = vrot.slane %v731_v55, 6  ;;  %v736_v44 = vrot.slane %v734_v56, 7  ;;  %v15195_v52 = vsel %vm15041_vm2, %v721_v3, 0 }
  0x32   : > { %18431 = vst [vmem:[#allocation35_spill] sm:$0xff] %v15172_v23  ;;  %18432 = vst [vmem:[#allocation36_spill] sm:$0xff] %v15176_v27  ;;  %v742_v47 = vshll.u32 %v15019_v11, 16  ;;  %v15201_v49 = vshll.u32 %v15195_v52, 16  ;;  %v15207_v55 = vrot.slane %v18064_v61, 1  ;;  %v15212_v56 = vrot.slane %v18067_v22, 1 }
  0x33   : > { %18433 = vst [vmem:[#allocation37_spill] sm:$0xff] %v15184_v34  ;;  %18436 = vst [vmem:[#allocation40_spill] sm:$0xff] %v15195_v52  ;;  %v15218_v21 = vrot.slane %v18068_v24, 1  ;;  %v2048_v61 = vrot.slane %v15195_v52, 2  ;;  %v737_v1 = vor.u32 %v736_v44, %v733_v43  ;;  %v18442_v24 = vshrl.u32 %v15195_v52, 16 }
  0x34   : > { %12352 = vmatpush3.bf16.msra.mxu1 %v14626_v46  ;;  %v739_v46 = vshrl.u32 %v15019_v11, 16  ;;  %18437 = vst [vmem:[#allocation41_spill] sm:$0xff] %v15201_v49  ;;  %18438 = vst [vmem:[#allocation42_spill] sm:$0xff] %v15207_v55  ;;  %v763_v19 = vshrl.u32 %v15025_v14, 16  ;;  %v782_v23 = vshll.u32 %v15029_v16, 16  ;;  %v787_v29 = vshrl.u32 %v15031_v17, 16 }
  0x35   : > { %12353 = vmatprep.subr.bf16.mxu1 %v14627_v53  ;;  %18439 = vst [vmem:[#allocation43_spill] sm:$0xff] %v15212_v56  ;;  %18440 = vst [vmem:[#allocation44_spill] sm:$0xff] %v15218_v21  ;;  %v779_v21 = vshrl.u32 %v15029_v16, 16  ;;  %v790_v28 = vshll.u32 %v15031_v17, 16  ;;  %vm1223_vm4 = vcmask 1046528   ;;  %v18504_v26 = vrot.slane %v15090_v59, 1 }
  0x36   : > { %vm1304_vm5 = vsmask.f32 6400  ;;  %vm7850_vm6 = vcmask 1044480   ;;  %vm4477_vm7 = vsmask.f32 7424 }
  0x37   : > { %vm5027_vm8 = vsmask.f32 5376 }
  0x38   : > { %12354 = vmatpush3.bf16.msra.mxu1 %v14627_v53  ;;  %v15152_v53 = vsel %vm15041_vm2, 0, %v713_v40  ;;  %v15187_v40 = vsel %vm2028_vm3, %v2041_v50, %v2042_v51  ;;  %v747_v50 = vshrl.u32 %v15021_v12, 16  ;;  %v750_v51 = vshll.u32 %v15021_v12, 16 }
  0x39   : > { %12355 = vmatprep.subr.bf16.mxu1 %v14628_v63  ;;  %18427 = vst [vmem:[#allocation31_spill] sm:$0xff] %v15152_v53  ;;  %v2044_v30 = vrot.slane %v15152_v53, 2  ;;  %18434 = vst [vmem:[#allocation38_spill] sm:$0xff] %v15187_v40 }
  0x3a   : > { %v752_v43 = vrot.slane %v750_v51, 7  ;;  %v15253_v51 = vsel %vm15041_vm2, %v737_v1, 0 }
  0x3b   : > { %v15224_v22 = vsel %vm2028_vm3, %v2044_v30, %v2045_v31  ;;  %v755_v30 = vshrl.u32 %v15023_v13, 16  ;;  %v758_v31 = vshll.u32 %v15023_v13, 16  ;;  %18448 = vst [vmem:[#allocation51_spill] sm:$0xff] %v15253_v51  ;;  %v15261_v0 = vshll.u32 %v15253_v51, 16 }
  0x3c   : > { %12356 = vmatpush3.bf16.msra.mxu1 %v14628_v63  ;;  %v14631_v63 = vld [vmem:[%s18053_s4 + $0xd0] sm:$0xff]   ;;  %18441 = vst [vmem:[#allocation45_spill] sm:$0xff] %v15224_v22 }
  0x3d   : > { %12389 = vmatprep.subr.bf16.mxu1 %v14629_v25  ;;  %18450 = vst [vmem:[#allocation53_spill] sm:$0xff] %v15261_v0 }
  0x3f   : > { %12358 = vmatmul.mubr.bf16.vlgmr.msra.gmra.mrb[0].mxu1 %v15114_v35  ;;  %v766_v35 = vshll.u32 %v15025_v14, 16 }
  0x40   : > { %12390 = vmatpush3.bf16.msra.mxu1 %v14629_v25  ;;  %12361 = vmatprep.mubr.bf16.mxu1 %v15133_v41  ;;  %v725_v25 = vrot.slane %v723_v48, 6  ;;  %v15191_v48 = vsel %vm15041_vm2, 0, %v721_v3  ;;  %v741_v3 = vrot.slane %v739_v46, 6  ;;  %v760_v41 = vrot.slane %v758_v31, 7 }
  0x41   : > { %12391 = vmatprep.subr.bf16.mxu1 %v14630_v42  ;;  %18435 = vst [vmem:[#allocation39_spill] sm:$0xff] %v15191_v48  ;;  %v2047_v20 = vrot.slane %v15191_v48, 2  ;;  %v18453_v31 = vshrl.u32 %v15253_v51, 16 }
  0x44   : > { %12392 = vmatpush3.bf16.msra.mxu1 %v14630_v42  ;;  %v729_v42 = vor.u32 %v728_v32, %v725_v25  ;;  %v744_v25 = vrot.slane %v742_v47, 7  ;;  %v14633_v32 = vld [vmem:[%s18053_s4 + $0xe0] sm:$0xff]   ;;  %v15245_v47 = vsel %vm2028_vm3, %v2047_v20, %v2048_v61  ;;  %v14634_v61 = vld [vmem:[%s18053_s4 + $0xe8] sm:$0xff]  }
  0x45   : > { %12393 = vmatprep.subr.bf16.mxu1 %v14631_v63  ;;  %18446 = vst [vmem:[#allocation49_spill] sm:$0xff] %v15245_v47 }
  0x46   : > { %v15236_v44 = vsel %vm15041_vm2, 0, %v729_v42  ;;  %v15240_v46 = vsel %vm15041_vm2, %v729_v42, 0  ;;  %v15257_v42 = vsel %vm15041_vm2, 0, %v737_v1  ;;  %v745_v20 = vor.u32 %v744_v25, %v741_v3  ;;  %v14635_v3 = vld [vmem:[%s18053_s4 + $0xf0] sm:$0xff]  }
  0x47   : > { %12362 = vmatmul.mubr.bf16.gmra.mrb[4].mxu1 %v15184_v34  ;;  %18444 = vst [vmem:[#allocation47_spill] sm:$0xff] %v15236_v44  ;;  %18445 = vst [vmem:[#allocation48_spill] sm:$0xff] %v15240_v46  ;;  %v757_v1 = vrot.slane %v755_v30, 6  ;;  %v18451_v25 = vshrl.u32 %v15240_v46, 16  ;;  %v2054_v30 = vrot.slane %v15253_v51, 2  ;;  %v18533_v62 = vrot.slane %v15236_v44, 1 }
  0x48   : > { %12365 = vmatprep.mubr.bf16.mxu1 %v15187_v40  ;;  %12394 = vmatpush3.bf16.msra.mxu1 %v14631_v63  ;;  %v15231_v63 = vrot.slane %v18442_v24, 1  ;;  %v749_v40 = vrot.slane %v747_v50, 6  ;;  %v15249_v50 = vshll.u32 %v15240_v46, 16  ;;  %18449 = vst [vmem:[#allocation52_spill] sm:$0xff] %v15257_v42  ;;  %v2051_v24 = vrot.slane %v15240_v46, 2 }
  0x49   : > { %12395 = vmatprep.subr.bf16.mxu1 %v14632_v33  ;;  %v15277_v49 = vrot.slane %v18451_v25, 1  ;;  %v15293_v25 = vsel %vm15041_vm2, %v745_v20, 0  ;;  %v761_v0 = vor.u32 %v760_v41, %v757_v1  ;;  %v781_v41 = vrot.slane %v779_v21, 6 }
  0x4a   : > { %18443 = vst [vmem:[#allocation46_spill] sm:$0xff] %v15231_v63  ;;  %18447 = vst [vmem:[#allocation50_spill] sm:$0xff] %v15249_v50  ;;  %v753_v34 = vor.u32 %v752_v43, %v749_v40  ;;  %v2053_v43 = vrot.slane %v15257_v42, 2  ;;  %v15297_v50 = vshll.u32 %v15293_v25, 16 }
  0x4b   : > { %18452 = vst [vmem:[#allocation54_spill] sm:$0xff] %v15277_v49  ;;  %18456 = vst [vmem:[#allocation57_spill] sm:$0xff] %v15293_v25  ;;  %v768_v49 = vrot.slane %v766_v35, 7 }
  0x4c   : > { %12396 = vmatpush3.bf16.msra.mxu1 %v14632_v33  ;;  %v2050_v33 = vrot.slane %v15236_v44, 2  ;;  %18457 = vst [vmem:[#allocation58_spill] sm:$0xff] %v15297_v50  ;;  %v15303_v63 = vsel %vm15041_vm2, %v753_v34, 0  ;;  %v15312_v27 = vsel %vm2028_vm3, %v2053_v43, %v2054_v30  ;;  %v15320_v35 = vsel %vm15041_vm2, 0, %v753_v34 }
  0x4d   : > { %12397 = vmatprep.subr.bf16.mxu1 %v14633_v32  ;;  %18458 = vst [vmem:[#allocation59_spill] sm:$0xff] %v15303_v63  ;;  %18460 = vst [vmem:[#allocation61_spill] sm:$0xff] %v15312_v27  ;;  %v15329_v43 = vshll.u32 %v15303_v63, 16  ;;  %v15333_v30 = vsel %vm15041_vm2, 0, %v761_v0  ;;  %v15337_v34 = vsel %vm15041_vm2, %v761_v0, 0  ;;  %v2059_v0 = vrot.slane %v15320_v35, 2 }
  0x4e   : > { %v15309_v40 = vsel %vm2028_vm3, %v2050_v33, %v2051_v24  ;;  %18461 = vst [vmem:[#allocation62_spill] sm:$0xff] %v15320_v35  ;;  %18465 = vst [vmem:[#allocation65_spill] sm:$0xff] %v15333_v30  ;;  %v2060_v55 = vrot.slane %v15303_v63, 2  ;;  %v2062_v17 = vrot.slane %v15333_v30, 2  ;;  %v2063_v16 = vrot.slane %v15337_v34, 2 }
  0x4f   : > { %12366 = vmatmul.mubr.bf16.gmra.mrb[8].mxu1 %v15224_v22  ;;  %v15284_v22 = vrot.slane %v18453_v31, 1  ;;  %v774_v31 = vshll.u32 %v15027_v15, 16  ;;  %18459 = vst [vmem:[#allocation60_spill] sm:$0xff] %v15309_v40  ;;  %18464 = vst [vmem:[#allocation64_spill] sm:$0xff] %v15329_v43 }
  0x50   : > { %12369 = vmatprep.mubr.bf16.mxu1 %v15245_v47  ;;  %12398 = vmatpush3.bf16.msra.mxu1 %v14633_v32  ;;  %v15289_v47 = vsel %vm15041_vm2, 0, %v745_v20  ;;  %v771_v32 = vshrl.u32 %v15027_v15, 16  ;;  %v14636_v20 = vld [vmem:[%s18053_s4 + $0xf8] sm:$0xff]   ;;  %18466 = vst [vmem:[#allocation66_spill] sm:$0xff] %v15337_v34 }
  0x51   : > { %18454 = vst [vmem:[#allocation55_spill] sm:$0xff] %v15284_v22  ;;  %18455 = vst [vmem:[#allocation56_spill] sm:$0xff] %v15289_v47  ;;  %12399 = vmatprep.subr.bf16.mxu1 %v14634_v61  ;;  %v765_v22 = vrot.slane %v763_v19, 6  ;;  %v2056_v56 = vrot.slane %v15289_v47, 2  ;;  %v2057_v19 = vrot.slane %v15293_v25, 2  ;;  %v776_v33 = vrot.slane %v774_v31, 7 }
  0x52   : > { %v773_v24 = vrot.slane %v771_v32, 6  ;;  %v14649_v32 = vld [vmem:[%s18051_s2] sm:$0xff]  }
  0x53   : > { %12197 = vmatprep.subr.bf16.mxu0 %v14649_v32  ;;  %v15355_v21 = vsel %vm2028_vm3, %v2056_v56, %v2057_v19 }
  0x54   : > { %12400 = vmatpush3.bf16.msra.mxu1 %v14634_v61  ;;  %v18462_v61 = vshrl.u32 %v15293_v25, 16  ;;  %18467 = vst [vmem:[#allocation67_spill] sm:$0xff] %v15355_v21  ;;  %12198 = vmatpush3.bf16.msra.mxu0 %v14649_v32  ;;  %v789_v32 = vrot.slane %v787_v29, 6 }
  0x55   : > { %12401 = vmatprep.subr.bf16.mxu1 %v14635_v3 }
  0x56   : > { %v15326_v1 = vrot.slane %v18462_v61, 1  ;;  %v769_v61 = vor.u32 %v768_v49, %v765_v22  ;;  %v18471_v22 = vshrl.u32 %v15337_v34, 16 }
  0x57   : > { %12370 = vmatmul.mubr.bf16.gmra.mrb[12].mxu1 %v15309_v40  ;;  %v784_v40 = vrot.slane %v782_v23, 7  ;;  %v18468_v23 = vshrl.u32 %v15303_v63, 16 }
  0x58   : > { %18463 = vst [vmem:[#allocation63_spill] sm:$0xff] %v15326_v1  ;;  %12373 = vmatprep.mubr.bf16.mxu1 %v15312_v27  ;;  %12402 = vmatpush3.bf16.msra.mxu1 %v14635_v3  ;;  %v15347_v1 = vld [vmem:[%s18053_s4 + $0x100] sm:$0xff]   ;;  %v777_v3 = vor.u32 %v776_v33, %v773_v24  ;;  %v15363_v27 = vshll.u32 %v15337_v34, 16  ;;  %v15369_v50 = vrot.slane %v18471_v22, 1  ;;  %v15373_v56 = vsel %vm15041_vm2, 0, %v769_v61 }
  0x59   : > { %12403 = vmatprep.subr.bf16.mxu1 %v14636_v20  ;;  %v15359_v49 = vrot.slane %v18468_v23, 1  ;;  %18473 = vst [vmem:[#allocation71_spill] sm:$0xff] %v15373_v56  ;;  %v15377_v19 = vsel %vm15041_vm2, %v769_v61, 0  ;;  %v785_v24 = vor.u32 %v784_v40, %v781_v41  ;;  %v15380_v33 = vsel %vm2028_vm3, %v2059_v0, %v2060_v55  ;;  %v14651_v40 = vld [vmem:[%s18051_s2 + $0x8] sm:$0xff]   ;;  %v14652_v41 = vld [vmem:[%s18051_s2 + $0x10] sm:$0xff]  }
  0x5a   : > { %18470 = vst [vmem:[#allocation69_spill] sm:$0xff] %v15363_v27  ;;  %18472 = vst [vmem:[#allocation70_spill] sm:$0xff] %v15369_v50  ;;  %v792_v23 = vrot.slane %v790_v28, 7  ;;  %v15385_v31 = vshll.u32 %v15377_v19, 16  ;;  %v15389_v50 = vsel %vm15041_vm2, %v777_v3, 0  ;;  %v15398_v28 = vsel %vm15041_vm2, 0, %v777_v3  ;;  %12199 = vmatprep.subr.bf16.mxu0 %v14651_v40 }
  0x5b   : > { %18469 = vst [vmem:[#allocation68_spill] sm:$0xff] %v15359_v49  ;;  %18474 = vst [vmem:[#allocation72_spill] sm:$0xff] %v15377_v19  ;;  %v15409_v61 = vsel %vm2028_vm3, %v2062_v17, %v2063_v16  ;;  %v2065_v0 = vrot.slane %v15373_v56, 2  ;;  %v15414_v3 = vsel %vm15041_vm2, %v785_v24, 0  ;;  %v2066_v29 = vrot.slane %v15377_v19, 2  ;;  %12200 = vmatpush3.bf16.msra.mxu0 %v14651_v40 }
  0x5c   : > { %12404 = vmatpush3.bf16.msra.mxu1 %v14636_v20  ;;  %18475 = vst [vmem:[#allocation73_spill] sm:$0xff] %v15380_v33  ;;  %18476 = vst [vmem:[#allocation74_spill] sm:$0xff] %v15385_v31  ;;  %v15402_v20 = vshll.u32 %v15389_v50, 16  ;;  %v15419_v55 = vsel %vm15041_vm2, 0, %v785_v24  ;;  %v18483_v16 = vshrl.u32 %v15377_v19, 16  ;;  %v2068_v27 = vrot.slane %v15398_v28, 2  ;;  %12201 = vmatprep.subr.bf16.mxu0 %v14652_v41 }
  0x5d   : > { %12437 = vmatprep.subr.bf16.mxu1 %v15347_v1  ;;  %18477 = vst [vmem:[#allocation75_spill] sm:$0xff] %v15389_v50  ;;  %18478 = vst [vmem:[#allocation76_spill] sm:$0xff] %v15398_v28  ;;  %v2069_v43 = vrot.slane %v15389_v50, 2  ;;  %v18485_v49 = vshrl.u32 %v15389_v50, 16  ;;  %v2071_v40 = vrot.slane %v15419_v55, 2  ;;  %v15443_v31 = vsel %vm2028_vm3, %v2065_v0, %v2066_v29  ;;  %v14654_v29 = vld [vmem:[%s18051_s2 + $0x18] sm:$0xff]  }
  0x5e   : > { %18479 = vst [vmem:[#allocation77_spill] sm:$0xff] %v15402_v20  ;;  %18480 = vst [vmem:[#allocation78_spill] sm:$0xff] %v15409_v61  ;;  %v15424_v17 = vrot.slane %v18483_v16, 1  ;;  %v2072_v16 = vrot.slane %v15414_v3, 2 }
  0x5f   : > { %12374 = vmatmul.mubr.bf16.gmra.mrb[16].mxu1 %v15355_v21  ;;  %18481 = vst [vmem:[#allocation79_spill] sm:$0xff] %v15414_v3  ;;  %18482 = vst [vmem:[#allocation80_spill] sm:$0xff] %v15419_v55  ;;  %v793_v21 = vor.u32 %v792_v23, %v789_v32  ;;  %v15431_v15 = vrot.slane %v18485_v49, 1  ;;  %v15435_v32 = vshll.u32 %v15414_v3, 16  ;;  %v18489_v49 = vshrl.u32 %v15414_v3, 16  ;;  %12202 = vmatpush3.bf16.msra.mxu0 %v14652_v41 }
  0x60   : > { %12377 = vmatprep.mubr.bf16.mxu1 %v15380_v33  ;;  %18484 = vst [vmem:[#allocation81_spill] sm:$0xff] %v15424_v17  ;;  %18488 = vst [vmem:[#allocation84_spill] sm:$0xff] %v15443_v31  ;;  %v795_v41 = vshrl.u32 %v15033_v18, 16  ;;  %v15472_v22 = vsel %vm2028_vm3, %v2068_v27, %v2069_v43  ;;  %12203 = vmatprep.subr.bf16.mxu0 %v14654_v29  ;;  %v15493_v27 = vsel %vm2028_vm3, %v2071_v40, %v2072_v16 }
  0x61   : > { %18486 = vst [vmem:[#allocation82_spill] sm:$0xff] %v15431_v15  ;;  %18487 = vst [vmem:[#allocation83_spill] sm:$0xff] %v15435_v32  ;;  %v15447_v15 = vrot.slane %v18489_v49, 1  ;;  %v15451_v24 = vsel %vm15041_vm2, 0, %v793_v21  ;;  %v15455_v23 = vsel %vm15041_vm2, %v793_v21, 0  ;;  %v14655_v21 = vld [vmem:[%s18051_s2 + $0x20] sm:$0xff]  }
  0x62   : > { %18491 = vst [vmem:[#allocation86_spill] sm:$0xff] %v15451_v24  ;;  %18492 = vst [vmem:[#allocation87_spill] sm:$0xff] %v15455_v23  ;;  %v15475_v33 = vshll.u32 %v15455_v23, 16  ;;  %v2074_v0 = vrot.slane %v15451_v24, 2  ;;  %v2075_v49 = vrot.slane %v15455_v23, 2  ;;  %v15507_v43 = vshrl.u32 %v15086_v57, 16 }
  0x63   : > { %18490 = vst [vmem:[#allocation85_spill] sm:$0xff] %v15447_v15  ;;  %v798_v15 = vshll.u32 %v15033_v18, 16  ;;  %18493 = vst [vmem:[#allocation88_spill] sm:$0xff] %v15472_v22  ;;  %12204 = vmatpush3.bf16.msra.mxu0 %v14654_v29  ;;  %v14657_v29 = vld [vmem:[%s18051_s2 + $0x28] sm:$0xff]   ;;  %v14660_v32 = vld [vmem:[%s18051_s2 + $0x38] sm:$0xff]  }
  0x64   : > { %18494 = vst [vmem:[#allocation89_spill] sm:$0xff] %v15475_v33  ;;  %12205 = vmatprep.subr.bf16.mxu0 %v14655_v21  ;;  %18495 = vst [vmem:[#allocation90_spill] sm:$0xff] %v15493_v27  ;;  %v15526_v18 = vsel %vm2028_vm3, %v2074_v0, %v2075_v49  ;;  %v18503_v33 = vshrl.u32 %v15102_v2, 16  ;;  %v15578_v0 = vshll.u32 %v15126_v38, 16 }
  0x65   : > { %v800_v14 = vrot.slane %v798_v15, 7  ;;  %18496 = vst [vmem:[#allocation91_spill] sm:$0xff] %v15507_v43  ;;  %v15514_v15 = vshll.u32 %v15086_v57, 16  ;;  %18500 = vst [vmem:[#allocation95_spill] sm:$0xff] %v15526_v18 }
  0x66   : > { %v15547_v17 = vrot.slane %v18503_v33, 1  ;;  %v15562_v33 = vshrl.u32 %v15118_v36, 16  ;;  %18511 = vst [vmem:[#allocation103_spill] sm:$0xff] %v15578_v0 }
  0x67   : > { %12378 = vmatmul.mubr.bf16.gmra.mrb[20].mxu1 %v15409_v61  ;;  %v797_v61 = vrot.slane %v795_v41, 6  ;;  %12206 = vmatpush3.bf16.msra.mxu0 %v14655_v21  ;;  %v14658_v21 = vld [vmem:[%s18051_s2 + $0x30] sm:$0xff]   ;;  %18497 = vst [vmem:[#allocation92_spill] sm:$0xff] %v15514_v15  ;;  %v18126_v41 = vshrl.u32 %v15090_v59, 16  ;;  %v15591_v59 = vshll.u32 %v15191_v48, 16 }
  0x68   : > { %12381 = vmatprep.mubr.bf16.mxu1 %v15443_v31  ;;  %12207 = vmatprep.subr.bf16.mxu0 %v14657_v29  ;;  %18507 = vst [vmem:[#allocation99_spill] sm:$0xff] %v15562_v33 }
  0x69   : > { %v801_v31 = vor.u32 %v800_v14, %v797_v61  ;;  %v15520_v14 = vshrl.u32 %v15094_v60, 16  ;;  %v15523_v61 = vshll.u32 %v15094_v60, 16  ;;  %v15543_v49 = vrot.slane %v18126_v41, 1  ;;  %18515 = vst [vmem:[#allocation107_spill] sm:$0xff] %v15591_v59 }
  0x6a   : > { %v15585_v41 = vshll.u32 %v15152_v53, 16 }
  0x6b   : > { %18498 = vst [vmem:[#allocation93_spill] sm:$0xff] %v15520_v14  ;;  %18499 = vst [vmem:[#allocation94_spill] sm:$0xff] %v15523_v61  ;;  %12208 = vmatpush3.bf16.msra.mxu0 %v14657_v29  ;;  %v15532_v40 = vsel %vm15041_vm2, 0, %v801_v31  ;;  %v15536_v16 = vsel %vm15041_vm2, %v801_v31, 0  ;;  %v18505_v31 = vrot.slane %v15086_v57, 1  ;;  %v15582_v29 = vshrl.u32 %v15152_v53, 16 }
  0x6c   : > { %12209 = vmatprep.subr.bf16.mxu0 %v14658_v21  ;;  %18501 = vst [vmem:[#allocation96_spill] sm:$0xff] %v15532_v40  ;;  %18502 = vst [vmem:[#allocation97_spill] sm:$0xff] %v15536_v16  ;;  %v18519_v61 = vrot.slane %v15094_v60, 1  ;;  %v18526_v60 = vrot.slane %v15156_v54, 1  ;;  %v18532_v57 = vrot.slane %v15240_v46, 1  ;;  %v18538_v46 = vrot.slane %v15289_v47, 1 }
  0x6d   : > { %v15555_v20 = vsel %vm1223_vm4, %v18505_v31, %v18504_v26  ;;  %v15569_v26 = vshll.u32 %v15536_v16, 16  ;;  %v15572_v31 = vshll.u32 %v15118_v36, 16  ;;  %18512 = vst [vmem:[#allocation104_spill] sm:$0xff] %v15582_v29  ;;  %18513 = vst [vmem:[#allocation105_spill] sm:$0xff] %v15585_v41  ;;  %v18561_v54 = vrot.slane %v15451_v24, 1 }
  0x6e   : > { %18506 = vst [vmem:[#allocation98_spill] sm:$0xff] %v15555_v20 }
  0x6f   : > { %12382 = vmatmul.mubr.bf16.gmra.mrb[24].mxu1 %v15472_v22  ;;  %12210 = vmatpush3.bf16.msra.mxu0 %v14658_v21  ;;  %18508 = vst [vmem:[#allocation100_spill] sm:$0xff] %v15569_v26  ;;  %18509 = vst [vmem:[#allocation101_spill] sm:$0xff] %v15572_v31  ;;  %v15575_v21 = vshrl.u32 %v15126_v38, 16  ;;  %v15596_v22 = vshrl.u32 %v15236_v44, 16  ;;  %v18518_v26 = vrot.slane %v15102_v2, 1  ;;  %v18525_v2 = vrot.slane %v15126_v38, 1 }
  0x70   : > { %12385 = vmatprep.mubr.bf16.mxu1 %v15493_v27  ;;  %12211 = vmatprep.subr.bf16.mxu0 %v14660_v32  ;;  %v15588_v27 = vshrl.u32 %v15191_v48, 16 }
  0x71   : > { %18510 = vst [vmem:[#allocation102_spill] sm:$0xff] %v15575_v21  ;;  %18516 = vst [vmem:[#allocation108_spill] sm:$0xff] %v15596_v22  ;;  %v15606_v14 = vsel %vm1223_vm4, %v18519_v61, %v18518_v26  ;;  %v18521_v61 = vrot.slane %v15122_v37, 1  ;;  %v18522_v26 = vrot.slane %v15118_v36, 1  ;;  %v18568_v37 = vrot.slane %v15139_v45, 2  ;;  %v18586_v36 = vld [vmem:[#allocation99_spill] sm:$0xff] }
  0x72   : > { %18514 = vst [vmem:[#allocation106_spill] sm:$0xff] %v15588_v27 }
  0x73   : > { %12212 = vmatpush3.bf16.msra.mxu0 %v14660_v32  ;;  %v14638_v32 = vld [vmem:[%s18053_s4 + $0x108] sm:$0xff]   ;;  %v15625_v58 = vsel %vm1223_vm4, %v18522_v26, %v18521_v61  ;;  %v15638_v61 = vshll.u32 %v15257_v42, 16  ;;  %v18524_v26 = vrot.slane %v15130_v39, 1 }
  0x75   : > { %18523 = vst [vmem:[#allocation111_spill] sm:$0xff] %v15638_v61  ;;  %v15650_v33 = vsel %vm1223_vm4, %v18525_v2, %v18524_v26  ;;  %v14641_v2 = vld [vmem:[%s18053_s4 + $0x120] sm:$0xff]   ;;  %v18531_v26 = vrot.slane %v15191_v48, 1  ;;  %v18584_v48 = vld [vmem:[#allocation94_spill] sm:$0xff] }
  0x76   : > { %12214 = vmatmul.mubr.bf16.vlgmr.msra.gmra.mrb[0].mxu0 %v15005_v4  ;;  %v14639_v4 = vld [vmem:[%s18053_s4 + $0x110] sm:$0xff]  }
  0x77   : > { %12386 = vmatmul.mubr.bf16.gmra.mrb[28].mxu1 %v15526_v18  ;;  %v15613_v18 = vshrl.u32 %v15257_v42, 16  ;;  %12217 = vmatprep.mubr.bf16.mxu0 %v15007_v5  ;;  %v14640_v5 = vld [vmem:[%s18053_s4 + $0x118] sm:$0xff]  }
  0x78   : > { %12405 = vmatprep.mubr.bf16.mxu1 %v15555_v20  ;;  %v15599_v20 = vshll.u32 %v15236_v44, 16  ;;  %v15877_v44 = vshll.u32 %v15419_v55, 16 }
  0x79   : > { %18520 = vst [vmem:[#allocation110_spill] sm:$0xff] %v15613_v18 }
  0x7a   : > { %18517 = vst [vmem:[#allocation109_spill] sm:$0xff] %v15599_v20  ;;  %18581 = vst [vmem:[#allocation125_spill] sm:$0xff] %v15877_v44 }
  0x7e   : > { %12218 = vmatmul.mubr.bf16.gmra.mrb[4].mxu0 %v15009_v6  ;;  %v15669_v6 = vshll.u32 %v15289_v47, 16 }
  0x7f   : > { %12406 = vmatmul.mubr.bf16.vlgmr.msra.gmra.mrb[0].mxu1 %v15606_v14  ;;  %12221 = vmatprep.mubr.bf16.mxu0 %v15011_v7  ;;  %v14642_v7 = vld [vmem:[%s18053_s4 + $0x128] sm:$0xff]  }
  0x80   : > { %12438 = vmatpush3.bf16.msra.mxu1 %v15347_v1  ;;  %12409 = vmatprep.mubr.bf16.mxu1 %v15625_v58  ;;  %v18527_v1 = vrot.slane %v15152_v53, 1  ;;  %18529 = vst [vmem:[#allocation113_spill] sm:$0xff] %v15669_v6  ;;  %v18585_v53 = vrot.slane %v18584_v48, 2 }
  0x81   : > { %12439 = vmatprep.subr.bf16.mxu1 %v14638_v32 }
  0x82   : > { %v15658_v31 = vsel %vm1223_vm4, %v18527_v1, %v18526_v60  ;;  %v18530_v60 = vrot.slane %v15195_v52, 1  ;;  %v18552_v52 = vld [vmem:[#allocation10_spill] sm:$0xff] }
  0x84   : > { %12440 = vmatpush3.bf16.msra.mxu1 %v14638_v32  ;;  %v15666_v32 = vshrl.u32 %v15289_v47, 16  ;;  %v15680_v1 = vsel %vm1223_vm4, %v18531_v26, %v18530_v60  ;;  %v14643_v60 = vld [vmem:[%s18053_s4 + $0x130] sm:$0xff]   ;;  %v18573_v47 = vld [vmem:[#allocation18_spill] sm:$0xff] }
  0x85   : > { %12441 = vmatprep.subr.bf16.mxu1 %v14639_v4 }
  0x86   : > { %18528 = vst [vmem:[#allocation112_spill] sm:$0xff] %v15666_v32  ;;  %12222 = vmatmul.mubr.bf16.gmra.mrb[8].mxu0 %v15013_v8  ;;  %v15697_v8 = vshrl.u32 %v15320_v35, 16 }
  0x87   : > { %12410 = vmatmul.mubr.bf16.gmra.mrb[4].mxu1 %v15650_v33  ;;  %12225 = vmatprep.mubr.bf16.mxu0 %v15015_v9  ;;  %v18535_v9 = vrot.slane %v15253_v51, 1 }
  0x88   : > { %12413 = vmatprep.mubr.bf16.mxu1 %v15658_v31  ;;  %12442 = vmatpush3.bf16.msra.mxu1 %v14639_v4  ;;  %v15688_v4 = vsel %vm1223_vm4, %v18533_v62, %v18532_v57  ;;  %18534 = vst [vmem:[#allocation114_spill] sm:$0xff] %v15697_v8  ;;  %v14644_v57 = vld [vmem:[%s18053_s4 + $0x138] sm:$0xff]   ;;  %v18536_v62 = vrot.slane %v15257_v42, 1  ;;  %v18579_v42 = vld [vmem:[#allocation33_spill] sm:$0xff] }
  0x89   : > { %12443 = vmatprep.subr.bf16.mxu1 %v14640_v5 }
  0x8a   : > { %v15708_v26 = vsel %vm1223_vm4, %v18536_v62, %v18535_v9  ;;  %v15723_v9 = vld [vmem:[%s18053_s4 + $0x140] sm:$0xff]   ;;  %v15728_v62 = vshll.u32 %v15320_v35, 16 }
  0x8c   : > { %12444 = vmatpush3.bf16.msra.mxu1 %v14640_v5  ;;  %v18537_v5 = vrot.slane %v15293_v25, 1  ;;  %18539 = vst [vmem:[#allocation115_spill] sm:$0xff] %v15728_v62  ;;  %v18543_v25 = vrot.slane %v15333_v30, 1 }
  0x8d   : > { %12445 = vmatprep.subr.bf16.mxu1 %v14641_v2 }
  0x8e   : > { %12226 = vmatmul.mubr.bf16.gmra.mrb[12].mxu0 %v15017_v10  ;;  %v18542_v10 = vrot.slane %v15337_v34, 1  ;;  %v18550_v34 = vrot.slane %v15398_v28, 1 }
  0x8f   : > { %12414 = vmatmul.mubr.bf16.gmra.mrb[8].mxu1 %v15680_v1  ;;  %12229 = vmatprep.mubr.bf16.mxu0 %v15019_v11  ;;  %v18540_v11 = vrot.slane %v15303_v63, 1 }
  0x90   : > { %12417 = vmatprep.mubr.bf16.mxu1 %v15688_v4  ;;  %12446 = vmatpush3.bf16.msra.mxu1 %v14641_v2  ;;  %v15716_v2 = vsel %vm1223_vm4, %v18538_v46, %v18537_v5  ;;  %v14665_v46 = vld [vmem:[%s18053_s4 + $0x40] sm:$0xff]   ;;  %v18541_v5 = vrot.slane %v15320_v35, 1  ;;  %v15747_v51 = vsel %vm1223_vm4, %v18543_v25, %v18542_v10  ;;  %v15761_v25 = vshll.u32 %v15333_v30, 16  ;;  %v18572_v35 = vld [vmem:[#allocation13_spill] sm:$0xff] }
  0x91   : > { %12447 = vmatprep.subr.bf16.mxu1 %v14642_v7  ;;  %12245 = vmatprep.subr.bf16.mxu0 %v14665_v46  ;;  %v18546_v10 = vrot.slane %v15377_v19, 1  ;;  %v14670_v19 = vld [vmem:[%s18053_s4 + $0x58] sm:$0xff]  }
  0x92   : > { %12246 = vmatpush3.bf16.msra.mxu0 %v14665_v46  ;;  %18545 = vst [vmem:[#allocation117_spill] sm:$0xff] %v15761_v25  ;;  %v18548_v46 = vld [vmem:[#allocation9_spill] sm:$0xff] }
  0x94   : > { %12448 = vmatpush3.bf16.msra.mxu1 %v14642_v7  ;;  %v15739_v7 = vsel %vm1223_vm4, %v18541_v5, %v18540_v11  ;;  %v18547_v11 = vrot.slane %v15373_v56, 1 }
  0x95   : > { %12449 = vmatprep.subr.bf16.mxu1 %v14643_v60 }
  0x96   : > { %12230 = vmatmul.mubr.bf16.gmra.mrb[16].mxu0 %v15021_v12  ;;  %v15772_v5 = vsel %vm1223_vm4, %v18547_v11, %v18546_v10  ;;  %v18549_v12 = vrot.slane %v15389_v50, 1  ;;  %v15792_v10 = vshll.u32 %v15373_v56, 16  ;;  %v18560_v50 = vrot.slane %v15455_v23, 1 }
  0x97   : > { %12418 = vmatmul.mubr.bf16.gmra.mrb[12].mxu1 %v15708_v26  ;;  %12233 = vmatprep.mubr.bf16.mxu0 %v15023_v13  ;;  %v14668_v13 = vld [vmem:[%s18053_s4 + $0x50] sm:$0xff]  }
  0x98   : > { %12421 = vmatprep.mubr.bf16.mxu1 %v15716_v2  ;;  %12450 = vmatpush3.bf16.msra.mxu1 %v14643_v60  ;;  %v15752_v60 = vshrl.u32 %v15333_v30, 16  ;;  %v15780_v63 = vsel %vm1223_vm4, %v18550_v34, %v18549_v12  ;;  %18554 = vst [vmem:[#allocation118_spill] sm:$0xff] %v15792_v10  ;;  %v15795_v34 = vshrl.u32 %v15398_v28, 16  ;;  %v18556_v12 = vrot.slane %v15414_v3, 1  ;;  %v14673_v3 = vld [vmem:[%s18053_s4 + $0x68] sm:$0xff]  }
  0x99   : > { %12451 = vmatprep.subr.bf16.mxu1 %v14644_v57  ;;  %18551 = vst [vmem:[#allocation9_spill] sm:$0xff] %v15780_v63  ;;  %v15814_v39 = vsel %vm1223_vm4, %v18561_v54, %v18560_v50  ;;  %v14674_v54 = vld [vmem:[%s18053_s4 + $0x70] sm:$0xff]   ;;  %v18570_v30 = vrot.slane %v15532_v40, 1 }
  0x9a   : > { %18544 = vst [vmem:[#allocation116_spill] sm:$0xff] %v15752_v60  ;;  %18555 = vst [vmem:[#allocation119_spill] sm:$0xff] %v15795_v34 }
  0x9c   : > { %12452 = vmatpush3.bf16.msra.mxu1 %v14644_v57  ;;  %v14667_v57 = vld [vmem:[%s18053_s4 + $0x48] sm:$0xff]  }
  0x9d   : > { %12485 = vmatprep.subr.bf16.mxu1 %v15723_v9  ;;  %12247 = vmatprep.subr.bf16.mxu0 %v14667_v57 }
  0x9e   : > { %12248 = vmatpush3.bf16.msra.mxu0 %v14667_v57  ;;  %v18559_v57 = vld [vmem:[#allocation11_spill] sm:$0xff] }
  0x9f   : > { %12422 = vmatmul.mubr.bf16.gmra.mrb[16].mxu1 %v15739_v7  ;;  %12249 = vmatprep.subr.bf16.mxu0 %v14668_v13  ;;  %18562 = vst [vmem:[#allocation11_spill] sm:$0xff] %v15814_v39 }
  0xa0   : > { %12425 = vmatprep.mubr.bf16.mxu1 %v15747_v51  ;;  %12234 = vmatmul.mubr.bf16.gmra.mrb[20].mxu0 %v18548_v46  ;;  %v15789_v46 = vshrl.u32 %v15373_v56, 16  ;;  %v18569_v56 = vrot.slane %v15536_v16, 1 }
  0xa1   : > { %12237 = vmatprep.mubr.bf16.mxu0 %v18552_v52  ;;  %v14671_v52 = vld [vmem:[%s18053_s4 + $0x60] sm:$0xff]  }
  0xa2   : > { %12250 = vmatpush3.bf16.msra.mxu0 %v14668_v13  ;;  %18553 = vst [vmem:[#allocation10_spill] sm:$0xff] %v15789_v46  ;;  %v18557_v13 = vrot.slane %v15419_v55, 1  ;;  %v15847_v50 = vsel %vm1223_vm4, %v18570_v30, %v18569_v56  ;;  %v14676_v30 = vld [vmem:[%s18053_s4 + $0x78] sm:$0xff]  }
  0xa3   : > { %12251 = vmatprep.subr.bf16.mxu0 %v14670_v19  ;;  %18571 = vst [vmem:[#allocation122_spill] sm:$0xff] %v15847_v50 }
  0xa4   : > { %v15806_v11 = vsel %vm1223_vm4, %v18557_v13, %v18556_v12  ;;  %v15825_v13 = vshll.u32 %v15398_v28, 16  ;;  %v1337_v28 = vor.u32 %v18568_v37, %v15543_v49 }
  0xa5   : > { %18558 = vst [vmem:[#allocation120_spill] sm:$0xff] %v15806_v11 }
  0xa6   : > { %12252 = vmatpush3.bf16.msra.mxu0 %v14670_v19  ;;  %v18563_v19 = vld [vmem:[#allocation12_spill] sm:$0xff] }
  0xa7   : > { %12426 = vmatmul.mubr.bf16.gmra.mrb[20].mxu1 %v15772_v5  ;;  %12253 = vmatprep.subr.bf16.mxu0 %v14671_v52  ;;  %18564 = vst [vmem:[#allocation12_spill] sm:$0xff] %v15825_v13 }
  0xa8   : > { %12429 = vmatprep.mubr.bf16.mxu1 %v15780_v63  ;;  %12238 = vmatmul.mubr.bf16.gmra.mrb[24].mxu0 %v18559_v57  ;;  %v18567_v57 = vrot.slane %v15514_v15, 2 }
  0xa9   : > { %12241 = vmatprep.mubr.bf16.mxu0 %v18563_v19  ;;  %v18566_v19 = vrot.slane %v15507_v43, 1  ;;  %v15851_v43 = vshrl.u32 %v18573_v47, 16 }
  0xaa   : > { %12254 = vmatpush3.bf16.msra.mxu0 %v14671_v52  ;;  %v15833_v52 = vshrl.u32 %v15419_v55, 16 }
  0xab   : > { %12255 = vmatprep.subr.bf16.mxu0 %v14673_v3  ;;  %v1329_v12 = vor.u32 %v18567_v57, %v18566_v19  ;;  %18574 = vst [vmem:[#allocation13_spill] sm:$0xff] %v15851_v43  ;;  %v15854_v57 = vshll.u32 %v18573_v47, 16  ;;  %v18576_v19 = vld [vmem:[#allocation19_spill] sm:$0xff] }
  0xac   : > { %18565 = vst [vmem:[#allocation121_spill] sm:$0xff] %v15833_v52  ;;  %v18207_v45 = vshrl.u32 %v18576_v19, 16  ;;  %v15858_v37 = vshll.u32 %v18576_v19, 16 }
  0xad   : > { %18575 = vst [vmem:[#allocation18_spill] sm:$0xff] %v15854_v57  ;;  %v1311_v56 = vrot.slane %v15854_v57, 2 }
  0xae   : > { %12256 = vmatpush3.bf16.msra.mxu0 %v14673_v3  ;;  %18577 = vst [vmem:[#allocation123_spill] sm:$0xff] %v15858_v37  ;;  %v15861_v3 = vsel %vm1304_vm5, %v1329_v12, %v1337_v28  ;;  %v1316_v49 = vrot.slane %v18207_v45, 1  ;;  %v1319_v15 = vrot.slane %v15858_v37, 2  ;;  %v18580_v28 = vrot.slane %v18579_v42, 2 }
  0xaf   : > { %12430 = vmatmul.mubr.bf16.gmra.mrb[24].mxu1 %v15806_v11  ;;  %12257 = vmatprep.subr.bf16.mxu0 %v14674_v54  ;;  %18578 = vst [vmem:[#allocation124_spill] sm:$0xff] %v15861_v3 }
  0xb0   : > { %12433 = vmatprep.mubr.bf16.mxu1 %v15814_v39  ;;  %12242 = vmatmul.mubr.bf16.gmra.mrb[28].mxu0 %v18572_v35  ;;  %v1308_v35 = vrot.slane %v15851_v43, 1  ;;  %v1354_v12 = vor.u32 %v18580_v28, %v15547_v17  ;;  %v18582_v43 = vld [vmem:[#allocation93_spill] sm:$0xff]  ;;  %v1320_v38 = vor.u32 %v1319_v15, %v1316_v49  ;;  %v18590_v28 = vld [vmem:[#allocation42_spill] sm:$0xff] }
  0xb1   : > { %v18583_v57 = vrot.slane %v18582_v43, 1  ;;  %v18588_v39 = vld [vmem:[#allocation101_spill] sm:$0xff] }
  0xb2   : > { %12258 = vmatpush3.bf16.msra.mxu0 %v14674_v54  ;;  %v1312_v37 = vor.u32 %v1311_v56, %v1308_v35  ;;  %v18589_v42 = vrot.slane %v18588_v39, 2  ;;  %v18591_v54 = vld [vmem:[#allocation34_spill] sm:$0xff]  ;;  %v18601_v56 = vrot.slane %v15578_v0, 2 }
  0xb3   : > { %v1346_v45 = vor.u32 %v18585_v53, %v18583_v57  ;;  %12259 = vmatprep.subr.bf16.mxu0 %v14676_v30  ;;  %v18592_v11 = vrot.slane %v18591_v54, 2  ;;  %v14646_v53 = vld [vmem:[%s18053_s4 + $0x148] sm:$0xff]   ;;  %v18605_v57 = vrot.slane %v15582_v29, 1 }
  0xb4   : > { %v15892_v63 = vsel %vm1304_vm5, %v1312_v37, %v1320_v38  ;;  %v14647_v38 = vld [vmem:[%s18053_s4 + $0x150] sm:$0xff]   ;;  %v18597_v37 = vld [vmem:[#allocation43_spill] sm:$0xff] }
  0xb5   : > { %v1371_v55 = vor.u32 %v18592_v11, %v18590_v28  ;;  %18593 = vst [vmem:[#allocation42_spill] sm:$0xff] %v15892_v63  ;;  %12261 = vmatprep.mubr.bf16.mxu0 %v15892_v63  ;;  %v15899_v15 = vsel %vm1304_vm5, %v1346_v45, %v1354_v12  ;;  %v18598_v45 = vld [vmem:[#allocation35_spill] sm:$0xff]  ;;  %v18602_v12 = vld [vmem:[#allocation44_spill] sm:$0xff]  ;;  %v18606_v11 = vrot.slane %v15585_v41, 2  ;;  %v18619_v41 = vrot.slane %v15599_v20, 2 }
  0xb6   : > { %12260 = vmatpush3.bf16.msra.mxu0 %v14676_v30  ;;  %18594 = vst [vmem:[#allocation126_spill] sm:$0xff] %v15899_v15  ;;  %v18599_v30 = vrot.slane %v18598_v45, 2 }
  0xb7   : > { %12434 = vmatmul.mubr.bf16.gmra.mrb[28].mxu1 %v15847_v50  ;;  %v18587_v50 = vrot.slane %v18586_v36, 1  ;;  %v1397_v45 = vor.u32 %v18606_v11, %v18605_v57  ;;  %v14650_v11 = vld [vmem:[%s18053_s4 + $0x160] sm:$0xff]   ;;  %v18618_v57 = vrot.slane %v15596_v22, 1 }
  0xb8   : > { %12453 = vmatprep.mubr.bf16.mxu1 %v15861_v3  ;;  %v1388_v35 = vor.u32 %v18599_v30, %v18597_v37 }
  0xb9   : > { %v1363_v17 = vor.u32 %v18589_v42, %v18587_v50  ;;  %12262 = vmatmul.mubr.bf16.vlgmr.msra.gmra.mrb[32].mxu0 %v15861_v3  ;;  %v18596_v50 = vld [vmem:[#allocation83_spill] sm:$0xff]  ;;  %v1431_v0 = vor.u32 %v18619_v41, %v18618_v57  ;;  %v14656_v41 = vld [vmem:[%s18053_s4 + $0x170] sm:$0xff]   ;;  %v15979_v57 = vshll.u32 %v15451_v24, 16 }
  0xba   : > { %12265 = vmatprep.mubr.bf16.mxu0 %v15899_v15 }
  0xbb   : > { %v15903_v42 = vsel %vm1304_vm5, %v1363_v17, %v1371_v55  ;;  %v18600_v55 = vrot.slane %v15575_v21, 1  ;;  %v18603_v17 = vld [vmem:[#allocation36_spill] sm:$0xff]  ;;  %18622 = vst [vmem:[#allocation129_spill] sm:$0xff] %v15979_v57 }
  0xbc   : > { %18595 = vst [vmem:[#allocation127_spill] sm:$0xff] %v15903_v42  ;;  %v18604_v28 = vrot.slane %v18603_v17, 2  ;;  %v18616_v17 = vld [vmem:[#allocation50_spill] sm:$0xff] }
  0xbd   : > { %v1380_v49 = vor.u32 %v18601_v56, %v18600_v55  ;;  %v18611_v55 = vld [vmem:[#allocation41_spill] sm:$0xff]  ;;  %v18617_v29 = vrot.slane %v18616_v17, 2  ;;  %v18629_v17 = vld [vmem:[#allocation58_spill] sm:$0xff] }
  0xbe   : > { %v1405_v54 = vor.u32 %v18604_v28, %v18602_v12  ;;  %v18612_v56 = vrot.slane %v18611_v55, 2  ;;  %v18615_v28 = vld [vmem:[#allocation54_spill] sm:$0xff]  ;;  %v18630_v22 = vrot.slane %v18629_v17, 2 }
  0xbf   : > { %12454 = vmatmul.mubr.bf16.vlgmr.msra.gmra.mrb[0].mxu1 %v15899_v15  ;;  %v15932_v37 = vsel %vm1304_vm5, %v1380_v49, %v1388_v35  ;;  %v15945_v35 = vshrl.u32 %v15451_v24, 16  ;;  %v1439_v21 = vor.u32 %v18617_v29, %v18615_v28  ;;  %v18628_v28 = vld [vmem:[#allocation63_spill] sm:$0xff]  ;;  %v18631_v29 = vrot.slane %v15666_v32, 1  ;;  %v18642_v17 = vld [vmem:[#allocation70_spill] sm:$0xff]  ;;  %v18643_v32 = vld [vmem:[#allocation69_spill] sm:$0xff] }
  0xc0   : > { %12486 = vmatpush3.bf16.msra.mxu1 %v15723_v9  ;;  %12457 = vmatprep.mubr.bf16.mxu1 %v15903_v42  ;;  %v14648_v9 = vld [vmem:[%s18053_s4 + $0x158] sm:$0xff]   ;;  %18607 = vst [vmem:[#allocation43_spill] sm:$0xff] %v15932_v37  ;;  %v15936_v30 = vsel %vm1304_vm5, %v1397_v45, %v1405_v54  ;;  %v18613_v54 = vrot.slane %v15588_v27, 1  ;;  %v18614_v45 = vrot.slane %v15591_v59, 2  ;;  %v1473_v55 = vor.u32 %v18630_v22, %v18628_v28 }
  0xc1   : > { %12487 = vmatprep.subr.bf16.mxu1 %v14646_v53  ;;  %12266 = vmatmul.mubr.bf16.gmra.mrb[36].mxu0 %v15903_v42  ;;  %18608 = vst [vmem:[#allocation44_spill] sm:$0xff] %v15936_v30  ;;  %18609 = vst [vmem:[#allocation128_spill] sm:$0xff] %v15945_v35  ;;  %v18632_v27 = vrot.slane %v15669_v6, 2  ;;  %v18635_v22 = vshrl.u32 %v15455_v23, 16  ;;  %v18640_v28 = vrot.slane %v15697_v8, 1  ;;  %v18645_v6 = vrot.slane %v15752_v60, 1 }
  0xc2   : > { %12269 = vmatprep.mubr.bf16.mxu0 %v15932_v37  ;;  %v1414_v12 = vor.u32 %v18614_v45, %v18613_v54  ;;  %v18660_v8 = vrot.slane %v15825_v13, 2 }
  0xc3   : > { %v1465_v20 = vor.u32 %v18632_v27, %v18631_v29  ;;  %v1571_v27 = vrot.slane %v18635_v22, 1  ;;  %v18636_v29 = vld [vmem:[#allocation89_spill] sm:$0xff]  ;;  %v18641_v22 = vrot.slane %v15728_v62, 2 }
  0xc4   : > { %12488 = vmatpush3.bf16.msra.mxu1 %v14646_v53  ;;  %v18610_v53 = vld [vmem:[#allocation46_spill] sm:$0xff] }
  0xc5   : > { %12489 = vmatprep.subr.bf16.mxu1 %v14647_v38  ;;  %v1422_v49 = vor.u32 %v18612_v56, %v18610_v53  ;;  %v14653_v53 = vld [vmem:[%s18053_s4 + $0x168] sm:$0xff]  }
  0xc7   : > { %12458 = vmatmul.mubr.bf16.gmra.mrb[4].mxu1 %v15932_v37  ;;  %v15966_v56 = vsel %vm1304_vm5, %v1414_v12, %v1422_v49  ;;  %v18624_v49 = vld [vmem:[#allocation53_spill] sm:$0xff] }
  0xc8   : > { %12461 = vmatprep.mubr.bf16.mxu1 %v15936_v30  ;;  %12490 = vmatpush3.bf16.msra.mxu1 %v14647_v38  ;;  %18620 = vst [vmem:[#allocation46_spill] sm:$0xff] %v15966_v56  ;;  %v15970_v38 = vsel %vm1304_vm5, %v1431_v0, %v1439_v21  ;;  %v18625_v54 = vrot.slane %v18624_v49, 2  ;;  %v18626_v0 = vrot.slane %v15613_v18, 1  ;;  %v18627_v21 = vrot.slane %v15638_v61, 2 }
  0xc9   : > { %12491 = vmatprep.subr.bf16.mxu1 %v14648_v9  ;;  %12270 = vmatmul.mubr.bf16.gmra.mrb[40].mxu0 %v15936_v30  ;;  %18621 = vst [vmem:[#allocation54_spill] sm:$0xff] %v15970_v38  ;;  %v18644_v49 = vrot.slane %v18643_v32, 2  ;;  %v18646_v61 = vrot.slane %v15761_v25, 2  ;;  %v18657_v32 = vld [vmem:[#allocation77_spill] sm:$0xff] }
  0xca   : > { %12273 = vmatprep.mubr.bf16.mxu0 %v15966_v56  ;;  %v1448_v12 = vor.u32 %v18627_v21, %v18626_v0  ;;  %v1574_v0 = vrot.slane %v18636_v29, 2  ;;  %v1482_v29 = vor.u32 %v18641_v22, %v18640_v28  ;;  %v18655_v28 = vrot.slane %v15792_v10, 2 }
  0xcb   : > { %v1507_v18 = vor.u32 %v18644_v49, %v18642_v17  ;;  %v1499_v59 = vor.u32 %v18646_v61, %v18645_v6  ;;  %v1566_v17 = vrot.slane %v15979_v57, 2  ;;  %v14683_v61 = vld [vmem:[%s18053_s4 + $0x8] sm:$0xff]   ;;  %v16049_v6 = vshrl.u32 %v15532_v40, 16  ;;  %v18656_v57 = vld [vmem:[#allocation82_spill] sm:$0xff] }
  0xcc   : > { %12492 = vmatpush3.bf16.msra.mxu1 %v14648_v9  ;;  %v18623_v9 = vld [vmem:[#allocation55_spill] sm:$0xff]  ;;  %v16052_v49 = vshll.u32 %v15532_v40, 16  ;;  %v18658_v60 = vrot.slane %v18657_v32, 2 }
  0xcd   : > { %12493 = vmatprep.subr.bf16.mxu1 %v14650_v11  ;;  %v1456_v45 = vor.u32 %v18625_v54, %v18623_v9  ;;  %v14659_v9 = vld [vmem:[%s18053_s4 + $0x178] sm:$0xff]   ;;  %18649 = vst [vmem:[#allocation130_spill] sm:$0xff] %v16049_v6 }
  0xce   : > { %18650 = vst [vmem:[#allocation131_spill] sm:$0xff] %v16052_v49 }
  0xcf   : > { %12462 = vmatmul.mubr.bf16.gmra.mrb[8].mxu1 %v15966_v56  ;;  %v16000_v54 = vsel %vm1304_vm5, %v1448_v12, %v1456_v45  ;;  %v16014_v45 = vld [vmem:[%s18053_s4 + $0x180] sm:$0xff]  }
  0xd0   : > { %12465 = vmatprep.mubr.bf16.mxu1 %v15970_v38  ;;  %12494 = vmatpush3.bf16.msra.mxu1 %v14650_v11  ;;  %18633 = vst [vmem:[#allocation55_spill] sm:$0xff] %v16000_v54  ;;  %v16004_v11 = vsel %vm1304_vm5, %v1465_v20, %v1473_v55  ;;  %v14681_v20 = vld [vmem:[%s18053_s4] sm:$0xff]   ;;  %v18637_v55 = vld [vmem:[#allocation68_spill] sm:$0xff] }
  0xd1   : > { %12495 = vmatprep.subr.bf16.mxu1 %v14653_v53  ;;  %12274 = vmatmul.mubr.bf16.gmra.mrb[44].mxu0 %v15970_v38  ;;  %18634 = vst [vmem:[#allocation63_spill] sm:$0xff] %v16004_v11 }
  0xd2   : > { %12277 = vmatprep.mubr.bf16.mxu0 %v16000_v54  ;;  %12293 = vmatprep.subr.bf16.mxu0 %v14681_v20 }
  0xd3   : > { %12294 = vmatpush3.bf16.msra.mxu0 %v14681_v20 }
  0xd4   : > { %12496 = vmatpush3.bf16.msra.mxu1 %v14653_v53  ;;  %v18638_v53 = vld [vmem:[#allocation64_spill] sm:$0xff]  ;;  %12295 = vmatprep.subr.bf16.mxu0 %v14683_v61 }
  0xd5   : > { %12497 = vmatprep.subr.bf16.mxu1 %v14656_v41  ;;  %v18639_v21 = vrot.slane %v18638_v53, 2  ;;  %v18659_v53 = vrot.slane %v15795_v34, 1 }
  0xd7   : > { %12466 = vmatmul.mubr.bf16.gmra.mrb[12].mxu1 %v16000_v54  ;;  %v1490_v12 = vor.u32 %v18639_v21, %v18637_v55  ;;  %v1533_v25 = vor.u32 %v18660_v8, %v18659_v53  ;;  %12296 = vmatpush3.bf16.msra.mxu0 %v14683_v61  ;;  %v2618_v8 = vrot.slane %v16049_v6, 1  ;;  %v2621_v53 = vrot.slane %v16052_v49, 2 }
  0xd8   : > { %12469 = vmatprep.mubr.bf16.mxu1 %v16004_v11  ;;  %12498 = vmatpush3.bf16.msra.mxu1 %v14656_v41  ;;  %v16039_v41 = vsel %vm1304_vm5, %v1499_v59, %v1507_v18  ;;  %v14684_v59 = vld [vmem:[%s18053_s4 + $0x10] sm:$0xff]   ;;  %v1541_v18 = vor.u32 %v18658_v60, %v18656_v57  ;;  %v14686_v57 = vld [vmem:[%s18053_s4 + $0x18] sm:$0xff]   ;;  %v18664_v61 = vshrl.u32 %v15536_v16, 16  ;;  %v18669_v49 = vrot.slane %v15945_v35, 1 }
  0xd9   : > { %12499 = vmatprep.subr.bf16.mxu1 %v14659_v9  ;;  %v16035_v55 = vsel %vm1304_vm5, %v1482_v29, %v1490_v12  ;;  %12278 = vmatmul.mubr.bf16.gmra.mrb[48].mxu0 %v16004_v11  ;;  %18648 = vst [vmem:[#allocation70_spill] sm:$0xff] %v16039_v41  ;;  %v18652_v29 = vld [vmem:[#allocation74_spill] sm:$0xff]  ;;  %v18654_v12 = vrot.slane %v15789_v46, 1  ;;  %v2892_v35 = vrot.slane %v15536_v16, 2 }
  0xda   : > { %18647 = vst [vmem:[#allocation68_spill] sm:$0xff] %v16035_v55  ;;  %12281 = vmatprep.mubr.bf16.mxu0 %v16035_v55  ;;  %v18653_v20 = vrot.slane %v18652_v29, 2  ;;  %12297 = vmatprep.subr.bf16.mxu0 %v14684_v59  ;;  %v1567_v32 = vor.u32 %v1566_v17, %v18669_v49  ;;  %v1224_v49 = vrot.slane %v18573_v47, 1  ;;  %v14678_v29 = vld [vmem:[%s18053_s4 + $0x1c8] sm:$0xff]  }
  0xdb   : > { %v1516_v22 = vor.u32 %v18655_v28, %v18654_v12  ;;  %12298 = vmatpush3.bf16.msra.mxu0 %v14684_v59  ;;  %v18663_v12 = vld [vmem:[#allocation100_spill] sm:$0xff]  ;;  %v18666_v59 = vrot.slane %v15877_v44, 2  ;;  %v18691_v44 = vld [vmem:[#allocation11_spill] sm:$0xff] }
  0xdc   : > { %12500 = vmatpush3.bf16.msra.mxu1 %v14659_v9  ;;  %v18651_v9 = vld [vmem:[#allocation81_spill] sm:$0xff]  ;;  %v2629_v60 = vrot.slane %v18663_v12, 2  ;;  %v18668_v12 = vrot.slane %v18596_v50, 2  ;;  %12299 = vmatprep.subr.bf16.mxu0 %v14686_v57 }
  0xdd   : > { %12533 = vmatprep.subr.bf16.mxu1 %v16014_v45  ;;  %v1524_v21 = vor.u32 %v18653_v20, %v18651_v9  ;;  %v16078_v20 = vsel %vm1304_vm5, %v1533_v25, %v1541_v18  ;;  %v14687_v25 = vld [vmem:[%s18053_s4 + $0x20] sm:$0xff]   ;;  %v18665_v18 = vrot.slane %v15833_v52, 1 }
  0xde   : > { %18662 = vst [vmem:[#allocation82_spill] sm:$0xff] %v16078_v20 }
  0xdf   : > { %12470 = vmatmul.mubr.bf16.gmra.mrb[16].mxu1 %v16035_v55  ;;  %v16074_v9 = vsel %vm1304_vm5, %v1516_v22, %v1524_v21  ;;  %v2626_v21 = vrot.slane %v18664_v61, 1  ;;  %v1550_v28 = vor.u32 %v18666_v59, %v18665_v18  ;;  %v18667_v22 = vld [vmem:[#allocation85_spill] sm:$0xff]  ;;  %v1575_v61 = vor.u32 %v1574_v0, %v1571_v27  ;;  %12300 = vmatpush3.bf16.msra.mxu0 %v14686_v57 }
  0xe0   : > { %12473 = vmatprep.mubr.bf16.mxu1 %v16039_v41  ;;  %18661 = vst [vmem:[#allocation81_spill] sm:$0xff] %v16074_v9  ;;  %v1558_v6 = vor.u32 %v18668_v12, %v18667_v22  ;;  %12301 = vmatprep.subr.bf16.mxu0 %v14687_v25  ;;  %v14689_v12 = vld [vmem:[%s18053_s4 + $0x28] sm:$0xff]   ;;  %v14690_v27 = vld [vmem:[%s18053_s4 + $0x30] sm:$0xff]   ;;  %v2622_v0 = vor.u32 %v2621_v53, %v2618_v8  ;;  %v1225_v57 = vrot.slane %v18576_v19, 1  ;;  %v18677_v22 = vld [vmem:[#allocation38_spill] sm:$0xff] }
  0xe1   : > { %12282 = vmatmul.mubr.bf16.gmra.mrb[52].mxu0 %v16039_v41  ;;  %v16108_v52 = vsel %vm1304_vm5, %v1567_v32, %v1575_v61  ;;  %v2630_v17 = vor.u32 %v2629_v60, %v2626_v21  ;;  %v18673_v60 = vld [vmem:[#allocation24_spill] sm:$0xff]  ;;  %v18674_v21 = vld [vmem:[#allocation98_spill] sm:$0xff]  ;;  %v14663_v18 = vld [vmem:[%s18053_s4 + $0x190] sm:$0xff]  }
  0xe2   : > { %12285 = vmatprep.mubr.bf16.mxu0 %v16074_v9  ;;  %v16104_v34 = vsel %vm1304_vm5, %v1550_v28, %v1558_v6  ;;  %18671 = vst [vmem:[#allocation132_spill] sm:$0xff] %v16108_v52  ;;  %v14692_v6 = vld [vmem:[%s18053_s4 + $0x38] sm:$0xff]   ;;  %v1226_v8 = vsel %vm1223_vm4, %v1224_v49, %v1225_v57  ;;  %v14662_v53 = vld [vmem:[%s18053_s4 + $0x188] sm:$0xff]   ;;  %v18676_v59 = vld [vmem:[#allocation37_spill] sm:$0xff] }
  0xe3   : > { %18670 = vst [vmem:[#allocation85_spill] sm:$0xff] %v16104_v34  ;;  %12302 = vmatpush3.bf16.msra.mxu0 %v14687_v25  ;;  %v16120_v32 = vsel %vm1304_vm5, %v2622_v0, %v2630_v17  ;;  %v18675_v25 = vld [vmem:[#allocation29_spill] sm:$0xff]  ;;  %v14664_v28 = vld [vmem:[%s18053_s4 + $0x198] sm:$0xff]   ;;  %v14666_v61 = vld [vmem:[%s18053_s4 + $0x1a0] sm:$0xff]  }
  0xe4   : > { %12303 = vmatprep.subr.bf16.mxu0 %v14689_v12  ;;  %18672 = vst [vmem:[#allocation133_spill] sm:$0xff] %v16120_v32  ;;  %v18680_v0 = vld [vmem:[#allocation60_spill] sm:$0xff]  ;;  %v14672_v17 = vld [vmem:[%s18053_s4 + $0x1b0] sm:$0xff]   ;;  %v18682_v57 = vld [vmem:[#allocation67_spill] sm:$0xff] }
  0xe5   : > { %v18681_v49 = vld [vmem:[#allocation61_spill] sm:$0xff] }
  0xe7   : > { %12474 = vmatmul.mubr.bf16.gmra.mrb[20].mxu1 %v16074_v9  ;;  %12304 = vmatpush3.bf16.msra.mxu0 %v14689_v12  ;;  %v14669_v12 = vld [vmem:[%s18053_s4 + $0x1a8] sm:$0xff]  }
  0xe8   : > { %12477 = vmatprep.mubr.bf16.mxu1 %v16078_v20  ;;  %12305 = vmatprep.subr.bf16.mxu0 %v14690_v27 }
  0xe9   : > { %12286 = vmatmul.mubr.bf16.gmra.mrb[56].mxu0 %v16078_v20 }
  0xea   : > { %12289 = vmatprep.mubr.bf16.mxu0 %v16104_v34 }
  0xeb   : > { %12306 = vmatpush3.bf16.msra.mxu0 %v14690_v27  ;;  %v18679_v27 = vld [vmem:[#allocation49_spill] sm:$0xff] }
  0xec   : > { %12307 = vmatprep.subr.bf16.mxu0 %v14692_v6 }
  0xef   : > { %12478 = vmatmul.mubr.bf16.gmra.mrb[24].mxu1 %v16104_v34  ;;  %12308 = vmatpush3.bf16.msra.mxu0 %v14692_v6  ;;  %v14675_v6 = vld [vmem:[%s18053_s4 + $0x1b8] sm:$0xff]  }
  0xf0   : > { %12481 = vmatprep.mubr.bf16.mxu1 %v16108_v52 }
  0xf1   : > { %12290 = vmatmul.mubr.bf16.gmra.mrb[60].mxu0 %v16108_v52 }
  0xf2   : > { %12309 = vmatprep.mubr.bf16.mxu0 %v1226_v8  ;;  %v18683_v8 = vld [vmem:[#allocation73_spill] sm:$0xff] }
  0xf7   : > { %12482 = vmatmul.mubr.bf16.gmra.mrb[28].mxu1 %v16120_v32 }
  0xf8   : > { %12501 = vmatprep.mubr.bf16.mxu1 %v18673_v60  ;;  %v14677_v60 = vld [vmem:[%s18053_s4 + $0x1c0] sm:$0xff]  }
  0xf9   : > { %12310 = vmatmul.mubr.bf16.vlgmr.msra.gmra.mrb[32].mxu0 %v18674_v21  ;;  %v18685_v21 = vld [vmem:[#allocation84_spill] sm:$0xff] }
  0xfa   : > { %12313 = vmatprep.mubr.bf16.mxu0 %v15606_v14 }
  0xff   : > { %12502 = vmatmul.mubr.bf16.vlgmr.msra.gmra.mrb[0].mxu1 %v18675_v25 }
 0x100   : > { %12534 = vmatpush3.bf16.msra.mxu1 %v16014_v45  ;;  %12505 = vmatprep.mubr.bf16.mxu1 %v18676_v59  ;;  %v18678_v45 = vld [vmem:[#allocation45_spill] sm:$0xff] }
 0x101   : > { %12535 = vmatprep.subr.bf16.mxu1 %v14662_v53  ;;  %12314 = vmatmul.mubr.bf16.gmra.mrb[36].mxu0 %v15625_v58 }
 0x102   : > { %12317 = vmatprep.mubr.bf16.mxu0 %v15650_v33 }
 0x104   : > { %12536 = vmatpush3.bf16.msra.mxu1 %v14662_v53  ;;  %v18684_v53 = vld [vmem:[#allocation78_spill] sm:$0xff] }
 0x105   : > { %12537 = vmatprep.subr.bf16.mxu1 %v14663_v18 }
 0x107   : > { %12506 = vmatmul.mubr.bf16.gmra.mrb[4].mxu1 %v18677_v22 }
 0x108   : > { %12509 = vmatprep.mubr.bf16.mxu1 %v18678_v45  ;;  %12538 = vmatpush3.bf16.msra.mxu1 %v14663_v18  ;;  %v18686_v18 = vld [vmem:[#allocation88_spill] sm:$0xff] }
 0x109   : > { %12539 = vmatprep.subr.bf16.mxu1 %v14664_v28  ;;  %12318 = vmatmul.mubr.bf16.gmra.mrb[40].mxu0 %v15658_v31 }
 0x10a   : > { %12321 = vmatprep.mubr.bf16.mxu0 %v15680_v1 }
 0x10c   : > { %12540 = vmatpush3.bf16.msra.mxu1 %v14664_v28  ;;  %v18687_v28 = vld [vmem:[#allocation9_spill] sm:$0xff] }
 0x10d   : > { %12541 = vmatprep.subr.bf16.mxu1 %v14666_v61 }
 0x10f   : > { %12510 = vmatmul.mubr.bf16.gmra.mrb[8].mxu1 %v18679_v27 }
 0x110   : > { %12513 = vmatprep.mubr.bf16.mxu1 %v18680_v0  ;;  %12542 = vmatpush3.bf16.msra.mxu1 %v14666_v61  ;;  %v18688_v61 = vld [vmem:[#allocation120_spill] sm:$0xff] }
 0x111   : > { %12543 = vmatprep.subr.bf16.mxu1 %v14669_v12  ;;  %12322 = vmatmul.mubr.bf16.gmra.mrb[44].mxu0 %v15688_v4 }
 0x112   : > { %12325 = vmatprep.mubr.bf16.mxu0 %v15708_v26 }
 0x114   : > { %12544 = vmatpush3.bf16.msra.mxu1 %v14669_v12  ;;  %v18689_v12 = vld [vmem:[#allocation90_spill] sm:$0xff] }
 0x115   : > { %12545 = vmatprep.subr.bf16.mxu1 %v14672_v17 }
 0x117   : > { %12514 = vmatmul.mubr.bf16.gmra.mrb[12].mxu1 %v18681_v49 }
 0x118   : > { %12517 = vmatprep.mubr.bf16.mxu1 %v18682_v57  ;;  %12546 = vmatpush3.bf16.msra.mxu1 %v14672_v17  ;;  %v18690_v17 = vld [vmem:[#allocation95_spill] sm:$0xff] }
 0x119   : > { %12547 = vmatprep.subr.bf16.mxu1 %v14675_v6  ;;  %12326 = vmatmul.mubr.bf16.gmra.mrb[48].mxu0 %v15716_v2 }
 0x11a   : > { %12329 = vmatprep.mubr.bf16.mxu0 %v15739_v7 }
 0x11c   : > { %12548 = vmatpush3.bf16.msra.mxu1 %v14675_v6  ;;  %v2891_v6 = vrot.slane %v15532_v40, 2 }
 0x11d   : > { %12581 = vmatprep.subr.bf16.mxu1 %v14677_v60 }
 0x11e   : > { %v16187_v50 = vsel %vm2028_vm3, %v2891_v6, %v2892_v35  ;;  %v14679_v35 = vld [vmem:[%s18053_s4 + $0x1d0] sm:$0xff]  }
 0x11f   : > { %12518 = vmatmul.mubr.bf16.gmra.mrb[16].mxu1 %v18683_v8 }
 0x120   : > { %12521 = vmatprep.mubr.bf16.mxu1 %v18684_v53 }
 0x121   : > { %12330 = vmatmul.mubr.bf16.gmra.mrb[52].mxu0 %v15747_v51 }
 0x122   : > { %12333 = vmatprep.mubr.bf16.mxu0 %v15772_v5 }
 0x127   : > { %12522 = vmatmul.mubr.bf16.gmra.mrb[20].mxu1 %v18685_v21 }
 0x128   : > { %12525 = vmatprep.mubr.bf16.mxu1 %v18686_v18 }
 0x129   : > { %12334 = vmatmul.mubr.bf16.gmra.mrb[56].mxu0 %v18687_v28 }
 0x12a   : > { %12337 = vmatprep.mubr.bf16.mxu0 %v18688_v61 }
 0x12f   : > { %12526 = vmatmul.mubr.bf16.gmra.mrb[24].mxu1 %v18689_v12 }
 0x130   : > { %12529 = vmatprep.mubr.bf16.mxu1 %v18690_v17 }
 0x131   : > { %12338 = vmatmul.mubr.bf16.gmra.mrb[60].mxu0 %v18691_v44 }
 0x137   : > { %12530 = vmatmul.mubr.bf16.gmra.mrb[28].mxu1 %v16187_v50 }
 0x138   : > { %12549 = vmatprep.mubr.bf16.mxu1 %v15606_v14  ;;  %v14680_v14 = vld [vmem:[%s18053_s4 + $0x1d8] sm:$0xff]  }
 0x13f   : > { %12550 = vmatmul.mubr.bf16.vlgmr.msra.gmra.mrb[0].mxu1 %v15625_v58  ;;  %v14682_v58 = vld [vmem:[%s18053_s4 + $0x1e0] sm:$0xff]  }
 0x140   : > { %12582 = vmatpush3.bf16.msra.mxu1 %v14677_v60  ;;  %12553 = vmatprep.mubr.bf16.mxu1 %v15650_v33  ;;  %v14685_v33 = vld [vmem:[%s18053_s4 + $0x1e8] sm:$0xff]  }
 0x141   : > { %12583 = vmatprep.subr.bf16.mxu1 %v14678_v29 }
 0x144   : > { %12584 = vmatpush3.bf16.msra.mxu1 %v14678_v29 }
 0x145   : > { %12585 = vmatprep.subr.bf16.mxu1 %v14679_v35 }
 0x147   : > { %12554 = vmatmul.mubr.bf16.gmra.mrb[4].mxu1 %v15658_v31  ;;  %v14688_v31 = vld [vmem:[%s18053_s4 + $0x1f0] sm:$0xff]  }
 0x148   : > { %12557 = vmatprep.mubr.bf16.mxu1 %v15680_v1  ;;  %12586 = vmatpush3.bf16.msra.mxu1 %v14679_v35  ;;  %v14691_v1 = vld [vmem:[%s18053_s4 + $0x1f8] sm:$0xff]  }
 0x149   : > { %12587 = vmatprep.subr.bf16.mxu1 %v14680_v14 }
 0x14c   : > { %12588 = vmatpush3.bf16.msra.mxu1 %v14680_v14 }
 0x14d   : > { %12589 = vmatprep.subr.bf16.mxu1 %v14682_v58 }
 0x14f   : > { %12558 = vmatmul.mubr.bf16.gmra.mrb[8].mxu1 %v15688_v4  ;;  %v14693_v4 = vld [vmem:[%s18053_s4 + $0x200] sm:$0xff]  }
 0x150   : > { %12561 = vmatprep.mubr.bf16.mxu1 %v15708_v26  ;;  %12590 = vmatpush3.bf16.msra.mxu1 %v14682_v58  ;;  %v18692_v26 = vld [vmem:[#allocation14_spill] sm:$0xff] }
 0x151   : > { %12591 = vmatprep.subr.bf16.mxu1 %v14685_v33  ;;  %v803_v29 = vshrl.u32 %v18692_v26, 16  ;;  %v806_v60 = vshll.u32 %v18692_v26, 16  ;;  %v12215_v26 = vpop.f32.mrb[0].mxu0 }
 0x153   : > { %v805_v6 = vrot.slane %v803_v29, 6  ;;  %v16267_v29 = vld [vmem:[%s18052_s3] ss:$0 sm:$0xff] }
 0x154   : > { %12592 = vmatpush3.bf16.msra.mxu1 %v14685_v33 }
 0x155   : > { %12593 = vmatprep.subr.bf16.mxu1 %v14688_v31 }
 0x157   : > { %12562 = vmatmul.mubr.bf16.gmra.mrb[12].mxu1 %v15716_v2  ;;  %v808_v2 = vrot.slane %v806_v60, 7  ;;  %v1009_v60 = vadd.f32 %v12215_v26, %v16267_v29 }
 0x158   : > { %12565 = vmatprep.mubr.bf16.mxu1 %v15739_v7  ;;  %12594 = vmatpush3.bf16.msra.mxu1 %v14688_v31  ;;  %v14696_v31 = vld [vmem:[%s18053_s4 + $0x218] sm:$0xff]  }
 0x159   : > { %12595 = vmatprep.subr.bf16.mxu1 %v14691_v1  ;;  %v809_v7 = vor.u32 %v808_v2, %v805_v6  ;;  %v1000_v6 = vpop.f32.mrb[1].mxu0  ;;  %v14699_v2 = vld [vmem:[%s18053_s4 + $0x230] sm:$0xff]  }
 0x15b   : > { %v16232_v14 = vsel %vm15041_vm2, 0, %v809_v7 }
 0x15c   : > { %12596 = vmatpush3.bf16.msra.mxu1 %v14691_v1  ;;  %18694 = vst [vmem:[#allocation24_spill] sm:$0xff] %v16232_v14  ;;  %v3155_v58 = vrot.slane %v16232_v14, 1  ;;  %v14697_v1 = vld [vmem:[%s18053_s4 + $0x220] sm:$0xff]  }
 0x15d   : > { %12629 = vmatprep.subr.bf16.mxu1 %v14693_v4 }
 0x15f   : > { %12566 = vmatmul.mubr.bf16.gmra.mrb[16].mxu1 %v15747_v51  ;;  %v16236_v51 = vsel %vm15041_vm2, %v809_v7, 0  ;;  %v1001_v7 = vadd.f32 %v16267_v29, %v1000_v6 }
 0x160   : > { %12569 = vmatprep.mubr.bf16.mxu1 %v15772_v5  ;;  %18695 = vst [vmem:[#allocation98_spill] sm:$0xff] %v16236_v51  ;;  %v18696_v5 = vld [vmem:[#allocation122_spill] sm:$0xff]  ;;  %v3156_v33 = vrot.slane %v16236_v51, 1  ;;  %v18706_v39 = vshrl.u32 %v16236_v51, 16 }
 0x162   : > { %v3428_v48 = vrot.slane %v18706_v39, 1 }
 0x167   : > { %12570 = vmatmul.mubr.bf16.gmra.mrb[20].mxu1 %v18687_v28  ;;  %v3157_v28 = vsel %vm1223_vm4, %v3155_v58, %v3156_v33  ;;  %v1129_v58 = vmax.f32 %v1009_v60, 0.0 }
 0x168   : > { %12573 = vmatprep.mubr.bf16.mxu1 %v18688_v61  ;;  %v14694_v61 = vld [vmem:[%s18053_s4 + $0x208] sm:$0xff]  }
 0x16f   : > { %12574 = vmatmul.mubr.bf16.gmra.mrb[24].mxu1 %v18691_v44  ;;  %v14695_v44 = vld [vmem:[%s18053_s4 + $0x210] sm:$0xff]  }
 0x170   : > { %12577 = vmatprep.mubr.bf16.mxu1 %v18696_v5  ;;  %v12216_v5 = vpop.f32.mrb[2].mxu0 }
 0x171   : > { %v1012_v33 = vadd.f32 %v12216_v5, %v16267_v29  ;;  %v16290_v5 = vld [vmem:[%s18055_s6 + $0x40] sm:$0xff]  }
 0x177   : > { %12578 = vmatmul.mubr.bf16.gmra.mrb[28].mxu1 %v3157_v28  ;;  %v1003_v28 = vpop.f32.mrb[3].mxu0 }
 0x178   : > { %12597 = vmatprep.mubr.bf16.mxu1 %v15899_v15  ;;  %v12219_v60 = vpop.f32.mrb[4].mxu0 }
 0x17f   : > { %12598 = vmatmul.mubr.bf16.vlgmr.msra.gmra.mrb[0].mxu1 %v15903_v42 }
 0x180   : > { %12630 = vmatpush3.bf16.msra.mxu1 %v14693_v4  ;;  %12601 = vmatprep.mubr.bf16.mxu1 %v15932_v37  ;;  %v14698_v4 = vld [vmem:[%s18053_s4 + $0x228] sm:$0xff]  }
 0x181   : > { %12631 = vmatprep.subr.bf16.mxu1 %v14694_v61 }
 0x184   : > { %12632 = vmatpush3.bf16.msra.mxu1 %v14694_v61  ;;  %v1127_v61 = vmax.f32 %v1001_v7, 0.0  ;;  %v1025_v7 = vadd.f32 %v12219_v60, %v16267_v29 }
 0x185   : > { %12633 = vmatprep.subr.bf16.mxu1 %v14695_v44 }
 0x187   : > { %12602 = vmatmul.mubr.bf16.gmra.mrb[4].mxu1 %v15936_v30 }
 0x188   : > { %12605 = vmatprep.mubr.bf16.mxu1 %v15966_v56  ;;  %12634 = vmatpush3.bf16.msra.mxu1 %v14695_v44  ;;  %v1004_v44 = vadd.f32 %v16267_v29, %v1003_v28  ;;  %v1133_v28 = vmax.f32 %v1025_v7, 0.0 }
 0x189   : > { %12635 = vmatprep.subr.bf16.mxu1 %v14696_v31 }
 0x18a   : > { %v1128_v26 = vmax.f32 %v1004_v44, 0.0 }
 0x18c   : > { %12636 = vmatpush3.bf16.msra.mxu1 %v14696_v31  ;;  %v1130_v31 = vmax.f32 %v1012_v33, 0.0  ;;  %v16283_v6 = vpack.c.bf16 %v1128_v26, %v1127_v61 }
 0x18d   : > { %12637 = vmatprep.subr.bf16.mxu1 %v14697_v1 }
 0x18e   : > { %v16280_v46 = vpack.c.bf16 %v1130_v31, %v1129_v58  ;;  %18698 = vst [vmem:[#allocation37_spill] sm:$0xff] %v16283_v6 }
 0x18f   : > { %12606 = vmatmul.mubr.bf16.gmra.mrb[8].mxu1 %v15970_v38 }
 0x190   : > { %12609 = vmatprep.mubr.bf16.mxu1 %v16000_v54  ;;  %12638 = vmatpush3.bf16.msra.mxu1 %v14697_v1  ;;  %v14700_v1 = vld [vmem:[%s18053_s4 + $0x238] sm:$0xff]   ;;  %18697 = vst [vmem:[#allocation29_spill] sm:$0xff] %v16280_v46 }
 0x191   : > { %12639 = vmatprep.subr.bf16.mxu1 %v14698_v4 }
 0x194   : > { %12640 = vmatpush3.bf16.msra.mxu1 %v14698_v4  ;;  %v1016_v4 = vpop.f32.mrb[5].mxu0 }
 0x195   : > { %12641 = vmatprep.subr.bf16.mxu1 %v14699_v2  ;;  %v1017_v58 = vadd.f32 %v16267_v29, %v1016_v4  ;;  %v12220_v33 = vpop.f32.mrb[6].mxu0 }
 0x196   : > { %v1028_v61 = vadd.f32 %v12220_v33, %v16267_v29  ;;  %v1019_v44 = vpop.f32.mrb[7].mxu0 }
 0x197   : > { %12610 = vmatmul.mubr.bf16.gmra.mrb[12].mxu1 %v16004_v11  ;;  %v1131_v31 = vmax.f32 %v1017_v58, 0.0  ;;  %v1020_v26 = vadd.f32 %v16267_v29, %v1019_v44  ;;  %v12223_v4 = vpop.f32.mrb[8].mxu0 }
 0x198   : > { %12613 = vmatprep.mubr.bf16.mxu1 %v16035_v55  ;;  %12642 = vmatpush3.bf16.msra.mxu1 %v14699_v2  ;;  %v1134_v2 = vmax.f32 %v1028_v61, 0.0  ;;  %v1041_v7 = vadd.f32 %v12223_v4, %v16267_v29  ;;  %v1032_v33 = vpop.f32.mrb[9].mxu0 }
 0x199   : > { %12643 = vmatprep.subr.bf16.mxu1 %v14700_v1  ;;  %v1132_v60 = vmax.f32 %v1020_v26, 0.0  ;;  %v1033_v58 = vadd.f32 %v16267_v29, %v1032_v33  ;;  %v12224_v44 = vpop.f32.mrb[10].mxu0 }
 0x19a   : > { %v16296_v13 = vpack.c.bf16 %v1134_v2, %v1133_v28  ;;  %v1044_v61 = vadd.f32 %v12224_v44, %v16267_v29  ;;  %v1035_v62 = vpop.f32.mrb[11].mxu0 }
 0x19b   : > { %v16299_v10 = vpack.c.bf16 %v1132_v60, %v1131_v31  ;;  %v1135_v26 = vmax.f32 %v1033_v58, 0.0  ;;  %v1036_v28 = vadd.f32 %v16267_v29, %v1035_v62  ;;  %v16310_v60 = vshrl.u32 %v16232_v14, 16  ;;  %v12227_v33 = vpop.f32.mrb[12].mxu0 }
 0x19c   : > { %12644 = vmatpush3.bf16.msra.mxu1 %v14700_v1  ;;  %18699 = vst [vmem:[#allocation38_spill] sm:$0xff] %v16296_v13  ;;  %v1137_v1 = vmax.f32 %v1041_v7, 0.0  ;;  %v1138_v2 = vmax.f32 %v1044_v61, 0.0  ;;  %v16316_v7 = vshll.u32 %v16232_v14, 16  ;;  %v16320_v62 = vshll.u32 %v16236_v51, 16 }
 0x19d   : > { %13253 = vmatprep.subr.bf16.mxu1 %v16290_v5  ;;  %18700 = vst [vmem:[#allocation45_spill] sm:$0xff] %v16299_v10  ;;  %v1136_v16 = vmax.f32 %v1036_v28, 0.0  ;;  %18702 = vst [vmem:[#allocation60_spill] sm:$0xff] %v16310_v60  ;;  %v1057_v44 = vadd.f32 %v12227_v33, %v16267_v29  ;;  %v3420_v23 = vrot.slane %v16310_v60, 1 }
 0x19e   : > { %v16306_v31 = vpack.c.bf16 %v1138_v2, %v1137_v1  ;;  %18704 = vst [vmem:[#allocation67_spill] sm:$0xff] %v16316_v7  ;;  %18705 = vst [vmem:[#allocation73_spill] sm:$0xff] %v16320_v62  ;;  %v1048_v1 = vpop.f32.mrb[13].mxu0  ;;  %v3423_v58 = vrot.slane %v16316_v7, 2  ;;  %v3431_v33 = vrot.slane %v16320_v62, 2 }
 0x19f   : > { %12614 = vmatmul.mubr.bf16.gmra.mrb[16].mxu1 %v16039_v41  ;;  %v16312_v4 = vpack.c.bf16 %v1136_v16, %v1135_v26  ;;  %v1049_v61 = vadd.f32 %v16267_v29, %v1048_v1  ;;  %v12228_v28 = vpop.f32.mrb[14].mxu0  ;;  %v1141_v2 = vmax.f32 %v1057_v44, 0.0 }
 0x1a0   : > { %12617 = vmatprep.mubr.bf16.mxu1 %v16074_v9  ;;  %18701 = vst [vmem:[#allocation49_spill] sm:$0xff] %v16306_v31  ;;  %v1060_v16 = vadd.f32 %v12228_v28, %v16267_v29  ;;  %v1051_v26 = vpop.f32.mrb[15].mxu0 }
 0x1a1   : > { %18703 = vst [vmem:[#allocation61_spill] sm:$0xff] %v16312_v4  ;;  %v1139_v36 = vmax.f32 %v1049_v61, 0.0  ;;  %v1052_v43 = vadd.f32 %v16267_v29, %v1051_v26  ;;  %v12231_v28 = vpop.f32.mrb[16].mxu0  ;;  %v3424_v61 = vor.u32 %v3423_v58, %v3420_v23  ;;  %v3432_v26 = vor.u32 %v3431_v33, %v3428_v48 }
 0x1a2   : > { %v1073_v60 = vadd.f32 %v12231_v28, %v16267_v29  ;;  %v1064_v7 = vpop.f32.mrb[17].mxu0 }
 0x1a3   : > { %v1140_v40 = vmax.f32 %v1052_v43, 0.0  ;;  %v1065_v39 = vadd.f32 %v16267_v29, %v1064_v7  ;;  %v12232_v24 = vpop.f32.mrb[18].mxu0 }
 0x1a4   : > { %v1145_v62 = vmax.f32 %v1073_v60, 0.0  ;;  %v1076_v43 = vadd.f32 %v12232_v24, %v16267_v29 }
 0x1a5   : > { %v16334_v44 = vpack.c.bf16 %v1140_v40, %v1139_v36  ;;  %v16342_v36 = vsel %vm1304_vm5, %v3424_v61, %v3432_v26 }
 0x1a6   : > { %18709 = vst [vmem:[#allocation88_spill] sm:$0xff] %v16342_v36  ;;  %v1146_v40 = vmax.f32 %v1076_v43, 0.0 }
 0x1a7   : > { %12618 = vmatmul.mubr.bf16.gmra.mrb[20].mxu1 %v16078_v20  ;;  %18708 = vst [vmem:[#allocation84_spill] sm:$0xff] %v16334_v44 }
 0x1a8   : > { %12621 = vmatprep.mubr.bf16.mxu1 %v16104_v34  ;;  %v1142_v34 = vmax.f32 %v1060_v16, 0.0  ;;  %v16344_v23 = vpack.c.bf16 %v1146_v40, %v1145_v62 }
 0x1aa   : > { %v16331_v1 = vpack.c.bf16 %v1142_v34, %v1141_v2  ;;  %v1067_v34 = vpop.f32.mrb[19].mxu0  ;;  %v1143_v2 = vmax.f32 %v1065_v39, 0.0  ;;  %18710 = vst [vmem:[#allocation9_spill] sm:$0xff] %v16344_v23 }
 0x1ab   : > { %v1068_v16 = vadd.f32 %v16267_v29, %v1067_v34  ;;  %v12235_v7 = vpop.f32.mrb[20].mxu0 }
 0x1ac   : > { %18707 = vst [vmem:[#allocation78_spill] sm:$0xff] %v16331_v1  ;;  %v1089_v24 = vadd.f32 %v12235_v7, %v16267_v29  ;;  %v1080_v60 = vpop.f32.mrb[21].mxu0 }
 0x1ad   : > { %v1081_v58 = vadd.f32 %v16267_v29, %v1080_v60  ;;  %v12236_v33 = vpop.f32.mrb[22].mxu0 }
 0x1ae   : > { %v1149_v28 = vmax.f32 %v1089_v24, 0.0  ;;  %v1092_v61 = vadd.f32 %v12236_v33, %v16267_v29  ;;  %v1083_v26 = vpop.f32.mrb[23].mxu0  ;;  %v14703_v24 = vld [vmem:[%s18055_s6 + $0x50] sm:$0xff]  }
 0x1af   : > { %12622 = vmatmul.mubr.bf16.gmra.mrb[24].mxu1 %v16108_v52  ;;  %v1147_v39 = vmax.f32 %v1081_v58, 0.0  ;;  %v1084_v62 = vadd.f32 %v16267_v29, %v1083_v26  ;;  %v14704_v26 = vld [vmem:[%s18055_s6 + $0x58] sm:$0xff]  }
 0x1b0   : > { %12625 = vmatprep.mubr.bf16.mxu1 %v16120_v32  ;;  %v1144_v32 = vmax.f32 %v1068_v16, 0.0  ;;  %v1150_v43 = vmax.f32 %v1092_v61, 0.0  ;;  %v12239_v16 = vpop.f32.mrb[24].mxu0 }
 0x1b1   : > { %v1148_v34 = vmax.f32 %v1084_v62, 0.0  ;;  %v1105_v40 = vadd.f32 %v12239_v16, %v16267_v29  ;;  %v1096_v7 = vpop.f32.mrb[25].mxu0 }
 0x1b2   : > { %v16347_v48 = vpack.c.bf16 %v1144_v32, %v1143_v2  ;;  %v14702_v32 = vld [vmem:[%s18055_s6 + $0x48] sm:$0xff]   ;;  %v1097_v60 = vadd.f32 %v16267_v29, %v1096_v7  ;;  %v12240_v58 = vpop.f32.mrb[26].mxu0 }
 0x1b3   : > { %v16360_v2 = vpack.c.bf16 %v1148_v34, %v1147_v39  ;;  %v1153_v33 = vmax.f32 %v1105_v40, 0.0  ;;  %v14705_v40 = vld [vmem:[%s18055_s6 + $0x60] sm:$0xff]  }
 0x1b4   : > { %18711 = vst [vmem:[#allocation120_spill] sm:$0xff] %v16347_v48  ;;  %v1151_v61 = vmax.f32 %v1097_v60, 0.0 }
 0x1b5   : > { %18713 = vst [vmem:[#allocation95_spill] sm:$0xff] %v16360_v2  ;;  %v3694_v2 = vrot.slane %v16236_v51, 2 }
 0x1b7   : > { %12626 = vmatmul.mubr.bf16.gmra.mrb[28].mxu1 %v16342_v36 }
 0x1b8   : > { %12645 = vmatprep.mubr.bf16.mxu1 %v18675_v25  ;;  %v16357_v25 = vpack.c.bf16 %v1150_v43, %v1149_v28  ;;  %v1099_v28 = vpop.f32.mrb[27].mxu0 }
 0x1b9   : > { %v12243_v34 = vpop.f32.mrb[28].mxu0 }
 0x1ba   : > { %18712 = vst [vmem:[#allocation90_spill] sm:$0xff] %v16357_v25  ;;  %v1121_v16 = vadd.f32 %v12243_v34, %v16267_v29  ;;  %v3693_v25 = vrot.slane %v16232_v14, 2 }
 0x1bc   : > { %v3695_v35 = vsel %vm2028_vm3, %v3693_v25, %v3694_v2  ;;  %v14729_v25 = vld [vmem:[%s18059_s10 + $0x60] sm:$0xff]  }
 0x1bf   : > { %12646 = vmatmul.mubr.bf16.vlgmr.msra.gmra.mrb[0].mxu1 %v18676_v59  ;;  %v1108_v59 = vadd.f32 %v12240_v58, %v16267_v29  ;;  %v1157_v58 = vmax.f32 %v1121_v16, 0.0 }
 0x1c0   : > { %12649 = vmatprep.mubr.bf16.mxu1 %v18677_v22  ;;  %13254 = vmatpush3.bf16.msra.mxu1 %v16290_v5  ;;  %v1100_v22 = vadd.f32 %v16267_v29, %v1099_v28 }
 0x1c1   : > { %13255 = vmatprep.subr.bf16.mxu1 %v14702_v32  ;;  %v1154_v5 = vmax.f32 %v1108_v59, 0.0 }
 0x1c2   : > { %v1152_v39 = vmax.f32 %v1100_v22, 0.0 }
 0x1c3   : > { %v16374_v62 = vpack.c.bf16 %v1154_v5, %v1153_v33 }
 0x1c4   : > { %13256 = vmatpush3.bf16.msra.mxu1 %v14702_v32  ;;  %v16377_v43 = vpack.c.bf16 %v1152_v39, %v1151_v61  ;;  %v1112_v32 = vpop.f32.mrb[29].mxu0 }
 0x1c5   : > { %13257 = vmatprep.subr.bf16.mxu1 %v14703_v24  ;;  %18714 = vst [vmem:[#allocation11_spill] sm:$0xff] %v16374_v62  ;;  %v1113_v7 = vadd.f32 %v16267_v29, %v1112_v32  ;;  %v12244_v60 = vpop.f32.mrb[30].mxu0 }
 0x1c6   : > { %18715 = vst [vmem:[#allocation14_spill] sm:$0xff] %v16377_v43  ;;  %v1115_v33 = vpop.f32.mrb[31].mxu0 }
 0x1c7   : > { %12650 = vmatmul.mubr.bf16.gmra.mrb[4].mxu1 %v18678_v45  ;;  %v1124_v45 = vadd.f32 %v12244_v60, %v16267_v29  ;;  %v1155_v59 = vmax.f32 %v1113_v7, 0.0  ;;  %v1116_v28 = vadd.f32 %v16267_v29, %v1115_v33  ;;  %v16422_v7 = vld [vmem:[%s18055_s6] sm:$0xff]  }
 0x1c8   : > { %12653 = vmatprep.mubr.bf16.mxu1 %v18679_v27  ;;  %13258 = vmatpush3.bf16.msra.mxu1 %v14703_v24  ;;  %v14706_v24 = vld [vmem:[%s18055_s6 + $0x68] sm:$0xff]  }
 0x1c9   : > { %13259 = vmatprep.subr.bf16.mxu1 %v14704_v26  ;;  %v1158_v27 = vmax.f32 %v1124_v45, 0.0  ;;  %v1156_v61 = vmax.f32 %v1116_v28, 0.0 }
 0x1cb   : > { %v16390_v22 = vpack.c.bf16 %v1158_v27, %v1157_v58  ;;  %v16393_v5 = vpack.c.bf16 %v1156_v61, %v1155_v59  ;;  %v18719_v27 = vld [vmem:[#allocation8_spill] sm:$0xff] }
 0x1cc   : > { %13260 = vmatpush3.bf16.msra.mxu1 %v14704_v26  ;;  %v16395_v39 = vpop.f32.mrb[32].mxu0  ;;  %v14707_v26 = vld [vmem:[%s18055_s6 + $0x70] sm:$0xff]   ;;  %v662_v61 = vshll.u32 %v18719_v27, 16 }
 0x1cd   : > { %13261 = vmatprep.subr.bf16.mxu1 %v14705_v40  ;;  %18716 = vst [vmem:[#allocation122_spill] sm:$0xff] %v16390_v22  ;;  %18717 = vst [vmem:[#allocation134_spill] sm:$0xff] %v16393_v5  ;;  %v16398_v29 = vpop.f32.mrb[33].mxu0 }
 0x1ce   : > { %v16403_v34 = vpop.f32.mrb[34].mxu0 }
 0x1cf   : > { %12654 = vmatmul.mubr.bf16.gmra.mrb[8].mxu1 %v18680_v0  ;;  %v16405_v16 = vpop.f32.mrb[35].mxu0  ;;  %v14708_v0 = vld [vmem:[%s18055_s6 + $0x78] sm:$0xff]  }
 0x1d0   : > { %12657 = vmatprep.mubr.bf16.mxu1 %v18681_v49  ;;  %13262 = vmatpush3.bf16.msra.mxu1 %v14705_v40  ;;  %v14717_v40 = vld [vmem:[%s18059_s10 + $0x40] sm:$0xff]  }
 0x1d1   : > { %13263 = vmatprep.subr.bf16.mxu1 %v14706_v24  ;;  %12677 = vmatprep.subr.bf16.mxu0 %v14717_v40 }
 0x1d2   : > { %12678 = vmatpush3.bf16.msra.mxu0 %v14717_v40 }
 0x1d4   : > { %13264 = vmatpush3.bf16.msra.mxu1 %v14706_v24  ;;  %v16411_v49 = vpop.f32.mrb[36].mxu0  ;;  %v659_v24 = vshrl.u32 %v18719_v27, 16 }
 0x1d5   : > { %13265 = vmatprep.subr.bf16.mxu1 %v14707_v26  ;;  %v16414_v32 = vpop.f32.mrb[37].mxu0 }
 0x1d6   : > { %v16424_v60 = vpop.f32.mrb[38].mxu0 }
 0x1d7   : > { %12658 = vmatmul.mubr.bf16.gmra.mrb[12].mxu1 %v18682_v57  ;;  %v18718_v57 = vld [vmem:[#allocation7_spill] sm:$0xff] }
 0x1d8   : > { %12661 = vmatprep.mubr.bf16.mxu1 %v18683_v8  ;;  %13266 = vmatpush3.bf16.msra.mxu1 %v14707_v26  ;;  %v651_v58 = vshrl.u32 %v18718_v57, 16  ;;  %v654_v45 = vshll.u32 %v18718_v57, 16  ;;  %v16428_v8 = vpop.f32.mrb[39].mxu0 }
 0x1d9   : > { %13267 = vmatprep.subr.bf16.mxu1 %v14708_v0 }
 0x1da   : > { %v653_v33 = vrot.slane %v651_v58, 6  ;;  %v656_v59 = vrot.slane %v654_v45, 7  ;;  %v664_v45 = vrot.slane %v662_v61, 7 }
 0x1dc   : > { %13268 = vmatpush3.bf16.msra.mxu1 %v14708_v0  ;;  %v16432_v28 = vpop.f32.mrb[40].mxu0  ;;  %v14720_v0 = vld [vmem:[%s18059_s10 + $0x48] sm:$0xff]   ;;  %v657_v57 = vor.u32 %v656_v59, %v653_v33 }
 0x1dd   : > { %13301 = vmatprep.subr.bf16.mxu1 %v16422_v7  ;;  %v16437_v26 = vpop.f32.mrb[41].mxu0  ;;  %12679 = vmatprep.subr.bf16.mxu0 %v14720_v0 }
 0x1de   : > { %v16442_v40 = vpop.f32.mrb[42].mxu0  ;;  %12680 = vmatpush3.bf16.msra.mxu0 %v14720_v0  ;;  %v16452_v27 = vsel %vm15041_vm2, %v657_v57, 0 }
 0x1df   : > { %12662 = vmatmul.mubr.bf16.gmra.mrb[16].mxu1 %v18684_v53  ;;  %v16444_v58 = vpop.f32.mrb[43].mxu0  ;;  %v661_v53 = vrot.slane %v659_v24, 6  ;;  %v14723_v24 = vld [vmem:[%s18059_s10 + $0x50] sm:$0xff]   ;;  %v7405_v52 = vshll.u32 %v16452_v27, 16 }
 0x1e0   : > { %12665 = vmatprep.mubr.bf16.mxu1 %v18685_v21  ;;  %v16448_v21 = vsel %vm15041_vm2, 0, %v657_v57  ;;  %v7402_v57 = vshrl.u32 %v16452_v27, 16  ;;  %12681 = vmatprep.subr.bf16.mxu0 %v14723_v24 }
 0x1e1   : > { %v665_v33 = vor.u32 %v664_v45, %v661_v53  ;;  %v7394_v61 = vshrl.u32 %v16448_v21, 16  ;;  %v7397_v0 = vshll.u32 %v16448_v21, 16  ;;  %v7407_v43 = vrot.slane %v7405_v52, 2 }
 0x1e2   : > { %12682 = vmatpush3.bf16.msra.mxu0 %v14723_v24  ;;  %v7404_v62 = vrot.slane %v7402_v57, 1 }
 0x1e3   : > { %v16477_v53 = vsel %vm15041_vm2, %v665_v33, 0  ;;  %v7396_v45 = vrot.slane %v7394_v61, 1  ;;  %v7399_v5 = vrot.slane %v7397_v0, 2  ;;  %v14726_v0 = vld [vmem:[%s18059_s10 + $0x58] sm:$0xff]  }
 0x1e4   : > { %v16455_v36 = vpop.f32.mrb[44].mxu0  ;;  %18720 = vst [vmem:[#allocation7_spill] sm:$0xff] %v16477_v53  ;;  %v16492_v61 = vshll.u32 %v16477_v53, 16  ;;  %v7408_v51 = vor.u32 %v7407_v43, %v7404_v62  ;;  %12683 = vmatprep.subr.bf16.mxu0 %v14726_v0  ;;  %v18724_v1 = vshrl.u32 %v16477_v53, 16 }
 0x1e5   : > { %v16458_v59 = vpop.f32.mrb[45].mxu0  ;;  %v7400_v57 = vor.u32 %v7399_v5, %v7396_v45 }
 0x1e6   : > { %18723 = vst [vmem:[#allocation136_spill] sm:$0xff] %v16492_v61  ;;  %12684 = vmatpush3.bf16.msra.mxu0 %v14726_v0  ;;  %v4587_v44 = vrot.slane %v18724_v1, 1  ;;  %v4588_v31 = vrot.slane %v16492_v61, 2  ;;  %v14715_v61 = vld [vmem:[%s18055_s6 + $0x30] sm:$0xff]  }
 0x1e7   : > { %12666 = vmatmul.mubr.bf16.gmra.mrb[20].mxu1 %v18686_v18  ;;  %v16467_v18 = vpop.f32.mrb[46].mxu0  ;;  %v7409_v5 = vsel %vm1304_vm5, %v7400_v57, %v7408_v51  ;;  %12685 = vmatprep.subr.bf16.mxu0 %v14729_v25 }
 0x1e8   : > { %12669 = vmatprep.mubr.bf16.mxu1 %v18689_v12  ;;  %v16469_v22 = vpop.f32.mrb[47].mxu0  ;;  %v16473_v12 = vsel %vm15041_vm2, 0, %v665_v33  ;;  %v4589_v45 = vor.u32 %v4588_v31, %v4587_v44  ;;  %v14730_v44 = vld [vmem:[%s18059_s10 + $0x68] sm:$0xff]  }
 0x1e9   : > { %v16486_v24 = vshrl.u32 %v16473_v12, 16  ;;  %v16489_v33 = vshll.u32 %v16473_v12, 16 }
 0x1ea   : > { %12686 = vmatpush3.bf16.msra.mxu0 %v14729_v25  ;;  %v14713_v25 = vld [vmem:[%s18055_s6 + $0x20] sm:$0xff]  }
 0x1eb   : > { %18721 = vst [vmem:[#allocation8_spill] sm:$0xff] %v16486_v24  ;;  %18722 = vst [vmem:[#allocation135_spill] sm:$0xff] %v16489_v33  ;;  %v4582_v48 = vrot.slane %v16486_v24, 1  ;;  %v4583_v52 = vrot.slane %v16489_v33, 2  ;;  %12687 = vmatprep.subr.bf16.mxu0 %v14730_v44  ;;  %v18726_v24 = vld [vmem:[#allocation20_spill] sm:$0xff]  ;;  %v18727_v33 = vld [vmem:[#allocation22_spill] sm:$0xff] }
 0x1ec   : > { %v16482_v23 = vpop.f32.mrb[48].mxu0 }
 0x1ed   : > { %v4584_v43 = vor.u32 %v4583_v52, %v4582_v48  ;;  %v14711_v48 = vld [vmem:[%s18055_s6 + $0x10] sm:$0xff]  }
 0x1ee   : > { %12688 = vmatpush3.bf16.msra.mxu0 %v14730_v44 }
 0x1ef   : > { %12670 = vmatmul.mubr.bf16.gmra.mrb[24].mxu1 %v18690_v17  ;;  %v16495_v17 = vpop.f32.mrb[49].mxu0  ;;  %v16523_v51 = vsel %vm1304_vm5, %v4584_v43, %v4589_v45  ;;  %v14731_v45 = vld [vmem:[%s18059_s10 + $0x70] sm:$0xff]  }
 0x1f0   : > { %12673 = vmatprep.mubr.bf16.mxu1 %v16187_v50  ;;  %v16500_v50 = vpop.f32.mrb[50].mxu0  ;;  %18725 = vst [vmem:[#allocation137_spill] sm:$0xff] %v16523_v51  ;;  %12689 = vmatprep.subr.bf16.mxu0 %v14731_v45 }
 0x1f1   : > { %v16502_v14 = vpop.f32.mrb[51].mxu0 }
 0x1f2   : > { %12690 = vmatpush3.bf16.msra.mxu0 %v14731_v45  ;;  %v14718_v45 = vld [vmem:[%s18055_s6 + $0x80] sm:$0xff]  }
 0x1f4   : > { %v16511_v62 = vpop.f32.mrb[52].mxu0 }
 0x1f5   : > { %v16513_v4 = vpop.f32.mrb[53].mxu0 }
 0x1f6   : > { %v16518_v2 = vpop.f32.mrb[54].mxu0 }
 0x1f7   : > { %12674 = vmatmul.mubr.bf16.gmra.mrb[28].mxu1 %v3695_v35  ;;  %v16520_v0 = vpop.f32.mrb[55].mxu0  ;;  %v14710_v35 = vld [vmem:[%s18055_s6 + $0x8] sm:$0xff]  }
 0x1f8   : > { %13269 = vmatprep.mubr.bf16.mxu1 %v7409_v5 }
 0x1fc   : > { %v16529_v31 = vpop.f32.mrb[56].mxu0 }
 0x1fd   : > { %v16533_v1 = vpop.f32.mrb[57].mxu0 }
 0x1fe   : > { %v16541_v52 = vpop.f32.mrb[58].mxu0 }
 0x1ff   : > { %13270 = vmatmul.mubr.bf16.vlgmr.msra.gmra.mrb[32].mxu1 %v16523_v51  ;;  %v16543_v57 = vpop.f32.mrb[59].mxu0  ;;  %v18735_v51 = vld [vmem:[#allocation62_spill] sm:$0xff] }
 0x200   : > { %13273 = vmatprep.mubr.bf16.mxu1 %v15892_v63  ;;  %13302 = vmatpush3.bf16.msra.mxu1 %v16422_v7  ;;  %v14712_v7 = vld [vmem:[%s18055_s6 + $0x18] sm:$0xff]   ;;  %v18732_v63 = vld [vmem:[#allocation47_spill] sm:$0xff] }
 0x201   : > { %13303 = vmatprep.subr.bf16.mxu1 %v14710_v35 }
 0x204   : > { %13304 = vmatpush3.bf16.msra.mxu1 %v14710_v35  ;;  %v16549_v5 = vpop.f32.mrb[60].mxu0 }
 0x205   : > { %13305 = vmatprep.subr.bf16.mxu1 %v14711_v48  ;;  %v16552_v43 = vpop.f32.mrb[61].mxu0 }
 0x206   : > { %v16560_v35 = vpop.f32.mrb[62].mxu0 }
 0x207   : > { %13274 = vmatmul.mubr.bf16.gmra.mrb[36].mxu1 %v15861_v3  ;;  %v16562_v44 = vpop.f32.mrb[63].mxu0  ;;  %v7858_v3 = vrot.slane %v18576_v19, 3  ;;  %v16694_v19 = vld [vmem:[%s18056_s7] ss:$0 sm:$0xff] }
 0x208   : > { %13277 = vmatprep.mubr.bf16.mxu1 %v15899_v15  ;;  %13306 = vmatpush3.bf16.msra.mxu1 %v14711_v48  ;;  %v14714_v48 = vld [vmem:[%s18055_s6 + $0x28] sm:$0xff]   ;;  %v7857_v15 = vrot.slane %v18573_v47, 3 }
 0x209   : > { %13307 = vmatprep.subr.bf16.mxu1 %v14712_v7 }
 0x20c   : > { %13308 = vmatpush3.bf16.msra.mxu1 %v14712_v7  ;;  %v14716_v7 = vld [vmem:[%s18055_s6 + $0x38] sm:$0xff]  }
 0x20d   : > { %13309 = vmatprep.subr.bf16.mxu1 %v14713_v25 }
 0x20f   : > { %13278 = vmatmul.mubr.bf16.gmra.mrb[40].mxu1 %v15903_v42  ;;  %v7855_v42 = vrot.slane %v16477_v53, 3 }
 0x210   : > { %13281 = vmatprep.mubr.bf16.mxu1 %v15932_v37  ;;  %13310 = vmatpush3.bf16.msra.mxu1 %v14713_v25  ;;  %v14732_v25 = vld [vmem:[%s18059_s10 + $0x78] sm:$0xff]   ;;  %v7854_v37 = vrot.slane %v16473_v12, 3 }
 0x211   : > { %13311 = vmatprep.subr.bf16.mxu1 %v14714_v48  ;;  %12691 = vmatprep.subr.bf16.mxu0 %v14732_v25 }
 0x212   : > { %12692 = vmatpush3.bf16.msra.mxu0 %v14732_v25  ;;  %v14722_v25 = vld [vmem:[%s18055_s6 + $0x98] sm:$0xff]   ;;  %v7856_v13 = vsel %vm7850_vm6, %v7854_v37, %v7855_v42 }
 0x213   : > { %v14738_v42 = vld [vmem:[%s18055_s6 + $0xd8] sm:$0xff]  }
 0x214   : > { %13312 = vmatpush3.bf16.msra.mxu1 %v14714_v48  ;;  %v14719_v48 = vld [vmem:[%s18055_s6 + $0x88] sm:$0xff]  }
 0x215   : > { %13313 = vmatprep.subr.bf16.mxu1 %v14715_v61 }
 0x217   : > { %13282 = vmatmul.mubr.bf16.gmra.mrb[44].mxu1 %v15936_v30  ;;  %v18738_v30 = vld [vmem:[#allocation76_spill] sm:$0xff] }
 0x218   : > { %13285 = vmatprep.mubr.bf16.mxu1 %v15966_v56  ;;  %13314 = vmatpush3.bf16.msra.mxu1 %v14715_v61  ;;  %v16588_v61 = vld [vmem:[%s18059_s10] sm:$0xff]   ;;  %v7852_v56 = vrot.slane %v16452_v27, 3  ;;  %v14735_v27 = vld [vmem:[%s18055_s6 + $0xc8] sm:$0xff]  }
 0x219   : > { %13315 = vmatprep.subr.bf16.mxu1 %v14716_v7  ;;  %12725 = vmatprep.subr.bf16.mxu0 %v16588_v61 }
 0x21c   : > { %13316 = vmatpush3.bf16.msra.mxu1 %v14716_v7  ;;  %v14721_v7 = vld [vmem:[%s18055_s6 + $0x90] sm:$0xff]  }
 0x21d   : > { %13349 = vmatprep.subr.bf16.mxu1 %v14718_v45 }
 0x21f   : > { %13286 = vmatmul.mubr.bf16.gmra.mrb[48].mxu1 %v15970_v38  ;;  %v18737_v38 = vld [vmem:[#allocation71_spill] sm:$0xff] }
 0x220   : > { %13289 = vmatprep.mubr.bf16.mxu1 %v16000_v54  ;;  %v18736_v54 = vld [vmem:[#allocation65_spill] sm:$0xff] }
 0x227   : > { %13290 = vmatmul.mubr.bf16.gmra.mrb[52].mxu1 %v16004_v11  ;;  %v18734_v11 = vld [vmem:[#allocation56_spill] sm:$0xff] }
 0x228   : > { %13293 = vmatprep.mubr.bf16.mxu1 %v16035_v55  ;;  %v18731_v55 = vld [vmem:[#allocation39_spill] sm:$0xff] }
 0x22f   : > { %13294 = vmatmul.mubr.bf16.gmra.mrb[56].mxu1 %v16039_v41  ;;  %v18730_v41 = vld [vmem:[#allocation31_spill] sm:$0xff] }
 0x230   : > { %13297 = vmatprep.mubr.bf16.mxu1 %v16074_v9  ;;  %v18729_v9 = vld [vmem:[#allocation27_spill] sm:$0xff] }
 0x237   : > { %13298 = vmatmul.mubr.bf16.gmra.mrb[60].mxu1 %v16078_v20  ;;  %v18728_v20 = vld [vmem:[#allocation25_spill] sm:$0xff] }
 0x238   : > { %13317 = vmatprep.mubr.bf16.mxu1 %v16448_v21  ;;  %v7866_v37 = vrot.slane %v18728_v20, 3 }
 0x23f   : > { %13318 = vmatmul.mubr.bf16.vlgmr.msra.gmra.mrb[32].mxu1 %v16473_v12 }
 0x240   : > { %13321 = vmatprep.mubr.bf16.mxu1 %v18573_v47  ;;  %13350 = vmatpush3.bf16.msra.mxu1 %v14718_v45  ;;  %v14724_v45 = vld [vmem:[%s18055_s6 + $0xa0] sm:$0xff]  }
 0x241   : > { %13351 = vmatprep.subr.bf16.mxu1 %v14719_v48  ;;  %v18740_v47 = vld [vmem:[#allocation23_spill] sm:$0xff] }
 0x242   : > { %v7864_v53 = vrot.slane %v18740_v47, 3 }
 0x244   : > { %13352 = vmatpush3.bf16.msra.mxu1 %v14719_v48  ;;  %v14725_v48 = vld [vmem:[%s18055_s6 + $0xa8] sm:$0xff]  }
 0x245   : > { %13353 = vmatprep.subr.bf16.mxu1 %v14721_v7 }
 0x247   : > { %13322 = vmatmul.mubr.bf16.gmra.mrb[36].mxu1 %v18726_v24 }
 0x248   : > { %13325 = vmatprep.mubr.bf16.mxu1 %v18727_v33  ;;  %13354 = vmatpush3.bf16.msra.mxu1 %v14721_v7  ;;  %v14727_v7 = vld [vmem:[%s18055_s6 + $0xb0] sm:$0xff]  }
 0x249   : > { %13355 = vmatprep.subr.bf16.mxu1 %v14722_v25 }
 0x24c   : > { %13356 = vmatpush3.bf16.msra.mxu1 %v14722_v25  ;;  %v14728_v25 = vld [vmem:[%s18055_s6 + $0xb8] sm:$0xff]  }
 0x24d   : > { %13357 = vmatprep.subr.bf16.mxu1 %v14724_v45 }
 0x24f   : > { %13326 = vmatmul.mubr.bf16.gmra.mrb[40].mxu1 %v18728_v20 }
 0x250   : > { %13329 = vmatprep.mubr.bf16.mxu1 %v18729_v9  ;;  %13358 = vmatpush3.bf16.msra.mxu1 %v14724_v45  ;;  %v14734_v45 = vld [vmem:[%s18055_s6 + $0xc0] sm:$0xff]  }
 0x251   : > { %13359 = vmatprep.subr.bf16.mxu1 %v14725_v48 }
 0x254   : > { %13360 = vmatpush3.bf16.msra.mxu1 %v14725_v48  ;;  %v18733_v48 = vld [vmem:[#allocation52_spill] sm:$0xff] }
 0x255   : > { %13361 = vmatprep.subr.bf16.mxu1 %v14727_v7 }
 0x257   : > { %13330 = vmatmul.mubr.bf16.gmra.mrb[44].mxu1 %v18730_v41 }
 0x258   : > { %13333 = vmatprep.mubr.bf16.mxu1 %v18731_v55  ;;  %13362 = vmatpush3.bf16.msra.mxu1 %v14727_v7  ;;  %v7851_v7 = vrot.slane %v16448_v21, 3  ;;  %v7859_v21 = vsel %vm7850_vm6, %v7857_v15, %v7858_v3  ;;  %v14737_v3 = vld [vmem:[%s18055_s6 + $0xd0] sm:$0xff]  }
 0x259   : > { %13363 = vmatprep.subr.bf16.mxu1 %v14728_v25 }
 0x25c   : > { %13364 = vmatpush3.bf16.msra.mxu1 %v14728_v25  ;;  %v7853_v25 = vsel %vm7850_vm6, %v7851_v7, %v7852_v56  ;;  %v7860_v56 = vrot.slane %v18726_v24, 3  ;;  %v18739_v7 = vld [vmem:[#allocation21_spill] sm:$0xff] }
 0x25d   : > { %13397 = vmatprep.subr.bf16.mxu1 %v14734_v45  ;;  %v7861_v12 = vrot.slane %v18739_v7, 3 }
 0x25f   : > { %13334 = vmatmul.mubr.bf16.gmra.mrb[48].mxu1 %v18732_v63  ;;  %v16656_v15 = vsel %vm7850_vm6, %v7860_v56, %v7861_v12  ;;  %v7869_v56 = vrot.slane %v18729_v9, 3 }
 0x260   : > { %13337 = vmatprep.mubr.bf16.mxu1 %v18733_v48  ;;  %18741 = vst [vmem:[#allocation20_spill] sm:$0xff] %v16656_v15 }
 0x267   : > { %13338 = vmatmul.mubr.bf16.gmra.mrb[52].mxu1 %v18734_v11 }
 0x268   : > { %13341 = vmatprep.mubr.bf16.mxu1 %v18735_v51 }
 0x26f   : > { %13342 = vmatmul.mubr.bf16.gmra.mrb[56].mxu1 %v18736_v54 }
 0x270   : > { %13345 = vmatprep.mubr.bf16.mxu1 %v18737_v38 }
 0x277   : > { %13346 = vmatmul.mubr.bf16.gmra.mrb[60].mxu1 %v18738_v30 }
 0x278   : > { %13365 = vmatprep.mubr.bf16.mxu1 %v7853_v25  ;;  %v7863_v25 = vrot.slane %v18727_v33, 3 }
 0x27f   : > { %13366 = vmatmul.mubr.bf16.vlgmr.msra.gmra.mrb[32].mxu1 %v7856_v13  ;;  %v16659_v13 = vsel %vm7850_vm6, %v7863_v25, %v7864_v53  ;;  %v14740_v53 = vld [vmem:[%s18055_s6 + $0xe0] sm:$0xff]  }
 0x280   : > { %13369 = vmatprep.mubr.bf16.mxu1 %v7859_v21  ;;  %13398 = vmatpush3.bf16.msra.mxu1 %v14734_v45  ;;  %18742 = vst [vmem:[#allocation22_spill] sm:$0xff] %v16659_v13  ;;  %v18743_v45 = vld [vmem:[#allocation26_spill] sm:$0xff] }
 0x281   : > { %13399 = vmatprep.subr.bf16.mxu1 %v14735_v27  ;;  %v7867_v21 = vrot.slane %v18743_v45, 3  ;;  %v18747_v45 = vld [vmem:[#allocation32_spill] sm:$0xff] }
 0x282   : > { %v7873_v7 = vrot.slane %v18747_v45, 3 }
 0x283   : > { %v16674_v25 = vsel %vm7850_vm6, %v7866_v37, %v7867_v21  ;;  %v7875_v37 = vrot.slane %v18731_v55, 3 }
 0x284   : > { %13400 = vmatpush3.bf16.msra.mxu1 %v14735_v27  ;;  %v18744_v27 = vld [vmem:[#allocation28_spill] sm:$0xff]  ;;  %18745 = vst [vmem:[#allocation25_spill] sm:$0xff] %v16674_v25 }
 0x285   : > { %13401 = vmatprep.subr.bf16.mxu1 %v14737_v3  ;;  %v7870_v12 = vrot.slane %v18744_v27, 3  ;;  %v7872_v27 = vrot.slane %v18730_v41, 3 }
 0x287   : > { %13370 = vmatmul.mubr.bf16.gmra.mrb[36].mxu1 %v16656_v15  ;;  %v16677_v47 = vsel %vm7850_vm6, %v7869_v56, %v7870_v12  ;;  %v14743_v56 = vld [vmem:[%s18055_s6 + $0xf0] sm:$0xff]  }
 0x288   : > { %13373 = vmatprep.mubr.bf16.mxu1 %v16659_v13  ;;  %13402 = vmatpush3.bf16.msra.mxu1 %v14737_v3  ;;  %18746 = vst [vmem:[#allocation27_spill] sm:$0xff] %v16677_v47  ;;  %v14741_v3 = vld [vmem:[%s18055_s6 + $0xe8] sm:$0xff]   ;;  %v16699_v13 = vsel %vm7850_vm6, %v7872_v27, %v7873_v7 }
 0x289   : > { %13403 = vmatprep.subr.bf16.mxu1 %v14738_v42  ;;  %18749 = vst [vmem:[#allocation31_spill] sm:$0xff] %v16699_v13 }
 0x28c   : > { %13404 = vmatpush3.bf16.msra.mxu1 %v14738_v42  ;;  %v18748_v42 = vld [vmem:[#allocation40_spill] sm:$0xff] }
 0x28d   : > { %13405 = vmatprep.subr.bf16.mxu1 %v14740_v53  ;;  %v7876_v21 = vrot.slane %v18748_v42, 3 }
 0x28f   : > { %13374 = vmatmul.mubr.bf16.gmra.mrb[40].mxu1 %v16674_v25  ;;  %v16704_v46 = vsel %vm7850_vm6, %v7875_v37, %v7876_v21  ;;  %v7881_v21 = vrot.slane %v18733_v48, 3 }
 0x290   : > { %13377 = vmatprep.mubr.bf16.mxu1 %v16677_v47  ;;  %13406 = vmatpush3.bf16.msra.mxu1 %v14740_v53  ;;  %18750 = vst [vmem:[#allocation39_spill] sm:$0xff] %v16704_v46 }
 0x291   : > { %13407 = vmatprep.subr.bf16.mxu1 %v14741_v3 }
 0x292   : > { %v12647_v12 = vpop.f32.mrb[0].mxu1 }
 0x293   : > { %v13733_v47 = vadd.f32 %v12647_v12, %v16395_v39  ;;  %v3796_v25 = vpop.f32.mrb[1].mxu1  ;;  %v14744_v39 = vld [vmem:[%s18055_s6 + $0xf8] sm:$0xff]   ;;  %v18752_v12 = vld [vmem:[#allocation51_spill] sm:$0xff] }
 0x294   : > { %v13734_v53 = vadd.f32 %v3796_v25, %v16398_v29  ;;  %v12648_v45 = vpop.f32.mrb[2].mxu1  ;;  %13408 = vmatpush3.bf16.msra.mxu1 %v14741_v3 }
 0x295   : > { %v3964_v42 = vadd.f32 %v13733_v47, %v16694_v19  ;;  %v13735_v15 = vadd.f32 %v12648_v45, %v16403_v34  ;;  %v3799_v10 = vpop.f32.mrb[3].mxu1  ;;  %13409 = vmatprep.subr.bf16.mxu1 %v14743_v56  ;;  %v7878_v34 = vrot.slane %v18732_v63, 3  ;;  %v18751_v45 = vld [vmem:[#allocation48_spill] sm:$0xff] }
 0x296   : > { %v3962_v29 = vadd.f32 %v13734_v53, %v16694_v19  ;;  %v13736_v25 = vadd.f32 %v3799_v10, %v16405_v16  ;;  %v7879_v27 = vrot.slane %v18751_v45, 3  ;;  %v7882_v53 = vrot.slane %v18752_v12, 3  ;;  %v16722_v10 = vld [vmem:[%s18055_s6 + $0x100] sm:$0xff]  }
 0x297   : > { %v3965_v7 = vadd.f32 %v13735_v15, %v16694_v19  ;;  %13378 = vmatmul.mubr.bf16.gmra.mrb[44].mxu1 %v16699_v13  ;;  %v3996_v3 = vmax.f32 %v3964_v42, 0.0 }
 0x298   : > { %v3963_v47 = vadd.f32 %v13736_v25, %v16694_v19  ;;  %13381 = vmatprep.mubr.bf16.mxu1 %v16704_v46  ;;  %13410 = vmatpush3.bf16.msra.mxu1 %v14743_v56  ;;  %v3994_v16 = vmax.f32 %v3962_v29, 0.0  ;;  %v16727_v6 = vsel %vm7850_vm6, %v7878_v34, %v7879_v27  ;;  %v16732_v29 = vsel %vm7850_vm6, %v7881_v21, %v7882_v53  ;;  %v18755_v34 = vld [vmem:[#allocation57_spill] sm:$0xff] }
 0x299   : > { %v3997_v37 = vmax.f32 %v3965_v7, 0.0  ;;  %13411 = vmatprep.subr.bf16.mxu1 %v14744_v39  ;;  %18753 = vst [vmem:[#allocation56_spill] sm:$0xff] %v16727_v6  ;;  %18754 = vst [vmem:[#allocation62_spill] sm:$0xff] %v16732_v29 }
 0x29a   : > { %v3995_v15 = vmax.f32 %v3963_v47, 0.0  ;;  %v12651_v25 = vpop.f32.mrb[4].mxu1 }
 0x29b   : > { %v4027_v46 = vpack.c.bf16 %v3997_v37, %v3996_v3  ;;  %v13737_v13 = vadd.f32 %v12651_v25, %v16411_v49  ;;  %v3812_v45 = vpop.f32.mrb[5].mxu1  ;;  %v14736_v49 = vld [vmem:[%s18059_s10 + $0x8] sm:$0xff]  }
 0x29c   : > { %v13738_v42 = vadd.f32 %v3812_v45, %v16414_v32  ;;  %v12652_v56 = vpop.f32.mrb[6].mxu1  ;;  %v4026_v7 = vpack.c.bf16 %v3995_v15, %v3994_v16  ;;  %13412 = vmatpush3.bf16.msra.mxu1 %v14744_v39  ;;  %v7885_v45 = vrot.slane %v18755_v34, 3 }
 0x29d   : > { %v3968_v12 = vadd.f32 %v13737_v13, %v16694_v19  ;;  %v13739_v48 = vadd.f32 %v12652_v56, %v16424_v60  ;;  %v3815_v63 = vpop.f32.mrb[7].mxu1  ;;  %13445 = vmatprep.subr.bf16.mxu1 %v16722_v10  ;;  %v7884_v13 = vrot.slane %v18734_v11, 3 }
 0x29e   : > { %v3966_v32 = vadd.f32 %v13738_v42, %v16694_v19  ;;  %v13740_v47 = vadd.f32 %v3815_v63, %v16428_v8  ;;  %12693 = vmatprep.mubr.bf16.mxu0 %v4026_v7  ;;  %v7887_v63 = vrot.slane %v18735_v51, 3  ;;  %v18756_v8 = vld [vmem:[#allocation59_spill] sm:$0xff] }
 0x29f   : > { %v3969_v39 = vadd.f32 %v13739_v48, %v16694_v19  ;;  %12694 = vmatmul.mubr.bf16.vlgmr.msra.gmra.mrb[64].mxu0 %v4027_v46  ;;  %13382 = vmatmul.mubr.bf16.gmra.mrb[48].mxu1 %v16727_v6  ;;  %v4000_v27 = vmax.f32 %v3968_v12, 0.0  ;;  %v7888_v48 = vrot.slane %v18756_v8, 3  ;;  %v14739_v46 = vld [vmem:[%s18059_s10 + $0x10] sm:$0xff]   ;;  %v16755_v56 = vsel %vm7850_vm6, %v7884_v13, %v7885_v45  ;;  %v18759_v45 = vld [vmem:[#allocation66_spill] sm:$0xff] }
 0x2a0   : > { %v3967_v60 = vadd.f32 %v13740_v47, %v16694_v19  ;;  %12726 = vmatpush3.bf16.msra.mxu0 %v16588_v61  ;;  %13385 = vmatprep.mubr.bf16.mxu1 %v16732_v29  ;;  %v3998_v37 = vmax.f32 %v3966_v32, 0.0  ;;  %18757 = vst [vmem:[#allocation65_spill] sm:$0xff] %v16755_v56  ;;  %v7890_v13 = vrot.slane %v18736_v54, 3 }
 0x2a1   : > { %v4001_v3 = vmax.f32 %v3969_v39, 0.0  ;;  %12727 = vmatprep.subr.bf16.mxu0 %v14736_v49  ;;  %v16760_v32 = vsel %vm7850_vm6, %v7887_v63, %v7888_v48  ;;  %v7893_v48 = vrot.slane %v18737_v38, 3 }
 0x2a2   : > { %v3999_v21 = vmax.f32 %v3967_v60, 0.0  ;;  %v12655_v61 = vpop.f32.mrb[8].mxu1  ;;  %18758 = vst [vmem:[#allocation71_spill] sm:$0xff] %v16760_v32 }
 0x2a3   : > { %v13741_v53 = vadd.f32 %v12655_v61, %v16432_v28  ;;  %v3828_v16 = vpop.f32.mrb[9].mxu1  ;;  %v4029_v15 = vpack.c.bf16 %v4001_v3, %v4000_v27  ;;  %v14742_v28 = vld [vmem:[%s18059_s10 + $0x18] sm:$0xff]   ;;  %v7891_v27 = vrot.slane %v18759_v45, 3  ;;  %v18863_v45 = vld [vmem:[#allocation69_spill] sm:$0xff] }
 0x2a4   : > { %v13742_v25 = vadd.f32 %v3828_v16, %v16437_v26  ;;  %v12656_v12 = vpop.f32.mrb[10].mxu1  ;;  %v4028_v42 = vpack.c.bf16 %v3999_v21, %v3998_v37  ;;  %12728 = vmatpush3.bf16.msra.mxu0 %v14736_v49  ;;  %v14745_v21 = vld [vmem:[%s18059_s10 + $0x20] sm:$0xff]  }
 0x2a5   : > { %v3972_v7 = vadd.f32 %v13741_v53, %v16694_v19  ;;  %v13743_v47 = vadd.f32 %v12656_v12, %v16442_v40  ;;  %v3831_v39 = vpop.f32.mrb[11].mxu1  ;;  %12729 = vmatprep.subr.bf16.mxu0 %v14739_v46 }
 0x2a6   : > { %v3970_v26 = vadd.f32 %v13742_v25, %v16694_v19  ;;  %v13744_v60 = vadd.f32 %v3831_v39, %v16444_v58  ;;  %12697 = vmatprep.mubr.bf16.mxu0 %v4028_v42  ;;  %v18760_v58 = vld [vmem:[#allocation72_spill] sm:$0xff] }
 0x2a7   : > { %v3973_v49 = vadd.f32 %v13743_v47, %v16694_v19  ;;  %12698 = vmatmul.mubr.bf16.gmra.mrb[68].mxu0 %v4029_v15  ;;  %13386 = vmatmul.mubr.bf16.gmra.mrb[52].mxu1 %v16755_v56  ;;  %v4004_v3 = vmax.f32 %v3972_v7, 0.0  ;;  %v7894_v37 = vrot.slane %v18760_v58, 3  ;;  %v16781_v47 = vsel %vm7850_vm6, %v7890_v13, %v7891_v27  ;;  %v18763_v27 = vld [vmem:[#allocation75_spill] sm:$0xff] }
 0x2a8   : > { %v3971_v40 = vadd.f32 %v13744_v60, %v16694_v19  ;;  %13389 = vmatprep.mubr.bf16.mxu1 %v16760_v32  ;;  %12730 = vmatpush3.bf16.msra.mxu0 %v14739_v46  ;;  %v4002_v61 = vmax.f32 %v3970_v26, 0.0  ;;  %18761 = vst [vmem:[#allocation76_spill] sm:$0xff] %v16781_v47  ;;  %v7896_v13 = vrot.slane %v18738_v30, 3 }
 0x2a9   : > { %v4005_v63 = vmax.f32 %v3973_v49, 0.0  ;;  %12731 = vmatprep.subr.bf16.mxu0 %v14742_v28  ;;  %v16786_v26 = vsel %vm7850_vm6, %v7893_v48, %v7894_v37 }
 0x2aa   : > { %v4003_v53 = vmax.f32 %v3971_v40, 0.0  ;;  %v12659_v16 = vpop.f32.mrb[12].mxu1  ;;  %18762 = vst [vmem:[#allocation57_spill] sm:$0xff] %v16786_v26 }
 0x2ab   : > { %v13745_v15 = vadd.f32 %v12659_v16, %v16455_v36  ;;  %v3844_v25 = vpop.f32.mrb[13].mxu1  ;;  %v4031_v12 = vpack.c.bf16 %v4005_v63, %v4004_v3  ;;  %v14746_v36 = vld [vmem:[%s18059_s10 + $0x28] sm:$0xff]   ;;  %v7897_v3 = vrot.slane %v18763_v27, 3 }
 0x2ac   : > { %v13746_v46 = vadd.f32 %v3844_v25, %v16458_v59  ;;  %v12660_v42 = vpop.f32.mrb[14].mxu1  ;;  %v4030_v7 = vpack.c.bf16 %v4003_v53, %v4002_v61  ;;  %12732 = vmatpush3.bf16.msra.mxu0 %v14742_v28 }
 0x2ad   : > { %v3976_v39 = vadd.f32 %v13745_v15, %v16694_v19  ;;  %v13747_v60 = vadd.f32 %v12660_v42, %v16467_v18  ;;  %v3847_v49 = vpop.f32.mrb[15].mxu1  ;;  %12733 = vmatprep.subr.bf16.mxu0 %v14745_v21 }
 0x2ae   : > { %v3974_v59 = vadd.f32 %v13746_v46, %v16694_v19  ;;  %v13748_v40 = vadd.f32 %v3847_v49, %v16469_v22  ;;  %12701 = vmatprep.mubr.bf16.mxu0 %v4030_v7  ;;  %v14747_v22 = vld [vmem:[%s18059_s10 + $0x30] sm:$0xff]  }
 0x2af   : > { %v3977_v28 = vadd.f32 %v13747_v60, %v16694_v19  ;;  %12702 = vmatmul.mubr.bf16.gmra.mrb[72].mxu0 %v4031_v12  ;;  %13390 = vmatmul.mubr.bf16.gmra.mrb[56].mxu1 %v16781_v47  ;;  %v4008_v63 = vmax.f32 %v3976_v39, 0.0 }
 0x2b0   : > { %v3975_v18 = vadd.f32 %v13748_v40, %v16694_v19  ;;  %13393 = vmatprep.mubr.bf16.mxu1 %v16786_v26  ;;  %12734 = vmatpush3.bf16.msra.mxu0 %v14745_v21  ;;  %v4006_v37 = vmax.f32 %v3974_v59, 0.0  ;;  %v16805_v21 = vsel %vm7850_vm6, %v7896_v13, %v7897_v3 }
 0x2b1   : > { %v4009_v48 = vmax.f32 %v3977_v28, 0.0  ;;  %12735 = vmatprep.subr.bf16.mxu0 %v14746_v36  ;;  %18764 = vst [vmem:[#allocation138_spill] sm:$0xff] %v16805_v21  ;;  %v16821_v28 = vld [vmem:[%s18054_s5 + $0x40] sm:$0xff]  }
 0x2b2   : > { %v4007_v61 = vmax.f32 %v3975_v18, 0.0  ;;  %v12663_v53 = vpop.f32.mrb[16].mxu1 }
 0x2b3   : > { %v13749_v16 = vadd.f32 %v12663_v53, %v16482_v23  ;;  %v3860_v15 = vpop.f32.mrb[17].mxu1  ;;  %v4033_v25 = vpack.c.bf16 %v4009_v48, %v4008_v63  ;;  %v14748_v23 = vld [vmem:[%s18059_s10 + $0x38] sm:$0xff]  }
 0x2b4   : > { %v13750_v12 = vadd.f32 %v3860_v15, %v16495_v17  ;;  %v12664_v46 = vpop.f32.mrb[18].mxu1  ;;  %v4032_v42 = vpack.c.bf16 %v4007_v61, %v4006_v37  ;;  %12736 = vmatpush3.bf16.msra.mxu0 %v14746_v36  ;;  %v14751_v15 = vld [vmem:[%s18055_s6 + $0x108] sm:$0xff]  }
 0x2b5   : > { %v3980_v7 = vadd.f32 %v13749_v16, %v16694_v19  ;;  %v13751_v39 = vadd.f32 %v12664_v46, %v16500_v50  ;;  %v3863_v60 = vpop.f32.mrb[19].mxu1  ;;  %12737 = vmatprep.subr.bf16.mxu0 %v14747_v22 }
 0x2b6   : > { %v3978_v49 = vadd.f32 %v13750_v12, %v16694_v19  ;;  %v13752_v17 = vadd.f32 %v3863_v60, %v16502_v14  ;;  %12705 = vmatprep.mubr.bf16.mxu0 %v4032_v42  ;;  %v14753_v42 = vld [vmem:[%s18055_s6 + $0x110] sm:$0xff]  }
 0x2b7   : > { %v3981_v59 = vadd.f32 %v13751_v39, %v16694_v19  ;;  %12706 = vmatmul.mubr.bf16.gmra.mrb[76].mxu0 %v4033_v25  ;;  %13394 = vmatmul.mubr.bf16.gmra.mrb[60].mxu1 %v16805_v21  ;;  %v4012_v50 = vmax.f32 %v3980_v7, 0.0 }
 0x2b8   : > { %v3979_v36 = vadd.f32 %v13752_v17, %v16694_v19  ;;  %13413 = vmatprep.mubr.bf16.mxu1 %v18726_v24  ;;  %12738 = vmatpush3.bf16.msra.mxu0 %v14747_v22  ;;  %v4010_v14 = vmax.f32 %v3978_v49, 0.0 }
 0x2b9   : > { %v4013_v40 = vmax.f32 %v3981_v59, 0.0  ;;  %12739 = vmatprep.subr.bf16.mxu0 %v14748_v23 }
 0x2ba   : > { %v4011_v18 = vmax.f32 %v3979_v36, 0.0  ;;  %v12667_v13 = vpop.f32.mrb[20].mxu1 }
 0x2bb   : > { %v13753_v3 = vadd.f32 %v12667_v13, %v16511_v62  ;;  %v3876_v63 = vpop.f32.mrb[21].mxu1  ;;  %v4035_v48 = vpack.c.bf16 %v4013_v40, %v4012_v50  ;;  %v14754_v50 = vld [vmem:[%s18055_s6 + $0x118] sm:$0xff]   ;;  %v14756_v13 = vld [vmem:[%s18055_s6 + $0x120] sm:$0xff]  }
 0x2bc   : > { %v13754_v37 = vadd.f32 %v3876_v63, %v16513_v4  ;;  %v12668_v61 = vpop.f32.mrb[22].mxu1  ;;  %v4034_v24 = vpack.c.bf16 %v4011_v18, %v4010_v14  ;;  %12740 = vmatpush3.bf16.msra.mxu0 %v14748_v23 }
 0x2bd   : > { %v3984_v22 = vadd.f32 %v13753_v3, %v16694_v19  ;;  %v13755_v53 = vadd.f32 %v12668_v61, %v16518_v2  ;;  %v3879_v16 = vpop.f32.mrb[23].mxu1  ;;  %12773 = vmatprep.subr.bf16.mxu0 %v16821_v28 }
 0x2be   : > { %v3982_v62 = vadd.f32 %v13754_v37, %v16694_v19  ;;  %v13756_v25 = vadd.f32 %v3879_v16, %v16520_v0  ;;  %12709 = vmatprep.mubr.bf16.mxu0 %v4034_v24 }
 0x2bf   : > { %v3985_v4 = vadd.f32 %v13755_v53, %v16694_v19  ;;  %12710 = vmatmul.mubr.bf16.gmra.mrb[80].mxu0 %v4035_v48  ;;  %13414 = vmatmul.mubr.bf16.vlgmr.msra.gmra.mrb[32].mxu1 %v18727_v33  ;;  %v4016_v2 = vmax.f32 %v3984_v22, 0.0 }
 0x2c0   : > { %v3983_v12 = vadd.f32 %v13756_v25, %v16694_v19  ;;  %13417 = vmatprep.mubr.bf16.mxu1 %v18728_v20  ;;  %13446 = vmatpush3.bf16.msra.mxu1 %v16722_v10  ;;  %v4014_v0 = vmax.f32 %v3982_v62, 0.0  ;;  %v14757_v25 = vld [vmem:[%s18055_s6 + $0x128] sm:$0xff]  }
 0x2c1   : > { %v4017_v46 = vmax.f32 %v3985_v4, 0.0  ;;  %13447 = vmatprep.subr.bf16.mxu1 %v14751_v15 }
 0x2c2   : > { %v4015_v7 = vmax.f32 %v3983_v12, 0.0  ;;  %v12671_v39 = vpop.f32.mrb[24].mxu1 }
 0x2c3   : > { %v13757_v60 = vadd.f32 %v12671_v39, %v16529_v31  ;;  %v3892_v23 = vpop.f32.mrb[25].mxu1  ;;  %v4037_v33 = vpack.c.bf16 %v4017_v46, %v4016_v2  ;;  %v18765_v2 = vld [vmem:[#allocation47_spill] sm:$0xff] }
 0x2c4   : > { %v13758_v49 = vadd.f32 %v3892_v23, %v16533_v1  ;;  %v12672_v17 = vpop.f32.mrb[26].mxu1  ;;  %v4036_v20 = vpack.c.bf16 %v4015_v7, %v4014_v0  ;;  %13448 = vmatpush3.bf16.msra.mxu1 %v14751_v15  ;;  %v18767_v23 = vld [vmem:[#allocation37_spill] sm:$0xff] }
 0x2c5   : > { %v3988_v10 = vadd.f32 %v13757_v60, %v16694_v19  ;;  %v13759_v59 = vadd.f32 %v12672_v17, %v16541_v52  ;;  %v3895_v36 = vpop.f32.mrb[27].mxu1  ;;  %13449 = vmatprep.subr.bf16.mxu1 %v14753_v42  ;;  %v18766_v60 = vld [vmem:[#allocation52_spill] sm:$0xff]  ;;  %v18768_v17 = vld [vmem:[#allocation29_spill] sm:$0xff] }
 0x2c6   : > { %v3986_v40 = vadd.f32 %v13758_v49, %v16694_v19  ;;  %v13760_v31 = vadd.f32 %v3895_v36, %v16543_v57  ;;  %12713 = vmatprep.mubr.bf16.mxu0 %v4036_v20  ;;  %v14752_v49 = vld [vmem:[%s18054_s5 + $0x48] sm:$0xff]   ;;  %v18769_v20 = vld [vmem:[#allocation45_spill] sm:$0xff]  ;;  %v18770_v36 = vld [vmem:[#allocation38_spill] sm:$0xff] }
 0x2c7   : > { %v3989_v1 = vadd.f32 %v13759_v59, %v16694_v19  ;;  %12714 = vmatmul.mubr.bf16.gmra.mrb[84].mxu0 %v4037_v33  ;;  %13418 = vmatmul.mubr.bf16.gmra.mrb[36].mxu1 %v18729_v9  ;;  %v4020_v52 = vmax.f32 %v3988_v10, 0.0  ;;  %v14766_v33 = vld [vmem:[%s18055_s6 + $0x140] sm:$0xff]   ;;  %v14755_v10 = vld [vmem:[%s18054_s5 + $0x50] sm:$0xff]   ;;  %v14758_v59 = vld [vmem:[%s18054_s5 + $0x58] sm:$0xff]  }
 0x2c8   : > { %v3987_v14 = vadd.f32 %v13760_v31, %v16694_v19  ;;  %13421 = vmatprep.mubr.bf16.mxu1 %v18730_v41  ;;  %13450 = vmatpush3.bf16.msra.mxu1 %v14753_v42  ;;  %v4018_v3 = vmax.f32 %v3986_v40, 0.0  ;;  %v14759_v42 = vld [vmem:[%s18055_s6 + $0x130] sm:$0xff]   ;;  %v14762_v40 = vld [vmem:[%s18054_s5 + $0x68] sm:$0xff]  }
 0x2c9   : > { %v4021_v18 = vmax.f32 %v3989_v1, 0.0  ;;  %13451 = vmatprep.subr.bf16.mxu1 %v14754_v50  ;;  %v18772_v31 = vld [vmem:[#allocation49_spill] sm:$0xff]  ;;  %v18773_v1 = vld [vmem:[#allocation80_spill] sm:$0xff] }
 0x2ca   : > { %v4019_v57 = vmax.f32 %v3987_v14, 0.0  ;;  %v12675_v63 = vpop.f32.mrb[28].mxu1  ;;  %v18774_v14 = vld [vmem:[#allocation84_spill] sm:$0xff] }
 0x2cb   : > { %v13761_v48 = vadd.f32 %v12675_v63, %v16549_v5  ;;  %v3908_v37 = vpop.f32.mrb[29].mxu1  ;;  %v4039_v61 = vpack.c.bf16 %v4021_v18, %v4020_v52  ;;  %v18775_v52 = vld [vmem:[#allocation86_spill] sm:$0xff]  ;;  %v14763_v18 = vld [vmem:[%s18054_s5 + $0x70] sm:$0xff]   ;;  %v18778_v63 = vld [vmem:[#allocation120_spill] sm:$0xff] }
 0x2cc   : > { %v13762_v24 = vadd.f32 %v3908_v37, %v16552_v43  ;;  %v12676_v22 = vpop.f32.mrb[30].mxu1  ;;  %v4038_v53 = vpack.c.bf16 %v4019_v57, %v4018_v3  ;;  %13452 = vmatpush3.bf16.msra.mxu1 %v14754_v50  ;;  %v18771_v50 = vld [vmem:[#allocation61_spill] sm:$0xff]  ;;  %v18776_v3 = vld [vmem:[#allocation78_spill] sm:$0xff]  ;;  %v18777_v57 = vld [vmem:[#allocation96_spill] sm:$0xff] }
 0x2cd   : > { %v3992_v16 = vadd.f32 %v13761_v48, %v16694_v19  ;;  %v13763_v15 = vadd.f32 %v12676_v22, %v16560_v35  ;;  %v3911_v62 = vpop.f32.mrb[31].mxu1  ;;  %13453 = vmatprep.subr.bf16.mxu1 %v14756_v13  ;;  %v18779_v48 = vld [vmem:[#allocation124_spill] sm:$0xff]  ;;  %v14765_v37 = vld [vmem:[%s18054_s5] sm:$0xff]   ;;  %v18781_v22 = vld [vmem:[#allocation126_spill] sm:$0xff] }
 0x2ce   : > { %v3990_v4 = vadd.f32 %v13762_v24, %v16694_v19  ;;  %v13764_v5 = vadd.f32 %v3911_v62, %v16562_v44  ;;  %12717 = vmatprep.mubr.bf16.mxu0 %v4038_v53  ;;  %v18780_v24 = vld [vmem:[#allocation9_spill] sm:$0xff]  ;;  %v18782_v53 = vld [vmem:[#allocation95_spill] sm:$0xff]  ;;  %v14770_v62 = vld [vmem:[%s18055_s6 + $0x158] sm:$0xff]  }
 0x2cf   : > { %v3993_v43 = vadd.f32 %v13763_v15, %v16694_v19  ;;  %12718 = vmatmul.mubr.bf16.gmra.mrb[88].mxu0 %v4039_v61  ;;  %13422 = vmatmul.mubr.bf16.gmra.mrb[40].mxu1 %v18731_v55  ;;  %v4024_v35 = vmax.f32 %v3992_v16, 0.0  ;;  %v14767_v61 = vld [vmem:[%s18055_s6 + $0x148] sm:$0xff]   ;;  %v18783_v16 = vld [vmem:[#allocation127_spill] sm:$0xff]  ;;  %v14769_v15 = vld [vmem:[%s18055_s6 + $0x150] sm:$0xff]  }
 0x2d0   : > { %v3991_v12 = vadd.f32 %v13764_v5, %v16694_v19  ;;  %13425 = vmatprep.mubr.bf16.mxu1 %v18765_v2  ;;  %13454 = vmatpush3.bf16.msra.mxu1 %v14756_v13  ;;  %v4022_v0 = vmax.f32 %v3990_v4, 0.0  ;;  %v14760_v19 = vld [vmem:[%s18055_s6 + $0x138] sm:$0xff]   ;;  %v18785_v4 = vld [vmem:[#allocation43_spill] sm:$0xff] }
 0x2d1   : > { %v4025_v46 = vmax.f32 %v3993_v43, 0.0  ;;  %13455 = vmatprep.subr.bf16.mxu1 %v14757_v25  ;;  %v14764_v13 = vld [vmem:[%s18054_s5 + $0x78] sm:$0xff]   ;;  %v18787_v43 = vld [vmem:[#allocation44_spill] sm:$0xff] }
 0x2d2   : > { %v4023_v44 = vmax.f32 %v3991_v12, 0.0  ;;  %v18786_v5 = vld [vmem:[#allocation14_spill] sm:$0xff]  ;;  %v14772_v12 = vld [vmem:[%s18055_s6 + $0x160] sm:$0xff]  }
 0x2d3   : > { %v4041_v7 = vpack.c.bf16 %v4025_v46, %v4024_v35  ;;  %v14773_v35 = vld [vmem:[%s18055_s6 + $0x168] sm:$0xff]   ;;  %v18788_v46 = vld [vmem:[#allocation11_spill] sm:$0xff] }
 0x2d4   : > { %v4040_v39 = vpack.c.bf16 %v4023_v44, %v4022_v0  ;;  %13456 = vmatpush3.bf16.msra.mxu1 %v14757_v25  ;;  %v18784_v25 = vld [vmem:[#allocation90_spill] sm:$0xff] }
 0x2d5   : > { %13457 = vmatprep.subr.bf16.mxu1 %v14759_v42  ;;  %v18790_v0 = vld [vmem:[#allocation134_spill] sm:$0xff] }
 0x2d6   : > { %12721 = vmatprep.mubr.bf16.mxu0 %v4040_v39  ;;  %v18791_v44 = vld [vmem:[#allocation54_spill] sm:$0xff] }
 0x2d7   : > { %12722 = vmatmul.mubr.bf16.gmra.mrb[92].mxu0 %v4041_v7  ;;  %13426 = vmatmul.mubr.bf16.gmra.mrb[44].mxu1 %v18766_v60  ;;  %v14775_v7 = vld [vmem:[%s18055_s6 + $0x170] sm:$0xff]   ;;  %v14776_v39 = vld [vmem:[%s18055_s6 + $0x178] sm:$0xff]  }
 0x2d8   : > { %12741 = vmatprep.mubr.bf16.mxu0 %v18767_v23  ;;  %13429 = vmatprep.mubr.bf16.mxu1 %v18734_v11  ;;  %v18793_v23 = vld [vmem:[#allocation55_spill] sm:$0xff] }
 0x2d9   : > { %13458 = vmatpush3.bf16.msra.mxu1 %v14759_v42  ;;  %v18789_v42 = vld [vmem:[#allocation46_spill] sm:$0xff] }
 0x2da   : > { %13459 = vmatprep.subr.bf16.mxu1 %v14760_v19 }
 0x2dd   : > { %13460 = vmatpush3.bf16.msra.mxu1 %v14760_v19  ;;  %v18792_v19 = vld [vmem:[#allocation122_spill] sm:$0xff] }
 0x2de   : > { %13493 = vmatprep.subr.bf16.mxu1 %v14766_v33 }
 0x2df   : > { %12742 = vmatmul.mubr.bf16.vlgmr.msra.gmra.mrb[64].mxu0 %v18768_v17  ;;  %13430 = vmatmul.mubr.bf16.gmra.mrb[48].mxu1 %v18735_v51  ;;  %v14782_v17 = vld [vmem:[%s18055_s6 + $0x180] sm:$0xff]  }
 0x2e0   : > { %12745 = vmatprep.mubr.bf16.mxu0 %v18769_v20  ;;  %12774 = vmatpush3.bf16.msra.mxu0 %v16821_v28  ;;  %v14761_v28 = vld [vmem:[%s18054_s5 + $0x60] sm:$0xff]   ;;  %v14768_v20 = vld [vmem:[%s18054_s5 + $0x8] sm:$0xff]  }
 0x2e1   : > { %13433 = vmatprep.mubr.bf16.mxu1 %v18736_v54  ;;  %12775 = vmatprep.subr.bf16.mxu0 %v14752_v49 }
 0x2e4   : > { %12776 = vmatpush3.bf16.msra.mxu0 %v14752_v49  ;;  %v18795_v49 = vld [vmem:[#allocation63_spill] sm:$0xff] }
 0x2e5   : > { %12777 = vmatprep.subr.bf16.mxu0 %v14755_v10 }
 0x2e7   : > { %12746 = vmatmul.mubr.bf16.gmra.mrb[68].mxu0 %v18770_v36  ;;  %13434 = vmatmul.mubr.bf16.gmra.mrb[52].mxu1 %v18737_v38  ;;  %v18798_v36 = vld [vmem:[#allocation70_spill] sm:$0xff] }
 0x2e8   : > { %12749 = vmatprep.mubr.bf16.mxu0 %v18771_v50  ;;  %13437 = vmatprep.mubr.bf16.mxu1 %v18738_v30  ;;  %v14771_v50 = vld [vmem:[%s18054_s5 + $0x10] sm:$0xff]  }
 0x2e9   : > { %12778 = vmatpush3.bf16.msra.mxu0 %v14755_v10  ;;  %v18796_v10 = vld [vmem:[#allocation42_spill] sm:$0xff] }
 0x2ea   : > { %12779 = vmatprep.subr.bf16.mxu0 %v14758_v59 }
 0x2ed   : > { %12780 = vmatpush3.bf16.msra.mxu0 %v14758_v59  ;;  %v18797_v59 = vld [vmem:[#allocation68_spill] sm:$0xff] }
 0x2ee   : > { %12781 = vmatprep.subr.bf16.mxu0 %v14761_v28 }
 0x2ef   : > { %12750 = vmatmul.mubr.bf16.gmra.mrb[72].mxu0 %v18772_v31  ;;  %13438 = vmatmul.mubr.bf16.gmra.mrb[56].mxu1 %v18773_v1  ;;  %v18800_v31 = vld [vmem:[#allocation82_spill] sm:$0xff] }
 0x2f0   : > { %12753 = vmatprep.mubr.bf16.mxu0 %v18774_v14  ;;  %13441 = vmatprep.mubr.bf16.mxu1 %v18775_v52  ;;  %v14777_v14 = vld [vmem:[%s18054_s5 + $0x20] sm:$0xff]  }
 0x2f1   : > { %12782 = vmatpush3.bf16.msra.mxu0 %v14761_v28  ;;  %v14774_v28 = vld [vmem:[%s18054_s5 + $0x18] sm:$0xff]  }
 0x2f2   : > { %12783 = vmatprep.subr.bf16.mxu0 %v14762_v40 }
 0x2f5   : > { %12784 = vmatpush3.bf16.msra.mxu0 %v14762_v40  ;;  %v18799_v40 = vld [vmem:[#allocation81_spill] sm:$0xff] }
 0x2f6   : > { %12785 = vmatprep.subr.bf16.mxu0 %v14763_v18 }
 0x2f7   : > { %12754 = vmatmul.mubr.bf16.gmra.mrb[76].mxu0 %v18776_v3  ;;  %13442 = vmatmul.mubr.bf16.gmra.mrb[60].mxu1 %v18777_v57  ;;  %v18802_v3 = vld [vmem:[#allocation132_spill] sm:$0xff] }
 0x2f8   : > { %12757 = vmatprep.mubr.bf16.mxu0 %v18778_v63  ;;  %13461 = vmatprep.mubr.bf16.mxu1 %v18779_v48  ;;  %v14779_v63 = vld [vmem:[%s18054_s5 + $0x30] sm:$0xff]  }
 0x2f9   : > { %12786 = vmatpush3.bf16.msra.mxu0 %v14763_v18  ;;  %v14778_v18 = vld [vmem:[%s18054_s5 + $0x28] sm:$0xff]  }
 0x2fa   : > { %12787 = vmatprep.subr.bf16.mxu0 %v14764_v13 }
 0x2fd   : > { %12788 = vmatpush3.bf16.msra.mxu0 %v14764_v13  ;;  %v18801_v13 = vld [vmem:[#allocation85_spill] sm:$0xff] }
 0x2fe   : > { %12821 = vmatprep.subr.bf16.mxu0 %v14765_v37 }
 0x2ff   : > { %12758 = vmatmul.mubr.bf16.gmra.mrb[80].mxu0 %v18780_v24  ;;  %13462 = vmatmul.mubr.bf16.vlgmr.msra.gmra.mrb[32].mxu1 %v18781_v22  ;;  %v18804_v24 = vld [vmem:[#allocation20_spill] sm:$0xff] }
 0x300   : > { %12761 = vmatprep.mubr.bf16.mxu0 %v18782_v53  ;;  %13465 = vmatprep.mubr.bf16.mxu1 %v18783_v16  ;;  %v14781_v53 = vld [vmem:[%s18054_s5 + $0x80] sm:$0xff]  }
 0x301   : > { %13494 = vmatpush3.bf16.msra.mxu1 %v14766_v33  ;;  %v18794_v33 = vld [vmem:[#allocation137_spill] sm:$0xff] }
 0x302   : > { %13495 = vmatprep.subr.bf16.mxu1 %v14767_v61 }
 0x305   : > { %13496 = vmatpush3.bf16.msra.mxu1 %v14767_v61  ;;  %v18803_v61 = vld [vmem:[#allocation133_spill] sm:$0xff] }
 0x306   : > { %13497 = vmatprep.subr.bf16.mxu1 %v14769_v15 }
 0x307   : > { %12762 = vmatmul.mubr.bf16.gmra.mrb[84].mxu0 %v18784_v25  ;;  %13466 = vmatmul.mubr.bf16.gmra.mrb[36].mxu1 %v18785_v4  ;;  %v18806_v25 = vld [vmem:[#allocation25_spill] sm:$0xff] }
 0x308   : > { %12765 = vmatprep.mubr.bf16.mxu0 %v18786_v5  ;;  %13469 = vmatprep.mubr.bf16.mxu1 %v18787_v43  ;;  %v14785_v5 = vld [vmem:[%s18055_s6 + $0x190] sm:$0xff]  }
 0x309   : > { %13498 = vmatpush3.bf16.msra.mxu1 %v14769_v15  ;;  %v14783_v15 = vld [vmem:[%s18055_s6 + $0x188] sm:$0xff]  }
 0x30a   : > { %13499 = vmatprep.subr.bf16.mxu1 %v14770_v62 }
 0x30d   : > { %13500 = vmatpush3.bf16.msra.mxu1 %v14770_v62  ;;  %v18805_v62 = vld [vmem:[#allocation22_spill] sm:$0xff] }
 0x30e   : > { %13501 = vmatprep.subr.bf16.mxu1 %v14772_v12 }
 0x30f   : > { %12766 = vmatmul.mubr.bf16.gmra.mrb[88].mxu0 %v18788_v46  ;;  %13470 = vmatmul.mubr.bf16.gmra.mrb[40].mxu1 %v18789_v42  ;;  %v18808_v46 = vld [vmem:[#allocation31_spill] sm:$0xff] }
 0x310   : > { %12769 = vmatprep.mubr.bf16.mxu0 %v18790_v0  ;;  %13473 = vmatprep.mubr.bf16.mxu1 %v18791_v44  ;;  %v14788_v0 = vld [vmem:[%s18055_s6 + $0x1a0] sm:$0xff]  }
 0x311   : > { %13502 = vmatpush3.bf16.msra.mxu1 %v14772_v12  ;;  %v14786_v12 = vld [vmem:[%s18055_s6 + $0x198] sm:$0xff]  }
 0x312   : > { %13503 = vmatprep.subr.bf16.mxu1 %v14773_v35 }
 0x315   : > { %13504 = vmatpush3.bf16.msra.mxu1 %v14773_v35  ;;  %v18807_v35 = vld [vmem:[#allocation27_spill] sm:$0xff] }
 0x316   : > { %13505 = vmatprep.subr.bf16.mxu1 %v14775_v7 }
 0x317   : > { %12770 = vmatmul.mubr.bf16.gmra.mrb[92].mxu0 %v18792_v19  ;;  %13474 = vmatmul.mubr.bf16.gmra.mrb[44].mxu1 %v18793_v23  ;;  %v14789_v19 = vld [vmem:[%s18055_s6 + $0x1a8] sm:$0xff]  }
 0x318   : > { %12789 = vmatprep.mubr.bf16.mxu0 %v18794_v33  ;;  %13477 = vmatprep.mubr.bf16.mxu1 %v18795_v49  ;;  %v18810_v33 = vld [vmem:[#allocation39_spill] sm:$0xff] }
 0x319   : > { %13506 = vmatpush3.bf16.msra.mxu1 %v14775_v7  ;;  %v18809_v7 = vld [vmem:[#allocation135_spill] sm:$0xff] }
 0x31a   : > { %13507 = vmatprep.subr.bf16.mxu1 %v14776_v39 }
 0x31d   : > { %13508 = vmatpush3.bf16.msra.mxu1 %v14776_v39  ;;  %v4483_v39 = vrot.slane %v18809_v7, 1 }
 0x31e   : > { %13541 = vmatprep.subr.bf16.mxu1 %v14782_v17 }
 0x31f   : > { %12790 = vmatmul.mubr.bf16.vlgmr.msra.gmra.mrb[96].mxu0 %v18796_v10  ;;  %13478 = vmatmul.mubr.bf16.gmra.mrb[48].mxu1 %v18797_v59  ;;  %v18812_v10 = vld [vmem:[#allocation136_spill] sm:$0xff] }
 0x320   : > { %12822 = vmatpush3.bf16.msra.mxu0 %v14765_v37  ;;  %12793 = vmatprep.mubr.bf16.mxu0 %v18779_v48  ;;  %v14780_v37 = vld [vmem:[%s18054_s5 + $0x38] sm:$0xff]  }
 0x321   : > { %13481 = vmatprep.mubr.bf16.mxu1 %v18798_v36  ;;  %12823 = vmatprep.subr.bf16.mxu0 %v14768_v20 }
 0x324   : > { %12824 = vmatpush3.bf16.msra.mxu0 %v14768_v20 }
 0x325   : > { %12825 = vmatprep.subr.bf16.mxu0 %v14771_v50 }
 0x327   : > { %12794 = vmatmul.mubr.bf16.gmra.mrb[100].mxu0 %v18781_v22  ;;  %13482 = vmatmul.mubr.bf16.gmra.mrb[52].mxu1 %v18799_v40 }
 0x328   : > { %12797 = vmatprep.mubr.bf16.mxu0 %v18783_v16  ;;  %13485 = vmatprep.mubr.bf16.mxu1 %v18800_v31 }
 0x329   : > { %12826 = vmatpush3.bf16.msra.mxu0 %v14771_v50  ;;  %v4488_v50 = vrot.slane %v18812_v10, 1 }
 0x32a   : > { %12827 = vmatprep.subr.bf16.mxu0 %v14774_v28 }
 0x32d   : > { %12828 = vmatpush3.bf16.msra.mxu0 %v14774_v28  ;;  %v14791_v28 = vld [vmem:[%s18055_s6 + $0x1b0] sm:$0xff]  }
 0x32e   : > { %12829 = vmatprep.subr.bf16.mxu0 %v14777_v14 }
 0x32f   : > { %12798 = vmatmul.mubr.bf16.gmra.mrb[104].mxu0 %v18785_v4  ;;  %13486 = vmatmul.mubr.bf16.gmra.mrb[56].mxu1 %v18801_v13 }
 0x330   : > { %12801 = vmatprep.mubr.bf16.mxu0 %v18787_v43  ;;  %13489 = vmatprep.mubr.bf16.mxu1 %v18802_v3  ;;  %v18833_v3 = vld [vmem:[#allocation104_spill] sm:$0xff] }
 0x331   : > { %12830 = vmatpush3.bf16.msra.mxu0 %v14777_v14  ;;  %v18813_v14 = vld [vmem:[#allocation18_spill] sm:$0xff] }
 0x332   : > { %12831 = vmatprep.subr.bf16.mxu0 %v14778_v18 }
 0x335   : > { %12832 = vmatpush3.bf16.msra.mxu0 %v14778_v18  ;;  %v4490_v18 = vrot.slane %v18813_v14, 1 }
 0x336   : > { %12833 = vmatprep.subr.bf16.mxu0 %v14779_v63 }
 0x337   : > { %12802 = vmatmul.mubr.bf16.gmra.mrb[108].mxu0 %v18789_v42  ;;  %13490 = vmatmul.mubr.bf16.gmra.mrb[60].mxu1 %v18803_v61  ;;  %v18859_v42 = vld [vmem:[#allocation117_spill] sm:$0xff] }
 0x338   : > { %12805 = vmatprep.mubr.bf16.mxu0 %v18791_v44  ;;  %13509 = vmatprep.mubr.bf16.mxu1 %v18804_v24  ;;  %v4534_v43 = vrot.slane %v18859_v42, 1  ;;  %v4536_v42 = vrot.slane %v18863_v45, 1  ;;  %v18869_v45 = vld [vmem:[#allocation74_spill] sm:$0xff] }
 0x339   : > { %12834 = vmatpush3.bf16.msra.mxu0 %v14779_v63 }
 0x33a   : > { %12835 = vmatprep.subr.bf16.mxu0 %v14780_v37 }
 0x33d   : > { %12836 = vmatpush3.bf16.msra.mxu0 %v14780_v37  ;;  %v18814_v37 = vld [vmem:[#allocation92_spill] sm:$0xff] }
 0x33e   : > { %12869 = vmatprep.subr.bf16.mxu0 %v14781_v53  ;;  %v4494_v24 = vrot.slane %v18814_v37, 1 }
 0x33f   : > { %12806 = vmatmul.mubr.bf16.gmra.mrb[112].mxu0 %v18793_v23  ;;  %13510 = vmatmul.mubr.bf16.vlgmr.msra.gmra.mrb[32].mxu1 %v18805_v62  ;;  %v18815_v62 = vld [vmem:[#allocation13_spill] sm:$0xff]  ;;  %v18846_v23 = vld [vmem:[#allocation50_spill] sm:$0xff] }
 0x340   : > { %12809 = vmatprep.mubr.bf16.mxu0 %v18795_v49  ;;  %13513 = vmatprep.mubr.bf16.mxu1 %v18806_v25  ;;  %v4491_v25 = vor.u32 %v4490_v18, %v18815_v62  ;;  %v14784_v18 = vld [vmem:[%s18054_s5 + $0x88] sm:$0xff]   ;;  %v4520_v44 = vrot.slane %v18846_v23, 1 }
 0x341   : > { %13542 = vmatpush3.bf16.msra.mxu1 %v14782_v17  ;;  %v18811_v17 = vld [vmem:[#allocation8_spill] sm:$0xff] }
 0x342   : > { %13543 = vmatprep.subr.bf16.mxu1 %v14783_v15  ;;  %v4484_v20 = vor.u32 %v4483_v39, %v18811_v17 }
 0x344   : > { %v4489_v63 = vsel %vm4477_vm7, %v4484_v20, %v4488_v50  ;;  %v18818_v20 = vld [vmem:[#allocation30_spill] sm:$0xff]  ;;  %v17052_v50 = vld [vmem:[%s18055_s6 + $0x1c0] sm:$0xff]  }
 0x345   : > { %13544 = vmatpush3.bf16.msra.mxu1 %v14783_v15  ;;  %v14792_v15 = vld [vmem:[%s18055_s6 + $0x1b8] sm:$0xff]  }
 0x346   : > { %13545 = vmatprep.subr.bf16.mxu1 %v14785_v5 }
 0x347   : > { %12810 = vmatmul.mubr.bf16.gmra.mrb[116].mxu0 %v18797_v59  ;;  %13514 = vmatmul.mubr.bf16.gmra.mrb[36].mxu1 %v18807_v35  ;;  %v18832_v35 = vld [vmem:[#allocation79_spill] sm:$0xff] }
 0x348   : > { %12813 = vmatprep.mubr.bf16.mxu0 %v18798_v36  ;;  %13517 = vmatprep.mubr.bf16.mxu1 %v18808_v46  ;;  %v8690_v61 = vrot.slane %v18832_v35, 3 }
 0x349   : > { %13546 = vmatpush3.bf16.msra.mxu1 %v14785_v5  ;;  %v18816_v5 = vld [vmem:[#allocation123_spill] sm:$0xff] }
 0x34a   : > { %13547 = vmatprep.subr.bf16.mxu1 %v14786_v12 }
 0x34d   : > { %13548 = vmatpush3.bf16.msra.mxu1 %v14786_v12  ;;  %v4492_v12 = vrot.slane %v18816_v5, 1 }
 0x34e   : > { %13549 = vmatprep.subr.bf16.mxu1 %v14788_v0 }
 0x34f   : > { %12814 = vmatmul.mubr.bf16.gmra.mrb[120].mxu0 %v18799_v40  ;;  %13518 = vmatmul.mubr.bf16.gmra.mrb[40].mxu1 %v18810_v33  ;;  %v4493_v16 = vsel %vm4477_vm7, %v4491_v25, %v4492_v12  ;;  %v18823_v12 = vld [vmem:[#allocation33_spill] sm:$0xff] }
 0x350   : > { %12817 = vmatprep.mubr.bf16.mxu0 %v18800_v31  ;;  %13521 = vmatprep.mubr.bf16.mxu1 %v16727_v6  ;;  %v18825_v6 = vld [vmem:[#allocation34_spill] sm:$0xff]  ;;  %v18834_v31 = vld [vmem:[#allocation36_spill] sm:$0xff] }
 0x351   : > { %13550 = vmatpush3.bf16.msra.mxu1 %v14788_v0  ;;  %v18817_v0 = vld [vmem:[#allocation91_spill] sm:$0xff]  ;;  %v4504_v33 = vrot.slane %v18825_v6, 1  ;;  %v4512_v40 = vrot.slane %v18834_v31, 1 }
 0x352   : > { %13551 = vmatprep.subr.bf16.mxu1 %v14789_v19  ;;  %v4495_v39 = vor.u32 %v4494_v24, %v18817_v0  ;;  %v18821_v24 = vld [vmem:[#allocation101_spill] sm:$0xff] }
 0x355   : > { %13552 = vmatpush3.bf16.msra.mxu1 %v14789_v19  ;;  %v4496_v19 = vrot.slane %v18818_v20, 1 }
 0x356   : > { %13553 = vmatprep.subr.bf16.mxu1 %v14791_v28 }
 0x357   : > { %12818 = vmatmul.mubr.bf16.gmra.mrb[124].mxu0 %v18801_v13  ;;  %13522 = vmatmul.mubr.bf16.gmra.mrb[44].mxu1 %v16732_v29  ;;  %v17057_v48 = vsel %vm4477_vm7, %v4495_v39, %v4496_v19  ;;  %v4500_v39 = vrot.slane %v18823_v12, 1  ;;  %v18824_v19 = vld [vmem:[#allocation99_spill] sm:$0xff] }
 0x358   : > { %12837 = vmatprep.mubr.bf16.mxu0 %v4489_v63  ;;  %13525 = vmatprep.mubr.bf16.mxu1 %v16755_v56  ;;  %v18819_v63 = vld [vmem:[#allocation94_spill] sm:$0xff]  ;;  %18820 = vst [vmem:[#allocation47_spill] sm:$0xff] %v17057_v48  ;;  %v4502_v56 = vrot.slane %v18821_v24, 1 }
 0x359   : > { %13554 = vmatpush3.bf16.msra.mxu1 %v14791_v28  ;;  %v4498_v22 = vrot.slane %v18819_v63, 1  ;;  %v18822_v28 = vld [vmem:[#allocation93_spill] sm:$0xff] }
 0x35a   : > { %13555 = vmatprep.subr.bf16.mxu1 %v14792_v15  ;;  %v4503_v29 = vor.u32 %v4502_v56, %v18824_v19  ;;  %v14790_v56 = vld [vmem:[%s18054_s5 + $0x98] sm:$0xff]  }
 0x35b   : > { %v4499_v25 = vor.u32 %v4498_v22, %v18822_v28 }
 0x35c   : > { %v17079_v22 = vsel %vm4477_vm7, %v4503_v29, %v4504_v33  ;;  %v8689_v33 = vrot.slane %v18773_v1, 3 }
 0x35d   : > { %13556 = vmatpush3.bf16.msra.mxu1 %v14792_v15  ;;  %v17075_v15 = vsel %vm4477_vm7, %v4499_v25, %v4500_v39  ;;  %18828 = vst [vmem:[#allocation37_spill] sm:$0xff] %v17079_v22  ;;  %v18831_v39 = vld [vmem:[#allocation35_spill] sm:$0xff] }
 0x35e   : > { %13589 = vmatprep.subr.bf16.mxu1 %v17052_v50  ;;  %18826 = vst [vmem:[#allocation52_spill] sm:$0xff] %v17075_v15  ;;  %v4508_v29 = vrot.slane %v18831_v39, 1 }
 0x35f   : > { %12838 = vmatmul.mubr.bf16.vlgmr.msra.gmra.mrb[96].mxu0 %v4493_v16  ;;  %13526 = vmatmul.mubr.bf16.gmra.mrb[48].mxu1 %v16760_v32  ;;  %v14787_v16 = vld [vmem:[%s18054_s5 + $0x90] sm:$0xff]  }
 0x360   : > { %12870 = vmatpush3.bf16.msra.mxu0 %v14781_v53  ;;  %12841 = vmatprep.mubr.bf16.mxu0 %v17057_v48  ;;  %v18827_v53 = vld [vmem:[#allocation103_spill] sm:$0xff] }
 0x361   : > { %13529 = vmatprep.mubr.bf16.mxu1 %v16781_v47  ;;  %12871 = vmatprep.subr.bf16.mxu0 %v14784_v18  ;;  %v4506_v32 = vrot.slane %v18827_v53, 1  ;;  %v18829_v47 = vld [vmem:[#allocation105_spill] sm:$0xff] }
 0x362   : > { %v4510_v46 = vrot.slane %v18829_v47, 1 }
 0x364   : > { %12872 = vmatpush3.bf16.msra.mxu0 %v14784_v18  ;;  %v18830_v18 = vld [vmem:[#allocation102_spill] sm:$0xff]  ;;  %v4511_v13 = vor.u32 %v4510_v46, %v18833_v3 }
 0x365   : > { %12873 = vmatprep.subr.bf16.mxu0 %v14787_v16  ;;  %v4507_v25 = vor.u32 %v4506_v32, %v18830_v18  ;;  %v14793_v32 = vld [vmem:[%s18054_s5 + $0xa0] sm:$0xff]  }
 0x366   : > { %v17108_v46 = vsel %vm4477_vm7, %v4511_v13, %v4512_v40  ;;  %v18842_v40 = vld [vmem:[#allocation106_spill] sm:$0xff] }
 0x367   : > { %12842 = vmatmul.mubr.bf16.gmra.mrb[100].mxu0 %v17075_v15  ;;  %13530 = vmatmul.mubr.bf16.gmra.mrb[52].mxu1 %v16786_v26  ;;  %v8692_v15 = vrot.slane %v18775_v52, 3  ;;  %v18835_v26 = vld [vmem:[#allocation87_spill] sm:$0xff]  ;;  %18839 = vst [vmem:[#allocation38_spill] sm:$0xff] %v17108_v46 }
 0x368   : > { %12845 = vmatprep.mubr.bf16.mxu0 %v17079_v22  ;;  %13533 = vmatprep.mubr.bf16.mxu1 %v16805_v21  ;;  %v8693_v48 = vrot.slane %v18835_v26, 3  ;;  %v17101_v21 = vsel %vm4477_vm7, %v4507_v25, %v4508_v29  ;;  %v17104_v22 = vsel %vm7850_vm6, %v8689_v33, %v8690_v61  ;;  %v18841_v26 = vld [vmem:[#allocation109_spill] sm:$0xff]  ;;  %v14794_v25 = vld [vmem:[%s18054_s5 + $0xa8] sm:$0xff]  }
 0x369   : > { %12874 = vmatpush3.bf16.msra.mxu0 %v14787_v16  ;;  %18836 = vst [vmem:[#allocation29_spill] sm:$0xff] %v17101_v21  ;;  %18837 = vst [vmem:[#allocation45_spill] sm:$0xff] %v17104_v22  ;;  %v18838_v16 = vld [vmem:[#allocation107_spill] sm:$0xff]  ;;  %v4518_v49 = vrot.slane %v18841_v26, 1  ;;  %v18845_v33 = vld [vmem:[#allocation108_spill] sm:$0xff] }
 0x36a   : > { %12875 = vmatprep.subr.bf16.mxu0 %v14790_v56  ;;  %v4514_v36 = vrot.slane %v18838_v16, 1  ;;  %v17111_v59 = vsel %vm7850_vm6, %v8692_v15, %v8693_v48  ;;  %v18843_v48 = vld [vmem:[#allocation41_spill] sm:$0xff]  ;;  %v8695_v15 = vrot.slane %v18777_v57, 3 }
 0x36b   : > { %18840 = vst [vmem:[#allocation61_spill] sm:$0xff] %v17111_v59  ;;  %v4516_v61 = vrot.slane %v18843_v48, 1  ;;  %v4519_v35 = vor.u32 %v4518_v49, %v18845_v33  ;;  %v18851_v49 = vld [vmem:[#allocation113_spill] sm:$0xff] }
 0x36c   : > { %v4515_v13 = vor.u32 %v4514_v36, %v18842_v40  ;;  %v4526_v27 = vrot.slane %v18851_v49, 1 }
 0x36d   : > { %12876 = vmatpush3.bf16.msra.mxu0 %v14790_v56  ;;  %v18844_v56 = vld [vmem:[#allocation97_spill] sm:$0xff] }
 0x36e   : > { %12877 = vmatprep.subr.bf16.mxu0 %v14793_v32  ;;  %v8696_v29 = vrot.slane %v18844_v56, 3  ;;  %v17138_v56 = vsel %vm4477_vm7, %v4519_v35, %v4520_v44  ;;  %v18853_v44 = vld [vmem:[#allocation53_spill] sm:$0xff] }
 0x36f   : > { %12846 = vmatmul.mubr.bf16.gmra.mrb[104].mxu0 %v17101_v21  ;;  %13534 = vmatmul.mubr.bf16.gmra.mrb[56].mxu1 %v17104_v22  ;;  %v14795_v22 = vld [vmem:[%s18054_s5 + $0xb0] sm:$0xff]   ;;  %18850 = vst [vmem:[#allocation84_spill] sm:$0xff] %v17138_v56  ;;  %v4524_v35 = vrot.slane %v18853_v44, 1 }
 0x370   : > { %12849 = vmatprep.mubr.bf16.mxu0 %v17108_v46  ;;  %13537 = vmatprep.mubr.bf16.mxu1 %v17111_v59  ;;  %v17131_v59 = vsel %vm4477_vm7, %v4515_v13, %v4516_v61  ;;  %v17134_v36 = vsel %vm7850_vm6, %v8695_v15, %v8696_v29  ;;  %v18849_v46 = vld [vmem:[#allocation111_spill] sm:$0xff]  ;;  %v18852_v13 = vld [vmem:[#allocation110_spill] sm:$0xff]  ;;  %v18854_v15 = vld [vmem:[#allocation112_spill] sm:$0xff] }
 0x371   : > { %12878 = vmatpush3.bf16.msra.mxu0 %v14793_v32  ;;  %18847 = vst [vmem:[#allocation49_spill] sm:$0xff] %v17131_v59  ;;  %18848 = vst [vmem:[#allocation80_spill] sm:$0xff] %v17134_v36  ;;  %v4522_v21 = vrot.slane %v18849_v46, 1  ;;  %v14796_v32 = vld [vmem:[%s18054_s5 + $0xb8] sm:$0xff]   ;;  %v4527_v29 = vor.u32 %v4526_v27, %v18854_v15  ;;  %v14799_v27 = vld [vmem:[%s18055_s6 + $0x1c8] sm:$0xff]  }
 0x372   : > { %12879 = vmatprep.subr.bf16.mxu0 %v14794_v25 }
 0x373   : > { %v4523_v61 = vor.u32 %v4522_v21, %v18852_v13 }
 0x375   : > { %12880 = vmatpush3.bf16.msra.mxu0 %v14794_v25  ;;  %v18855_v25 = vld [vmem:[#allocation58_spill] sm:$0xff] }
 0x376   : > { %12881 = vmatprep.subr.bf16.mxu0 %v14795_v22  ;;  %v4528_v58 = vrot.slane %v18855_v25, 1 }
 0x377   : > { %12850 = vmatmul.mubr.bf16.gmra.mrb[108].mxu0 %v17131_v59  ;;  %13538 = vmatmul.mubr.bf16.gmra.mrb[60].mxu1 %v17134_v36  ;;  %v17155_v59 = vld [vmem:[%s18054_s5 + $0xc0] sm:$0xff]   ;;  %v17158_v36 = vsel %vm4477_vm7, %v4523_v61, %v4524_v35  ;;  %v18861_v61 = vld [vmem:[#allocation64_spill] sm:$0xff] }
 0x378   : > { %12853 = vmatprep.mubr.bf16.mxu0 %v17138_v56  ;;  %13557 = vmatprep.mubr.bf16.mxu1 %v18729_v9  ;;  %18856 = vst [vmem:[#allocation86_spill] sm:$0xff] %v17158_v36  ;;  %v18857_v56 = vld [vmem:[#allocation115_spill] sm:$0xff]  ;;  %v17162_v21 = vsel %vm4477_vm7, %v4527_v29, %v4528_v58  ;;  %v4532_v35 = vrot.slane %v18861_v61, 1  ;;  %v18862_v29 = vld [vmem:[#allocation116_spill] sm:$0xff] }
 0x379   : > { %12882 = vmatpush3.bf16.msra.mxu0 %v14795_v22  ;;  %v4530_v9 = vrot.slane %v18857_v56, 1  ;;  %18858 = vst [vmem:[#allocation78_spill] sm:$0xff] %v17162_v21  ;;  %v18860_v22 = vld [vmem:[#allocation114_spill] sm:$0xff] }
 0x37a   : > { %12883 = vmatprep.subr.bf16.mxu0 %v14796_v32 }
 0x37b   : > { %v4531_v58 = vor.u32 %v4530_v9, %v18860_v22  ;;  %v18867_v9 = vld [vmem:[#allocation12_spill] sm:$0xff] }
 0x37c   : > { %v4542_v61 = vrot.slane %v18867_v9, 1 }
 0x37d   : > { %12884 = vmatpush3.bf16.msra.mxu0 %v14796_v32  ;;  %v4535_v32 = vor.u32 %v4534_v43, %v18862_v29  ;;  %v14802_v43 = vld [vmem:[%s18055_s6 + $0x1d8] sm:$0xff]  }
 0x37e   : > { %12917 = vmatprep.subr.bf16.mxu0 %v17155_v59 }
 0x37f   : > { %12854 = vmatmul.mubr.bf16.gmra.mrb[112].mxu0 %v17158_v36  ;;  %13558 = vmatmul.mubr.bf16.vlgmr.msra.gmra.mrb[32].mxu1 %v18730_v41  ;;  %v14801_v36 = vld [vmem:[%s18055_s6 + $0x1d0] sm:$0xff]   ;;  %v18864_v41 = vld [vmem:[#allocation118_spill] sm:$0xff] }
 0x380   : > { %12857 = vmatprep.mubr.bf16.mxu0 %v17162_v21  ;;  %13561 = vmatprep.mubr.bf16.mxu1 %v18731_v55  ;;  %v4538_v8 = vrot.slane %v18864_v41, 1  ;;  %v17183_v21 = vsel %vm4477_vm7, %v4531_v58, %v4532_v35  ;;  %v17186_v55 = vsel %vm4477_vm7, %v4535_v32, %v4536_v42  ;;  %v4540_v58 = vrot.slane %v18869_v45, 1  ;;  %v18870_v42 = vld [vmem:[#allocation119_spill] sm:$0xff] }
 0x381   : > { %13590 = vmatpush3.bf16.msra.mxu1 %v17052_v50  ;;  %18865 = vst [vmem:[#allocation96_spill] sm:$0xff] %v17183_v21  ;;  %18866 = vst [vmem:[#allocation120_spill] sm:$0xff] %v17186_v55  ;;  %v18868_v50 = vld [vmem:[#allocation10_spill] sm:$0xff]  ;;  %v4543_v35 = vor.u32 %v4542_v61, %v18870_v42  ;;  %v5028_v45 = vrot.slane %v18811_v17, 2 }
 0x382   : > { %13591 = vmatprep.subr.bf16.mxu1 %v14799_v27  ;;  %v4539_v41 = vor.u32 %v4538_v8, %v18868_v50  ;;  %v18873_v8 = vld [vmem:[#allocation125_spill] sm:$0xff] }
 0x383   : > { %v4546_v9 = vrot.slane %v18873_v8, 1 }
 0x385   : > { %13592 = vmatpush3.bf16.msra.mxu1 %v14799_v27  ;;  %v18871_v27 = vld [vmem:[#allocation77_spill] sm:$0xff] }
 0x386   : > { %13593 = vmatprep.subr.bf16.mxu1 %v14801_v36  ;;  %v4544_v32 = vrot.slane %v18871_v27, 1  ;;  %v5032_v27 = vrot.slane %v18812_v10, 3  ;;  %v18877_v10 = vld [vmem:[#allocation83_spill] sm:$0xff] }
 0x387   : > { %12858 = vmatmul.mubr.bf16.gmra.mrb[116].mxu0 %v17183_v21  ;;  %13562 = vmatmul.mubr.bf16.gmra.mrb[36].mxu1 %v18765_v2  ;;  %v14804_v21 = vld [vmem:[%s18055_s6 + $0x1e0] sm:$0xff]   ;;  %v17204_v2 = vsel %vm4477_vm7, %v4539_v41, %v4540_v58  ;;  %v14805_v41 = vld [vmem:[%s18055_s6 + $0x1e8] sm:$0xff]  }
 0x388   : > { %12861 = vmatprep.mubr.bf16.mxu0 %v17186_v55  ;;  %13565 = vmatprep.mubr.bf16.mxu1 %v18766_v60  ;;  %18872 = vst [vmem:[#allocation9_spill] sm:$0xff] %v17204_v2  ;;  %v5029_v55 = vrot.slane %v18809_v7, 3  ;;  %v18874_v60 = vld [vmem:[#allocation7_spill] sm:$0xff]  ;;  %v18876_v7 = vld [vmem:[#allocation121_spill] sm:$0xff] }
 0x389   : > { %13594 = vmatpush3.bf16.msra.mxu1 %v14801_v36  ;;  %v18875_v50 = vshrl.u32 %v18874_v60, 16  ;;  %v17213_v36 = vsel %vm4477_vm7, %v4543_v35, %v4544_v32  ;;  %v4547_v17 = vor.u32 %v4546_v9, %v18876_v7  ;;  %v5036_v32 = vrot.slane %v18813_v14, 3  ;;  %v18878_v60 = vld [vmem:[#allocation19_spill] sm:$0xff]  ;;  %v18880_v14 = vld [vmem:[#allocation21_spill] sm:$0xff] }
 0x38a   : > { %13595 = vmatprep.subr.bf16.mxu1 %v14802_v43  ;;  %v5030_v58 = vor.u32 %v5029_v55, %v5028_v45  ;;  %v18881_v55 = vshrl.u32 %v18880_v14, 16 }
 0x38b   : > { %v5031_v61 = vrot.slane %v18875_v50, 2  ;;  %v4548_v50 = vrot.slane %v18877_v10, 1 }
 0x38d   : > { %13596 = vmatpush3.bf16.msra.mxu1 %v14802_v43  ;;  %v5033_v35 = vor.u32 %v5032_v27, %v5031_v61  ;;  %v5035_v43 = vrot.slane %v18815_v62, 2  ;;  %v17233_v9 = vsel %vm4477_vm7, %v4547_v17, %v4548_v50  ;;  %v5043_v62 = vrot.slane %v18814_v37, 3  ;;  %v14808_v17 = vld [vmem:[%s18055_s6 + $0x1f8] sm:$0xff]  }
 0x38e   : > { %13597 = vmatprep.subr.bf16.mxu1 %v14804_v21  ;;  %v5045_v27 = vrot.slane %v18881_v55, 2  ;;  %v5050_v50 = vrot.slane %v18819_v63, 3  ;;  %v14800_v63 = vld [vmem:[%s18054_s5 + $0xc8] sm:$0xff]  }
 0x38f   : > { %12862 = vmatmul.mubr.bf16.gmra.mrb[120].mxu0 %v17204_v2  ;;  %13566 = vmatmul.mubr.bf16.gmra.mrb[40].mxu1 %v18734_v11  ;;  %v18879_v2 = vshrl.u32 %v18878_v60, 16  ;;  %v5039_v11 = vrot.slane %v18816_v5, 3  ;;  %v5034_v45 = vsel %vm5027_vm8, %v5030_v58, %v5033_v35  ;;  %v5037_v5 = vor.u32 %v5036_v32, %v5035_v43  ;;  %v18882_v58 = vld [vmem:[#allocation23_spill] sm:$0xff]  ;;  %v18884_v60 = vld [vmem:[#allocation26_spill] sm:$0xff] }
 0x390   : > { %12865 = vmatprep.mubr.bf16.mxu0 %v17213_v36  ;;  %13569 = vmatprep.mubr.bf16.mxu1 %v18735_v51  ;;  %v14807_v51 = vld [vmem:[%s18055_s6 + $0x1f0] sm:$0xff]   ;;  %v5056_v43 = vrot.slane %v18824_v19, 2  ;;  %v5057_v32 = vrot.slane %v18821_v24, 3 }
 0x391   : > { %13598 = vmatpush3.bf16.msra.mxu1 %v14804_v21  ;;  %v5038_v8 = vrot.slane %v18879_v2, 2  ;;  %v5042_v21 = vrot.slane %v18817_v0, 2  ;;  %v5046_v2 = vrot.slane %v18818_v20, 3  ;;  %v14803_v19 = vld [vmem:[%s18054_s5 + $0xd0] sm:$0xff]  }
 0x392   : > { %13599 = vmatprep.subr.bf16.mxu1 %v14805_v41 }
 0x393   : > { %v5040_v61 = vor.u32 %v5039_v11, %v5038_v8  ;;  %v5044_v37 = vor.u32 %v5043_v62, %v5042_v21  ;;  %v5047_v0 = vor.u32 %v5046_v2, %v5045_v27  ;;  %v17251_v8 = vld [vmem:[%s18055_s6 + $0x200] sm:$0xff]   ;;  %v18885_v11 = vshrl.u32 %v18884_v60, 16  ;;  %v18887_v27 = vld [vmem:[#allocation28_spill] sm:$0xff] }
 0x394   : > { %v18886_v62 = vld [vmem:[#allocation15_spill] sm:$0xff]  ;;  %v18888_v2 = vshrl.u32 %v18887_v27, 16 }
 0x395   : > { %13600 = vmatpush3.bf16.msra.mxu1 %v14805_v41  ;;  %v5041_v20 = vsel %vm5027_vm8, %v5037_v5, %v5040_v61  ;;  %v5049_v41 = vrot.slane %v18822_v28, 2  ;;  %v17264_v21 = vsel %vm5027_vm8, %v5044_v37, %v5047_v0  ;;  %v811_v14 = vshrl.u32 %v18886_v62, 16 }
 0x396   : > { %13601 = vmatprep.subr.bf16.mxu1 %v14807_v51  ;;  %v814_v55 = vshll.u32 %v18886_v62, 16  ;;  %v5066_v5 = vrot.slane %v18888_v2, 2  ;;  %v5067_v61 = vrot.slane %v18831_v39, 3  ;;  %v5070_v37 = vrot.slane %v18833_v3, 2  ;;  %v18891_v3 = vld [vmem:[#allocation16_spill] sm:$0xff] }
 0x397   : > { %12866 = vmatmul.mubr.bf16.gmra.mrb[124].mxu0 %v17233_v9  ;;  %13570 = vmatmul.mubr.bf16.gmra.mrb[44].mxu1 %v18736_v54  ;;  %v18883_v54 = vshrl.u32 %v18882_v58, 16  ;;  %v5051_v28 = vor.u32 %v5050_v50, %v5049_v41  ;;  %v5071_v0 = vrot.slane %v18829_v47, 3  ;;  %v5074_v41 = vrot.slane %v18834_v31, 3  ;;  %v18894_v62 = vld [vmem:[#allocation48_spill] sm:$0xff] }
 0x398   : > { %12885 = vmatprep.mubr.bf16.mxu0 %v5034_v45  ;;  %13573 = vmatprep.mubr.bf16.mxu1 %v18737_v38  ;;  %v5053_v38 = vrot.slane %v18823_v12, 3  ;;  %v5060_v45 = vrot.slane %v18825_v6, 3  ;;  %v5058_v6 = vor.u32 %v5057_v32, %v5056_v43  ;;  %v813_v50 = vrot.slane %v811_v14, 6 }
 0x399   : > { %13602 = vmatpush3.bf16.msra.mxu1 %v14807_v51  ;;  %v5052_v35 = vrot.slane %v18883_v54, 2  ;;  %v5059_v51 = vrot.slane %v18885_v11, 2  ;;  %v816_v58 = vrot.slane %v814_v55, 7  ;;  %v5068_v54 = vor.u32 %v5067_v61, %v5066_v5 }
 0x39a   : > { %13603 = vmatprep.subr.bf16.mxu1 %v14808_v17  ;;  %v819_v47 = vshrl.u32 %v18891_v3, 16  ;;  %v5072_v31 = vor.u32 %v5071_v0, %v5070_v37  ;;  %v5077_v11 = vrot.slane %v18842_v40, 2  ;;  %v18895_v40 = vshrl.u32 %v18894_v62, 16  ;;  %v18898_v0 = vld [vmem:[#allocation51_spill] sm:$0xff]  ;;  %v18907_v62 = vld [vmem:[#allocation69_spill] sm:$0xff] }
 0x39b   : > { %v5054_v24 = vor.u32 %v5053_v38, %v5052_v35  ;;  %v5061_v12 = vor.u32 %v5060_v45, %v5059_v51  ;;  %v14806_v35 = vld [vmem:[%s18054_s5 + $0xd8] sm:$0xff]   ;;  %v822_v38 = vshll.u32 %v18891_v3, 16  ;;  %v17304_v32 = vor.u32 %v816_v58, %v813_v50  ;;  %v14809_v51 = vld [vmem:[%s18054_s5 + $0xe0] sm:$0xff]   ;;  %v18892_v45 = vld [vmem:[#allocation40_spill] sm:$0xff] }
 0x39c   : > { %v5087_v14 = vrot.slane %v18895_v40, 2  ;;  %v5091_v61 = vrot.slane %v18852_v13, 2  ;;  %v5092_v37 = vrot.slane %v18849_v46, 3  ;;  %v5098_v13 = vrot.slane %v18854_v15, 2 }
 0x39d   : > { %13604 = vmatpush3.bf16.msra.mxu1 %v14808_v17  ;;  %v17288_v17 = vsel %vm5027_vm8, %v5058_v6, %v5061_v12  ;;  %v824_v6 = vrot.slane %v822_v38, 7  ;;  %v5084_v12 = vrot.slane %v18845_v33, 2  ;;  %v14812_v38 = vld [vmem:[%s18054_s5 + $0xf8] sm:$0xff]   ;;  %v5116_v40 = vrot.slane %v18907_v62, 3 }
 0x39e   : > { %13637 = vmatprep.subr.bf16.mxu1 %v17251_v8  ;;  %v5093_v3 = vor.u32 %v5092_v37, %v5091_v61  ;;  %v18911_v37 = vld [vmem:[#allocation118_spill] sm:$0xff] }
 0x39f   : > { %12886 = vmatmul.mubr.bf16.vlgmr.msra.gmra.mrb[96].mxu0 %v5041_v20  ;;  %13574 = vmatmul.mubr.bf16.gmra.mrb[48].mxu1 %v18738_v30  ;;  %v5063_v30 = vrot.slane %v18830_v18, 2  ;;  %v18889_v18 = vld [vmem:[#allocation32_spill] sm:$0xff] }
 0x3a0   : > { %12918 = vmatpush3.bf16.msra.mxu0 %v17155_v59  ;;  %12889 = vmatprep.mubr.bf16.mxu0 %v17264_v21  ;;  %v5064_v59 = vrot.slane %v18827_v53, 3  ;;  %v18890_v20 = vshrl.u32 %v18889_v18, 16  ;;  %v18899_v18 = vshrl.u32 %v18898_v0, 16  ;;  %v5120_v0 = vrot.slane %v18911_v37, 3  ;;  %v18927_v37 = vld [vmem:[#allocation47_spill] sm:$0xff] }
 0x3a1   : > { %13577 = vmatprep.mubr.bf16.mxu1 %v18773_v1  ;;  %12919 = vmatprep.subr.bf16.mxu0 %v14800_v63  ;;  %v17285_v1 = vsel %vm5027_vm8, %v5051_v28, %v5054_v24  ;;  %v5081_v28 = vrot.slane %v18843_v48, 3  ;;  %v821_v24 = vrot.slane %v819_v47, 6  ;;  %v14810_v48 = vld [vmem:[%s18054_s5 + $0xe8] sm:$0xff]  }
 0x3a2   : > { %v5073_v53 = vrot.slane %v18890_v20, 2  ;;  %v5065_v39 = vor.u32 %v5064_v59, %v5063_v30  ;;  %v17328_v59 = vsel %vm15041_vm2, 0, %v17304_v32  ;;  %v5094_v20 = vrot.slane %v18899_v18, 2  ;;  %v18912_v18 = vld [vmem:[#allocation72_spill] sm:$0xff] }
 0x3a3   : > { %v17337_v27 = vor.u32 %v824_v6, %v821_v24  ;;  %v18905_v6 = vld [vmem:[#allocation66_spill] sm:$0xff]  ;;  %v18935_v30 = vld [vmem:[#allocation132_spill] sm:$0xff] }
 0x3a4   : > { %12920 = vmatpush3.bf16.msra.mxu0 %v14800_v63  ;;  %v5075_v43 = vor.u32 %v5074_v41, %v5073_v53  ;;  %v17307_v60 = vsel %vm5027_vm8, %v5065_v39, %v5068_v54  ;;  %v18893_v63 = vshrl.u32 %v18892_v45, 16  ;;  %v5095_v53 = vrot.slane %v18853_v44, 3  ;;  %v14811_v41 = vld [vmem:[%s18054_s5 + $0xf0] sm:$0xff]   ;;  %v18903_v45 = vld [vmem:[#allocation64_spill] sm:$0xff] }
 0x3a5   : > { %12921 = vmatprep.subr.bf16.mxu0 %v14803_v19  ;;  %v17353_v58 = vsel %vm15041_vm2, 0, %v17337_v27  ;;  %v5099_v44 = vrot.slane %v18851_v49, 3  ;;  %v18900_v39 = vshrl.u32 %v18755_v34, 16 }
 0x3a6   : > { %v17323_v55 = vsel %vm5027_vm8, %v5072_v31, %v5075_v43  ;;  %v5096_v47 = vor.u32 %v5095_v53, %v5094_v20  ;;  %v5105_v31 = vrot.slane %v18860_v22, 2  ;;  %v5106_v43 = vrot.slane %v18857_v56, 3  ;;  %v14815_v56 = vld [vmem:[%s18055_s6 + $0x208] sm:$0xff]  }
 0x3a7   : > { %12890 = vmatmul.mubr.bf16.gmra.mrb[100].mxu0 %v17285_v1  ;;  %13578 = vmatmul.mubr.bf16.gmra.mrb[52].mxu1 %v18775_v52  ;;  %v5078_v52 = vrot.slane %v18838_v16, 3  ;;  %v5088_v16 = vrot.slane %v18846_v23, 3  ;;  %v5101_v54 = vrot.slane %v18900_v39, 2  ;;  %v5100_v34 = vor.u32 %v5099_v44, %v5098_v13  ;;  %v18908_v22 = vld [vmem:[#allocation44_spill] sm:$0xff] }
 0x3a8   : > { %12893 = vmatprep.mubr.bf16.mxu0 %v17288_v17  ;;  %13581 = vmatprep.mubr.bf16.mxu1 %v18777_v57  ;;  %v5080_v57 = vrot.slane %v18893_v63, 2  ;;  %v17371_v15 = vsel %vm5027_vm8, %v5093_v3, %v5096_v47  ;;  %v5109_v63 = vrot.slane %v18903_v45, 3  ;;  %v18913_v20 = vshrl.u32 %v18912_v18, 16  ;;  %v18916_v3 = vld [vmem:[#allocation75_spill] sm:$0xff]  ;;  %v14816_v18 = vld [vmem:[%s18054_s5 + $0x108] sm:$0xff]  }
 0x3a9   : > { %12922 = vmatpush3.bf16.msra.mxu0 %v14803_v19  ;;  %v5085_v19 = vrot.slane %v18841_v26, 3  ;;  %v18897_v26 = vld [vmem:[#allocation24_spill] sm:$0xff]  ;;  %v5079_v33 = vor.u32 %v5078_v52, %v5077_v11  ;;  %v5089_v5 = vor.u32 %v5088_v16, %v5087_v14  ;;  %v18901_v11 = vld [vmem:[#allocation59_spill] sm:$0xff]  ;;  %v18909_v16 = vld [vmem:[#allocation46_spill] sm:$0xff]  ;;  %v18917_v47 = vshrl.u32 %v18916_v3, 16 }
 0x3aa   : > { %12923 = vmatprep.subr.bf16.mxu0 %v14806_v35  ;;  %v5082_v23 = vor.u32 %v5081_v28, %v5080_v57  ;;  %v18902_v52 = vshrl.u32 %v18901_v11, 16  ;;  %v5112_v57 = vrot.slane %v18862_v29, 2  ;;  %v18904_v28 = vld [vmem:[#allocation117_spill] sm:$0xff]  ;;  %v5107_v29 = vor.u32 %v5106_v43, %v5105_v31  ;;  %v14818_v31 = vld [vmem:[%s18055_s6 + $0x218] sm:$0xff]  }
 0x3ab   : > { %v5086_v2 = vor.u32 %v5085_v19, %v5084_v12  ;;  %v5113_v24 = vrot.slane %v18904_v28, 3  ;;  %v18906_v12 = vshrl.u32 %v18905_v6, 16  ;;  %v5122_v53 = vrot.slane %v18913_v20, 2  ;;  %v18919_v43 = vld [vmem:[#allocation54_spill] sm:$0xff]  ;;  %v18933_v3 = vld [vmem:[#allocation85_spill] sm:$0xff] }
 0x3ac   : > { %v17348_v50 = vsel %vm5027_vm8, %v5079_v33, %v5082_v23  ;;  %v5133_v28 = vrot.slane %v18876_v7, 2  ;;  %v18925_v7 = vld [vmem:[#allocation68_spill] sm:$0xff]  ;;  %v17466_v20 = vsel %vm15041_vm2, %v17304_v32, 0 }
 0x3ad   : > { %12924 = vmatpush3.bf16.msra.mxu0 %v14806_v35  ;;  %v17356_v46 = vsel %vm5027_vm8, %v5086_v2, %v5089_v5  ;;  %v5102_v35 = vrot.slane %v18855_v25, 3  ;;  %v17376_v25 = vld [vmem:[%s18054_s5 + $0x100] sm:$0xff]   ;;  %v5115_v19 = vrot.slane %v18906_v12, 2  ;;  %v5114_v33 = vor.u32 %v5113_v24, %v5112_v57  ;;  %v14817_v2 = vld [vmem:[%s18055_s6 + $0x210] sm:$0xff]   ;;  %v18910_v5 = vld [vmem:[#allocation10_spill] sm:$0xff] }
 0x3ae   : > { %12925 = vmatprep.subr.bf16.mxu0 %v14809_v51  ;;  %v5119_v61 = vrot.slane %v18910_v5, 2  ;;  %v18921_v24 = vld [vmem:[#allocation125_spill] sm:$0xff]  ;;  %v18922_v12 = vld [vmem:[#allocation79_spill] sm:$0xff]  ;;  %v14824_v5 = vld [vmem:[%s18055_s6 + $0x238] sm:$0xff]   ;;  %v18395_v32 = vshrl.u32 %v17466_v20, 16 }
 0x3af   : > { %12894 = vmatmul.mubr.bf16.gmra.mrb[104].mxu0 %v17307_v60  ;;  %13582 = vmatmul.mubr.bf16.gmra.mrb[56].mxu1 %v18897_v26  ;;  %v5103_v49 = vor.u32 %v5102_v35, %v5101_v54  ;;  %v5117_v23 = vor.u32 %v5116_v40, %v5115_v19  ;;  %v18915_v54 = vld [vmem:[#allocation12_spill] sm:$0xff]  ;;  %v5134_v6 = vrot.slane %v18921_v24, 3  ;;  %v18923_v19 = vshrl.u32 %v18922_v12, 16 }
 0x3b0   : > { %12897 = vmatprep.mubr.bf16.mxu0 %v17323_v55  ;;  %13585 = vmatprep.mubr.bf16.mxu1 %v17328_v59  ;;  %v5127_v35 = vrot.slane %v18915_v54, 3  ;;  %v5121_v11 = vor.u32 %v5120_v0, %v5119_v61  ;;  %v5137_v40 = vrot.slane %v18877_v10, 3  ;;  %v14823_v10 = vld [vmem:[%s18055_s6 + $0x230] sm:$0xff]   ;;  %v18926_v61 = vld [vmem:[#allocation70_spill] sm:$0xff]  ;;  %v17476_v54 = vshll.u32 %v17328_v59, 16 }
 0x3b1   : > { %12926 = vmatpush3.bf16.msra.mxu0 %v14809_v51  ;;  %v5108_v51 = vrot.slane %v18902_v52, 2  ;;  %v17389_v14 = vsel %vm5027_vm8, %v5100_v34, %v5103_v49  ;;  %v17412_v39 = vsel %vm5027_vm8, %v5114_v33, %v5117_v23  ;;  %v18918_v34 = vld [vmem:[#allocation77_spill] sm:$0xff]  ;;  %v5136_v62 = vrot.slane %v18923_v19, 2  ;;  %v14825_v19 = vld [vmem:[%s18054_s5 + $0x120] sm:$0xff]  }
 0x3b2   : > { %12927 = vmatprep.subr.bf16.mxu0 %v14810_v48  ;;  %v5130_v49 = vrot.slane %v18918_v34, 3  ;;  %v5135_v33 = vor.u32 %v5134_v6, %v5133_v28  ;;  %v18928_v0 = vld [vmem:[#allocation81_spill] sm:$0xff]  ;;  %v6491_v34 = vrot.slane %v17476_v54, 2 }
 0x3b3   : > { %v5138_v23 = vor.u32 %v5137_v40, %v5136_v62 }
 0x3b5   : > { %12928 = vmatpush3.bf16.msra.mxu0 %v14810_v48  ;;  %v5110_v48 = vor.u32 %v5109_v63, %v5108_v51  ;;  %v14820_v63 = vld [vmem:[%s18055_s6 + $0x220] sm:$0xff]  }
 0x3b6   : > { %12929 = vmatprep.subr.bf16.mxu0 %v14811_v41 }
 0x3b7   : > { %12898 = vmatmul.mubr.bf16.gmra.mrb[108].mxu0 %v17348_v50  ;;  %13586 = vmatmul.mubr.bf16.gmra.mrb[60].mxu1 %v17353_v58  ;;  %v17409_v44 = vsel %vm5027_vm8, %v5107_v29, %v5110_v48  ;;  %v14821_v29 = vld [vmem:[%s18055_s6 + $0x228] sm:$0xff]   ;;  %v18924_v48 = vld [vmem:[#allocation63_spill] sm:$0xff] }
 0x3b8   : > { %12901 = vmatprep.mubr.bf16.mxu0 %v17356_v46  ;;  %13605 = vmatprep.mubr.bf16.mxu1 %v18785_v4 }
 0x3b9   : > { %12930 = vmatpush3.bf16.msra.mxu0 %v14811_v41  ;;  %v18914_v41 = vld [vmem:[#allocation74_spill] sm:$0xff] }
 0x3ba   : > { %12931 = vmatprep.subr.bf16.mxu0 %v14812_v38  ;;  %v5123_v13 = vrot.slane %v18914_v41, 3  ;;  %v18930_v41 = vld [vmem:[#allocation82_spill] sm:$0xff] }
 0x3bc   : > { %v5124_v52 = vor.u32 %v5123_v13, %v5122_v53  ;;  %v18929_v53 = vld [vmem:[#allocation52_spill] sm:$0xff]  ;;  %v18931_v13 = vld [vmem:[#allocation37_spill] sm:$0xff] }
 0x3bd   : > { %12932 = vmatpush3.bf16.msra.mxu0 %v14812_v38  ;;  %v5129_v38 = vrot.slane %v18917_v47, 2  ;;  %v17489_v47 = vsel %vm15041_vm2, %v17337_v27, 0  ;;  %v9218_v27 = vshrl.u32 %v17353_v58, 16 }
 0x3be   : > { %12965 = vmatprep.subr.bf16.mxu0 %v17376_v25  ;;  %v17430_v57 = vsel %vm5027_vm8, %v5121_v11, %v5124_v52  ;;  %v14822_v11 = vld [vmem:[%s18054_s5 + $0x118] sm:$0xff]   ;;  %v18934_v52 = vld [vmem:[#allocation29_spill] sm:$0xff]  ;;  %v9226_v28 = vshrl.u32 %v17489_v47, 16  ;;  %v9229_v24 = vshll.u32 %v17489_v47, 16 }
 0x3bf   : > { %12902 = vmatmul.mubr.bf16.gmra.mrb[112].mxu0 %v17371_v15  ;;  %13606 = vmatmul.mubr.bf16.vlgmr.msra.gmra.mrb[32].mxu1 %v18908_v22  ;;  %v5131_v45 = vor.u32 %v5130_v49, %v5129_v38  ;;  %v6495_v49 = vrot.slane %v18395_v32, 1  ;;  %v9220_v62 = vrot.slane %v9218_v27, 1  ;;  %v18944_v27 = vld [vmem:[#allocation27_spill] sm:$0xff] }
 0x3c0   : > { %12905 = vmatprep.mubr.bf16.mxu0 %v17389_v14  ;;  %13609 = vmatprep.mubr.bf16.mxu1 %v18909_v16 }
 0x3c1   : > { %13638 = vmatpush3.bf16.msra.mxu1 %v17251_v8  ;;  %v5126_v8 = vrot.slane %v18870_v42, 2  ;;  %v18920_v42 = vld [vmem:[#allocation55_spill] sm:$0xff] }
 0x3c2   : > { %13639 = vmatprep.subr.bf16.mxu1 %v14815_v56 }
 0x3c3   : > { %v5128_v51 = vor.u32 %v5127_v35, %v5126_v8  ;;  %v17473_v8 = vshrl.u32 %v17328_v59, 16  ;;  %v17479_v35 = vshll.u32 %v17466_v20, 16 }
 0x3c5   : > { %13640 = vmatpush3.bf16.msra.mxu1 %v14815_v56  ;;  %v17438_v56 = vsel %vm5027_vm8, %v5128_v51, %v5131_v45  ;;  %18932 = vst [vmem:[#allocation95_spill] sm:$0xff] %v17479_v35  ;;  %v6490_v38 = vrot.slane %v17473_v8, 1  ;;  %v9221_v51 = vshll.u32 %v17353_v58, 16  ;;  %v18936_v45 = vld [vmem:[#allocation38_spill] sm:$0xff] }
 0x3c6   : > { %13641 = vmatprep.subr.bf16.mxu1 %v14817_v2 }
 0x3c7   : > { %12906 = vmatmul.mubr.bf16.gmra.mrb[116].mxu0 %v17409_v44  ;;  %13610 = vmatmul.mubr.bf16.gmra.mrb[36].mxu1 %v18919_v43  ;;  %v6492_v6 = vor.u32 %v6491_v34, %v6490_v38  ;;  %v9223_v40 = vrot.slane %v9221_v51, 2  ;;  %v14827_v38 = vld [vmem:[%s18054_s5 + $0x130] sm:$0xff]   ;;  %v14829_v51 = vld [vmem:[%s18054_s5 + $0x140] sm:$0xff]  }
 0x3c8   : > { %12909 = vmatprep.mubr.bf16.mxu0 %v17412_v39  ;;  %13613 = vmatprep.mubr.bf16.mxu1 %v18920_v42 }
 0x3c9   : > { %13642 = vmatpush3.bf16.msra.mxu1 %v14817_v2  ;;  %v17451_v2 = vsel %vm5027_vm8, %v5135_v33, %v5138_v23  ;;  %v9231_v33 = vrot.slane %v9229_v24, 2  ;;  %v18946_v24 = vld [vmem:[#allocation31_spill] sm:$0xff] }
 0x3ca   : > { %13643 = vmatprep.subr.bf16.mxu1 %v14818_v31 }
 0x3cd   : > { %13644 = vmatpush3.bf16.msra.mxu1 %v14818_v31  ;;  %v6496_v31 = vrot.slane %v17479_v35, 2  ;;  %v18965_v35 = vld [vmem:[#allocation127_spill] sm:$0xff] }
 0x3ce   : > { %13645 = vmatprep.subr.bf16.mxu1 %v14820_v63 }
 0x3cf   : > { %12910 = vmatmul.mubr.bf16.gmra.mrb[120].mxu0 %v17430_v57  ;;  %13614 = vmatmul.mubr.bf16.gmra.mrb[40].mxu1 %v18924_v48  ;;  %v6497_v12 = vor.u32 %v6496_v31, %v6495_v49  ;;  %v14828_v49 = vld [vmem:[%s18054_s5 + $0x138] sm:$0xff]  }
 0x3d0   : > { %12913 = vmatprep.mubr.bf16.mxu0 %v17438_v56  ;;  %13617 = vmatprep.mubr.bf16.mxu1 %v18925_v7  ;;  %v18942_v31 = vld [vmem:[#allocation86_spill] sm:$0xff] }
 0x3d1   : > { %13646 = vmatpush3.bf16.msra.mxu1 %v14820_v63  ;;  %v18937_v63 = vld [vmem:[#allocation133_spill] sm:$0xff]  ;;  %v17511_v23 = vsel %vm1304_vm5, %v6492_v6, %v6497_v12  ;;  %v18947_v6 = vld [vmem:[#allocation120_spill] sm:$0xff]  ;;  %v18948_v12 = vld [vmem:[#allocation39_spill] sm:$0xff] }
 0x3d2   : > { %13647 = vmatprep.subr.bf16.mxu1 %v14821_v29  ;;  %18938 = vst [vmem:[#allocation90_spill] sm:$0xff] %v17511_v23 }
 0x3d5   : > { %13648 = vmatpush3.bf16.msra.mxu1 %v14821_v29  ;;  %v9228_v29 = vrot.slane %v9226_v28, 1  ;;  %v18945_v28 = vld [vmem:[#allocation96_spill] sm:$0xff] }
 0x3d6   : > { %13649 = vmatprep.subr.bf16.mxu1 %v14823_v10 }
 0x3d7   : > { %12914 = vmatmul.mubr.bf16.gmra.mrb[124].mxu0 %v17451_v2  ;;  %13618 = vmatmul.mubr.bf16.gmra.mrb[44].mxu1 %v18926_v61 }
 0x3d8   : > { %12933 = vmatprep.mubr.bf16.mxu0 %v18927_v37  ;;  %13621 = vmatprep.mubr.bf16.mxu1 %v18928_v0  ;;  %v18940_v37 = vld [vmem:[#allocation88_spill] sm:$0xff] }
 0x3d9   : > { %13650 = vmatpush3.bf16.msra.mxu1 %v14823_v10  ;;  %v14826_v10 = vld [vmem:[%s18054_s5 + $0x128] sm:$0xff]  }
 0x3da   : > { %13651 = vmatprep.subr.bf16.mxu1 %v14824_v5 }
 0x3dd   : > { %13652 = vmatpush3.bf16.msra.mxu1 %v14824_v5  ;;  %v18939_v5 = vld [vmem:[#allocation49_spill] sm:$0xff] }
 0x3df   : > { %12934 = vmatmul.mubr.bf16.vlgmr.msra.gmra.mrb[96].mxu0 %v18929_v53  ;;  %13622 = vmatmul.mubr.bf16.gmra.mrb[48].mxu1 %v18930_v41  ;;  %v9224_v53 = vor.u32 %v9223_v40, %v9220_v62  ;;  %v18950_v40 = vld [vmem:[#allocation9_spill] sm:$0xff] }
 0x3e0   : > { %12966 = vmatpush3.bf16.msra.mxu0 %v17376_v25  ;;  %12937 = vmatprep.mubr.bf16.mxu0 %v18931_v13  ;;  %v14819_v25 = vld [vmem:[%s18054_s5 + $0x110] sm:$0xff]  }
 0x3e1   : > { %13625 = vmatprep.mubr.bf16.mxu1 %v18933_v3  ;;  %12967 = vmatprep.subr.bf16.mxu0 %v14816_v18 }
 0x3e4   : > { %12968 = vmatpush3.bf16.msra.mxu0 %v14816_v18  ;;  %v18941_v18 = vld [vmem:[#allocation84_spill] sm:$0xff] }
 0x3e5   : > { %12969 = vmatprep.subr.bf16.mxu0 %v14819_v25 }
 0x3e7   : > { %12938 = vmatmul.mubr.bf16.gmra.mrb[100].mxu0 %v18934_v52  ;;  %13626 = vmatmul.mubr.bf16.gmra.mrb[52].mxu1 %v18935_v30 }
 0x3e8   : > { %12941 = vmatprep.mubr.bf16.mxu0 %v18936_v45  ;;  %13629 = vmatprep.mubr.bf16.mxu1 %v18937_v63 }
 0x3e9   : > { %12970 = vmatpush3.bf16.msra.mxu0 %v14819_v25  ;;  %v9232_v25 = vor.u32 %v9231_v33, %v9228_v29  ;;  %v18951_v29 = vld [vmem:[#allocation56_spill] sm:$0xff]  ;;  %v18952_v33 = vld [vmem:[#allocation62_spill] sm:$0xff] }
 0x3ea   : > { %12971 = vmatprep.subr.bf16.mxu0 %v14822_v11 }
 0x3eb   : > { %v9233_v34 = vsel %vm1304_vm5, %v9224_v53, %v9232_v25  ;;  %v18954_v25 = vld [vmem:[#allocation89_spill] sm:$0xff] }
 0x3ed   : > { %12972 = vmatpush3.bf16.msra.mxu0 %v14822_v11  ;;  %v18943_v11 = vld [vmem:[#allocation78_spill] sm:$0xff] }
 0x3ee   : > { %12973 = vmatprep.subr.bf16.mxu0 %v14825_v19 }
 0x3ef   : > { %12942 = vmatmul.mubr.bf16.gmra.mrb[104].mxu0 %v18939_v5  ;;  %13630 = vmatmul.mubr.bf16.gmra.mrb[56].mxu1 %v18940_v37  ;;  %v18960_v37 = vld [vmem:[#allocation76_spill] sm:$0xff] }
 0x3f0   : > { %12945 = vmatprep.mubr.bf16.mxu0 %v18941_v18  ;;  %13633 = vmatprep.mubr.bf16.mxu1 %v17511_v23 }
 0x3f1   : > { %12974 = vmatpush3.bf16.msra.mxu0 %v14825_v19  ;;  %v18949_v19 = vld [vmem:[#allocation129_spill] sm:$0xff] }
 0x3f2   : > { %12975 = vmatprep.subr.bf16.mxu0 %v14826_v10  ;;  %v5414_v62 = vrot.slane %v18949_v19, 1 }
 0x3f5   : > { %12976 = vmatpush3.bf16.msra.mxu0 %v14826_v10  ;;  %v18953_v10 = vld [vmem:[#allocation128_spill] sm:$0xff] }
 0x3f6   : > { %12977 = vmatprep.subr.bf16.mxu0 %v14827_v38  ;;  %v5415_v53 = vor.u32 %v5414_v62, %v18953_v10 }
 0x3f7   : > { %12946 = vmatmul.mubr.bf16.gmra.mrb[108].mxu0 %v18942_v31  ;;  %13634 = vmatmul.mubr.bf16.gmra.mrb[60].mxu1 %v9233_v34  ;;  %v18955_v34 = vld [vmem:[#allocation131_spill] sm:$0xff] }
 0x3f8   : > { %12949 = vmatprep.mubr.bf16.mxu0 %v18943_v11  ;;  %13653 = vmatprep.mubr.bf16.mxu1 %v18944_v27 }
 0x3f9   : > { %12978 = vmatpush3.bf16.msra.mxu0 %v14827_v38  ;;  %v5416_v38 = vrot.slane %v18954_v25, 1 }
 0x3fa   : > { %12979 = vmatprep.subr.bf16.mxu0 %v14828_v49 }
 0x3fb   : > { %v17546_v27 = vsel %vm4477_vm7, %v5415_v53, %v5416_v38  ;;  %v18961_v53 = vld [vmem:[#allocation124_spill] sm:$0xff]  ;;  %v18962_v38 = vld [vmem:[#allocation57_spill] sm:$0xff] }
 0x3fd   : > { %12980 = vmatpush3.bf16.msra.mxu0 %v14828_v49  ;;  %v5418_v49 = vrot.slane %v18955_v34, 1 }
 0x3fe   : > { %13013 = vmatprep.subr.bf16.mxu0 %v14829_v51 }
 0x3ff   : > { %12950 = vmatmul.mubr.bf16.gmra.mrb[112].mxu0 %v18945_v28  ;;  %13654 = vmatmul.mubr.bf16.vlgmr.msra.gmra.mrb[32].mxu1 %v18946_v24  ;;  %v18956_v24 = vld [vmem:[#allocation65_spill] sm:$0xff] }
 0x400   : > { %12953 = vmatprep.mubr.bf16.mxu0 %v18947_v6  ;;  %13657 = vmatprep.mubr.bf16.mxu1 %v18948_v12  ;;  %v18957_v12 = vld [vmem:[#allocation71_spill] sm:$0xff] }
 0x407   : > { %12954 = vmatmul.mubr.bf16.gmra.mrb[116].mxu0 %v18950_v40  ;;  %13658 = vmatmul.mubr.bf16.gmra.mrb[36].mxu1 %v18951_v29  ;;  %v18958_v29 = vld [vmem:[#allocation130_spill] sm:$0xff] }
 0x408   : > { %12957 = vmatprep.mubr.bf16.mxu0 %v17213_v36  ;;  %13661 = vmatprep.mubr.bf16.mxu1 %v18952_v33  ;;  %v5419_v32 = vor.u32 %v5418_v49, %v18958_v29  ;;  %v18959_v33 = vld [vmem:[#allocation100_spill] sm:$0xff]  ;;  %v18964_v49 = vld [vmem:[#allocation138_spill] sm:$0xff] }
 0x409   : > { %v5420_v23 = vrot.slane %v18959_v33, 1 }
 0x40b   : > { %v17555_v62 = vsel %vm4477_vm7, %v5419_v32, %v5420_v23  ;;  %v18966_v32 = vld [vmem:[#allocation45_spill] sm:$0xff] }
 0x40c   : > { %v14831_v23 = vld [vmem:[%s18054_s5 + $0x150] sm:$0xff]  }
 0x40f   : > { %12958 = vmatmul.mubr.bf16.gmra.mrb[120].mxu0 %v17233_v9  ;;  %13662 = vmatmul.mubr.bf16.gmra.mrb[40].mxu1 %v18956_v24  ;;  %v14830_v24 = vld [vmem:[%s18054_s5 + $0x148] sm:$0xff]  }
 0x410   : > { %12961 = vmatprep.mubr.bf16.mxu0 %v17546_v27  ;;  %13665 = vmatprep.mubr.bf16.mxu1 %v18957_v12  ;;  %v18963_v12 = vld [vmem:[#allocation126_spill] sm:$0xff] }
 0x417   : > { %12962 = vmatmul.mubr.bf16.gmra.mrb[124].mxu0 %v17555_v62  ;;  %13666 = vmatmul.mubr.bf16.gmra.mrb[44].mxu1 %v18960_v37  ;;  %v14832_v37 = vld [vmem:[%s18054_s5 + $0x158] sm:$0xff]  }
 0x418   : > { %12981 = vmatprep.mubr.bf16.mxu0 %v18961_v53  ;;  %13669 = vmatprep.mubr.bf16.mxu1 %v18962_v38  ;;  %v18967_v53 = vld [vmem:[#allocation61_spill] sm:$0xff]  ;;  %v9497_v38 = vrot.slane %v18897_v26, 3  ;;  %v14834_v26 = vld [vmem:[%s18054_s5 + $0x168] sm:$0xff]  }
 0x41f   : > { %12982 = vmatmul.mubr.bf16.vlgmr.msra.gmra.mrb[96].mxu0 %v18963_v12  ;;  %13670 = vmatmul.mubr.bf16.gmra.mrb[48].mxu1 %v18964_v49  ;;  %v18969_v12 = vld [vmem:[#allocation98_spill] sm:$0xff] }
 0x420   : > { %13014 = vmatpush3.bf16.msra.mxu0 %v14829_v51  ;;  %12985 = vmatprep.mubr.bf16.mxu0 %v18965_v35  ;;  %v18968_v51 = vld [vmem:[#allocation80_spill] sm:$0xff]  ;;  %v9498_v49 = vrot.slane %v18969_v12, 3 }
 0x421   : > { %13673 = vmatprep.mubr.bf16.mxu1 %v18966_v32  ;;  %13015 = vmatprep.subr.bf16.mxu0 %v14830_v24  ;;  %v9501_v32 = vrot.slane %v17466_v20, 3 }
 0x424   : > { %13016 = vmatpush3.bf16.msra.mxu0 %v14830_v24  ;;  %v9500_v24 = vrot.slane %v17328_v59, 3  ;;  %v9503_v59 = vrot.slane %v17353_v58, 3  ;;  %v14838_v58 = vld [vmem:[%s18054_s5 + $0x188] sm:$0xff]  }
 0x425   : > { %13017 = vmatprep.subr.bf16.mxu0 %v14831_v23 }
 0x427   : > { %12986 = vmatmul.mubr.bf16.gmra.mrb[100].mxu0 %v18785_v4  ;;  %13674 = vmatmul.mubr.bf16.gmra.mrb[52].mxu1 %v18967_v53  ;;  %v14833_v4 = vld [vmem:[%s18054_s5 + $0x160] sm:$0xff]   ;;  %v9499_v53 = vsel %vm7850_vm6, %v9497_v38, %v9498_v49  ;;  %v14836_v38 = vld [vmem:[%s18054_s5 + $0x178] sm:$0xff]   ;;  %v14843_v49 = vld [vmem:[%s18054_s5 + $0x1b0] sm:$0xff]  }
 0x428   : > { %12989 = vmatprep.mubr.bf16.mxu0 %v18908_v22  ;;  %13677 = vmatprep.mubr.bf16.mxu1 %v18968_v51  ;;  %v9502_v22 = vsel %vm7850_vm6, %v9500_v24, %v9501_v32  ;;  %v14844_v24 = vld [vmem:[%s18054_s5 + $0x1b8] sm:$0xff]   ;;  %v14845_v32 = vld [vmem:[%s18054_s5 + $0x1c0] sm:$0xff]  }
 0x429   : > { %13018 = vmatpush3.bf16.msra.mxu0 %v14831_v23  ;;  %v9504_v23 = vrot.slane %v17489_v47, 3  ;;  %v14842_v47 = vld [vmem:[%s18054_s5 + $0x1a8] sm:$0xff]  }
 0x42a   : > { %13019 = vmatprep.subr.bf16.mxu0 %v14832_v37 }
 0x42b   : > { %v9505_v51 = vsel %vm7850_vm6, %v9503_v59, %v9504_v23  ;;  %v18970_v59 = vld [vmem:[#allocation87_spill] sm:$0xff] }
 0x42c   : > { %v18971_v23 = vshrl.u32 %v18970_v59, 16 }
 0x42d   : > { %13020 = vmatpush3.bf16.msra.mxu0 %v14832_v37  ;;  %v14835_v37 = vld [vmem:[%s18054_s5 + $0x170] sm:$0xff]  }
 0x42e   : > { %13021 = vmatprep.subr.bf16.mxu0 %v14833_v4 }
 0x42f   : > { %12990 = vmatmul.mubr.bf16.gmra.mrb[104].mxu0 %v18909_v16  ;;  %13678 = vmatmul.mubr.bf16.gmra.mrb[56].mxu1 %v9499_v53  ;;  %v5940_v53 = vrot.slane %v18953_v10, 2 }
 0x430   : > { %12993 = vmatprep.mubr.bf16.mxu0 %v18919_v43  ;;  %13681 = vmatprep.mubr.bf16.mxu1 %v9502_v22  ;;  %v14839_v22 = vld [vmem:[%s18054_s5 + $0x190] sm:$0xff]  }
 0x431   : > { %13022 = vmatpush3.bf16.msra.mxu0 %v14833_v4  ;;  %v14837_v4 = vld [vmem:[%s18054_s5 + $0x180] sm:$0xff]  }
 0x432   : > { %13023 = vmatprep.subr.bf16.mxu0 %v14834_v26 }
 0x435   : > { %13024 = vmatpush3.bf16.msra.mxu0 %v14834_v26  ;;  %v5941_v26 = vrot.slane %v18949_v19, 3  ;;  %v5951_v19 = vrot.slane %v18959_v33, 3 }
 0x436   : > { %13025 = vmatprep.subr.bf16.mxu0 %v14835_v37 }
 0x437   : > { %12994 = vmatmul.mubr.bf16.gmra.mrb[108].mxu0 %v18920_v42  ;;  %13682 = vmatmul.mubr.bf16.gmra.mrb[60].mxu1 %v9505_v51  ;;  %v5944_v51 = vrot.slane %v18954_v25, 3 }
 0x438   : > { %12997 = vmatprep.mubr.bf16.mxu0 %v18924_v48 }
 0x439   : > { %13026 = vmatpush3.bf16.msra.mxu0 %v14835_v37  ;;  %v5943_v37 = vrot.slane %v18971_v23, 2 }
 0x43a   : > { %13027 = vmatprep.subr.bf16.mxu0 %v14836_v38 }
 0x43d   : > { %13028 = vmatpush3.bf16.msra.mxu0 %v14836_v38  ;;  %v5942_v38 = vor.u32 %v5941_v26, %v5940_v53  ;;  %v6223_v26 = vrot.slane %v17476_v54, 1 }
 0x43e   : > { %13061 = vmatprep.subr.bf16.mxu0 %v14837_v4 }
 0x43f   : > { %12998 = vmatmul.mubr.bf16.gmra.mrb[112].mxu0 %v18925_v7 }
 0x440   : > { %13001 = vmatprep.mubr.bf16.mxu0 %v18926_v61 }
 0x447   : > { %13002 = vmatmul.mubr.bf16.gmra.mrb[116].mxu0 %v18928_v0 }
 0x448   : > { %13005 = vmatprep.mubr.bf16.mxu0 %v18930_v41 }
 0x44f   : > { %13006 = vmatmul.mubr.bf16.gmra.mrb[120].mxu0 %v18933_v3 }
 0x450   : > { %13009 = vmatprep.mubr.bf16.mxu0 %v18935_v30 }
 0x457   : > { %13010 = vmatmul.mubr.bf16.gmra.mrb[124].mxu0 %v18937_v63 }
 0x458   : > { %13029 = vmatprep.mubr.bf16.mxu0 %v17264_v21  ;;  %v14840_v21 = vld [vmem:[%s18054_s5 + $0x198] sm:$0xff]  }
 0x45f   : > { %13030 = vmatmul.mubr.bf16.vlgmr.msra.gmra.mrb[96].mxu0 %v17285_v1  ;;  %v14841_v1 = vld [vmem:[%s18054_s5 + $0x1a0] sm:$0xff]  }
 0x460   : > { %13062 = vmatpush3.bf16.msra.mxu0 %v14837_v4  ;;  %13033 = vmatprep.mubr.bf16.mxu0 %v17288_v17  ;;  %v5945_v4 = vor.u32 %v5944_v51, %v5943_v37 }
 0x461   : > { %13063 = vmatprep.subr.bf16.mxu0 %v14838_v58 }
 0x464   : > { %13064 = vmatpush3.bf16.msra.mxu0 %v14838_v58  ;;  %v5947_v58 = vrot.slane %v18958_v29, 2  ;;  %v14847_v29 = vld [vmem:[%s18054_s5 + $0x1d0] sm:$0xff]  }
 0x465   : > { %13065 = vmatprep.subr.bf16.mxu0 %v14839_v22 }
 0x467   : > { %13034 = vmatmul.mubr.bf16.gmra.mrb[100].mxu0 %v17307_v60 }
 0x468   : > { %13037 = vmatprep.mubr.bf16.mxu0 %v17323_v55  ;;  %13066 = vmatpush3.bf16.msra.mxu0 %v14839_v22  ;;  %v5948_v22 = vrot.slane %v18955_v34, 3  ;;  %v14846_v34 = vld [vmem:[%s18054_s5 + $0x1c8] sm:$0xff]  }
 0x469   : > { %13067 = vmatprep.subr.bf16.mxu0 %v14840_v21 }
 0x46a   : > { %v5949_v25 = vor.u32 %v5948_v22, %v5947_v58 }
 0x46c   : > { %13068 = vmatpush3.bf16.msra.mxu0 %v14840_v21  ;;  %v18972_v21 = vld [vmem:[#allocation97_spill] sm:$0xff] }
 0x46d   : > { %13069 = vmatprep.subr.bf16.mxu0 %v14841_v1 }
 0x46f   : > { %13038 = vmatmul.mubr.bf16.gmra.mrb[104].mxu0 %v17348_v50 }
 0x470   : > { %13041 = vmatprep.mubr.bf16.mxu0 %v17356_v46  ;;  %13070 = vmatpush3.bf16.msra.mxu0 %v14841_v1  ;;  %v18973_v1 = vshrl.u32 %v18972_v21, 16 }
 0x471   : > { %13071 = vmatprep.subr.bf16.mxu0 %v14842_v47 }
 0x472   : > { %v5950_v10 = vrot.slane %v18973_v1, 2 }
 0x474   : > { %13072 = vmatpush3.bf16.msra.mxu0 %v14842_v47  ;;  %v17661_v47 = vsel %vm5027_vm8, %v5942_v38, %v5945_v4 }
 0x475   : > { %13073 = vmatprep.subr.bf16.mxu0 %v14843_v49 }
 0x477   : > { %13042 = vmatmul.mubr.bf16.gmra.mrb[108].mxu0 %v17371_v15 }
 0x478   : > { %13045 = vmatprep.mubr.bf16.mxu0 %v17389_v14  ;;  %13074 = vmatpush3.bf16.msra.mxu0 %v14843_v49  ;;  %v5952_v49 = vor.u32 %v5951_v19, %v5950_v10 }
 0x479   : > { %13075 = vmatprep.subr.bf16.mxu0 %v14844_v24 }
 0x47c   : > { %13076 = vmatpush3.bf16.msra.mxu0 %v14844_v24  ;;  %v17666_v24 = vsel %vm5027_vm8, %v5949_v25, %v5952_v49 }
 0x47d   : > { %13109 = vmatprep.subr.bf16.mxu0 %v14845_v32 }
 0x47f   : > { %13046 = vmatmul.mubr.bf16.gmra.mrb[112].mxu0 %v17409_v44 }
 0x480   : > { %13049 = vmatprep.mubr.bf16.mxu0 %v17412_v39 }
 0x487   : > { %13050 = vmatmul.mubr.bf16.gmra.mrb[116].mxu0 %v17430_v57 }
 0x488   : > { %13053 = vmatprep.mubr.bf16.mxu0 %v17438_v56 }
 0x48f   : > { %13054 = vmatmul.mubr.bf16.gmra.mrb[120].mxu0 %v17451_v2 }
 0x490   : > { %13057 = vmatprep.mubr.bf16.mxu0 %v17661_v47 }
 0x497   : > { %13058 = vmatmul.mubr.bf16.gmra.mrb[124].mxu0 %v17666_v24 }
 0x498   : > { %13077 = vmatprep.mubr.bf16.mxu0 %v18931_v13  ;;  %v14848_v13 = vld [vmem:[%s18054_s5 + $0x1d8] sm:$0xff]  }
 0x49f   : > { %13078 = vmatmul.mubr.bf16.vlgmr.msra.gmra.mrb[96].mxu0 %v18934_v52  ;;  %v14849_v52 = vld [vmem:[%s18054_s5 + $0x1e0] sm:$0xff]  }
 0x4a0   : > { %13110 = vmatpush3.bf16.msra.mxu0 %v14845_v32  ;;  %13081 = vmatprep.mubr.bf16.mxu0 %v18936_v45  ;;  %v14850_v45 = vld [vmem:[%s18054_s5 + $0x1e8] sm:$0xff]   ;;  %v18976_v32 = vld [vmem:[#allocation73_spill] sm:$0xff] }
 0x4a1   : > { %13111 = vmatprep.subr.bf16.mxu0 %v14846_v34  ;;  %v6216_v53 = vrot.slane %v18976_v32, 1 }
 0x4a4   : > { %13112 = vmatpush3.bf16.msra.mxu0 %v14846_v34 }
 0x4a5   : > { %13113 = vmatprep.subr.bf16.mxu0 %v14847_v29 }
 0x4a7   : > { %13082 = vmatmul.mubr.bf16.gmra.mrb[100].mxu0 %v18939_v5  ;;  %v14851_v5 = vld [vmem:[%s18054_s5 + $0x1f0] sm:$0xff]  }
 0x4a8   : > { %13085 = vmatprep.mubr.bf16.mxu0 %v18941_v18  ;;  %13114 = vmatpush3.bf16.msra.mxu0 %v14847_v29  ;;  %v14852_v18 = vld [vmem:[%s18054_s5 + $0x1f8] sm:$0xff]  }
 0x4a9   : > { %13115 = vmatprep.subr.bf16.mxu0 %v14848_v13 }
 0x4ac   : > { %13116 = vmatpush3.bf16.msra.mxu0 %v14848_v13 }
 0x4ad   : > { %13117 = vmatprep.subr.bf16.mxu0 %v14849_v52 }
 0x4af   : > { %13086 = vmatmul.mubr.bf16.gmra.mrb[104].mxu0 %v18942_v31  ;;  %v14853_v31 = vld [vmem:[%s18054_s5 + $0x200] sm:$0xff]  }
 0x4b0   : > { %13089 = vmatprep.mubr.bf16.mxu0 %v18943_v11  ;;  %13118 = vmatpush3.bf16.msra.mxu0 %v14849_v52  ;;  %v18974_v11 = vld [vmem:[#allocation67_spill] sm:$0xff] }
 0x4b1   : > { %13119 = vmatprep.subr.bf16.mxu0 %v14850_v45  ;;  %v6214_v33 = vrot.slane %v18974_v11, 1 }
 0x4b4   : > { %13120 = vmatpush3.bf16.msra.mxu0 %v14850_v45 }
 0x4b5   : > { %13121 = vmatprep.subr.bf16.mxu0 %v14851_v5 }
 0x4b7   : > { %13090 = vmatmul.mubr.bf16.gmra.mrb[108].mxu0 %v18945_v28  ;;  %v18975_v28 = vld [vmem:[#allocation60_spill] sm:$0xff] }
 0x4b8   : > { %13093 = vmatprep.mubr.bf16.mxu0 %v18947_v6  ;;  %13122 = vmatpush3.bf16.msra.mxu0 %v14851_v5  ;;  %v6215_v6 = vor.u32 %v6214_v33, %v18975_v28 }
 0x4b9   : > { %13123 = vmatprep.subr.bf16.mxu0 %v14852_v18 }
 0x4ba   : > { %v6217_v59 = vsel %vm4477_vm7, %v6215_v6, %v6216_v53  ;;  %v14854_v6 = vld [vmem:[%s18054_s5 + $0x208] sm:$0xff]  }
 0x4bc   : > { %13124 = vmatpush3.bf16.msra.mxu0 %v14852_v18 }
 0x4bd   : > { %13157 = vmatprep.subr.bf16.mxu0 %v14853_v31 }
 0x4bf   : > { %13094 = vmatmul.mubr.bf16.gmra.mrb[112].mxu0 %v18950_v40  ;;  %v18977_v40 = vld [vmem:[#allocation95_spill] sm:$0xff] }
 0x4c0   : > { %13097 = vmatprep.mubr.bf16.mxu0 %v17213_v36  ;;  %v17715_v36 = vld [vmem:[%s18058_s9] ss:$0 sm:$0xff] }
 0x4c7   : > { %13098 = vmatmul.mubr.bf16.gmra.mrb[116].mxu0 %v17233_v9  ;;  %v6224_v9 = vor.u32 %v6223_v26, %v17473_v8 }
 0x4c8   : > { %13101 = vmatprep.mubr.bf16.mxu0 %v17546_v27  ;;  %v6228_v27 = vrot.slane %v18977_v40, 1 }
 0x4ca   : > { %v6229_v58 = vsel %vm4477_vm7, %v6224_v9, %v6228_v27 }
 0x4cf   : > { %13102 = vmatmul.mubr.bf16.gmra.mrb[120].mxu0 %v17555_v62 }
 0x4d0   : > { %13105 = vmatprep.mubr.bf16.mxu0 %v6217_v59  ;;  %v18978_v59 = vld [vmem:[#allocation43_spill] sm:$0xff] }
 0x4d2   : > { %v13655_v23 = vpop.f32.mrb[32].mxu1 }
 0x4d3   : > { %v9776_v37 = vadd.f32 %v13655_v23, %v17715_v36  ;;  %v9608_v51 = vpop.f32.mrb[33].mxu1  ;;  %v18979_v23 = vld [vmem:[#allocation44_spill] sm:$0xff] }
 0x4d4   : > { %v9774_v38 = vadd.f32 %v17715_v36, %v9608_v51  ;;  %v13656_v4 = vpop.f32.mrb[34].mxu1  ;;  %v14855_v51 = vld [vmem:[%s18054_s5 + $0x210] sm:$0xff]  }
 0x4d5   : > { %v9777_v62 = vadd.f32 %v13656_v4, %v17715_v36  ;;  %v9611_v22 = vpop.f32.mrb[35].mxu1  ;;  %v9808_v1 = vmax.f32 %v9776_v37, 0.0 }
 0x4d6   : > { %v9775_v21 = vadd.f32 %v17715_v36, %v9611_v22  ;;  %v9806_v19 = vmax.f32 %v9774_v38, 0.0 }
 0x4d7   : > { %v9809_v10 = vmax.f32 %v9777_v62, 0.0  ;;  %13106 = vmatmul.mubr.bf16.gmra.mrb[124].mxu0 %v6229_v58 }
 0x4d8   : > { %v9807_v25 = vmax.f32 %v9775_v21, 0.0  ;;  %13125 = vmatprep.mubr.bf16.mxu0 %v18965_v35 }
 0x4d9   : > { %v17725_v49 = vpack.c.bf16 %v9809_v10, %v9808_v1  ;;  %v14856_v10 = vld [vmem:[%s18054_s5 + $0x218] sm:$0xff]  }
 0x4da   : > { %v17727_v34 = vpack.c.bf16 %v9807_v25, %v9806_v19  ;;  %v13659_v29 = vpop.f32.mrb[36].mxu1 }
 0x4db   : > { %v9780_v13 = vadd.f32 %v13659_v29, %v17715_v36  ;;  %v9624_v52 = vpop.f32.mrb[37].mxu1 }
 0x4dc   : > { %v9778_v45 = vadd.f32 %v17715_v36, %v9624_v52  ;;  %v13660_v5 = vpop.f32.mrb[38].mxu1 }
 0x4dd   : > { %v9781_v18 = vadd.f32 %v13660_v5, %v17715_v36  ;;  %v9627_v33 = vpop.f32.mrb[39].mxu1  ;;  %v9812_v53 = vmax.f32 %v9780_v13, 0.0  ;;  %v14857_v5 = vld [vmem:[%s18054_s5 + $0x220] sm:$0xff]  }
 0x4de   : > { %v9779_v35 = vadd.f32 %v17715_v36, %v9627_v33  ;;  %v9810_v9 = vmax.f32 %v9778_v45, 0.0 }
 0x4df   : > { %v9813_v26 = vmax.f32 %v9781_v18, 0.0  ;;  %13126 = vmatmul.mubr.bf16.vlgmr.msra.gmra.mrb[96].mxu0 %v18978_v59  ;;  %v14858_v59 = vld [vmem:[%s18054_s5 + $0x228] sm:$0xff]  }
 0x4e0   : > { %v9811_v27 = vmax.f32 %v9779_v35, 0.0  ;;  %13158 = vmatpush3.bf16.msra.mxu0 %v14853_v31  ;;  %13129 = vmatprep.mubr.bf16.mxu0 %v18979_v23 }
 0x4e1   : > { %v17738_v37 = vpack.c.bf16 %v9813_v26, %v9812_v53  ;;  %13159 = vmatprep.subr.bf16.mxu0 %v14854_v6 }
 0x4e2   : > { %v17743_v38 = vpack.c.bf16 %v9811_v27, %v9810_v9  ;;  %v13663_v4 = vpop.f32.mrb[40].mxu1 }
 0x4e3   : > { %v9784_v58 = vadd.f32 %v13663_v4, %v17715_v36  ;;  %v9640_v62 = vpop.f32.mrb[41].mxu1 }
 0x4e4   : > { %v9782_v22 = vadd.f32 %v17715_v36, %v9640_v62  ;;  %v13664_v21 = vpop.f32.mrb[42].mxu1  ;;  %13160 = vmatpush3.bf16.msra.mxu0 %v14854_v6  ;;  %v14859_v62 = vld [vmem:[%s18054_s5 + $0x230] sm:$0xff]  }
 0x4e5   : > { %v9785_v31 = vadd.f32 %v13664_v21, %v17715_v36  ;;  %v9643_v1 = vpop.f32.mrb[43].mxu1  ;;  %13161 = vmatprep.subr.bf16.mxu0 %v14855_v51  ;;  %v9816_v25 = vmax.f32 %v9784_v58, 0.0 }
 0x4e6   : > { %v9783_v19 = vadd.f32 %v17715_v36, %v9643_v1  ;;  %v9814_v13 = vmax.f32 %v9782_v22, 0.0 }
 0x4e7   : > { %v9817_v29 = vmax.f32 %v9785_v31, 0.0  ;;  %13130 = vmatmul.mubr.bf16.gmra.mrb[100].mxu0 %v18909_v16 }
 0x4e8   : > { %v9815_v52 = vmax.f32 %v9783_v19, 0.0  ;;  %13133 = vmatprep.mubr.bf16.mxu0 %v18919_v43  ;;  %13162 = vmatpush3.bf16.msra.mxu0 %v14855_v51 }
 0x4e9   : > { %v17754_v45 = vpack.c.bf16 %v9817_v29, %v9816_v25  ;;  %13163 = vmatprep.subr.bf16.mxu0 %v14856_v10  ;;  %v14860_v25 = vld [vmem:[%s18054_s5 + $0x238] sm:$0xff]  }
 0x4ea   : > { %v17759_v18 = vpack.c.bf16 %v9815_v52, %v9814_v13  ;;  %v13667_v33 = vpop.f32.mrb[44].mxu1 }
 0x4eb   : > { %v9788_v6 = vadd.f32 %v13667_v33, %v17715_v36  ;;  %v9656_v35 = vpop.f32.mrb[45].mxu1 }
 0x4ec   : > { %v9786_v16 = vadd.f32 %v17715_v36, %v9656_v35  ;;  %v13668_v53 = vpop.f32.mrb[46].mxu1  ;;  %13164 = vmatpush3.bf16.msra.mxu0 %v14856_v10  ;;  %v14861_v35 = vld [vmem:[%s18059_s10 + $0x80] sm:$0xff]  }
 0x4ed   : > { %v9789_v43 = vadd.f32 %v13668_v53, %v17715_v36  ;;  %v9659_v26 = vpop.f32.mrb[47].mxu1  ;;  %13165 = vmatprep.subr.bf16.mxu0 %v14857_v5  ;;  %v9820_v27 = vmax.f32 %v9788_v6, 0.0 }
 0x4ee   : > { %v9787_v9 = vadd.f32 %v17715_v36, %v9659_v26  ;;  %v9818_v51 = vmax.f32 %v9786_v16, 0.0 }
 0x4ef   : > { %v9821_v23 = vmax.f32 %v9789_v43, 0.0  ;;  %13134 = vmatmul.mubr.bf16.gmra.mrb[104].mxu0 %v18920_v42 }
 0x4f0   : > { %v9819_v4 = vmax.f32 %v9787_v9, 0.0  ;;  %13137 = vmatprep.mubr.bf16.mxu0 %v18924_v48  ;;  %13166 = vmatpush3.bf16.msra.mxu0 %v14857_v5 }
 0x4f1   : > { %v17770_v58 = vpack.c.bf16 %v9821_v23, %v9820_v27  ;;  %13167 = vmatprep.subr.bf16.mxu0 %v14858_v59 }
 0x4f2   : > { %v17775_v22 = vpack.c.bf16 %v9819_v4, %v9818_v51  ;;  %v13671_v21 = vpop.f32.mrb[48].mxu1 }
 0x4f3   : > { %v9792_v31 = vadd.f32 %v13671_v21, %v17715_v36  ;;  %v9672_v1 = vpop.f32.mrb[49].mxu1 }
 0x4f4   : > { %v9790_v42 = vadd.f32 %v17715_v36, %v9672_v1  ;;  %v13672_v10 = vpop.f32.mrb[50].mxu1  ;;  %13168 = vmatpush3.bf16.msra.mxu0 %v14858_v59 }
 0x4f5   : > { %v9793_v48 = vadd.f32 %v13672_v10, %v17715_v36  ;;  %v9675_v19 = vpop.f32.mrb[51].mxu1  ;;  %13169 = vmatprep.subr.bf16.mxu0 %v14859_v62  ;;  %v9824_v13 = vmax.f32 %v9792_v31, 0.0 }
 0x4f6   : > { %v9791_v29 = vadd.f32 %v17715_v36, %v9675_v19  ;;  %v9822_v5 = vmax.f32 %v9790_v42, 0.0 }
 0x4f7   : > { %v9825_v52 = vmax.f32 %v9793_v48, 0.0  ;;  %13138 = vmatmul.mubr.bf16.gmra.mrb[108].mxu0 %v18925_v7 }
 0x4f8   : > { %v9823_v33 = vmax.f32 %v9791_v29, 0.0  ;;  %13141 = vmatprep.mubr.bf16.mxu0 %v18926_v61  ;;  %13170 = vmatpush3.bf16.msra.mxu0 %v14859_v62 }
 0x4f9   : > { %v17786_v6 = vpack.c.bf16 %v9825_v52, %v9824_v13  ;;  %13171 = vmatprep.subr.bf16.mxu0 %v14860_v25 }
 0x4fa   : > { %v17791_v16 = vpack.c.bf16 %v9823_v33, %v9822_v5  ;;  %v13675_v53 = vpop.f32.mrb[52].mxu1 }
 0x4fb   : > { %v9796_v43 = vadd.f32 %v13675_v53, %v17715_v36  ;;  %v9688_v26 = vpop.f32.mrb[53].mxu1 }
 0x4fc   : > { %v9794_v7 = vadd.f32 %v17715_v36, %v9688_v26  ;;  %v13676_v59 = vpop.f32.mrb[54].mxu1  ;;  %13172 = vmatpush3.bf16.msra.mxu0 %v14860_v25 }
 0x4fd   : > { %v9797_v61 = vadd.f32 %v13676_v59, %v17715_v36  ;;  %v9691_v9 = vpop.f32.mrb[55].mxu1  ;;  %13205 = vmatprep.subr.bf16.mxu0 %v14861_v35  ;;  %v9828_v23 = vmax.f32 %v9796_v43, 0.0 }
 0x4fe   : > { %v9795_v27 = vadd.f32 %v17715_v36, %v9691_v9  ;;  %v9826_v4 = vmax.f32 %v9794_v7, 0.0 }
 0x4ff   : > { %v9829_v51 = vmax.f32 %v9797_v61, 0.0  ;;  %13142 = vmatmul.mubr.bf16.gmra.mrb[112].mxu0 %v18928_v0 }
 0x500   : > { %v9827_v62 = vmax.f32 %v9795_v27, 0.0  ;;  %13145 = vmatprep.mubr.bf16.mxu0 %v18930_v41 }
 0x501   : > { %v17799_v21 = vpack.c.bf16 %v9829_v51, %v9828_v23 }
 0x502   : > { %v17801_v31 = vpack.c.bf16 %v9827_v62, %v9826_v4  ;;  %v13679_v1 = vpop.f32.mrb[56].mxu1  ;;  %v18980_v62 = vld [vmem:[#allocation88_spill] sm:$0xff] }
 0x503   : > { %v9800_v42 = vadd.f32 %v13679_v1, %v17715_v36  ;;  %v9704_v10 = vpop.f32.mrb[57].mxu1 }
 0x504   : > { %v9798_v48 = vadd.f32 %v17715_v36, %v9704_v10  ;;  %v13680_v19 = vpop.f32.mrb[58].mxu1  ;;  %v18981_v10 = vld [vmem:[#allocation90_spill] sm:$0xff] }
 0x505   : > { %v9801_v25 = vadd.f32 %v13680_v19, %v17715_v36  ;;  %v9707_v29 = vpop.f32.mrb[59].mxu1  ;;  %v9832_v13 = vmax.f32 %v9800_v42, 0.0  ;;  %v6765_v19 = vrot.slane %v17473_v8, 2  ;;  %v14868_v8 = vld [vmem:[%s18059_s10 + $0xb8] sm:$0xff]  }
 0x506   : > { %v9799_v0 = vadd.f32 %v17715_v36, %v9707_v29  ;;  %v9830_v41 = vmax.f32 %v9798_v48, 0.0  ;;  %v6762_v48 = vrot.slane %v18976_v32, 3 }
 0x507   : > { %v9833_v52 = vmax.f32 %v9801_v25, 0.0  ;;  %13146 = vmatmul.mubr.bf16.gmra.mrb[116].mxu0 %v18933_v3 }
 0x508   : > { %v9831_v5 = vmax.f32 %v9799_v0, 0.0  ;;  %13149 = vmatprep.mubr.bf16.mxu0 %v18935_v30 }
 0x509   : > { %v17809_v33 = vpack.c.bf16 %v9833_v52, %v9832_v13 }
 0x50a   : > { %v17811_v53 = vpack.c.bf16 %v9831_v5, %v9830_v41  ;;  %v13683_v43 = vpop.f32.mrb[60].mxu1 }
 0x50b   : > { %v9804_v26 = vadd.f32 %v13683_v43, %v17715_v36  ;;  %v9720_v7 = vpop.f32.mrb[61].mxu1 }
 0x50c   : > { %v9802_v59 = vadd.f32 %v17715_v36, %v9720_v7  ;;  %v13684_v61 = vpop.f32.mrb[62].mxu1 }
 0x50d   : > { %v9805_v9 = vadd.f32 %v13684_v61, %v17715_v36  ;;  %v9723_v27 = vpop.f32.mrb[63].mxu1  ;;  %v9836_v23 = vmax.f32 %v9804_v26, 0.0 }
 0x50e   : > { %v9803_v3 = vadd.f32 %v17715_v36, %v9723_v27  ;;  %v9834_v30 = vmax.f32 %v9802_v59, 0.0  ;;  %v14862_v36 = vld [vmem:[%s18059_s10 + $0x88] sm:$0xff]  }
 0x50f   : > { %v9837_v51 = vmax.f32 %v9805_v9, 0.0  ;;  %13150 = vmatmul.mubr.bf16.gmra.mrb[120].mxu0 %v18937_v63  ;;  %v14863_v63 = vld [vmem:[%s18059_s10 + $0x90] sm:$0xff]  }
 0x510   : > { %v9835_v4 = vmax.f32 %v9803_v3, 0.0  ;;  %13153 = vmatprep.mubr.bf16.mxu0 %v18980_v62 }
 0x511   : > { %v17819_v1 = vpack.c.bf16 %v9837_v51, %v9836_v23  ;;  %v14870_v23 = vld [vmem:[%s18059_s10 + $0xc8] sm:$0xff]  }
 0x512   : > { %v17821_v42 = vpack.c.bf16 %v9835_v4, %v9834_v30 }
 0x517   : > { %13154 = vmatmul.mubr.bf16.gmra.mrb[124].mxu0 %v18981_v10 }
 0x518   : > { %13173 = vmatprep.mubr.bf16.mxu0 %v17288_v17  ;;  %v14864_v17 = vld [vmem:[%s18059_s10 + $0x98] sm:$0xff]  }
 0x51f   : > { %13174 = vmatmul.mubr.bf16.vlgmr.msra.gmra.mrb[96].mxu0 %v17307_v60  ;;  %v14865_v60 = vld [vmem:[%s18059_s10 + $0xa0] sm:$0xff]  }
 0x520   : > { %13177 = vmatprep.mubr.bf16.mxu0 %v17323_v55  ;;  %13206 = vmatpush3.bf16.msra.mxu0 %v14861_v35  ;;  %v14866_v55 = vld [vmem:[%s18059_s10 + $0xa8] sm:$0xff]  }
 0x521   : > { %13207 = vmatprep.subr.bf16.mxu0 %v14862_v36 }
 0x524   : > { %13208 = vmatpush3.bf16.msra.mxu0 %v14862_v36 }
 0x525   : > { %13209 = vmatprep.subr.bf16.mxu0 %v14863_v63 }
 0x527   : > { %13178 = vmatmul.mubr.bf16.gmra.mrb[100].mxu0 %v17348_v50  ;;  %v14867_v50 = vld [vmem:[%s18059_s10 + $0xb0] sm:$0xff]  }
 0x528   : > { %13181 = vmatprep.mubr.bf16.mxu0 %v17356_v46  ;;  %13210 = vmatpush3.bf16.msra.mxu0 %v14863_v63  ;;  %v6758_v46 = vrot.slane %v18975_v28, 2 }
 0x529   : > { %13211 = vmatprep.subr.bf16.mxu0 %v14864_v17 }
 0x52c   : > { %13212 = vmatpush3.bf16.msra.mxu0 %v14864_v17  ;;  %v14871_v17 = vld [vmem:[%s18059_s10 + $0xd0] sm:$0xff]  }
 0x52d   : > { %13213 = vmatprep.subr.bf16.mxu0 %v14865_v60 }
 0x52f   : > { %13182 = vmatmul.mubr.bf16.gmra.mrb[104].mxu0 %v17371_v15  ;;  %v6759_v15 = vrot.slane %v18974_v11, 3  ;;  %v6769_v11 = vrot.slane %v18977_v40, 3 }
 0x530   : > { %13185 = vmatprep.mubr.bf16.mxu0 %v17389_v14  ;;  %13214 = vmatpush3.bf16.msra.mxu0 %v14865_v60  ;;  %v18982_v14 = vshrl.u32 %v18969_v12, 16 }
 0x531   : > { %13215 = vmatprep.subr.bf16.mxu0 %v14866_v55 }
 0x532   : > { %v6761_v35 = vrot.slane %v18982_v14, 2 }
 0x534   : > { %13216 = vmatpush3.bf16.msra.mxu0 %v14866_v55 }
 0x535   : > { %13217 = vmatprep.subr.bf16.mxu0 %v14867_v50 }
 0x537   : > { %13186 = vmatmul.mubr.bf16.gmra.mrb[108].mxu0 %v17409_v44  ;;  %v6760_v44 = vor.u32 %v6759_v15, %v6758_v46 }
 0x538   : > { %13189 = vmatprep.mubr.bf16.mxu0 %v17412_v39  ;;  %13218 = vmatpush3.bf16.msra.mxu0 %v14867_v50  ;;  %v6763_v39 = vor.u32 %v6762_v48, %v6761_v35  ;;  %v14872_v48 = vld [vmem:[%s18059_s10 + $0xd8] sm:$0xff]  }
 0x539   : > { %13219 = vmatprep.subr.bf16.mxu0 %v14868_v8 }
 0x53a   : > { %v6764_v12 = vsel %vm5027_vm8, %v6760_v44, %v6763_v39 }
 0x53c   : > { %13220 = vmatpush3.bf16.msra.mxu0 %v14868_v8 }
 0x53f   : > { %13190 = vmatmul.mubr.bf16.gmra.mrb[112].mxu0 %v17430_v57  ;;  %v6766_v57 = vrot.slane %v17476_v54, 3  ;;  %v17877_v54 = vld [vmem:[%s18057_s8] ss:$0 sm:$0xff] }
 0x540   : > { %13193 = vmatprep.mubr.bf16.mxu0 %v17438_v56  ;;  %v18983_v56 = vshrl.u32 %v17466_v20, 16  ;;  %v14869_v20 = vld [vmem:[%s18059_s10 + $0xc0] sm:$0xff]  }
 0x541   : > { %v6767_v32 = vor.u32 %v6766_v57, %v6765_v19  ;;  %13685 = vmatprep.subr.bf16.mxu0 %v14869_v20 }
 0x542   : > { %v6768_v28 = vrot.slane %v18983_v56, 2 }
 0x547   : > { %13194 = vmatmul.mubr.bf16.gmra.mrb[116].mxu0 %v17451_v2  ;;  %v6770_v2 = vor.u32 %v6769_v11, %v6768_v28 }
 0x548   : > { %13197 = vmatprep.mubr.bf16.mxu0 %v17661_v47 }
 0x549   : > { %v6771_v47 = vsel %vm5027_vm8, %v6767_v32, %v6770_v2 }
 0x54f   : > { %13198 = vmatmul.mubr.bf16.gmra.mrb[120].mxu0 %v17666_v24 }
 0x550   : > { %13201 = vmatprep.mubr.bf16.mxu0 %v6764_v12  ;;  %v14873_v12 = vld [vmem:[%s18059_s10 + $0xe0] sm:$0xff]  }
 0x557   : > { %13202 = vmatmul.mubr.bf16.gmra.mrb[124].mxu0 %v6771_v47 }
 0x5f2   : > { %v13175_v24 = vpop.f32.mrb[96].mxu0 }
 0x5f3   : > { %v7041_v40 = vadd.f32 %v13175_v24, %v17877_v54  ;;  %v6873_v25 = vpop.f32.mrb[97].mxu0 }
 0x5f4   : > { %v7039_v29 = vadd.f32 %v17877_v54, %v6873_v25  ;;  %v13176_v0 = vpop.f32.mrb[98].mxu0  ;;  %v14874_v25 = vld [vmem:[%s18059_s10 + $0xe8] sm:$0xff]  }
 0x5f5   : > { %v7042_v13 = vadd.f32 %v13176_v0, %v17877_v54  ;;  %v6876_v52 = vpop.f32.mrb[99].mxu0  ;;  %v7073_v5 = vmax.f32 %v7041_v40, 0.0 }
 0x5f6   : > { %v7040_v41 = vadd.f32 %v17877_v54, %v6876_v52  ;;  %v7071_v26 = vmax.f32 %v7039_v29, 0.0 }
 0x5f7   : > { %v7074_v43 = vmax.f32 %v7042_v13, 0.0 }
 0x5f8   : > { %v7072_v7 = vmax.f32 %v7040_v41, 0.0 }
 0x5f9   : > { %v7104_v59 = vpack.c.bf16 %v7074_v43, %v7073_v5 }
 0x5fa   : > { %v7103_v61 = vpack.c.bf16 %v7072_v7, %v7071_v26  ;;  %v13179_v9 = vpop.f32.mrb[100].mxu0  ;;  %v14875_v26 = vld [vmem:[%s18059_s10 + $0xf0] sm:$0xff]  }
 0x5fb   : > { %v7045_v27 = vadd.f32 %v13179_v9, %v17877_v54  ;;  %v6889_v3 = vpop.f32.mrb[101].mxu0 }
 0x5fc   : > { %v7043_v51 = vadd.f32 %v17877_v54, %v6889_v3  ;;  %v13180_v30 = vpop.f32.mrb[102].mxu0  ;;  %13221 = vmatprep.mubr.bf16.mxu0 %v7103_v61 }
 0x5fd   : > { %v7046_v4 = vadd.f32 %v13180_v30, %v17877_v54  ;;  %v6892_v62 = vpop.f32.mrb[103].mxu0  ;;  %13222 = vmatmul.mubr.bf16.vlgmr.msra.gmra.mrb[64].mxu0 %v7104_v59  ;;  %v7077_v36 = vmax.f32 %v7045_v27, 0.0 }
 0x5fe   : > { %v7044_v10 = vadd.f32 %v17877_v54, %v6892_v62  ;;  %13686 = vmatpush3.bf16.msra.mxu0 %v14869_v20  ;;  %v7075_v60 = vmax.f32 %v7043_v51, 0.0  ;;  %v14876_v51 = vld [vmem:[%s18059_s10 + $0xf8] sm:$0xff]  }
 0x5ff   : > { %v7078_v63 = vmax.f32 %v7046_v4, 0.0  ;;  %13687 = vmatprep.subr.bf16.mxu0 %v14870_v23 }
 0x600   : > { %v7076_v55 = vmax.f32 %v7044_v10, 0.0 }
 0x601   : > { %v7106_v50 = vpack.c.bf16 %v7078_v63, %v7077_v36 }
 0x602   : > { %v7105_v46 = vpack.c.bf16 %v7076_v55, %v7075_v60  ;;  %v13183_v15 = vpop.f32.mrb[104].mxu0  ;;  %13688 = vmatpush3.bf16.msra.mxu0 %v14870_v23 }
 0x603   : > { %v7049_v14 = vadd.f32 %v13183_v15, %v17877_v54  ;;  %v6905_v35 = vpop.f32.mrb[105].mxu0  ;;  %13689 = vmatprep.subr.bf16.mxu0 %v14871_v17 }
 0x604   : > { %v7047_v44 = vadd.f32 %v17877_v54, %v6905_v35  ;;  %v13184_v39 = vpop.f32.mrb[106].mxu0  ;;  %13225 = vmatprep.mubr.bf16.mxu0 %v7105_v46 }
 0x605   : > { %v7050_v19 = vadd.f32 %v13184_v39, %v17877_v54  ;;  %v6908_v57 = vpop.f32.mrb[107].mxu0  ;;  %13226 = vmatmul.mubr.bf16.gmra.mrb[68].mxu0 %v7106_v50  ;;  %v7081_v28 = vmax.f32 %v7049_v14, 0.0 }
 0x606   : > { %v7048_v56 = vadd.f32 %v17877_v54, %v6908_v57  ;;  %13690 = vmatpush3.bf16.msra.mxu0 %v14871_v17  ;;  %v7079_v32 = vmax.f32 %v7047_v44, 0.0 }
 0x607   : > { %v7082_v11 = vmax.f32 %v7050_v19, 0.0  ;;  %13691 = vmatprep.subr.bf16.mxu0 %v14872_v48 }
 0x608   : > { %v7080_v2 = vmax.f32 %v7048_v56, 0.0 }
 0x609   : > { %v7108_v47 = vpack.c.bf16 %v7082_v11, %v7081_v28 }
 0x60a   : > { %v7107_v8 = vpack.c.bf16 %v7080_v2, %v7079_v32  ;;  %v13187_v20 = vpop.f32.mrb[108].mxu0  ;;  %13692 = vmatpush3.bf16.msra.mxu0 %v14872_v48 }
 0x60b   : > { %v7053_v24 = vadd.f32 %v13187_v20, %v17877_v54  ;;  %v6921_v40 = vpop.f32.mrb[109].mxu0  ;;  %13693 = vmatprep.subr.bf16.mxu0 %v14873_v12 }
 0x60c   : > { %v7051_v29 = vadd.f32 %v17877_v54, %v6921_v40  ;;  %v13188_v0 = vpop.f32.mrb[110].mxu0  ;;  %13229 = vmatprep.mubr.bf16.mxu0 %v7107_v8 }
 0x60d   : > { %v7054_v13 = vadd.f32 %v13188_v0, %v17877_v54  ;;  %v6924_v52 = vpop.f32.mrb[111].mxu0  ;;  %13230 = vmatmul.mubr.bf16.gmra.mrb[72].mxu0 %v7108_v47  ;;  %v7085_v5 = vmax.f32 %v7053_v24, 0.0 }
 0x60e   : > { %v7052_v41 = vadd.f32 %v17877_v54, %v6924_v52  ;;  %13694 = vmatpush3.bf16.msra.mxu0 %v14873_v12  ;;  %v7083_v7 = vmax.f32 %v7051_v29, 0.0 }
 0x60f   : > { %v7086_v43 = vmax.f32 %v7054_v13, 0.0  ;;  %13695 = vmatprep.subr.bf16.mxu0 %v14874_v25 }
 0x610   : > { %v7084_v59 = vmax.f32 %v7052_v41, 0.0 }
 0x611   : > { %v7110_v61 = vpack.c.bf16 %v7086_v43, %v7085_v5 }
 0x612   : > { %v7109_v9 = vpack.c.bf16 %v7084_v59, %v7083_v7  ;;  %v13191_v27 = vpop.f32.mrb[112].mxu0  ;;  %13696 = vmatpush3.bf16.msra.mxu0 %v14874_v25 }
 0x613   : > { %v7057_v3 = vadd.f32 %v13191_v27, %v17877_v54  ;;  %v6937_v23 = vpop.f32.mrb[113].mxu0  ;;  %13697 = vmatprep.subr.bf16.mxu0 %v14875_v26 }
 0x614   : > { %v7055_v30 = vadd.f32 %v17877_v54, %v6937_v23  ;;  %v13192_v4 = vpop.f32.mrb[114].mxu0  ;;  %13233 = vmatprep.mubr.bf16.mxu0 %v7109_v9 }
 0x615   : > { %v7058_v62 = vadd.f32 %v13192_v4, %v17877_v54  ;;  %v6940_v10 = vpop.f32.mrb[115].mxu0  ;;  %13234 = vmatmul.mubr.bf16.gmra.mrb[76].mxu0 %v7110_v61  ;;  %v7089_v63 = vmax.f32 %v7057_v3, 0.0 }
 0x616   : > { %v7056_v36 = vadd.f32 %v17877_v54, %v6940_v10  ;;  %13698 = vmatpush3.bf16.msra.mxu0 %v14875_v26  ;;  %v7087_v60 = vmax.f32 %v7055_v30, 0.0 }
 0x617   : > { %v7090_v17 = vmax.f32 %v7058_v62, 0.0  ;;  %13699 = vmatprep.subr.bf16.mxu0 %v14876_v51 }
 0x618   : > { %v7088_v55 = vmax.f32 %v7056_v36, 0.0 }
 0x619   : > { %v7112_v50 = vpack.c.bf16 %v7090_v17, %v7089_v63 }
 0x61a   : > { %v7111_v46 = vpack.c.bf16 %v7088_v55, %v7087_v60  ;;  %v13195_v15 = vpop.f32.mrb[116].mxu0  ;;  %13700 = vmatpush3.bf16.msra.mxu0 %v14876_v51 }
 0x61b   : > { %v7061_v14 = vadd.f32 %v13195_v15, %v17877_v54  ;;  %v6953_v35 = vpop.f32.mrb[117].mxu0 }
 0x61c   : > { %v7059_v48 = vadd.f32 %v17877_v54, %v6953_v35  ;;  %v13196_v44 = vpop.f32.mrb[118].mxu0  ;;  %13237 = vmatprep.mubr.bf16.mxu0 %v7111_v46 }
 0x61d   : > { %v7062_v39 = vadd.f32 %v13196_v44, %v17877_v54  ;;  %v6956_v19 = vpop.f32.mrb[119].mxu0  ;;  %13238 = vmatmul.mubr.bf16.gmra.mrb[80].mxu0 %v7112_v50  ;;  %v7093_v56 = vmax.f32 %v7061_v14, 0.0 }
 0x61e   : > { %v7060_v57 = vadd.f32 %v17877_v54, %v6956_v19  ;;  %v7091_v11 = vmax.f32 %v7059_v48, 0.0 }
 0x61f   : > { %v7094_v28 = vmax.f32 %v7062_v39, 0.0 }
 0x620   : > { %v7092_v12 = vmax.f32 %v7060_v57, 0.0 }
 0x621   : > { %v7114_v32 = vpack.c.bf16 %v7094_v28, %v7093_v56 }
 0x622   : > { %v7113_v2 = vpack.c.bf16 %v7092_v12, %v7091_v11  ;;  %v13199_v47 = vpop.f32.mrb[120].mxu0 }
 0x623   : > { %v7065_v8 = vadd.f32 %v13199_v47, %v17877_v54  ;;  %v6969_v20 = vpop.f32.mrb[121].mxu0 }
 0x624   : > { %v7063_v24 = vadd.f32 %v17877_v54, %v6969_v20  ;;  %v13200_v40 = vpop.f32.mrb[122].mxu0  ;;  %13241 = vmatprep.mubr.bf16.mxu0 %v7113_v2 }
 0x625   : > { %v7066_v25 = vadd.f32 %v13200_v40, %v17877_v54  ;;  %v6972_v29 = vpop.f32.mrb[123].mxu0  ;;  %13242 = vmatmul.mubr.bf16.gmra.mrb[84].mxu0 %v7114_v32  ;;  %v7097_v13 = vmax.f32 %v7065_v8, 0.0 }
 0x626   : > { %v7064_v0 = vadd.f32 %v17877_v54, %v6972_v29  ;;  %v7095_v41 = vmax.f32 %v7063_v24, 0.0 }
 0x627   : > { %v7098_v52 = vmax.f32 %v7066_v25, 0.0 }
 0x628   : > { %v7096_v5 = vmax.f32 %v7064_v0, 0.0 }
 0x629   : > { %v7116_v43 = vpack.c.bf16 %v7098_v52, %v7097_v13 }
 0x62a   : > { %v7115_v26 = vpack.c.bf16 %v7096_v5, %v7095_v41  ;;  %v13203_v7 = vpop.f32.mrb[124].mxu0 }
 0x62b   : > { %v7069_v59 = vadd.f32 %v13203_v7, %v17877_v54  ;;  %v6985_v61 = vpop.f32.mrb[125].mxu0 }
 0x62c   : > { %v7067_v9 = vadd.f32 %v17877_v54, %v6985_v61  ;;  %v13204_v27 = vpop.f32.mrb[126].mxu0  ;;  %13245 = vmatprep.mubr.bf16.mxu0 %v7115_v26 }
 0x62d   : > { %v7070_v3 = vadd.f32 %v13204_v27, %v17877_v54  ;;  %v6988_v23 = vpop.f32.mrb[127].mxu0  ;;  %13246 = vmatmul.mubr.bf16.gmra.mrb[88].mxu0 %v7116_v43  ;;  %v7101_v30 = vmax.f32 %v7069_v59, 0.0 }
 0x62e   : > { %v7068_v51 = vadd.f32 %v17877_v54, %v6988_v23  ;;  %v7099_v62 = vmax.f32 %v7067_v9, 0.0 }
 0x62f   : > { %v7102_v4 = vmax.f32 %v7070_v3, 0.0 }
 0x630   : > { %v7100_v10 = vmax.f32 %v7068_v51, 0.0 }
 0x631   : > { %v7118_v36 = vpack.c.bf16 %v7102_v4, %v7101_v30 }
 0x632   : > { %v7117_v63 = vpack.c.bf16 %v7100_v10, %v7099_v62 }
 0x634   : > { %13249 = vmatprep.mubr.bf16.mxu0 %v7117_v63 }
 0x635   : > { %13250 = vmatmul.mubr.bf16.gmra.mrb[92].mxu0 %v7118_v36 }
 0x636   : > { %13701 = vmatprep.mubr.bf16.mxu0 %v17727_v34 }
 0x63d   : > { %13702 = vmatmul.mubr.bf16.vlgmr.msra.gmra.mrb[64].mxu0 %v17725_v49  ;;  %v17953_v49 = vld [vmem:[%s395_s13] ss:$0 sm:$0xff] }
 0x63e   : > { %13705 = vmatprep.mubr.bf16.mxu0 %v17743_v38 }
 0x645   : > { %13706 = vmatmul.mubr.bf16.gmra.mrb[68].mxu0 %v17738_v37  ;;  %v17958_v37 = vld [vmem:[%s18060_s11] ss:$0 sm:$0xff] }
 0x646   : > { %13709 = vmatprep.mubr.bf16.mxu0 %v17759_v18 }
 0x64d   : > { %13710 = vmatmul.mubr.bf16.gmra.mrb[72].mxu0 %v17754_v45 }
 0x64e   : > { %13713 = vmatprep.mubr.bf16.mxu0 %v17775_v22 }
 0x655   : > { %13714 = vmatmul.mubr.bf16.gmra.mrb[76].mxu0 %v17770_v58 }
 0x656   : > { %13717 = vmatprep.mubr.bf16.mxu0 %v17791_v16 }
 0x65d   : > { %13718 = vmatmul.mubr.bf16.gmra.mrb[80].mxu0 %v17786_v6 }
 0x65e   : > { %13721 = vmatprep.mubr.bf16.mxu0 %v17801_v31 }
 0x665   : > { %13722 = vmatmul.mubr.bf16.gmra.mrb[84].mxu0 %v17799_v21 }
 0x666   : > { %13725 = vmatprep.mubr.bf16.mxu0 %v17811_v53 }
 0x66d   : > { %13726 = vmatmul.mubr.bf16.gmra.mrb[88].mxu0 %v17809_v33 }
 0x66e   : > { %13729 = vmatprep.mubr.bf16.mxu0 %v17821_v42 }
 0x675   : > { %13730 = vmatmul.mubr.bf16.gmra.mrb[92].mxu0 %v17819_v1 }
 0x710   : > { %v13703_v34 = vpop.f32.mrb[64].mxu0 }
 0x711   : > { %v10121_v38 = vadd.f32 %v13703_v34, %v17953_v49  ;;  %v9953_v45 = vpop.f32.mrb[65].mxu0 }
 0x712   : > { %v10119_v18 = vadd.f32 %v17953_v49, %v9953_v45  ;;  %v13704_v58 = vpop.f32.mrb[66].mxu0 }
 0x713   : > { %v10160_v22 = vadd.f32 %v17958_v37, %v10121_v38  ;;  %v10122_v6 = vadd.f32 %v13704_v58, %v17953_v49  ;;  %v9956_v16 = vpop.f32.mrb[67].mxu0 }
 0x714   : > { %v10158_v21 = vadd.f32 %v17958_v37, %v10119_v18  ;;  %v10120_v31 = vadd.f32 %v17953_v49, %v9956_v16 }
 0x715   : > { %v10161_v33 = vadd.f32 %v17958_v37, %v10122_v6  ;;  %v10192_v1 = vmax.f32 %v10160_v22, 0.0 }
 0x716   : > { %v10159_v53 = vadd.f32 %v17958_v37, %v10120_v31  ;;  %v10190_v54 = vmax.f32 %v10158_v21, 0.0 }
 0x717   : > { %v10193_v42 = vmax.f32 %v10161_v33, 0.0 }
 0x718   : > { %v10191_v17 = vmax.f32 %v10159_v53, 0.0  ;;  %v13707_v60 = vpop.f32.mrb[68].mxu0 }
 0x719   : > { %v11342_v55 = vpack.c.bf16 %v10193_v42, %v10192_v1  ;;  %v10125_v50 = vadd.f32 %v13707_v60, %v17953_v49  ;;  %v9969_v46 = vpop.f32.mrb[69].mxu0 }
 0x71a   : > { %v11337_v15 = vpack.c.bf16 %v10191_v17, %v10190_v54  ;;  %v10123_v14 = vadd.f32 %v17953_v49, %v9969_v46  ;;  %v13708_v35 = vpop.f32.mrb[70].mxu0 }
 0x71b   : > { %11414 = vst [vmem:[%s15003_s17 + $0x8] sm:$0xff] %v11342_v55   ;;  %v10164_v48 = vadd.f32 %v17958_v37, %v10125_v50  ;;  %v10126_v44 = vadd.f32 %v13708_v35, %v17953_v49  ;;  %v9972_v39 = vpop.f32.mrb[71].mxu0 }
 0x71c   : > { %11338 = vst [vmem:[%s15003_s17] sm:$0xff] %v11337_v15   ;;  %v10162_v19 = vadd.f32 %v17958_v37, %v10123_v14  ;;  %v10124_v57 = vadd.f32 %v17953_v49, %v9972_v39 }
 0x71d   : > { %v10165_v56 = vadd.f32 %v17958_v37, %v10126_v44  ;;  %v10196_v11 = vmax.f32 %v10164_v48, 0.0 }
 0x71e   : > { %v10163_v28 = vadd.f32 %v17958_v37, %v10124_v57  ;;  %v10194_v32 = vmax.f32 %v10162_v19, 0.0 }
 0x71f   : > { %v10197_v12 = vmax.f32 %v10165_v56, 0.0 }
 0x720   : > { %v10195_v2 = vmax.f32 %v10163_v28, 0.0  ;;  %v13711_v47 = vpop.f32.mrb[72].mxu0 }
 0x721   : > { %v11352_v8 = vpack.c.bf16 %v10197_v12, %v10196_v11  ;;  %v10129_v20 = vadd.f32 %v13711_v47, %v17953_v49  ;;  %v9985_v24 = vpop.f32.mrb[73].mxu0 }
 0x722   : > { %v11347_v40 = vpack.c.bf16 %v10195_v2, %v10194_v32  ;;  %v10127_v25 = vadd.f32 %v17953_v49, %v9985_v24  ;;  %v13712_v29 = vpop.f32.mrb[74].mxu0 }
 0x723   : > { %11416 = vst [vmem:[%s15003_s17 + $0x18] sm:$0xff] %v11352_v8   ;;  %v10168_v0 = vadd.f32 %v17958_v37, %v10129_v20  ;;  %v10130_v13 = vadd.f32 %v13712_v29, %v17953_v49  ;;  %v9988_v52 = vpop.f32.mrb[75].mxu0 }
 0x724   : > { %11415 = vst [vmem:[%s15003_s17 + $0x10] sm:$0xff] %v11347_v40   ;;  %v10166_v41 = vadd.f32 %v17958_v37, %v10127_v25  ;;  %v10128_v5 = vadd.f32 %v17953_v49, %v9988_v52 }
 0x725   : > { %v10169_v43 = vadd.f32 %v17958_v37, %v10130_v13  ;;  %v10200_v7 = vmax.f32 %v10168_v0, 0.0 }
 0x726   : > { %v10167_v26 = vadd.f32 %v17958_v37, %v10128_v5  ;;  %v10198_v61 = vmax.f32 %v10166_v41, 0.0 }
 0x727   : > { %v10201_v59 = vmax.f32 %v10169_v43, 0.0 }
 0x728   : > { %v10199_v9 = vmax.f32 %v10167_v26, 0.0  ;;  %v13715_v27 = vpop.f32.mrb[76].mxu0 }
 0x729   : > { %v11362_v3 = vpack.c.bf16 %v10201_v59, %v10200_v7  ;;  %v10133_v23 = vadd.f32 %v13715_v27, %v17953_v49  ;;  %v10001_v51 = vpop.f32.mrb[77].mxu0 }
 0x72a   : > { %v11357_v30 = vpack.c.bf16 %v10199_v9, %v10198_v61  ;;  %v10131_v4 = vadd.f32 %v17953_v49, %v10001_v51  ;;  %v13716_v62 = vpop.f32.mrb[78].mxu0 }
 0x72b   : > { %11418 = vst [vmem:[%s15003_s17 + $0x28] sm:$0xff] %v11362_v3   ;;  %v10172_v10 = vadd.f32 %v17958_v37, %v10133_v23  ;;  %v10134_v36 = vadd.f32 %v13716_v62, %v17953_v49  ;;  %v10004_v63 = vpop.f32.mrb[79].mxu0 }
 0x72c   : > { %11417 = vst [vmem:[%s15003_s17 + $0x20] sm:$0xff] %v11357_v30   ;;  %v10170_v34 = vadd.f32 %v17958_v37, %v10131_v4  ;;  %v10132_v38 = vadd.f32 %v17953_v49, %v10004_v63 }
 0x72d   : > { %v10173_v45 = vadd.f32 %v17958_v37, %v10134_v36  ;;  %v10204_v58 = vmax.f32 %v10172_v10, 0.0 }
 0x72e   : > { %v10171_v18 = vadd.f32 %v17958_v37, %v10132_v38  ;;  %v10202_v6 = vmax.f32 %v10170_v34, 0.0 }
 0x72f   : > { %v10205_v22 = vmax.f32 %v10173_v45, 0.0 }
 0x730   : > { %v10203_v16 = vmax.f32 %v10171_v18, 0.0  ;;  %v13719_v21 = vpop.f32.mrb[80].mxu0 }
 0x731   : > { %v11372_v31 = vpack.c.bf16 %v10205_v22, %v10204_v58  ;;  %v10137_v33 = vadd.f32 %v13719_v21, %v17953_v49  ;;  %v10017_v53 = vpop.f32.mrb[81].mxu0 }
 0x732   : > { %v11367_v1 = vpack.c.bf16 %v10203_v16, %v10202_v6  ;;  %v10135_v42 = vadd.f32 %v17953_v49, %v10017_v53  ;;  %v13720_v54 = vpop.f32.mrb[82].mxu0 }
 0x733   : > { %11420 = vst [vmem:[%s15003_s17 + $0x38] sm:$0xff] %v11372_v31   ;;  %v10176_v17 = vadd.f32 %v17958_v37, %v10137_v33  ;;  %v10138_v60 = vadd.f32 %v13720_v54, %v17953_v49  ;;  %v10020_v55 = vpop.f32.mrb[83].mxu0 }
 0x734   : > { %11419 = vst [vmem:[%s15003_s17 + $0x30] sm:$0xff] %v11367_v1   ;;  %v10174_v50 = vadd.f32 %v17958_v37, %v10135_v42  ;;  %v10136_v46 = vadd.f32 %v17953_v49, %v10020_v55 }
 0x735   : > { %v10177_v15 = vadd.f32 %v17958_v37, %v10138_v60  ;;  %v10208_v35 = vmax.f32 %v10176_v17, 0.0 }
 0x736   : > { %v10175_v14 = vadd.f32 %v17958_v37, %v10136_v46  ;;  %v10206_v44 = vmax.f32 %v10174_v50, 0.0 }
 0x737   : > { %v10209_v48 = vmax.f32 %v10177_v15, 0.0 }
 0x738   : > { %v10207_v39 = vmax.f32 %v10175_v14, 0.0  ;;  %v13723_v19 = vpop.f32.mrb[84].mxu0 }
 0x739   : > { %v11382_v57 = vpack.c.bf16 %v10209_v48, %v10208_v35  ;;  %v10141_v56 = vadd.f32 %v13723_v19, %v17953_v49  ;;  %v10033_v28 = vpop.f32.mrb[85].mxu0 }
 0x73a   : > { %v11377_v11 = vpack.c.bf16 %v10207_v39, %v10206_v44  ;;  %v10139_v12 = vadd.f32 %v17953_v49, %v10033_v28  ;;  %v13724_v32 = vpop.f32.mrb[86].mxu0 }
 0x73b   : > { %11422 = vst [vmem:[%s15003_s17 + $0x48] sm:$0xff] %v11382_v57   ;;  %v10180_v2 = vadd.f32 %v17958_v37, %v10141_v56  ;;  %v10142_v47 = vadd.f32 %v13724_v32, %v17953_v49  ;;  %v10036_v8 = vpop.f32.mrb[87].mxu0 }
 0x73c   : > { %11421 = vst [vmem:[%s15003_s17 + $0x40] sm:$0xff] %v11377_v11   ;;  %v10178_v20 = vadd.f32 %v17958_v37, %v10139_v12  ;;  %v10140_v24 = vadd.f32 %v17953_v49, %v10036_v8 }
 0x73d   : > { %v10181_v40 = vadd.f32 %v17958_v37, %v10142_v47  ;;  %v10212_v29 = vmax.f32 %v10180_v2, 0.0 }
 0x73e   : > { %v10179_v25 = vadd.f32 %v17958_v37, %v10140_v24  ;;  %v10210_v13 = vmax.f32 %v10178_v20, 0.0 }
 0x73f   : > { %v10213_v0 = vmax.f32 %v10181_v40, 0.0 }
 0x740   : > { %v10211_v52 = vmax.f32 %v10179_v25, 0.0  ;;  %v13727_v41 = vpop.f32.mrb[88].mxu0 }
 0x741   : > { %v11392_v5 = vpack.c.bf16 %v10213_v0, %v10212_v29  ;;  %v10145_v43 = vadd.f32 %v13727_v41, %v17953_v49  ;;  %v10049_v26 = vpop.f32.mrb[89].mxu0 }
 0x742   : > { %v11387_v7 = vpack.c.bf16 %v10211_v52, %v10210_v13  ;;  %v10143_v59 = vadd.f32 %v17953_v49, %v10049_v26  ;;  %v13728_v61 = vpop.f32.mrb[90].mxu0 }
 0x743   : > { %11424 = vst [vmem:[%s15003_s17 + $0x58] sm:$0xff] %v11392_v5   ;;  %v10184_v9 = vadd.f32 %v17958_v37, %v10145_v43  ;;  %v10146_v27 = vadd.f32 %v13728_v61, %v17953_v49  ;;  %v10052_v3 = vpop.f32.mrb[91].mxu0 }
 0x744   : > { %11423 = vst [vmem:[%s15003_s17 + $0x50] sm:$0xff] %v11387_v7   ;;  %v10182_v23 = vadd.f32 %v17958_v37, %v10143_v59  ;;  %v10144_v51 = vadd.f32 %v17953_v49, %v10052_v3 }
 0x745   : > { %v10185_v30 = vadd.f32 %v17958_v37, %v10146_v27  ;;  %v10216_v62 = vmax.f32 %v10184_v9, 0.0 }
 0x746   : > { %v10183_v4 = vadd.f32 %v17958_v37, %v10144_v51  ;;  %v10214_v36 = vmax.f32 %v10182_v23, 0.0 }
 0x747   : > { %v10217_v10 = vmax.f32 %v10185_v30, 0.0 }
 0x748   : > { %v10215_v63 = vmax.f32 %v10183_v4, 0.0  ;;  %v13731_v34 = vpop.f32.mrb[92].mxu0 }
 0x749   : > { %v11402_v38 = vpack.c.bf16 %v10217_v10, %v10216_v62  ;;  %v10149_v45 = vadd.f32 %v13731_v34, %v17953_v49  ;;  %v10065_v18 = vpop.f32.mrb[93].mxu0 }
 0x74a   : > { %v11397_v58 = vpack.c.bf16 %v10215_v63, %v10214_v36  ;;  %v10147_v22 = vadd.f32 %v17953_v49, %v10065_v18  ;;  %v13732_v6 = vpop.f32.mrb[94].mxu0 }
 0x74b   : > { %11426 = vst [vmem:[%s15003_s17 + $0x68] sm:$0xff] %v11402_v38   ;;  %v10188_v16 = vadd.f32 %v17958_v37, %v10149_v45  ;;  %v10150_v21 = vadd.f32 %v13732_v6, %v17953_v49  ;;  %v10068_v31 = vpop.f32.mrb[95].mxu0 }
 0x74c   : > { %11425 = vst [vmem:[%s15003_s17 + $0x60] sm:$0xff] %v11397_v58   ;;  %v10186_v33 = vadd.f32 %v17958_v37, %v10147_v22  ;;  %v10148_v53 = vadd.f32 %v17953_v49, %v10068_v31 }
 0x74d   : > { %v10189_v1 = vadd.f32 %v17958_v37, %v10150_v21  ;;  %v10220_v54 = vmax.f32 %v10188_v16, 0.0 }
 0x74e   : > { %v10187_v42 = vadd.f32 %v17958_v37, %v10148_v53  ;;  %v10218_v60 = vmax.f32 %v10186_v33, 0.0 }
 0x74f   : > { %v10221_v17 = vmax.f32 %v10189_v1, 0.0 }
 0x750   : > { %v10219_v55 = vmax.f32 %v10187_v42, 0.0 }
 0x751   : > { %v11412_v50 = vpack.c.bf16 %v10221_v17, %v10220_v54 }
 0x752   : > { %v11407_v46 = vpack.c.bf16 %v10219_v55, %v10218_v60 }
 0x753   : > { %11428 = vst [vmem:[%s15003_s17 + $0x78] sm:$0xff] %v11412_v50  }
 0x754   : > { %11427 = vst [vmem:[%s15003_s17 + $0x70] sm:$0xff] %v11407_v46  }
 0x755 PF: > { %s22_s23 = sadd.s32 1, %s14901_s23   ;;  %s18984_s21 = smov %s14897_s22 }
 0x756   : > { %p19_p5 = scmp.ge.s32.totalorder %s22_s23, 4   ;;  %s18985_s22 = smov %s18987_s24 }
 0x758   :  { %21 = sbr.rel (!%p19_p5) target bundleno = 2 (0x2), region = 222 }
 0x75f   :  { %10414 = vsyncmov [#allocation3] }
 0x762   :  { %s10415_s13 = vpop.sfrf %10414 }
 0x763   :  { %p11298_p6 = scmp.ne.s32.totalorder %s10415_s13, 0 }
 0x765   :  { %10419 = shalt.err (%p11298_p6)  }
 0x766   :  { %10421 = vsyncmov [#allocation3 + $0x1] }
 0x769   :  { %s10422_s30 = vpop.sfrf %10421 }
 0x76a   :  { %p11299_p7 = scmp.ne.s32.totalorder %s10422_s30, 0 }
 0x76c   :  { %10426 = shalt.err (%p11299_p7)  }

</bundles_post_ra>
